<compile_context>
chip_gen: v7x
topology: tpu7x:2x2x1
jax: 0.10.0
libtpu: 0.0.40
codegen_flags: <defaults>
</compile_context>

<pallas_src>
import functools
import math

import jax
import jax.numpy as jnp
from jax import lax
from jax.experimental import pallas as pl
from jax.experimental.pallas import tpu as pltpu


# ----------------------------------------------------------------------------
# Generation-aware budgets
# ----------------------------------------------------------------------------
def _vmem_capacity_bytes():
    try:
        return int(pltpu.get_tpu_info().vmem_capacity_bytes)
    except Exception:
        return 64 * 1024 * 1024          # conservative fallback (v7x-sized)


_VMEM_CAP = _vmem_capacity_bytes()
if _VMEM_CAP >= 100 * 1024 * 1024:       # v5e / v6e: 128 MiB VMEM
    VMEM_LIMIT = 100 * 1024 * 1024
    TARGET_ROWS = 2048
else:                                    # v7x: 64 MiB VMEM per TensorCore
    VMEM_LIMIT = 48 * 1024 * 1024
    TARGET_ROWS = 1024


# ----------------------------------------------------------------------------
# Pallas kernels
# ----------------------------------------------------------------------------
def _apply_act(acc, act):
    if act == "relu":
        return jnp.maximum(acc, 0.0)
    if act == "lrelu":
        return jnp.where(acc > 0, acc, acc * 0.1)
    return acc


def _conv_direct_kernel(x_ref, w_ref, b_ref, o_ref, *, kh, kw, act,
                        fold_kh, fold_kw):
    """'same' conv, stride 1.  Whole padded image resident in VMEM; patches are
    built in-kernel and the taps are folded into the MXU contraction dim.

    x_ref : (1, Hp, Wp, Cin)  padded image (fetched once per batch index)
    w_ref : (kh*kw*Cin, Cout) | (kh, kw*Cin, Cout) | (kh*kw, Cin, Cout)
    b_ref : (1, Cout) f32
    o_ref : (1, th, W, Cout)
    """
    cin = x_ref.shape[-1]
    _, th, wout, cout = o_ref.shape
    rows = th * wout
    r0 = pl.program_id(1) * th
    if th % 8 == 0:
        r0 = pl.multiple_of(r0, 8)

    def tap(dy, dx):
        return x_ref[0, pl.ds(r0 + dy, th), pl.ds(dx, wout), :]   # (th, W, Cin)

    if fold_kh and fold_kw:
        pieces = [tap(dy, dx) for dy in range(kh) for dx in range(kw)]
        slab = pieces[0] if len(pieces) == 1 else jnp.concatenate(pieces, axis=-1)
        acc = jnp.dot(slab.reshape(rows, kh * kw * cin), w_ref[...],
                      preferred_element_type=jnp.float32)
    elif fold_kw:
        acc = None
        for dy in range(kh):
            pieces = [tap(dy, dx) for dx in range(kw)]
            slab = pieces[0] if kw == 1 else jnp.concatenate(pieces, axis=-1)
            d = jnp.dot(slab.reshape(rows, kw * cin), w_ref[dy],
                        preferred_element_type=jnp.float32)
            acc = d if acc is None else acc + d
    else:                                   # tiny Cin (<8): per-tap dots
        acc = None
        for dy in range(kh):
            for dx in range(kw):
                d = jnp.dot(tap(dy, dx).reshape(rows, cin), w_ref[dy * kw + dx],
                            preferred_element_type=jnp.float32)
                acc = d if acc is None else acc + d

    acc = _apply_act(acc + b_ref[...], act)
    o_ref[...] = acc.reshape(o_ref.shape).astype(o_ref.dtype)


def _resblock_kernel(x_ref, w1_ref, b1_ref, w2_ref, b2_ref, o_ref, y_ref, *,
                     img_h, img_w):
    """Fused ResidualBlockNoBN: out = x + conv2(relu(conv1(x))).

    x_ref : (1, H+4, W+4, C) input padded by 2 (resident in VMEM)
    w*_ref: (9*C, C) tap-major weights;  b*_ref: (1, C) f32
    y_ref : (th+2, W+2, C) VMEM scratch holding the conv1 row band (+halo)
    o_ref : (1, th, W, C)
    """
    c = x_ref.shape[-1]
    _, th, wout, _ = o_ref.shape
    hin = th + 2
    rows1 = hin * wout
    rows = th * wout
    r0 = pl.program_id(1) * th
    if th % 8 == 0:
        r0 = pl.multiple_of(r0, 8)

    # conv1 + relu over output rows [r0-1, r0+th] (1-row halo), cols [0, W).
    p1 = jnp.concatenate(
        [x_ref[0, pl.ds(r0 + dy, hin), pl.ds(1 + dx, wout), :]
         for dy in range(3) for dx in range(3)], axis=-1)
    y = jnp.dot(p1.reshape(rows1, 9 * c), w1_ref[...],
                preferred_element_type=jnp.float32)
    y = jnp.maximum(y + b1_ref[...], 0.0).reshape(hin, wout, c)

    # conv2 must see zeros outside the image: mask the halo rows that fall
    # outside [0, H); the left/right halo columns of the scratch stay zero.
    q = r0 - 1 + lax.broadcasted_iota(jnp.int32, (hin, wout), 0)
    row_ok = ((q >= 0) & (q < img_h))[:, :, None]
    y_ref[...] = jnp.zeros(y_ref.shape, y_ref.dtype)
    y_ref[:, 1:wout + 1, :] = jnp.where(row_ok, y, 0.0).astype(y_ref.dtype)

    # conv2 + bias + residual add for the th output rows of this band.
    p2 = jnp.concatenate(
        [y_ref[dy:dy + th, dx:dx + wout, :]
         for dy in range(3) for dx in range(3)], axis=-1)
    out = jnp.dot(p2.reshape(rows, 9 * c), w2_ref[...],
                  preferred_element_type=jnp.float32)
    res = x_ref[0, pl.ds(r0 + 2, th), pl.ds(2, wout), :].reshape(rows, c)
    out = out + b2_ref[...] + res.astype(jnp.float32)
    o_ref[...] = out.reshape(o_ref.shape).astype(o_ref.dtype)


def _mm_bias_kernel(a_ref, w_ref, b_ref, o_ref, *, act):
    """Fused matmul + bias + act fallback kernel (tiny SpyNet pyramid levels)."""
    acc = jnp.dot(a_ref[...], w_ref[...], preferred_element_type=jnp.float32)
    o_ref[...] = _apply_act(acc + b_ref[...], act).astype(o_ref.dtype)


# ----------------------------------------------------------------------------
# Conv wrappers
# ----------------------------------------------------------------------------
def _pick_row_tile(h, w):
    # NOTE: divisor search; for pathological H (primes) this degrades to small
    # tiles but stays correct.
    th = max(1, min(h, TARGET_ROWS // max(w, 1)))
    while h % th:
        th -= 1
    return th


def _conv_im2col_fallback(xp, w4, bias, h, w, act, out_dtype):
    """im2col + tiled matmul fallback (only for tiny SpyNet pyramid levels)."""
    n = xp.shape[0]
    kh, kw, cin, cout = w4.shape
    cols = [xp[:, dy:dy + h, dx:dx + w, :] for dy in range(kh) for dx in range(kw)]
    a = jnp.concatenate(cols, axis=-1).reshape(n * h * w, kh * kw * cin)
    wm = w4.reshape(kh * kw * cin, cout)
    b2 = bias.reshape(1, cout).astype(jnp.float32)

    m, k = a.shape
    tm = m if m <= 1024 else 1024
    mp = ((m + tm - 1) // tm) * tm
    if mp != m:
        a = jnp.pad(a, ((0, mp - m), (0, 0)))
    out = pl.pallas_call(
        functools.partial(_mm_bias_kernel, act=act),
        out_shape=jax.ShapeDtypeStruct((mp, cout), out_dtype),
        grid=(mp // tm,),
        in_specs=[pl.BlockSpec((tm, k), lambda i: (i, 0)),
                  pl.BlockSpec((k, cout), lambda i: (0, 0)),
                  pl.BlockSpec((1, cout), lambda i: (0, 0))],
        out_specs=pl.BlockSpec((tm, cout), lambda i: (i, 0)),
        compiler_params=pltpu.CompilerParams(
            dimension_semantics=("parallel",),
            vmem_limit_bytes=VMEM_LIMIT),
    )(a, wm, b2)
    if mp != m:
        out = out[:m]
    return out.reshape(n, h, w, cout)


def conv2d_nhwc(x, w4, bias, pad, act="none", out_dtype=jnp.bfloat16,
                compute_dtype=jnp.bfloat16):
    """'same' conv2d, NHWC, stride 1.  x:(N,H,W,Cin); w4:(kh,kw,Cin,Cout)."""
    n, h, w, cin = x.shape
    kh, kw, _, cout = w4.shape
    x = x.astype(compute_dtype)
    w4 = w4.astype(compute_dtype)
    # TODO(synk): the pad halo is still materialized in HBM by XLA.
    xp = jnp.pad(x, ((0, 0), (pad, pad), (pad, pad), (0, 0))) if pad > 0 else x

    same_conv = (2 * pad == kh - 1) and (2 * pad == kw - 1)
    if not (same_conv and w % 8 == 0):
        return _conv_im2col_fallback(xp, w4, bias, h, w, act, out_dtype)

    hp, wp = h + 2 * pad, w + 2 * pad
    th = _pick_row_tile(h, w)

    if cin < 8 and kh * kw > 1:               # e.g. conv_first (Cin=3): per-tap
        fold_kh = fold_kw = False
        wm = w4.reshape(kh * kw, cin, cout)
    elif kh * kw <= 9:                        # 1x1 / 3x3: full K-fold
        fold_kh = fold_kw = True
        wm = w4.reshape(kh * kw * cin, cout)
    else:                                     # 7x7 SpyNet: fold kw per dy
        fold_kh, fold_kw = False, True
        wm = w4.reshape(kh, kw * cin, cout)
    b2 = bias.reshape(1, cout).astype(jnp.float32)

    if wm.ndim == 2:
        w_spec = pl.BlockSpec(wm.shape, lambda ni, hi: (0, 0))
    else:
        w_spec = pl.BlockSpec(wm.shape, lambda ni, hi: (0, 0, 0))

    in_specs = [
        pl.BlockSpec((1, hp, wp, cin), lambda ni, hi: (ni, 0, 0, 0)),  # resident
        w_spec,
        pl.BlockSpec((1, cout), lambda ni, hi: (0, 0)),
    ]
    return pl.pallas_call(
        functools.partial(_conv_direct_kernel, kh=kh, kw=kw, act=act,
                          fold_kh=fold_kh, fold_kw=fold_kw),
        out_shape=jax.ShapeDtypeStruct((n, h, w, cout), out_dtype),
        grid=(n, h // th),
        in_specs=in_specs,
        out_specs=pl.BlockSpec((1, th, w, cout), lambda ni, hi: (ni, hi, 0, 0)),
        compiler_params=pltpu.CompilerParams(
            dimension_semantics=("parallel", "parallel"),
            vmem_limit_bytes=VMEM_LIMIT),
    )(xp, wm, b2)


def residual_block_fused(x, p):
    """ResidualBlockNoBN: x + conv2(relu(conv1(x))), one fused pallas_call."""
    n, h, w, c = x.shape
    if w % 8 != 0:
        y = conv2d_nhwc(x, p["conv1"]["w"], p["conv1"]["b"], pad=1, act="relu")
        y = conv2d_nhwc(y, p["conv2"]["w"], p["conv2"]["b"], pad=1, act="none")
        return (x.astype(jnp.float32) + y.astype(jnp.float32)).astype(jnp.bfloat16)

    xb = x.astype(jnp.bfloat16)
    xp = jnp.pad(xb, ((0, 0), (2, 2), (2, 2), (0, 0)))
    th = _pick_row_tile(h, w)
    w1 = p["conv1"]["w"].reshape(9 * c, c).astype(jnp.bfloat16)
    w2 = p["conv2"]["w"].reshape(9 * c, c).astype(jnp.bfloat16)
    b1 = p["conv1"]["b"].reshape(1, c).astype(jnp.float32)
    b2 = p["conv2"]["b"].reshape(1, c).astype(jnp.float32)
    hp, wp = h + 4, w + 4
    return pl.pallas_call(
        functools.partial(_resblock_kernel, img_h=h, img_w=w),
        out_shape=jax.ShapeDtypeStruct((n, h, w, c), jnp.bfloat16),
        grid=(n, h // th),
        in_specs=[
            pl.BlockSpec((1, hp, wp, c), lambda ni, hi: (ni, 0, 0, 0)),
            pl.BlockSpec((9 * c, c), lambda ni, hi: (0, 0)),
            pl.BlockSpec((1, c), lambda ni, hi: (0, 0)),
            pl.BlockSpec((9 * c, c), lambda ni, hi: (0, 0)),
            pl.BlockSpec((1, c), lambda ni, hi: (0, 0)),
        ],
        out_specs=pl.BlockSpec((1, th, w, c), lambda ni, hi: (ni, hi, 0, 0)),
        scratch_shapes=[pltpu.VMEM((th + 2, w + 2, c), jnp.bfloat16)],
        compiler_params=pltpu.CompilerParams(
            dimension_semantics=("parallel", "parallel"),
            vmem_limit_bytes=VMEM_LIMIT),
    )(xp, w1, b1, w2, b2)


# ----------------------------------------------------------------------------
# Plain-JAX glue ops
# TODO(synk): flow_warp (grid_sample) and bilinear resize are data-dependent
#             gathers; kept in plain JAX rather than Pallas.
# ----------------------------------------------------------------------------
def avg_pool2_nhwc(x):
    b, h, w, c = x.shape
    return x.reshape(b, h // 2, 2, w // 2, 2, c).mean(axis=(2, 4))


def bilinear_resize_nhwc(x, oh, ow, align_corners):
    """Matches torch.nn.functional.interpolate(mode='bilinear')."""
    b, h, w, c = x.shape
    xf = x.astype(jnp.float32)
    if align_corners:
        sy = (jnp.arange(oh, dtype=jnp.float32) * ((h - 1) / (oh - 1))
              if oh > 1 else jnp.zeros((oh,), jnp.float32))
        sx = (jnp.arange(ow, dtype=jnp.float32) * ((w - 1) / (ow - 1))
              if ow > 1 else jnp.zeros((ow,), jnp.float32))
    else:
        sy = jnp.maximum((jnp.arange(oh, dtype=jnp.float32) + 0.5) * (h / oh) - 0.5, 0.0)
        sx = jnp.maximum((jnp.arange(ow, dtype=jnp.float32) + 0.5) * (w / ow) - 0.5, 0.0)
    y0 = jnp.clip(jnp.floor(sy).astype(jnp.int32), 0, h - 1)
    x0 = jnp.clip(jnp.floor(sx).astype(jnp.int32), 0, w - 1)
    y1 = jnp.clip(y0 + 1, 0, h - 1)
    x1 = jnp.clip(x0 + 1, 0, w - 1)
    wy = sy - y0.astype(jnp.float32)
    wx = sx - x0.astype(jnp.float32)
    top = xf[:, y0, :, :]
    bot = xf[:, y1, :, :]
    v = top * (1.0 - wy)[None, :, None, None] + bot * wy[None, :, None, None]
    left = v[:, :, x0, :]
    right = v[:, :, x1, :]
    return left * (1.0 - wx)[None, None, :, None] + right * wx[None, None, :, None]


def flow_warp_nhwc(x, flow, padding_mode="zeros"):
    """basicsr.flow_warp (grid_sample, bilinear, align_corners=True), NHWC."""
    n, h, w, c = x.shape
    gy, gx = jnp.meshgrid(jnp.arange(h, dtype=jnp.float32),
                          jnp.arange(w, dtype=jnp.float32), indexing="ij")
    px = gx[None] + flow[..., 0]
    py = gy[None] + flow[..., 1]
    if padding_mode == "border":
        px = jnp.clip(px, 0.0, w - 1.0)
        py = jnp.clip(py, 0.0, h - 1.0)
    x0 = jnp.floor(px)
    y0 = jnp.floor(py)
    x1 = x0 + 1.0
    y1 = y0 + 1.0
    wx1 = px - x0
    wx0 = 1.0 - wx1
    wy1 = py - y0
    wy0 = 1.0 - wy1
    xf = x.reshape(n, h * w, c)

    def gather(xi, yi):
        xi_c = jnp.clip(xi, 0.0, w - 1.0).astype(jnp.int32)
        yi_c = jnp.clip(yi, 0.0, h - 1.0).astype(jnp.int32)
        idx = (yi_c * w + xi_c).reshape(n, h * w)
        g = jnp.take_along_axis(xf, idx[:, :, None], axis=1).reshape(n, h, w, c)
        if padding_mode == "zeros":
            valid = ((xi >= 0.0) & (xi <= w - 1.0) &
                     (yi >= 0.0) & (yi <= h - 1.0)).astype(x.dtype)
            g = g * valid[..., None]
        return g

    return (gather(x0, y0) * (wx0 * wy0)[..., None]
            + gather(x1, y0) * (wx1 * wy0)[..., None]
            + gather(x0, y1) * (wx0 * wy1)[..., None]
            + gather(x1, y1) * (wx1 * wy1)[..., None])


def pixel_shuffle_nhwc(x, r):
    b, h, w, c = x.shape
    cout = c // (r * r)
    x = x.reshape(b, h, w, cout, r, r)
    x = jnp.transpose(x, (0, 1, 4, 2, 5, 3))
    return x.reshape(b, h * r, w * r, cout)


# ----------------------------------------------------------------------------
# Parameter init (deterministic, synthetic); f32 master weights
# ----------------------------------------------------------------------------
def init_conv_params(key, kh, kw, cin, cout):
    kw_key, kb_key = jax.random.split(key)
    fan_in = kh * kw * cin
    w = jax.random.normal(kw_key, (kh, kw, cin, cout), jnp.float32) / math.sqrt(fan_in)
    b = 0.01 * jax.random.normal(kb_key, (cout,), jnp.float32)
    return {"w": w, "b": b}


def init_spynet_params(key):
    chans = [(8, 32), (32, 64), (64, 32), (32, 16), (16, 2)]
    modules = []
    for _ in range(6):
        convs = []
        for ci, co in chans:
            key, sub = jax.random.split(key)
            convs.append(init_conv_params(sub, 7, 7, ci, co))
        modules.append(convs)
    return modules


def init_flowfeavsr_params(key, num_in_ch, num_out_ch, num_feat, num_frame,
                           num_extract_block, num_reconstruct_block):
    p = {}
    key, k = jax.random.split(key)
    p["conv_first"] = init_conv_params(k, 3, 3, num_in_ch, num_feat)
    p["feature_extraction"] = []
    for _ in range(num_extract_block):
        key, k1 = jax.random.split(key)
        key, k2 = jax.random.split(key)
        p["feature_extraction"].append(
            {"conv1": init_conv_params(k1, 3, 3, num_feat, num_feat),
             "conv2": init_conv_params(k2, 3, 3, num_feat, num_feat)})
    key, k = jax.random.split(key)
    p["spynet"] = init_spynet_params(k)
    key, k = jax.random.split(key)
    p["fusion"] = init_conv_params(k, 1, 1, num_frame * num_feat, num_feat)
    p["reconstruction"] = []
    for _ in range(num_reconstruct_block):
        key, k1 = jax.random.split(key)
        key, k2 = jax.random.split(key)
        p["reconstruction"].append(
            {"conv1": init_conv_params(k1, 3, 3, num_feat, num_feat),
             "conv2": init_conv_params(k2, 3, 3, num_feat, num_feat)})
    key, k = jax.random.split(key)
    p["upconv1"] = init_conv_params(k, 3, 3, num_feat, num_feat * 4)
    key, k = jax.random.split(key)
    p["upconv2"] = init_conv_params(k, 3, 3, num_feat, 64 * 4)
    key, k = jax.random.split(key)
    p["conv_hr"] = init_conv_params(k, 3, 3, 64, 64)
    key, k = jax.random.split(key)
    p["conv_last"] = init_conv_params(k, 3, 3, 64, num_out_ch)
    return p


# ----------------------------------------------------------------------------
# SpyNet (NHWC end-to-end)
# ----------------------------------------------------------------------------
SPY_MEAN = jnp.array([0.485, 0.456, 0.406], dtype=jnp.float32).reshape(1, 1, 1, 3)
SPY_STD = jnp.array([0.229, 0.224, 0.225], dtype=jnp.float32).reshape(1, 1, 1, 3)


def spynet_basic_module(convs, x):
    acts = ["relu", "relu", "relu", "relu", "none"]
    for i, (conv, act) in enumerate(zip(convs, acts)):
        precise = i >= 3                 # keep the flow head (last 2 convs) f32
        cdt = jnp.float32 if precise else jnp.bfloat16
        odt = jnp.float32 if precise else jnp.bfloat16
        x = conv2d_nhwc(x, conv["w"], conv["b"], pad=3, act=act,
                        out_dtype=odt, compute_dtype=cdt)
    return x


def spynet_process(params, ref, supp):
    ref_p = [(ref - SPY_MEAN) / SPY_STD]
    supp_p = [(supp - SPY_MEAN) / SPY_STD]
    for _ in range(5):
        ref_p.insert(0, avg_pool2_nhwc(ref_p[0]))
        supp_p.insert(0, avg_pool2_nhwc(supp_p[0]))
    n = ref.shape[0]
    h0, w0 = ref_p[0].shape[1], ref_p[0].shape[2]
    flow = jnp.zeros((n, h0 // 2, w0 // 2, 2), jnp.float32)
    for level in range(6):
        up = bilinear_resize_nhwc(flow, flow.shape[1] * 2, flow.shape[2] * 2,
                                  align_corners=True) * 2.0
        if up.shape[1] != ref_p[level].shape[1]:
            up = jnp.pad(up, ((0, 0), (0, 1), (0, 0), (0, 0)), mode="edge")
        if up.shape[2] != ref_p[level].shape[2]:
            up = jnp.pad(up, ((0, 0), (0, 0), (0, 1), (0, 0)), mode="edge")
        warped = flow_warp_nhwc(supp_p[level], up, padding_mode="border")
        inp = jnp.concatenate([ref_p[level], warped, up], axis=-1)
        flow = spynet_basic_module(params[level], inp) + up
    return flow


def spynet_forward(params, ref, supp):
    h, w = ref.shape[1], ref.shape[2]
    w_floor = int(math.floor(math.ceil(w / 32.0) * 32.0))
    h_floor = int(math.floor(math.ceil(h / 32.0) * 32.0))
    ref_r = bilinear_resize_nhwc(ref, h_floor, w_floor, align_corners=False)
    supp_r = bilinear_resize_nhwc(supp, h_floor, w_floor, align_corners=False)
    flow = spynet_process(params, ref_r, supp_r)
    flow = bilinear_resize_nhwc(flow, h, w, align_corners=False)
    scale = jnp.array([w / float(w_floor), h / float(h_floor)],
                      jnp.float32).reshape(1, 1, 1, 2)
    return flow * scale


# ----------------------------------------------------------------------------
# FlowFeaVSR forward (NHWC internally, NCHW at the interface)
# ----------------------------------------------------------------------------
def flowfeavsr_forward(params, x, center_frame_idx):
    b, t, c, h, w = x.shape
    assert h % 4 == 0 and w % 4 == 0
    nf = params["conv_first"]["w"].shape[-1]

    x_nhwc = jnp.transpose(x, (0, 1, 3, 4, 2))                  # (b, t, h, w, c)
    x_center = x_nhwc[:, center_frame_idx]                      # (b, h, w, c)

    feat = conv2d_nhwc(x_nhwc.reshape(b * t, h, w, c),
                       params["conv_first"]["w"], params["conv_first"]["b"],
                       pad=1, act="lrelu")
    for blk in params["feature_extraction"]:
        feat = residual_block_fused(feat, blk)                  # (b*t, h, w, nf)

    # SpyNet for all t frames in one batched call.
    ref_all = jnp.broadcast_to(x_center[:, None], (b, t, h, w, c)).reshape(b * t, h, w, c)
    supp_all = x_nhwc.reshape(b * t, h, w, c)
    flow_all = spynet_forward(params["spynet"], ref_all, supp_all)   # (b*t, h, w, 2)

    # TODO(synk): the flow_warp gather of `feat` could be fused into the fusion
    #             conv (scalar-prefetched indices); kept as a separate JAX op.
    aligned = flow_warp_nhwc(feat, flow_all, padding_mode="zeros")   # (b*t, h, w, nf)
    aligned = aligned.reshape(b, t, h, w, nf)
    aligned = jnp.transpose(aligned, (0, 2, 3, 1, 4)).reshape(b, h, w, t * nf)

    out = conv2d_nhwc(aligned, params["fusion"]["w"], params["fusion"]["b"],
                      pad=0, act="none")
    for blk in params["reconstruction"]:
        out = residual_block_fused(out, blk)

    # lrelu is elementwise so it commutes with pixel_shuffle -> fused into conv.
    out = conv2d_nhwc(out, params["upconv1"]["w"], params["upconv1"]["b"], pad=1, act="lrelu")
    out = pixel_shuffle_nhwc(out, 2)
    out = conv2d_nhwc(out, params["upconv2"]["w"], params["upconv2"]["b"], pad=1, act="lrelu")
    out = pixel_shuffle_nhwc(out, 2)
    out = conv2d_nhwc(out, params["conv_hr"]["w"], params["conv_hr"]["b"], pad=1, act="lrelu")
    out = conv2d_nhwc(out, params["conv_last"]["w"], params["conv_last"]["b"],
                      pad=1, act="none", out_dtype=jnp.float32)

    base = bilinear_resize_nhwc(x_center, 4 * h, 4 * w, align_corners=False)
    out = out + base
    return jnp.transpose(out, (0, 3, 1, 2))                     # back to NCHW


# ----------------------------------------------------------------------------
if __name__ == "__main__":
    num_in_ch, num_out_ch = 3, 3
    num_feat = 32
    num_frame = 3
    num_extract_block = 2
    num_reconstruct_block = 2
    center_frame_idx = num_frame // 2

    # h = w = 64: smallest size for which SpyNet's 6-level pyramid is non-degenerate.
    b, h, w = 1, 64, 64
    key = jax.random.PRNGKey(0)
    kx, kp = jax.random.split(key)
    x = jax.random.uniform(kx, (b, num_frame, num_in_ch, h, w), jnp.float32)
    params = init_flowfeavsr_params(kp, num_in_ch, num_out_ch, num_feat, num_frame,
                                    num_extract_block, num_reconstruct_block)

    out = flowfeavsr_forward(params, x, center_frame_idx)
    out = jax.block_until_ready(out)
    assert out.shape == (b, num_out_ch, 4 * h, 4 * w)
    assert bool(jnp.all(jnp.isfinite(out)))
    print("KERNEL_OK")
</pallas_src>

<mosaic_0001>
module attributes {stable_mosaic.version = 11 : i64} {
  func.func @_conv_direct_kernel(%arg0: i32, %arg1: i32, %arg2: memref<1x66x66x3xbf16, #tpu.memory_space<vmem>>, %arg3: memref<9x3x32xbf16, #tpu.memory_space<vmem>>, %arg4: memref<1x32xf32, #tpu.memory_space<vmem>>, %arg5: memref<1x16x64x32xbf16, #tpu.memory_space<vmem>>) attributes {dimension_semantics = [#tpu.dimension_semantics<parallel>, #tpu.dimension_semantics<parallel>], iteration_bounds = array<i64: 3, 4>, scalar_prefetch = 0 : i64, scratch_operands = 0 : i64, tpu.core_type = #tpu.core_type<tc>, window_params = [{transform_indices = @transform_0, window_bounds = array<i64: 1, 66, 66, 3>}, {pipeline_mode = #tpu.pipeline_mode<synchronous>, transform_indices = @transform_1, window_bounds = array<i64: 9, 3, 32>}, {pipeline_mode = #tpu.pipeline_mode<synchronous>, transform_indices = @transform_2, window_bounds = array<i64: 1, 32>}, {transform_indices = @transform_3, window_bounds = array<i64: 1, 16, 64, 32>}]} {
    %c16_i32 = arith.constant 16 : i32
    %0 = arith.muli %arg1, %c16_i32 : i32
    %1 = tpu.assume_multiple %0, 8 : i32
    %c0_i32 = arith.constant 0 : i32
    %2 = arith.addi %1, %c0_i32 : i32
    %c0 = arith.constant 0 : index
    %3 = arith.index_cast %2 : i32 to index
    %c0_0 = arith.constant 0 : index
    %c0_1 = arith.constant 0 : index
    %4 = vector.load %arg2[%c0, %3, %c0_0, %c0_1] : memref<1x66x66x3xbf16, #tpu.memory_space<vmem>>, vector<1x16x64x3xbf16>
    %5 = vector.shape_cast %4 : vector<1x16x64x3xbf16> to vector<16x64x3xbf16>
    %6 = vector.shape_cast %5 : vector<16x64x3xbf16> to vector<1024x3xbf16>
    %c0_2 = arith.constant 0 : index
    %c0_3 = arith.constant 0 : index
    %c0_4 = arith.constant 0 : index
    %7 = vector.load %arg3[%c0_2, %c0_3, %c0_4] : memref<9x3x32xbf16, #tpu.memory_space<vmem>>, vector<1x3x32xbf16>
    %8 = vector.shape_cast %7 : vector<1x3x32xbf16> to vector<3x32xbf16>
    %cst = arith.constant dense<0.000000e+00> : vector<1024x32xf32>
    %9 = tpu.matmul %6, %8, %cst {dimension_numbers = #tpu.dot_dimension_numbers<[1], [0], [0], [1], [0, 0, 1, 1], [], []>} : vector<1024x3xbf16>, vector<3x32xbf16>, vector<1024x32xf32> -> vector<1024x32xf32>
    %c0_i32_5 = arith.constant 0 : i32
    %10 = arith.addi %1, %c0_i32_5 : i32
    %c0_6 = arith.constant 0 : index
    %11 = arith.index_cast %10 : i32 to index
    %c1 = arith.constant 1 : index
    %c0_7 = arith.constant 0 : index
    %12 = vector.load %arg2[%c0_6, %11, %c1, %c0_7] : memref<1x66x66x3xbf16, #tpu.memory_space<vmem>>, vector<1x16x64x3xbf16>
    %13 = vector.shape_cast %12 : vector<1x16x64x3xbf16> to vector<16x64x3xbf16>
    %14 = vector.shape_cast %13 : vector<16x64x3xbf16> to vector<1024x3xbf16>
    %c1_8 = arith.constant 1 : index
    %c0_9 = arith.constant 0 : index
    %c0_10 = arith.constant 0 : index
    %15 = vector.load %arg3[%c1_8, %c0_9, %c0_10] : memref<9x3x32xbf16, #tpu.memory_space<vmem>>, vector<1x3x32xbf16>
    %16 = vector.shape_cast %15 : vector<1x3x32xbf16> to vector<3x32xbf16>
    %cst_11 = arith.constant dense<0.000000e+00> : vector<1024x32xf32>
    %17 = tpu.matmul %14, %16, %cst_11 {dimension_numbers = #tpu.dot_dimension_numbers<[1], [0], [0], [1], [0, 0, 1, 1], [], []>} : vector<1024x3xbf16>, vector<3x32xbf16>, vector<1024x32xf32> -> vector<1024x32xf32>
    %18 = arith.addf %9, %17 : vector<1024x32xf32>
    %c0_i32_12 = arith.constant 0 : i32
    %19 = arith.addi %1, %c0_i32_12 : i32
    %c0_13 = arith.constant 0 : index
    %20 = arith.index_cast %19 : i32 to index
    %c2 = arith.constant 2 : index
    %c0_14 = arith.constant 0 : index
    %21 = vector.load %arg2[%c0_13, %20, %c2, %c0_14] : memref<1x66x66x3xbf16, #tpu.memory_space<vmem>>, vector<1x16x64x3xbf16>
    %22 = vector.shape_cast %21 : vector<1x16x64x3xbf16> to vector<16x64x3xbf16>
    %23 = vector.shape_cast %22 : vector<16x64x3xbf16> to vector<1024x3xbf16>
    %c2_15 = arith.constant 2 : index
    %c0_16 = arith.constant 0 : index
    %c0_17 = arith.constant 0 : index
    %24 = vector.load %arg3[%c2_15, %c0_16, %c0_17] : memref<9x3x32xbf16, #tpu.memory_space<vmem>>, vector<1x3x32xbf16>
    %25 = vector.shape_cast %24 : vector<1x3x32xbf16> to vector<3x32xbf16>
    %cst_18 = arith.constant dense<0.000000e+00> : vector<1024x32xf32>
    %26 = tpu.matmul %23, %25, %cst_18 {dimension_numbers = #tpu.dot_dimension_numbers<[1], [0], [0], [1], [0, 0, 1, 1], [], []>} : vector<1024x3xbf16>, vector<3x32xbf16>, vector<1024x32xf32> -> vector<1024x32xf32>
    %27 = arith.addf %18, %26 : vector<1024x32xf32>
    %c1_i32 = arith.constant 1 : i32
    %28 = arith.addi %1, %c1_i32 : i32
    %c0_19 = arith.constant 0 : index
    %29 = arith.index_cast %28 : i32 to index
    %c0_20 = arith.constant 0 : index
    %c0_21 = arith.constant 0 : index
    %30 = vector.load %arg2[%c0_19, %29, %c0_20, %c0_21] : memref<1x66x66x3xbf16, #tpu.memory_space<vmem>>, vector<1x16x64x3xbf16>
    %31 = vector.shape_cast %30 : vector<1x16x64x3xbf16> to vector<16x64x3xbf16>
    %32 = vector.shape_cast %31 : vector<16x64x3xbf16> to vector<1024x3xbf16>
    %c3 = arith.constant 3 : index
    %c0_22 = arith.constant 0 : index
    %c0_23 = arith.constant 0 : index
    %33 = vector.load %arg3[%c3, %c0_22, %c0_23] : memref<9x3x32xbf16, #tpu.memory_space<vmem>>, vector<1x3x32xbf16>
    %34 = vector.shape_cast %33 : vector<1x3x32xbf16> to vector<3x32xbf16>
    %cst_24 = arith.constant dense<0.000000e+00> : vector<1024x32xf32>
    %35 = tpu.matmul %32, %34, %cst_24 {dimension_numbers = #tpu.dot_dimension_numbers<[1], [0], [0], [1], [0, 0, 1, 1], [], []>} : vector<1024x3xbf16>, vector<3x32xbf16>, vector<1024x32xf32> -> vector<1024x32xf32>
    %36 = arith.addf %27, %35 : vector<1024x32xf32>
    %c1_i32_25 = arith.constant 1 : i32
    %37 = arith.addi %1, %c1_i32_25 : i32
    %c0_26 = arith.constant 0 : index
    %38 = arith.index_cast %37 : i32 to index
    %c1_27 = arith.constant 1 : index
    %c0_28 = arith.constant 0 : index
    %39 = vector.load %arg2[%c0_26, %38, %c1_27, %c0_28] : memref<1x66x66x3xbf16, #tpu.memory_space<vmem>>, vector<1x16x64x3xbf16>
    %40 = vector.shape_cast %39 : vector<1x16x64x3xbf16> to vector<16x64x3xbf16>
    %41 = vector.shape_cast %40 : vector<16x64x3xbf16> to vector<1024x3xbf16>
    %c4 = arith.constant 4 : index
    %c0_29 = arith.constant 0 : index
    %c0_30 = arith.constant 0 : index
    %42 = vector.load %arg3[%c4, %c0_29, %c0_30] : memref<9x3x32xbf16, #tpu.memory_space<vmem>>, vector<1x3x32xbf16>
    %43 = vector.shape_cast %42 : vector<1x3x32xbf16> to vector<3x32xbf16>
    %cst_31 = arith.constant dense<0.000000e+00> : vector<1024x32xf32>
    %44 = tpu.matmul %41, %43, %cst_31 {dimension_numbers = #tpu.dot_dimension_numbers<[1], [0], [0], [1], [0, 0, 1, 1], [], []>} : vector<1024x3xbf16>, vector<3x32xbf16>, vector<1024x32xf32> -> vector<1024x32xf32>
    %45 = arith.addf %36, %44 : vector<1024x32xf32>
    %c1_i32_32 = arith.constant 1 : i32
    %46 = arith.addi %1, %c1_i32_32 : i32
    %c0_33 = arith.constant 0 : index
    %47 = arith.index_cast %46 : i32 to index
    %c2_34 = arith.constant 2 : index
    %c0_35 = arith.constant 0 : index
    %48 = vector.load %arg2[%c0_33, %47, %c2_34, %c0_35] : memref<1x66x66x3xbf16, #tpu.memory_space<vmem>>, vector<1x16x64x3xbf16>
    %49 = vector.shape_cast %48 : vector<1x16x64x3xbf16> to vector<16x64x3xbf16>
    %50 = vector.shape_cast %49 : vector<16x64x3xbf16> to vector<1024x3xbf16>
    %c5 = arith.constant 5 : index
    %c0_36 = arith.constant 0 : index
    %c0_37 = arith.constant 0 : index
    %51 = vector.load %arg3[%c5, %c0_36, %c0_37] : memref<9x3x32xbf16, #tpu.memory_space<vmem>>, vector<1x3x32xbf16>
    %52 = vector.shape_cast %51 : vector<1x3x32xbf16> to vector<3x32xbf16>
    %cst_38 = arith.constant dense<0.000000e+00> : vector<1024x32xf32>
    %53 = tpu.matmul %50, %52, %cst_38 {dimension_numbers = #tpu.dot_dimension_numbers<[1], [0], [0], [1], [0, 0, 1, 1], [], []>} : vector<1024x3xbf16>, vector<3x32xbf16>, vector<1024x32xf32> -> vector<1024x32xf32>
    %54 = arith.addf %45, %53 : vector<1024x32xf32>
    %c2_i32 = arith.constant 2 : i32
    %55 = arith.addi %1, %c2_i32 : i32
    %c0_39 = arith.constant 0 : index
    %56 = arith.index_cast %55 : i32 to index
    %c0_40 = arith.constant 0 : index
    %c0_41 = arith.constant 0 : index
    %57 = vector.load %arg2[%c0_39, %56, %c0_40, %c0_41] : memref<1x66x66x3xbf16, #tpu.memory_space<vmem>>, vector<1x16x64x3xbf16>
    %58 = vector.shape_cast %57 : vector<1x16x64x3xbf16> to vector<16x64x3xbf16>
    %59 = vector.shape_cast %58 : vector<16x64x3xbf16> to vector<1024x3xbf16>
    %c6 = arith.constant 6 : index
    %c0_42 = arith.constant 0 : index
    %c0_43 = arith.constant 0 : index
    %60 = vector.load %arg3[%c6, %c0_42, %c0_43] : memref<9x3x32xbf16, #tpu.memory_space<vmem>>, vector<1x3x32xbf16>
    %61 = vector.shape_cast %60 : vector<1x3x32xbf16> to vector<3x32xbf16>
    %cst_44 = arith.constant dense<0.000000e+00> : vector<1024x32xf32>
    %62 = tpu.matmul %59, %61, %cst_44 {dimension_numbers = #tpu.dot_dimension_numbers<[1], [0], [0], [1], [0, 0, 1, 1], [], []>} : vector<1024x3xbf16>, vector<3x32xbf16>, vector<1024x32xf32> -> vector<1024x32xf32>
    %63 = arith.addf %54, %62 : vector<1024x32xf32>
    %c2_i32_45 = arith.constant 2 : i32
    %64 = arith.addi %1, %c2_i32_45 : i32
    %c0_46 = arith.constant 0 : index
    %65 = arith.index_cast %64 : i32 to index
    %c1_47 = arith.constant 1 : index
    %c0_48 = arith.constant 0 : index
    %66 = vector.load %arg2[%c0_46, %65, %c1_47, %c0_48] : memref<1x66x66x3xbf16, #tpu.memory_space<vmem>>, vector<1x16x64x3xbf16>
    %67 = vector.shape_cast %66 : vector<1x16x64x3xbf16> to vector<16x64x3xbf16>
    %68 = vector.shape_cast %67 : vector<16x64x3xbf16> to vector<1024x3xbf16>
    %c7 = arith.constant 7 : index
    %c0_49 = arith.constant 0 : index
    %c0_50 = arith.constant 0 : index
    %69 = vector.load %arg3[%c7, %c0_49, %c0_50] : memref<9x3x32xbf16, #tpu.memory_space<vmem>>, vector<1x3x32xbf16>
    %70 = vector.shape_cast %69 : vector<1x3x32xbf16> to vector<3x32xbf16>
    %cst_51 = arith.constant dense<0.000000e+00> : vector<1024x32xf32>
    %71 = tpu.matmul %68, %70, %cst_51 {dimension_numbers = #tpu.dot_dimension_numbers<[1], [0], [0], [1], [0, 0, 1, 1], [], []>} : vector<1024x3xbf16>, vector<3x32xbf16>, vector<1024x32xf32> -> vector<1024x32xf32>
    %72 = arith.addf %63, %71 : vector<1024x32xf32>
    %c2_i32_52 = arith.constant 2 : i32
    %73 = arith.addi %1, %c2_i32_52 : i32
    %c0_53 = arith.constant 0 : index
    %74 = arith.index_cast %73 : i32 to index
    %c2_54 = arith.constant 2 : index
    %c0_55 = arith.constant 0 : index
    %75 = vector.load %arg2[%c0_53, %74, %c2_54, %c0_55] : memref<1x66x66x3xbf16, #tpu.memory_space<vmem>>, vector<1x16x64x3xbf16>
    %76 = vector.shape_cast %75 : vector<1x16x64x3xbf16> to vector<16x64x3xbf16>
    %77 = vector.shape_cast %76 : vector<16x64x3xbf16> to vector<1024x3xbf16>
    %c8 = arith.constant 8 : index
    %c0_56 = arith.constant 0 : index
    %c0_57 = arith.constant 0 : index
    %78 = vector.load %arg3[%c8, %c0_56, %c0_57] : memref<9x3x32xbf16, #tpu.memory_space<vmem>>, vector<1x3x32xbf16>
    %79 = vector.shape_cast %78 : vector<1x3x32xbf16> to vector<3x32xbf16>
    %cst_58 = arith.constant dense<0.000000e+00> : vector<1024x32xf32>
    %80 = tpu.matmul %77, %79, %cst_58 {dimension_numbers = #tpu.dot_dimension_numbers<[1], [0], [0], [1], [0, 0, 1, 1], [], []>} : vector<1024x3xbf16>, vector<3x32xbf16>, vector<1024x32xf32> -> vector<1024x32xf32>
    %81 = arith.addf %72, %80 : vector<1024x32xf32>
    %c0_59 = arith.constant 0 : index
    %c0_60 = arith.constant 0 : index
    %82 = vector.load %arg4[%c0_59, %c0_60] : memref<1x32xf32, #tpu.memory_space<vmem>>, vector<1x32xf32>
    %83 = vector.broadcast %82 : vector<1x32xf32> to vector<1024x32xf32>
    %84 = arith.addf %81, %83 : vector<1024x32xf32>
    %cst_61 = arith.constant 0.000000e+00 : f32
    %85 = vector.broadcast %cst_61 : f32 to vector<1024x32xf32>
    %86 = arith.cmpf ogt, %84, %85 : vector<1024x32xf32>
    %cst_62 = arith.constant 1.000000e-01 : f32
    %87 = vector.broadcast %cst_62 : f32 to vector<1024x32xf32>
    %88 = arith.mulf %84, %87 : vector<1024x32xf32>
    %89 = arith.select %86, %84, %88 : vector<1024x32xi1>, vector<1024x32xf32>
    %90 = vector.shape_cast %89 : vector<1024x32xf32> to vector<1x16x64x32xf32>
    %91 = arith.truncf %90 : vector<1x16x64x32xf32> to vector<1x16x64x32xbf16>
    %c0_63 = arith.constant 0 : index
    %c0_64 = arith.constant 0 : index
    %c0_65 = arith.constant 0 : index
    %c0_66 = arith.constant 0 : index
    %92 = vector.load %arg5[%c0_63, %c0_64, %c0_65, %c0_66] : memref<1x16x64x32xbf16, #tpu.memory_space<vmem>>, vector<1x16x64x32xbf16>
    tpu.vector_store %arg5[%c0_63, %c0_64, %c0_65, %c0_66], %91 {strides = array<i32>} : memref<1x16x64x32xbf16, #tpu.memory_space<vmem>>, vector<1x16x64x32xbf16>,
    return
  }
  func.func @transform_0(%arg0: i32, %arg1: i32) -> (i32, i32, i32, i32) {
    %c0_i32 = arith.constant 0 : i32
    %c0_i32_0 = arith.constant 0 : i32
    %c0_i32_1 = arith.constant 0 : i32
    %c0_i32_2 = arith.constant 0 : i32
    return %arg0, %c0_i32, %c0_i32_0, %c0_i32_1 : i32, i32, i32, i32
  }
  func.func @transform_1(%arg0: i32, %arg1: i32) -> (i32, i32, i32) {
    %c0_i32 = arith.constant 0 : i32
    %c0_i32_0 = arith.constant 0 : i32
    %c0_i32_1 = arith.constant 0 : i32
    %c0_i32_2 = arith.constant 0 : i32
    return %c0_i32, %c0_i32_0, %c0_i32_1 : i32, i32, i32
  }
  func.func @transform_2(%arg0: i32, %arg1: i32) -> (i32, i32) {
    %c0_i32 = arith.constant 0 : i32
    %c0_i32_0 = arith.constant 0 : i32
    %c0_i32_1 = arith.constant 0 : i32
    return %c0_i32, %c0_i32_0 : i32, i32
  }
  func.func @transform_3(%arg0: i32, %arg1: i32) -> (i32, i32, i32, i32) {
    %c0_i32 = arith.constant 0 : i32
    %c0_i32_0 = arith.constant 0 : i32
    %c0_i32_1 = arith.constant 0 : i32
    return %arg0, %arg1, %c0_i32, %c0_i32_0 : i32, i32, i32, i32
  }
}

</mosaic_0001>

<bundles_post_ra>
// kernel: tpu_custom_call.1
= control target key start
LH: loop header
LB: loop body
LE: loop exit
PB: predicated region body
PF: predicated region fallthrough
CT: control target
= control target key end

     0   :  { %s23036_s12 = smov 0   ;;  %s23038_s13 = smov 0   ;;  %s29136_s0 = inlined_call_operand.vmem [shape: bf16[3,66,66,3], index: 0, kind: input, shape index: {}]   ;;  %s29137_s1 = inlined_call_operand.vmem [shape: bf16[9,3,32], index: 1, kind: input, shape index: {}]   ;;  %s29138_s2 = inlined_call_operand.vmem [shape: f32[1,32], index: 2, kind: input, shape index: {}]   ;;  %s29139_s3 = inlined_call_operand.vmem [shape: bf16[3,64,64,32], index: 3, kind: output, shape index: {}]  }
   0x1   :  { %s23040_s14 = smov 0   ;;  %s23042_s15 = smov 0  }
   0x2   :  { %s23044_s16 = smov 0  }
   0x3 LB: > { %s22_s17 = sadd.s32 1, %s23005_s14  ;;  %s25_s18 = sadd.s32 1, %s23009_s15  ;;  %s23013_s16 = sphi %s23044_s16, %s13_s16   ;;  %s23009_s15 = sphi %s23042_s15, %s29508_s15   ;;  %s23005_s14 = sphi %s23040_s14, %s29507_s14   ;;  %s23001_s13 = sphi %s23038_s13, %s29506_s13   ;;  %s22997_s12 = sphi %s23036_s12, %s29505_s12  }
   0x4   : > { %p23_p0 = scmp.ge.s32.totalorder %s22_s17, 4  ;;  %p17457_p1 = scmp.ge.s32.totalorder %s23013_s16, 1 }
   0x5   : > { %p151_p2 = scmp.lt.s32.totalorder %s23013_s16, 13 }
   0x6   : > { %s29510_s17 = smov (%p23_p0, %s22_s17), 0  ;;  %s29512_s18 = smov (!%p23_p0, %s25_s18), %s23009_s15 }
   0x7   : > { %p152_p3 = pnand %p17457_p1, %p151_p2  ;;  %p27_p4 = scmp.ge.s32.totalorder %s29512_s18, 3 }
   0x9   : > { %s29514_s18 = smov (%p27_p4, %s29512_s18), 0  ;;  %155 = sbr.rel (%p152_p3) target bundleno = 1582 (0x62e), region = 32 }
  0x10   : > { %v17466_v0 = vld [vmem:[%s29137_s1 + $0x2] sm:$0x3]  ;;  %vm2080_vm0 = vcmask 1040384   ;;  %vm2081_vm1 = vcmask 1041408   ;;  %p180_p5 = scmp.lt.s32.totalorder %s23001_s13, 2  ;;  %v23015_v1 = vmov 65535  }
  0x11   : > { %v2082_v2 = vsel %vm2080_vm0, 4294967295, %v23015_v1  ;;  %v18271_v3 = vld [vmem:[%s29137_s1 + $0x8] sm:$0x3]  ;;  %s19385_s23 = smul.u32 576, %s22997_s12  ;;  %v329_v7 = vld [vmem:[%s29137_s1] sm:$0x3] }
  0x12   : > { %v23074_v4 = vsel %vm2081_vm1, %v2082_v2, 0  ;;  %s29516_s13 = smov (!%p180_p5, %s23001_s13), 2  ;;  %v18432_v8 = vld [vmem:[%s29137_s1 + $0xa] sm:$0x3]  ;;  %vm346_vm2 = vsmask.f32 3328 }
  0x13   : > { %v2085_v5 = vand.u32 %v17466_v0, %v23074_v4  ;;  %v23080_v6 = vand.u32 %v18271_v3, %v23074_v4  ;;  %s22295_s28 = smul.u32 2376, %s29516_s13  ;;  %v23091_v9 = vand.u32 %v23074_v4, %v329_v7  ;;  %v23094_v10 = vand.u32 %v18432_v8, %v23074_v4  ;;  %s17461_s25 = sshll.u32 %s29516_s13, 9 }
  0x14   : > { %vm347_vm3 = vsmask.f32 7440  ;;  %vm1887_vm4 = vcmask 23552   ;;  %v29193_v35 = vmov 0  ;;  %vm3740_vm6 = vcmask 1042432  }
  0x15   : > { %29192 = vst [vmem:[#allocation2_spill] sm:$0xff] %v23080_v6  ;;  %20099 = vmatprep.subr.bf16.mxu1 %v2085_v5  ;;  %20619 = vmatprep.subr.bf16.mxu0 %v23080_v6  ;;  %s184_s4 = scalar_lea.vmem %s29136_s0, %s22295_s28  ;;  %vm23119_vm5 = vmor %vm346_vm2, %vm347_vm3  ;;  %vm3741_vm7 = vcmask 1046532   ;;  %vm17224_vm9 = vcmask 257024  }
  0x16   : > { %20100 = vmatpush3.bf16.msra.mxu1 %v2085_v5  ;;  %20620 = vmatpush3.bf16.msra.mxu0 %v23080_v6  ;;  %s23101_s5 = scalar_lea.vmem %s184_s4, %s19385_s23  ;;  %v29194_v35 = vsel %vm23119_vm5, 4294967295, %v29193_v35  ;;  %vm23613_vm8 = vmor %vm3740_vm6, %vm3741_vm7  ;;  %s17459_s23 = sshll.u32 %s22997_s12, 4 }
  0x17   : > { %20229 = vmatprep.subr.bf16.mxu1 %v23091_v9  ;;  %20749 = vmatprep.subr.bf16.mxu0 %v23094_v10  ;;  %v201_v11 = vld [vmem:[%s23101_s5] sm:$0xf]  ;;  %v202_v12 = vld [vmem:[%s23101_s5 + $0x4] sm:$0xf]  ;;  %v203_v13 = vld [vmem:[%s23101_s5 + $0x8] sm:$0xf] }
  0x18   : > { %v350_v14 = vshrl.u32 %v201_v11, 16  ;;  %v353_v15 = vshll.u32 %v201_v11, 16  ;;  %v359_v16 = vshll.u32 %v202_v12, 16  ;;  %v363_v17 = vshrl.u32 %v202_v12, 16  ;;  %v18127_v20 = vld [vmem:[%s23101_s5 + $0x24] sm:$0xf] }
  0x19   : > { %v369_v18 = vshll.u32 %v203_v13, 16  ;;  %v373_v19 = vshrl.u32 %v203_v13, 16  ;;  %v23110_v21 = vld [vmem:[%s23101_s5 + $0x28] sm:$0xf]  ;;  %v23113_v26 = vld [vmem:[%s23101_s5 + $0x2c] sm:$0xf] }
  0x1a   : > { %v352_v22 = vrot.slane %v350_v14, 4  ;;  %v355_v23 = vrot.slane %v353_v15, 5  ;;  %v361_v24 = vrot.slane %v359_v16, 5  ;;  %v365_v25 = vrot.slane %v363_v17, 4  ;;  %29195 = vst [vmem:[#allocation3_spill] sm:$0xff] %v29194_v35  ;;  %p28424_p6 = scmp.lt.s32.totalorder %s17459_s23, 63 }
  0x1b   : > { %v371_v27 = vrot.slane %v369_v18, 5  ;;  %v375_v28 = vrot.slane %v373_v19, 4  ;;  %v6672_v29 = vshrl.u32 %v18127_v20, 16  ;;  %v6675_v30 = vshll.u32 %v18127_v20, 16  ;;  %v204_v44 = vld [vmem:[%s23101_s5 + $0xc] sm:$0xf] }
  0x1c   : > { %v356_v31 = vor.u32 %v355_v23, %v352_v22  ;;  %v366_v32 = vor.u32 %v365_v25, %v361_v24  ;;  %v6681_v33 = vshll.u32 %v23110_v21, 16  ;;  %v6685_v34 = vshrl.u32 %v23110_v21, 16  ;;  %v205_v48 = vld [vmem:[%s23101_s5 + $0x10] sm:$0xf]  ;;  %v23144_v2 = vld [vmem:[%s23101_s5 + $0x34] sm:$0xf] }
  0x1d   : > { %v376_v36 = vor.u32 %v375_v28, %v371_v27  ;;  %v6674_v37 = vrot.slane %v6672_v29, 4  ;;  %v6677_v38 = vrot.slane %v6675_v30, 5  ;;  %v6691_v39 = vshll.u32 %v23113_v26, 16  ;;  %v23133_v61 = vld [vmem:[%s23101_s5 + $0x30] sm:$0xf]  ;;  %s29518_s23 = smov (!%p28424_p6, %s17459_s23), 63 }
  0x1e   : > { %v357_v40 = vrot.slane %v356_v31, 4  ;;  %v367_v41 = vrot.slane %v366_v32, 4  ;;  %v6683_v42 = vrot.slane %v6681_v33, 5  ;;  %v6687_v43 = vrot.slane %v6685_v34, 4  ;;  %v206_v15 = vld [vmem:[%s23101_s5 + $0x14] sm:$0xf] }
  0x1f   : > { %v6678_v45 = vor.u32 %v6677_v38, %v6674_v37  ;;  %v6693_v46 = vrot.slane %v6691_v39, 5  ;;  %v6695_v47 = vshrl.u32 %v23113_v26, 16  ;;  %v377_v51 = vrot.slane %v376_v36, 4  ;;  %v18132_v36 = vld [vmem:[%s23101_s5 + $0x38] sm:$0xf]  ;;  %s17460_s12 = sshll.u32 %s29518_s23, 3 }
  0x20   : > { %v362_v49 = vsel %vm23119_vm5, %v357_v40, %v361_v24  ;;  %v372_v50 = vsel %vm23119_vm5, %v367_v41, %v371_v27  ;;  %v6688_v52 = vor.u32 %v6687_v43, %v6683_v42  ;;  %v9242_v56 = vrot.slane %v23113_v26, 5  ;;  %v207_v24 = vld [vmem:[%s23101_s5 + $0x18] sm:$0xf]  ;;  %v18133_v40 = vld [vmem:[%s23101_s5 + $0x3c] sm:$0xf]  ;;  %s28533_s27 = sadd.s32 %s17461_s25, %s17460_s12 }
  0x21   : > { %v17467_v53 = vcombine.low %v362_v49, %v372_v50  ;;  %v6679_v54 = vrot.slane %v6678_v45, 4  ;;  %v6697_v55 = vrot.slane %v6695_v47, 4  ;;  %v379_v58 = vshll.u32 %v204_v44, 16  ;;  %v18256_v35 = vld [vmem:[%s23101_s5 + $0x228] sm:$0xf]  ;;  %s17462_s28 = sshll.u32 %s28533_s27, 2 }
  0x22   : > { %v6689_v57 = vrot.slane %v6688_v52, 4  ;;  %v383_v59 = vshrl.u32 %v204_v44, 16  ;;  %v389_v60 = vshll.u32 %v205_v48, 16  ;;  %v9239_v0 = vrot.slane %v23110_v21, 5  ;;  %s28585_s4 = scalar_lea.vmem %s29139_s3, %s17462_s28 }
  0x23   : > { %20101 = vmatprep.mubr.msk.bf16.mxu1 %vm1887_vm4, %v17467_v53  ;;  %v6684_v62 = vsel %vm23119_vm5, %v6679_v54, %v6683_v42  ;;  %v6698_v63 = vor.u32 %v6697_v55, %v6693_v46  ;;  %v23141_v1 = vrot.slane %v9242_v56, 4  ;;  %v381_v5 = vrot.slane %v379_v58, 5  ;;  %v208_v54 = vld [vmem:[%s23101_s5 + $0x1c] sm:$0xf] }
  0x24   : > { %v6694_v3 = vsel %vm23119_vm5, %v6689_v57, %v6693_v46  ;;  %v385_v7 = vrot.slane %v383_v59, 4  ;;  %v391_v8 = vrot.slane %v389_v60, 5  ;;  %v6701_v13 = vshll.u32 %v23133_v61, 16  ;;  %v330_v60 = vld [vmem:[%s23101_s5 + $0x20] sm:$0x1] }
  0x25   : > { %v6699_v11 = vrot.slane %v6698_v63, 4  ;;  %v18272_v12 = vcombine.low %v6684_v62, %v6694_v3  ;;  %v6705_v14 = vshrl.u32 %v23133_v61, 16  ;;  %v382_v16 = vsel %vm23119_vm5, %v377_v51, %v381_v5 }
  0x26   : > { %v386_v17 = vor.u32 %v385_v7, %v381_v5  ;;  %v6711_v18 = vshll.u32 %v23144_v2, 16  ;;  %v9245_v19 = vrot.slane %v23133_v61, 5  ;;  %v6703_v20 = vrot.slane %v6701_v13, 5 }
  0x27   : > { %20621 = vmatprep.mubr.msk.bf16.mxu0 %vm1887_vm4, %v18272_v12  ;;  %v6707_v22 = vrot.slane %v6705_v14, 4  ;;  %v9248_v23 = vrot.slane %v23144_v2, 5  ;;  %v393_v25 = vshrl.u32 %v205_v48, 16  ;;  %v399_v30 = vshll.u32 %v206_v15, 16 }
  0x28   : > { %v387_v27 = vrot.slane %v386_v17, 4  ;;  %v6713_v28 = vrot.slane %v6711_v18, 5  ;;  %v23160_v29 = vrot.slane %v9245_v19, 4  ;;  %v6704_v31 = vsel %vm23119_vm5, %v6699_v11, %v6703_v20 }
  0x29   : > { %v6708_v32 = vor.u32 %v6707_v22, %v6703_v20  ;;  %v395_v33 = vrot.slane %v393_v25, 4  ;;  %v403_v34 = vshrl.u32 %v206_v15, 16  ;;  %v401_v38 = vrot.slane %v399_v30, 5 }
  0x2a   : > { %v392_v37 = vsel %vm23119_vm5, %v387_v27, %v391_v8  ;;  %v409_v39 = vshll.u32 %v207_v24, 16  ;;  %v6715_v41 = vshrl.u32 %v23144_v2, 16  ;;  %v6721_v48 = vshll.u32 %v18132_v36, 16 }
  0x2b   : > { %v17468_v42 = vcombine.low %v382_v16, %v392_v37  ;;  %v6709_v43 = vrot.slane %v6708_v32, 4  ;;  %v396_v44 = vor.u32 %v395_v33, %v391_v8  ;;  %v405_v45 = vrot.slane %v403_v34, 4  ;;  %v18135_v16 = vld [vmem:[%s23101_s5 + $0x44] sm:$0x1] }
  0x2c   : > { %v411_v46 = vrot.slane %v409_v39, 5  ;;  %v6717_v47 = vrot.slane %v6715_v41, 4  ;;  %v6725_v49 = vshrl.u32 %v18132_v36, 16  ;;  %v6731_v53 = vshll.u32 %v18133_v40, 16 }
  0x2d   : > { %20102 = vmatmul.mubr.msk.bf16.vlgmr.msra.gmra.mrb[0].mxu1 %vm1887_vm4, %v17468_v42  ;;  %v6714_v50 = vsel %vm23119_vm5, %v6709_v43, %v6713_v28  ;;  %v397_v51 = vrot.slane %v396_v44, 4  ;;  %v406_v52 = vor.u32 %v405_v45, %v401_v38  ;;  %v6723_v58 = vrot.slane %v6721_v48, 5  ;;  %v211_v44 = vld [vmem:[%s23101_s5 + $0x2c] sm:$0xf] }
  0x2e   : > { %20230 = vmatpush3.bf16.msra.mxu1 %v23091_v9  ;;  %v18273_v55 = vcombine.low %v6704_v31, %v6714_v50  ;;  %v6718_v57 = vor.u32 %v6717_v47, %v6713_v28  ;;  %v6727_v59 = vrot.slane %v6725_v49, 4  ;;  %v6733_v3 = vrot.slane %v6731_v53, 5  ;;  %v18134_v9 = vld [vmem:[%s23101_s5 + $0x40] sm:$0xf] }
  0x2f   : > { %v402_v62 = vsel %vm23119_vm5, %v397_v51, %v401_v38  ;;  %v407_v63 = vrot.slane %v406_v52, 4  ;;  %v413_v5 = vshrl.u32 %v207_v24, 16  ;;  %v419_v11 = vshll.u32 %v208_v54, 16 }
  0x30   : > { %20622 = vmatmul.mubr.msk.bf16.vlgmr.msra.gmra.mrb[0].mxu0 %vm1887_vm4, %v18273_v55  ;;  %v6719_v7 = vrot.slane %v6718_v57, 4  ;;  %v6728_v8 = vor.u32 %v6727_v59, %v6723_v58  ;;  %v423_v12 = vshrl.u32 %v208_v54, 16  ;;  %v429_v15 = vshll.u32 %v330_v60, 16  ;;  %v18136_v54 = vld [vmem:[%s23101_s5 + $0x48] sm:$0xf] }
  0x31   : > { %20750 = vmatpush3.bf16.msra.mxu0 %v23094_v10  ;;  %v412_v13 = vsel %vm23119_vm5, %v407_v63, %v411_v46  ;;  %v415_v14 = vrot.slane %v413_v5, 4  ;;  %v6735_v17 = vshrl.u32 %v18133_v40, 16  ;;  %v421_v24 = vrot.slane %v419_v11, 5  ;;  %v209_v10 = vld [vmem:[%s23101_s5 + $0x24] sm:$0xf] }
  0x32   : > { %v17469_v18 = vcombine.low %v402_v62, %v412_v13  ;;  %v6724_v20 = vsel %vm23119_vm5, %v6719_v7, %v6723_v58  ;;  %v6729_v22 = vrot.slane %v6728_v8, 4  ;;  %v425_v27 = vrot.slane %v423_v12, 4  ;;  %v210_v40 = vld [vmem:[%s23101_s5 + $0x28] sm:$0xf]  ;;  %v18137_v60 = vld [vmem:[%s23101_s5 + $0x4c] sm:$0xf] }
  0x33   : > { %v416_v25 = vor.u32 %v415_v14, %v411_v46  ;;  %v431_v28 = vrot.slane %v429_v15, 5  ;;  %v6737_v30 = vrot.slane %v6735_v17, 4  ;;  %v6741_v32 = vshll.u32 %v18134_v9, 16  ;;  %v18138_v11 = vld [vmem:[%s23101_s5 + $0x50] sm:$0xf] }
  0x34   : > { %20105 = vmatprep.mubr.msk.bf16.mxu1 %vm1887_vm4, %v17469_v18  ;;  %v6734_v31 = vsel %vm23119_vm5, %v6729_v22, %v6733_v3  ;;  %v6745_v33 = vshrl.u32 %v18134_v9, 16  ;;  %v6751_v34 = vshll.u32 %v18135_v16, 16  ;;  %v426_v38 = vor.u32 %v425_v27, %v421_v24  ;;  %v212_v17 = vld [vmem:[%s23101_s5 + $0x30] sm:$0xf] }
  0x35   : > { %v18274_v36 = vcombine.low %v6724_v20, %v6734_v31  ;;  %v417_v37 = vrot.slane %v416_v25, 4  ;;  %v6738_v39 = vor.u32 %v6737_v30, %v6733_v3  ;;  %v6743_v41 = vrot.slane %v6741_v32, 5  ;;  %v213_v32 = vld [vmem:[%s23101_s5 + $0x34] sm:$0xf] }
  0x36   : > { %v6747_v42 = vrot.slane %v6745_v33, 4  ;;  %v6753_v43 = vrot.slane %v6751_v34, 5  ;;  %v434_v45 = vshrl.u32 %v209_v10, 16  ;;  %v427_v47 = vrot.slane %v426_v38, 4 }
  0x37   : > { %20625 = vmatprep.mubr.msk.bf16.mxu0 %vm1887_vm4, %v18274_v36  ;;  %v422_v46 = vsel %vm23119_vm5, %v417_v37, %v421_v24  ;;  %v6739_v48 = vrot.slane %v6738_v39, 4  ;;  %v437_v49 = vshll.u32 %v209_v10, 16  ;;  %v443_v52 = vshll.u32 %v210_v40, 16 }
  0x38   : > { %v6748_v50 = vor.u32 %v6747_v42, %v6743_v41  ;;  %v436_v51 = vrot.slane %v434_v45, 4  ;;  %v447_v53 = vshrl.u32 %v210_v40, 16  ;;  %v432_v55 = vsel %vm23119_vm5, %v427_v47, %v431_v28  ;;  %v18139_v40 = vld [vmem:[%s23101_s5 + $0x54] sm:$0xf] }
  0x39   : > { %v6744_v57 = vsel %vm23119_vm5, %v6739_v48, %v6743_v41  ;;  %v439_v58 = vrot.slane %v437_v49, 5  ;;  %v453_v59 = vshll.u32 %v211_v44, 16  ;;  %v17470_v62 = vcombine.low %v422_v46, %v432_v55 }
  0x3a   : > { %v6749_v63 = vrot.slane %v6748_v50, 4  ;;  %v445_v3 = vrot.slane %v443_v52, 5  ;;  %v449_v5 = vrot.slane %v447_v53, 4  ;;  %v6756_v12 = vshrl.u32 %v18136_v54, 16 }
  0x3b   : > { %v440_v7 = vor.u32 %v439_v58, %v436_v51  ;;  %v455_v8 = vrot.slane %v453_v59, 5  ;;  %v6759_v9 = vshll.u32 %v18136_v54, 16  ;;  %20106 = vmatmul.mubr.msk.bf16.gmra.mrb[4].mxu1 %vm1887_vm4, %v17470_v62  ;;  %v6765_v15 = vshll.u32 %v18137_v60, 16  ;;  %v18140_v51 = vld [vmem:[%s23101_s5 + $0x58] sm:$0xf] }
  0x3c   : > { %v6754_v13 = vsel %vm23119_vm5, %v6749_v63, %v6753_v43  ;;  %v450_v14 = vor.u32 %v449_v5, %v445_v3  ;;  %v6769_v16 = vshrl.u32 %v18137_v60, 16  ;;  %v6758_v22 = vrot.slane %v6756_v12, 4  ;;  %v214_v59 = vld [vmem:[%s23101_s5 + $0x38] sm:$0xf] }
  0x3d   : > { %v18275_v18 = vcombine.low %v6744_v57, %v6754_v13  ;;  %v441_v20 = vrot.slane %v440_v7, 4  ;;  %v6761_v24 = vrot.slane %v6759_v9, 5  ;;  %v6767_v27 = vrot.slane %v6765_v15, 5  ;;  %v215_v13 = vld [vmem:[%s23101_s5 + $0x3c] sm:$0xf] }
  0x3e   : > { %v451_v25 = vrot.slane %v450_v14, 4  ;;  %v6771_v28 = vrot.slane %v6769_v16, 4  ;;  %v6775_v30 = vshll.u32 %v18138_v11, 16  ;;  %v457_v33 = vshrl.u32 %v211_v44, 16 }
  0x3f   : > { %20626 = vmatmul.mubr.msk.bf16.gmra.mrb[4].mxu0 %vm1887_vm4, %v18275_v18  ;;  %v446_v10 = vsel %vm23119_vm5, %v441_v20, %v445_v3  ;;  %v6762_v31 = vor.u32 %v6761_v24, %v6758_v22  ;;  %v463_v34 = vshll.u32 %v212_v17, 16  ;;  %v467_v39 = vshrl.u32 %v212_v17, 16  ;;  %v18141_v22 = vld [vmem:[%s23101_s5 + $0x5c] sm:$0xf] }
  0x40   : > { %v456_v36 = vsel %vm23119_vm5, %v451_v25, %v455_v8  ;;  %v6772_v37 = vor.u32 %v6771_v28, %v6767_v27  ;;  %v6777_v38 = vrot.slane %v6775_v30, 5  ;;  %v459_v43 = vrot.slane %v457_v33, 4 }
  0x41   : > { %v17471_v41 = vcombine.low %v446_v10, %v456_v36  ;;  %v6763_v42 = vrot.slane %v6762_v31, 4  ;;  %v465_v45 = vrot.slane %v463_v34, 5  ;;  %v469_v47 = vrot.slane %v467_v39, 4  ;;  %v216_v39 = vld [vmem:[%s23101_s5 + $0x40] sm:$0xf] }
  0x42   : > { %v6773_v46 = vrot.slane %v6772_v37, 4  ;;  %v473_v48 = vshll.u32 %v213_v32, 16  ;;  %v6779_v49 = vshrl.u32 %v18138_v11, 16  ;;  %v460_v50 = vor.u32 %v459_v43, %v455_v8 }
  0x43   : > { %20109 = vmatprep.mubr.msk.bf16.mxu1 %vm1887_vm4, %v17471_v41  ;;  %v6768_v44 = vsel %vm23119_vm5, %v6763_v42, %v6767_v27  ;;  %v6785_v52 = vshll.u32 %v18139_v40, 16  ;;  %v6789_v53 = vshrl.u32 %v18139_v40, 16  ;;  %v470_v55 = vor.u32 %v469_v47, %v465_v45 }
  0x44   : > { %v6778_v54 = vsel %vm23119_vm5, %v6773_v46, %v6777_v38  ;;  %v475_v57 = vrot.slane %v473_v48, 5  ;;  %v6781_v58 = vrot.slane %v6779_v49, 4  ;;  %v461_v62 = vrot.slane %v460_v50, 4  ;;  %v331_v50 = vld [vmem:[%s23101_s5 + $0x44] sm:$0x1] }
  0x45   : > { %v18276_v60 = vcombine.low %v6768_v44, %v6778_v54  ;;  %v6787_v63 = vrot.slane %v6785_v52, 5  ;;  %v6791_v3 = vrot.slane %v6789_v53, 4  ;;  %v471_v5 = vrot.slane %v470_v55, 4 }
  0x46   : > { %v6782_v7 = vor.u32 %v6781_v58, %v6777_v38  ;;  %v6795_v11 = vshll.u32 %v18140_v51, 16  ;;  %v477_v8 = vshrl.u32 %v213_v32, 16  ;;  %v466_v12 = vsel %vm23119_vm5, %v461_v62, %v465_v45  ;;  %v18142_v32 = vld [vmem:[%s23101_s5 + $0x60] sm:$0xf]  ;;  %v18143_v58 = vld [vmem:[%s23101_s5 + $0x64] sm:$0xf] }
  0x47   : > { %20629 = vmatprep.mubr.msk.bf16.mxu0 %vm1887_vm4, %v18276_v60  ;;  %v6792_v9 = vor.u32 %v6791_v3, %v6787_v63  ;;  %v483_v14 = vshll.u32 %v214_v59, 16  ;;  %v487_v15 = vshrl.u32 %v214_v59, 16  ;;  %v476_v16 = vsel %vm23119_vm5, %v471_v5, %v475_v57 }
  0x48   : > { %v6783_v17 = vrot.slane %v6782_v7, 4  ;;  %v6797_v18 = vrot.slane %v6795_v11, 5  ;;  %v479_v20 = vrot.slane %v477_v8, 4  ;;  %v17472_v24 = vcombine.low %v466_v12, %v476_v16 }
  0x49   : > { %v6793_v25 = vrot.slane %v6792_v9, 4  ;;  %v485_v27 = vrot.slane %v483_v14, 5  ;;  %v489_v28 = vrot.slane %v487_v15, 4  ;;  %v493_v31 = vshll.u32 %v215_v13, 16  ;;  %v18144_v9 = vld [vmem:[%s23101_s5 + $0x68] sm:$0x1] }
  0x4a   : > { %v6788_v30 = vsel %vm23119_vm5, %v6783_v17, %v6787_v63  ;;  %v480_v10 = vor.u32 %v479_v20, %v475_v57  ;;  %v6799_v33 = vshrl.u32 %v18140_v51, 16  ;;  %20110 = vmatmul.mubr.msk.bf16.gmra.mrb[8].mxu1 %vm1887_vm4, %v17472_v24  ;;  %v6805_v37 = vshll.u32 %v18141_v22, 16  ;;  %v217_v15 = vld [vmem:[%s23101_s5 + $0x48] sm:$0xf] }
  0x4b   : > { %v6798_v34 = vsel %vm23119_vm5, %v6793_v25, %v6797_v18  ;;  %v490_v36 = vor.u32 %v489_v28, %v485_v27  ;;  %v6809_v38 = vshrl.u32 %v18141_v22, 16  ;;  %v495_v42 = vrot.slane %v493_v31, 5  ;;  %v218_v22 = vld [vmem:[%s23101_s5 + $0x4c] sm:$0xf] }
  0x4c   : > { %v18277_v40 = vcombine.low %v6788_v30, %v6798_v34  ;;  %v481_v41 = vrot.slane %v480_v10, 4  ;;  %v6801_v43 = vrot.slane %v6799_v33, 4  ;;  %v6807_v46 = vrot.slane %v6805_v37, 5 }
  0x4d   : > { %v491_v45 = vrot.slane %v490_v36, 4  ;;  %v6811_v47 = vrot.slane %v6809_v38, 4  ;;  %v6815_v48 = vshll.u32 %v18142_v32, 16  ;;  %v497_v51 = vshrl.u32 %v215_v13, 16  ;;  %v219_v36 = vld [vmem:[%s23101_s5 + $0x50] sm:$0xf] }
  0x4e   : > { %20630 = vmatmul.mubr.msk.bf16.gmra.mrb[8].mxu0 %vm1887_vm4, %v18277_v40  ;;  %v486_v49 = vsel %vm23119_vm5, %v481_v41, %v485_v27  ;;  %v6802_v44 = vor.u32 %v6801_v43, %v6797_v18  ;;  %v503_v52 = vshll.u32 %v216_v39, 16  ;;  %v507_v57 = vshrl.u32 %v216_v39, 16  ;;  %v18145_v39 = vld [vmem:[%s23101_s5 + $0x6c] sm:$0xf] }
  0x4f   : > { %v496_v53 = vsel %vm23119_vm5, %v491_v45, %v495_v42  ;;  %v6812_v54 = vor.u32 %v6811_v47, %v6807_v46  ;;  %v6817_v55 = vrot.slane %v6815_v48, 5  ;;  %v499_v62 = vrot.slane %v497_v51, 4  ;;  %v18146_v45 = vld [vmem:[%s23101_s5 + $0x70] sm:$0xf] }
  0x50   : > { %v17473_v59 = vcombine.low %v486_v49, %v496_v53  ;;  %v6803_v60 = vrot.slane %v6802_v44, 4  ;;  %v505_v63 = vrot.slane %v503_v52, 5  ;;  %v509_v5 = vrot.slane %v507_v57, 4 }
  0x51   : > { %v6813_v3 = vrot.slane %v6812_v54, 4  ;;  %v513_v7 = vshll.u32 %v331_v50, 16  ;;  %v6819_v11 = vshrl.u32 %v18142_v32, 16  ;;  %v500_v12 = vor.u32 %v499_v62, %v495_v42 }
  0x52   : > { %20113 = vmatprep.mubr.msk.bf16.mxu1 %vm1887_vm4, %v17473_v59  ;;  %v6808_v8 = vsel %vm23119_vm5, %v6803_v60, %v6807_v46  ;;  %v6825_v13 = vshll.u32 %v18143_v58, 16  ;;  %v6829_v14 = vshrl.u32 %v18143_v58, 16  ;;  %v510_v17 = vor.u32 %v509_v5, %v505_v63  ;;  %v220_v59 = vld [vmem:[%s23101_s5 + $0x54] sm:$0xf] }
  0x53   : > { %v6818_v16 = vsel %vm23119_vm5, %v6813_v3, %v6817_v55  ;;  %v515_v18 = vrot.slane %v513_v7, 5  ;;  %v6821_v20 = vrot.slane %v6819_v11, 4  ;;  %v501_v25 = vrot.slane %v500_v12, 4 }
  0x54   : > { %v18278_v24 = vcombine.low %v6808_v8, %v6818_v16  ;;  %v6827_v27 = vrot.slane %v6825_v13, 5  ;;  %v6831_v28 = vrot.slane %v6829_v14, 4  ;;  %v511_v30 = vrot.slane %v510_v17, 4  ;;  %v221_v13 = vld [vmem:[%s23101_s5 + $0x58] sm:$0xf] }
  0x55   : > { %v6822_v10 = vor.u32 %v6821_v20, %v6817_v55  ;;  %v6835_v31 = vshll.u32 %v18144_v9, 16  ;;  %v518_v32 = vshrl.u32 %v217_v15, 16  ;;  %v506_v33 = vsel %vm23119_vm5, %v501_v25, %v505_v63  ;;  %v18147_v55 = vld [vmem:[%s23101_s5 + $0x74] sm:$0xf] }
  0x56   : > { %20633 = vmatprep.mubr.msk.bf16.mxu0 %vm1887_vm4, %v18278_v24  ;;  %v6832_v34 = vor.u32 %v6831_v28, %v6827_v27  ;;  %v521_v37 = vshll.u32 %v217_v15, 16  ;;  %v527_v38 = vshll.u32 %v218_v22, 16  ;;  %v516_v40 = vsel %vm23119_vm5, %v511_v30, %v515_v18 }
  0x57   : > { %v6823_v41 = vrot.slane %v6822_v10, 4  ;;  %v6837_v42 = vrot.slane %v6835_v31, 5  ;;  %v520_v43 = vrot.slane %v518_v32, 4  ;;  %v17474_v46 = vcombine.low %v506_v33, %v516_v40 }
  0x58   : > { %v6833_v47 = vrot.slane %v6832_v34, 4  ;;  %v523_v48 = vrot.slane %v521_v37, 5  ;;  %v529_v49 = vrot.slane %v527_v38, 5  ;;  %v531_v50 = vshrl.u32 %v218_v22, 16  ;;  %v18148_v22 = vld [vmem:[%s23101_s5 + $0x78] sm:$0xf] }
  0x59   : > { %v6828_v44 = vsel %vm23119_vm5, %v6823_v41, %v6827_v27  ;;  %v537_v51 = vshll.u32 %v219_v36, 16  ;;  %v6840_v52 = vshrl.u32 %v18145_v39, 16  ;;  %20114 = vmatmul.mubr.msk.bf16.gmra.mrb[12].mxu1 %vm1887_vm4, %v17474_v46  ;;  %v6843_v57 = vshll.u32 %v18145_v39, 16 }
  0x5a   : > { %v6838_v53 = vsel %vm23119_vm5, %v6833_v47, %v6837_v42  ;;  %v524_v54 = vor.u32 %v523_v48, %v520_v43  ;;  %v6849_v58 = vshll.u32 %v18146_v45, 16  ;;  %v533_v62 = vrot.slane %v531_v50, 4  ;;  %v222_v48 = vld [vmem:[%s23101_s5 + $0x5c] sm:$0xf] }
  0x5b   : > { %v18279_v60 = vcombine.low %v6828_v44, %v6838_v53  ;;  %v539_v63 = vrot.slane %v537_v51, 5  ;;  %v6842_v3 = vrot.slane %v6840_v52, 4  ;;  %v6845_v7 = vrot.slane %v6843_v57, 5 }
  0x5c   : > { %v525_v5 = vrot.slane %v524_v54, 4  ;;  %v6851_v11 = vrot.slane %v6849_v58, 5  ;;  %v6853_v8 = vshrl.u32 %v18146_v45, 16  ;;  %v534_v12 = vor.u32 %v533_v62, %v529_v49 }
  0x5d   : > { %20634 = vmatmul.mubr.msk.bf16.gmra.mrb[12].mxu0 %vm1887_vm4, %v18279_v60  ;;  %v6859_v9 = vshll.u32 %v18147_v55, 16  ;;  %v541_v14 = vshrl.u32 %v219_v36, 16  ;;  %v547_v15 = vshll.u32 %v220_v59, 16  ;;  %v6846_v17 = vor.u32 %v6845_v7, %v6842_v3  ;;  %v18149_v36 = vld [vmem:[%s23101_s5 + $0x7c] sm:$0xf] }
  0x5e   : > { %v530_v16 = vsel %vm23119_vm5, %v525_v5, %v529_v49  ;;  %v6855_v18 = vrot.slane %v6853_v8, 4  ;;  %v551_v20 = vshrl.u32 %v220_v59, 16  ;;  %v535_v24 = vrot.slane %v534_v12, 4 }
  0x5f   : > { %v6861_v25 = vrot.slane %v6859_v9, 5  ;;  %v543_v27 = vrot.slane %v541_v14, 4  ;;  %v549_v28 = vrot.slane %v547_v15, 5  ;;  %v6847_v30 = vrot.slane %v6846_v17, 4  ;;  %v18151_v14 = vld [vmem:[%s23101_s5 + $0x84] sm:$0xf] }
  0x60   : > { %v6856_v10 = vor.u32 %v6855_v18, %v6851_v11  ;;  %v553_v31 = vrot.slane %v551_v20, 4  ;;  %v557_v32 = vshll.u32 %v221_v13, 16  ;;  %v540_v33 = vsel %vm23119_vm5, %v535_v24, %v539_v63 }
  0x61   : > { %v544_v34 = vor.u32 %v543_v27, %v539_v63  ;;  %v6863_v37 = vshrl.u32 %v18147_v55, 16  ;;  %v6869_v38 = vshll.u32 %v18148_v22, 16  ;;  %v17475_v39 = vcombine.low %v530_v16, %v540_v33  ;;  %v223_v55 = vld [vmem:[%s23101_s5 + $0x60] sm:$0xf] }
  0x62   : > { %v6852_v40 = vsel %vm23119_vm5, %v6847_v30, %v6851_v11  ;;  %v6857_v41 = vrot.slane %v6856_v10, 4  ;;  %v554_v42 = vor.u32 %v553_v31, %v549_v28  ;;  %v559_v45 = vrot.slane %v557_v32, 5  ;;  %v18150_v63 = vld [vmem:[%s23101_s5 + $0x80] sm:$0xf]  ;;  %v224_v31 = vld [vmem:[%s23101_s5 + $0x64] sm:$0xf] }
  0x63   : > { %v545_v43 = vrot.slane %v544_v34, 4  ;;  %v6865_v46 = vrot.slane %v6863_v37, 4  ;;  %v6871_v47 = vrot.slane %v6869_v38, 5  ;;  %20117 = vmatprep.mubr.msk.bf16.mxu1 %vm1887_vm4, %v17475_v39  ;;  %v6873_v50 = vshrl.u32 %v18148_v22, 16 }
  0x64   : > { %v6862_v49 = vsel %vm23119_vm5, %v6857_v41, %v6861_v25  ;;  %v555_v44 = vrot.slane %v554_v42, 4  ;;  %v6879_v51 = vshll.u32 %v18149_v36, 16  ;;  %v561_v57 = vshrl.u32 %v221_v13, 16 }
  0x65   : > { %v18280_v52 = vcombine.low %v6852_v40, %v6862_v49  ;;  %v550_v53 = vsel %vm23119_vm5, %v545_v43, %v549_v28  ;;  %v6866_v54 = vor.u32 %v6865_v46, %v6861_v25  ;;  %v6875_v59 = vrot.slane %v6873_v50, 4 }
  0x66   : > { %v560_v58 = vsel %vm23119_vm5, %v555_v44, %v559_v45  ;;  %v6881_v60 = vrot.slane %v6879_v51, 5  ;;  %v567_v62 = vshll.u32 %v222_v48, 16  ;;  %v563_v7 = vrot.slane %v561_v57, 4  ;;  %v18152_v44 = vld [vmem:[%s23101_s5 + $0x88] sm:$0xf] }
  0x67   : > { %20637 = vmatprep.mubr.msk.bf16.mxu0 %vm1887_vm4, %v18280_v52  ;;  %v17476_v3 = vcombine.low %v550_v53, %v560_v58  ;;  %v6867_v5 = vrot.slane %v6866_v54, 4  ;;  %v571_v11 = vshrl.u32 %v222_v48, 16  ;;  %v6876_v8 = vor.u32 %v6875_v59, %v6871_v47  ;;  %v225_v57 = vld [vmem:[%s23101_s5 + $0x6c] sm:$0xf] }
  0x68   : > { %v569_v12 = vrot.slane %v567_v62, 5  ;;  %v577_v9 = vshll.u32 %v223_v55, 16  ;;  %v6883_v15 = vshrl.u32 %v18149_v36, 16  ;;  %v564_v16 = vor.u32 %v563_v7, %v559_v45  ;;  %v332_v36 = vld [vmem:[%s23101_s5 + $0x68] sm:$0x1] }
  0x69   : > { %20118 = vmatmul.mubr.msk.bf16.gmra.mrb[16].mxu1 %vm1887_vm4, %v17476_v3  ;;  %v6872_v13 = vsel %vm23119_vm5, %v6867_v5, %v6871_v47  ;;  %v573_v17 = vrot.slane %v571_v11, 4  ;;  %v6889_v18 = vshll.u32 %v18150_v63, 16  ;;  %v6877_v20 = vrot.slane %v6876_v8, 4 }
  0x6a   : > { %v579_v22 = vrot.slane %v577_v9, 5  ;;  %v6885_v24 = vrot.slane %v6883_v15, 4  ;;  %v6893_v25 = vshrl.u32 %v18150_v63, 16  ;;  %v565_v27 = vrot.slane %v564_v16, 4  ;;  %v226_v63 = vld [vmem:[%s23101_s5 + $0x70] sm:$0xf] }
  0x6b   : > { %v574_v28 = vor.u32 %v573_v17, %v569_v12  ;;  %v6891_v30 = vrot.slane %v6889_v18, 5  ;;  %v6899_v10 = vshll.u32 %v18151_v14, 16  ;;  %v6882_v32 = vsel %vm23119_vm5, %v6877_v20, %v6881_v60  ;;  %v227_v17 = vld [vmem:[%s23101_s5 + $0x74] sm:$0xf] }
  0x6c   : > { %v6886_v33 = vor.u32 %v6885_v24, %v6881_v60  ;;  %v6895_v34 = vrot.slane %v6893_v25, 4  ;;  %v581_v37 = vshrl.u32 %v223_v55, 16  ;;  %v18281_v38 = vcombine.low %v6872_v13, %v6882_v32  ;;  %v18153_v55 = vld [vmem:[%s23101_s5 + $0x8c] sm:$0x1] }
  0x6d   : > { %v570_v39 = vsel %vm23119_vm5, %v565_v27, %v569_v12  ;;  %v575_v40 = vrot.slane %v574_v28, 4  ;;  %v6901_v41 = vrot.slane %v6899_v10, 5  ;;  %v587_v46 = vshll.u32 %v224_v31, 16 }
  0x6e   : > { %v6887_v42 = vrot.slane %v6886_v33, 4  ;;  %v6896_v43 = vor.u32 %v6895_v34, %v6891_v30  ;;  %v583_v45 = vrot.slane %v581_v37, 4  ;;  %20638 = vmatmul.mubr.msk.bf16.gmra.mrb[16].mxu0 %vm1887_vm4, %v18281_v38  ;;  %v591_v48 = vshrl.u32 %v224_v31, 16  ;;  %v18154_v31 = vld [vmem:[%s23101_s5 + $0x90] sm:$0xf] }
  0x6f   : > { %v580_v47 = vsel %vm23119_vm5, %v575_v40, %v579_v22  ;;  %v597_v49 = vshll.u32 %v332_v36, 16  ;;  %v6903_v50 = vshrl.u32 %v18151_v14, 16  ;;  %v589_v58 = vrot.slane %v587_v46, 5  ;;  %v18155_v37 = vld [vmem:[%s23101_s5 + $0x94] sm:$0xf] }
  0x70   : > { %v17477_v51 = vcombine.low %v570_v39, %v580_v47  ;;  %v6892_v52 = vsel %vm23119_vm5, %v6887_v42, %v6891_v30  ;;  %v6897_v53 = vrot.slane %v6896_v43, 4  ;;  %v584_v54 = vor.u32 %v583_v45, %v579_v22  ;;  %v18156_v45 = vld [vmem:[%s23101_s5 + $0x98] sm:$0xf] }
  0x71   : > { %v593_v59 = vrot.slane %v591_v48, 4  ;;  %v599_v60 = vrot.slane %v597_v49, 5  ;;  %v6905_v62 = vrot.slane %v6903_v50, 4  ;;  %v6909_v7 = vshll.u32 %v18152_v44, 16 }
  0x72   : > { %20121 = vmatprep.mubr.msk.bf16.mxu1 %vm1887_vm4, %v17477_v51  ;;  %v6902_v3 = vsel %vm23119_vm5, %v6897_v53, %v6901_v41  ;;  %v585_v5 = vrot.slane %v584_v54, 4  ;;  %v6913_v11 = vshrl.u32 %v18152_v44, 16  ;;  %v6919_v14 = vshll.u32 %v18153_v55, 16  ;;  %v228_v51 = vld [vmem:[%s23101_s5 + $0x78] sm:$0xf] }
  0x73   : > { %v18282_v8 = vcombine.low %v6892_v52, %v6902_v3  ;;  %v594_v12 = vor.u32 %v593_v59, %v589_v58  ;;  %v6906_v9 = vor.u32 %v6905_v62, %v6901_v41  ;;  %v6911_v13 = vrot.slane %v6909_v7, 5 }
  0x74   : > { %v590_v15 = vsel %vm23119_vm5, %v585_v5, %v589_v58  ;;  %v6915_v16 = vrot.slane %v6913_v11, 4  ;;  %v602_v18 = vshrl.u32 %v225_v57, 16  ;;  %v6921_v24 = vrot.slane %v6919_v14, 5  ;;  %v18157_v11 = vld [vmem:[%s23101_s5 + $0x9c] sm:$0xf] }
  0x75   : > { %20641 = vmatprep.mubr.msk.bf16.mxu0 %vm1887_vm4, %v18282_v8  ;;  %v595_v20 = vrot.slane %v594_v12, 4  ;;  %v6907_v22 = vrot.slane %v6906_v9, 4  ;;  %v605_v25 = vshll.u32 %v225_v57, 16  ;;  %v611_v30 = vshll.u32 %v226_v63, 16  ;;  %v229_v57 = vld [vmem:[%s23101_s5 + $0x7c] sm:$0xf] }
  0x76   : > { %v6916_v27 = vor.u32 %v6915_v16, %v6911_v13  ;;  %v604_v28 = vrot.slane %v602_v18, 4  ;;  %v615_v10 = vshrl.u32 %v226_v63, 16  ;;  %v621_v36 = vshll.u32 %v227_v17, 16 }
  0x77   : > { %v600_v32 = vsel %vm23119_vm5, %v595_v20, %v599_v60  ;;  %v6912_v33 = vsel %vm23119_vm5, %v6907_v22, %v6911_v13  ;;  %v607_v34 = vrot.slane %v605_v25, 5  ;;  %v613_v40 = vrot.slane %v611_v30, 5  ;;  %v18158_v20 = vld [vmem:[%s23101_s5 + $0xa0] sm:$0xf] }
  0x78   : > { %v17478_v38 = vcombine.low %v590_v15, %v600_v32  ;;  %v6917_v39 = vrot.slane %v6916_v27, 4  ;;  %v617_v41 = vrot.slane %v615_v10, 4  ;;  %v623_v43 = vrot.slane %v621_v36, 5 }
  0x79   : > { %v608_v42 = vor.u32 %v607_v34, %v604_v28  ;;  %v6924_v46 = vshrl.u32 %v18154_v31, 16  ;;  %v6927_v47 = vshll.u32 %v18154_v31, 16  ;;  %v6933_v44 = vshll.u32 %v18155_v37, 16  ;;  %v230_v28 = vld [vmem:[%s23101_s5 + $0x80] sm:$0xf] }
  0x7a   : > { %20122 = vmatmul.mubr.msk.bf16.gmra.mrb[20].mxu1 %vm1887_vm4, %v17478_v38  ;;  %v6922_v48 = vsel %vm23119_vm5, %v6917_v39, %v6921_v24  ;;  %v618_v49 = vor.u32 %v617_v41, %v613_v40  ;;  %v6937_v50 = vshrl.u32 %v18155_v37, 16  ;;  %v6943_v62 = vshll.u32 %v18156_v45, 16 }
  0x7b   : > { %v18283_v52 = vcombine.low %v6912_v33, %v6922_v48  ;;  %v609_v53 = vrot.slane %v608_v42, 4  ;;  %v6926_v54 = vrot.slane %v6924_v46, 4  ;;  %v6929_v55 = vrot.slane %v6927_v47, 5  ;;  %v231_v48 = vld [vmem:[%s23101_s5 + $0x84] sm:$0xf] }
  0x7c   : > { %v619_v58 = vrot.slane %v618_v49, 4  ;;  %v6935_v59 = vrot.slane %v6933_v44, 5  ;;  %v6939_v60 = vrot.slane %v6937_v50, 4  ;;  %v625_v5 = vshrl.u32 %v227_v17, 16  ;;  %v18159_v50 = vld [vmem:[%s23101_s5 + $0xa4] sm:$0xf] }
  0x7d   : > { %20642 = vmatmul.mubr.msk.bf16.gmra.mrb[20].mxu0 %vm1887_vm4, %v18283_v52  ;;  %v614_v63 = vsel %vm23119_vm5, %v609_v53, %v613_v40  ;;  %v6930_v3 = vor.u32 %v6929_v55, %v6926_v54  ;;  %v631_v7 = vshll.u32 %v228_v51, 16  ;;  %v6945_v9 = vrot.slane %v6943_v62, 5  ;;  %v18160_v55 = vld [vmem:[%s23101_s5 + $0xa8] sm:$0xf] }
  0x7e   : > { %v624_v8 = vsel %vm23119_vm5, %v619_v58, %v623_v43  ;;  %v6940_v12 = vor.u32 %v6939_v60, %v6935_v59  ;;  %v635_v14 = vshrl.u32 %v228_v51, 16  ;;  %v627_v16 = vrot.slane %v625_v5, 4 }
  0x7f   : > { %v17479_v15 = vcombine.low %v614_v63, %v624_v8  ;;  %v6931_v13 = vrot.slane %v6930_v3, 4  ;;  %v633_v18 = vrot.slane %v631_v7, 5  ;;  %v641_v25 = vshll.u32 %v229_v57, 16  ;;  %v232_v7 = vld [vmem:[%s23101_s5 + $0x88] sm:$0xf] }
  0x80   : > { %v6941_v22 = vrot.slane %v6940_v12, 4  ;;  %v637_v24 = vrot.slane %v635_v14, 4  ;;  %v6947_v27 = vshrl.u32 %v18156_v45, 16  ;;  %v628_v30 = vor.u32 %v627_v16, %v623_v43 }
  0x81   : > { %20125 = vmatprep.mubr.msk.bf16.mxu1 %vm1887_vm4, %v17479_v15  ;;  %v6936_v17 = vsel %vm23119_vm5, %v6931_v13, %v6935_v59  ;;  %v6953_v10 = vshll.u32 %v18157_v11, 16  ;;  %v6957_v31 = vshrl.u32 %v18157_v11, 16  ;;  %v643_v34 = vrot.slane %v641_v25, 5 }
  0x82   : > { %v6946_v32 = vsel %vm23119_vm5, %v6941_v22, %v6945_v9  ;;  %v638_v33 = vor.u32 %v637_v24, %v633_v18  ;;  %v6949_v36 = vrot.slane %v6947_v27, 4  ;;  %v629_v38 = vrot.slane %v628_v30, 4 }
  0x83   : > { %v18284_v37 = vcombine.low %v6936_v17, %v6946_v32  ;;  %v6955_v39 = vrot.slane %v6953_v10, 5  ;;  %v6959_v40 = vrot.slane %v6957_v31, 4  ;;  %v6963_v45 = vshll.u32 %v18158_v20, 16  ;;  %v18161_v10 = vld [vmem:[%s23101_s5 + $0xac] sm:$0xf] }
  0x84   : > { %v639_v41 = vrot.slane %v638_v33, 4  ;;  %v6950_v42 = vor.u32 %v6949_v36, %v6945_v9  ;;  %v645_v46 = vshrl.u32 %v229_v57, 16  ;;  %v634_v43 = vsel %vm23119_vm5, %v629_v38, %v633_v18  ;;  %v333_v18 = vld [vmem:[%s23101_s5 + $0x8c] sm:$0x1] }
  0x85   : > { %20645 = vmatprep.mubr.msk.bf16.mxu0 %vm1887_vm4, %v18284_v37  ;;  %v6960_v47 = vor.u32 %v6959_v40, %v6955_v39  ;;  %v651_v49 = vshll.u32 %v230_v28, 16  ;;  %v655_v44 = vshrl.u32 %v230_v28, 16  ;;  %v6965_v53 = vrot.slane %v6963_v45, 5  ;;  %v18162_v40 = vld [vmem:[%s23101_s5 + $0xb0] sm:$0x1] }
  0x86   : > { %v644_v51 = vsel %vm23119_vm5, %v639_v41, %v643_v34  ;;  %v6951_v52 = vrot.slane %v6950_v42, 4  ;;  %v647_v54 = vrot.slane %v645_v46, 4  ;;  %v661_v3 = vshll.u32 %v231_v48, 16  ;;  %v233_v41 = vld [vmem:[%s23101_s5 + $0x90] sm:$0xf] }
  0x87   : > { %v17480_v58 = vcombine.low %v634_v43, %v644_v51  ;;  %v6961_v57 = vrot.slane %v6960_v47, 4  ;;  %v653_v59 = vrot.slane %v651_v49, 5  ;;  %v657_v60 = vrot.slane %v655_v44, 4  ;;  %v234_v47 = vld [vmem:[%s23101_s5 + $0x94] sm:$0xf] }
  0x88   : > { %v6956_v62 = vsel %vm23119_vm5, %v6951_v52, %v6955_v39  ;;  %v648_v63 = vor.u32 %v647_v54, %v643_v34  ;;  %v6967_v5 = vshrl.u32 %v18158_v20, 16  ;;  %v6973_v12 = vshll.u32 %v18159_v50, 16 }
  0x89   : > { %20126 = vmatmul.mubr.msk.bf16.gmra.mrb[24].mxu1 %vm1887_vm4, %v17480_v58  ;;  %v6966_v11 = vsel %vm23119_vm5, %v6961_v57, %v6965_v53  ;;  %v658_v8 = vor.u32 %v657_v60, %v653_v59  ;;  %v6977_v9 = vshrl.u32 %v18159_v50, 16  ;;  %v663_v13 = vrot.slane %v661_v3, 5  ;;  %v235_v3 = vld [vmem:[%s23101_s5 + $0x98] sm:$0xf] }
  0x8a   : > { %v18285_v14 = vcombine.low %v6956_v62, %v6966_v11  ;;  %v649_v15 = vrot.slane %v648_v63, 4  ;;  %v6969_v16 = vrot.slane %v6967_v5, 4  ;;  %v6975_v24 = vrot.slane %v6973_v12, 5 }
  0x8b   : > { %v659_v22 = vrot.slane %v658_v8, 4  ;;  %v6979_v25 = vrot.slane %v6977_v9, 4  ;;  %v6983_v20 = vshll.u32 %v18160_v55, 16  ;;  %v665_v17 = vshrl.u32 %v231_v48, 16  ;;  %v18163_v9 = vld [vmem:[%s23101_s5 + $0xb4] sm:$0xf] }
  0x8c   : > { %20646 = vmatmul.mubr.msk.bf16.gmra.mrb[24].mxu0 %vm1887_vm4, %v18285_v14  ;;  %v654_v27 = vsel %vm23119_vm5, %v649_v15, %v653_v59  ;;  %v6970_v28 = vor.u32 %v6969_v16, %v6965_v53  ;;  %v671_v30 = vshll.u32 %v232_v7, 16  ;;  %v675_v34 = vshrl.u32 %v232_v7, 16  ;;  %v18164_v14 = vld [vmem:[%s23101_s5 + $0xb8] sm:$0xf] }
  0x8d   : > { %v664_v31 = vsel %vm23119_vm5, %v659_v22, %v663_v13  ;;  %v6980_v32 = vor.u32 %v6979_v25, %v6975_v24  ;;  %v6985_v33 = vrot.slane %v6983_v20, 5  ;;  %v667_v38 = vrot.slane %v665_v17, 4 }
  0x8e   : > { %v17481_v36 = vcombine.low %v654_v27, %v664_v31  ;;  %v6971_v37 = vrot.slane %v6970_v28, 4  ;;  %v673_v39 = vrot.slane %v671_v30, 5  ;;  %v677_v45 = vrot.slane %v675_v34, 4  ;;  %v18165_v30 = vld [vmem:[%s23101_s5 + $0xbc] sm:$0xf] }
  0x8f   : > { %v6981_v42 = vrot.slane %v6980_v32, 4  ;;  %v681_v46 = vshll.u32 %v333_v18, 16  ;;  %v6987_v43 = vshrl.u32 %v18160_v55, 16  ;;  %v668_v49 = vor.u32 %v667_v38, %v663_v13 }
  0x90   : > { %20129 = vmatprep.mubr.msk.bf16.mxu1 %vm1887_vm4, %v17481_v36  ;;  %v6976_v48 = vsel %vm23119_vm5, %v6971_v37, %v6975_v24  ;;  %v6993_v44 = vshll.u32 %v18161_v10, 16  ;;  %v6997_v50 = vshrl.u32 %v18161_v10, 16  ;;  %v678_v52 = vor.u32 %v677_v45, %v673_v39  ;;  %v236_v36 = vld [vmem:[%s23101_s5 + $0x9c] sm:$0xf] }
  0x91   : > { %v6986_v51 = vsel %vm23119_vm5, %v6981_v42, %v6985_v33  ;;  %v683_v53 = vrot.slane %v681_v46, 5  ;;  %v6989_v54 = vrot.slane %v6987_v43, 4  ;;  %v669_v55 = vrot.slane %v668_v49, 4 }
  0x92   : > { %v18286_v58 = vcombine.low %v6976_v48, %v6986_v51  ;;  %v6995_v57 = vrot.slane %v6993_v44, 5  ;;  %v6999_v59 = vrot.slane %v6997_v50, 4  ;;  %v679_v60 = vrot.slane %v678_v52, 4 }
  0x93   : > { %v6990_v62 = vor.u32 %v6989_v54, %v6985_v33  ;;  %v7003_v63 = vshll.u32 %v18162_v40, 16  ;;  %v686_v5 = vshrl.u32 %v233_v41, 16  ;;  %v674_v7 = vsel %vm23119_vm5, %v669_v55, %v673_v39 }
  0x94   : > { %20649 = vmatprep.mubr.msk.bf16.mxu0 %vm1887_vm4, %v18286_v58  ;;  %v7000_v11 = vor.u32 %v6999_v59, %v6995_v57  ;;  %v689_v8 = vshll.u32 %v233_v41, 16  ;;  %v695_v12 = vshll.u32 %v234_v47, 16  ;;  %v684_v15 = vsel %vm23119_vm5, %v679_v60, %v683_v53  ;;  %v237_v41 = vld [vmem:[%s23101_s5 + $0xa0] sm:$0xf] }
  0x95   : > { %v6991_v13 = vrot.slane %v6990_v62, 4  ;;  %v7005_v16 = vrot.slane %v7003_v63, 5  ;;  %v688_v18 = vrot.slane %v686_v5, 4  ;;  %v17482_v22 = vcombine.low %v674_v7, %v684_v15 }
  0x96   : > { %v7001_v24 = vrot.slane %v7000_v11, 4  ;;  %v691_v25 = vrot.slane %v689_v8, 5  ;;  %v697_v20 = vrot.slane %v695_v12, 5  ;;  %v699_v28 = vshrl.u32 %v234_v47, 16  ;;  %v18166_v47 = vld [vmem:[%s23101_s5 + $0xc0] sm:$0xf] }
  0x97   : > { %v6996_v27 = vsel %vm23119_vm5, %v6991_v13, %v6995_v57  ;;  %v705_v17 = vshll.u32 %v235_v3, 16  ;;  %v7008_v10 = vshrl.u32 %v18163_v9, 16  ;;  %20130 = vmatmul.mubr.msk.bf16.gmra.mrb[28].mxu1 %vm1887_vm4, %v17482_v22  ;;  %v7011_v33 = vshll.u32 %v18163_v9, 16  ;;  %v18167_v11 = vld [vmem:[%s23101_s5 + $0xc4] sm:$0xf] }
  0x98   : > { %v7006_v31 = vsel %vm23119_vm5, %v7001_v24, %v7005_v16  ;;  %v692_v32 = vor.u32 %v691_v25, %v688_v18  ;;  %v7017_v34 = vshll.u32 %v18164_v14, 16  ;;  %v701_v38 = vrot.slane %v699_v28, 4  ;;  %v238_v9 = vld [vmem:[%s23101_s5 + $0xa4] sm:$0xf] }
  0x99   : > { %v18287_v37 = vcombine.low %v6996_v27, %v7006_v31  ;;  %v707_v39 = vrot.slane %v705_v17, 5  ;;  %v7010_v40 = vrot.slane %v7008_v10, 4  ;;  %v7013_v45 = vrot.slane %v7011_v33, 5  ;;  %v18168_v10 = vld [vmem:[%s23101_s5 + $0xc8] sm:$0xf] }
  0x9a   : > { %v693_v42 = vrot.slane %v692_v32, 4  ;;  %v7019_v46 = vrot.slane %v7017_v34, 5  ;;  %v7021_v43 = vshrl.u32 %v18164_v14, 16  ;;  %v702_v48 = vor.u32 %v701_v38, %v697_v20 }
  0x9b   : > { %20650 = vmatmul.mubr.msk.bf16.gmra.mrb[28].mxu0 %vm1887_vm4, %v18287_v37  ;;  %v7027_v49 = vshll.u32 %v18165_v30, 16  ;;  %v709_v44 = vshrl.u32 %v235_v3, 16  ;;  %v715_v50 = vshll.u32 %v236_v36, 16  ;;  %v7014_v52 = vor.u32 %v7013_v45, %v7010_v40  ;;  %v18169_v40 = vld [vmem:[%s23101_s5 + $0xcc] sm:$0xf] }
  0x9c   : > { %v698_v51 = vsel %vm23119_vm5, %v693_v42, %v697_v20  ;;  %v7023_v53 = vrot.slane %v7021_v43, 4  ;;  %v719_v54 = vshrl.u32 %v236_v36, 16  ;;  %v703_v58 = vrot.slane %v702_v48, 4  ;;  %v239_v20 = vld [vmem:[%s23101_s5 + $0xa8] sm:$0xf] }
  0x9d   : > { %v7029_v55 = vrot.slane %v7027_v49, 5  ;;  %v711_v57 = vrot.slane %v709_v44, 4  ;;  %v717_v59 = vrot.slane %v715_v50, 5  ;;  %v7015_v60 = vrot.slane %v7014_v52, 4 }
  0x9e   : > { %v7024_v62 = vor.u32 %v7023_v53, %v7019_v46  ;;  %v721_v63 = vrot.slane %v719_v54, 4  ;;  %v725_v5 = vshll.u32 %v237_v41, 16  ;;  %v708_v3 = vsel %vm23119_vm5, %v703_v58, %v707_v39 }
  0x9f   : > { %v712_v7 = vor.u32 %v711_v57, %v707_v39  ;;  %v7031_v8 = vshrl.u32 %v18165_v30, 16  ;;  %v7037_v12 = vshll.u32 %v18166_v47, 16  ;;  %v17483_v14 = vcombine.low %v698_v51, %v708_v3  ;;  %v240_v57 = vld [vmem:[%s23101_s5 + $0xac] sm:$0xf] }
  0xa0   : > { %v7020_v15 = vsel %vm23119_vm5, %v7015_v60, %v7019_v46  ;;  %v7025_v13 = vrot.slane %v7024_v62, 4  ;;  %v722_v16 = vor.u32 %v721_v63, %v717_v59  ;;  %v727_v22 = vrot.slane %v725_v5, 5  ;;  %v334_v5 = vld [vmem:[%s23101_s5 + $0xb0] sm:$0x1] }
  0xa1   : > { %v713_v18 = vrot.slane %v712_v7, 4  ;;  %v7033_v24 = vrot.slane %v7031_v8, 4  ;;  %v7039_v25 = vrot.slane %v7037_v12, 5  ;;  %20133 = vmatprep.mubr.msk.bf16.mxu1 %vm1887_vm4, %v17483_v14  ;;  %v7041_v17 = vshrl.u32 %v18166_v47, 16 }
  0xa2   : > { %v7030_v27 = vsel %vm23119_vm5, %v7025_v13, %v7029_v55  ;;  %v723_v28 = vrot.slane %v722_v16, 4  ;;  %v7047_v30 = vshll.u32 %v18167_v11, 16  ;;  %v729_v34 = vshrl.u32 %v237_v41, 16  ;;  %v18170_v13 = vld [vmem:[%s23101_s5 + $0xd0] sm:$0xf] }
  0xa3   : > { %v18288_v31 = vcombine.low %v7020_v15, %v7030_v27  ;;  %v718_v32 = vsel %vm23119_vm5, %v713_v18, %v717_v59  ;;  %v7034_v33 = vor.u32 %v7033_v24, %v7029_v55  ;;  %v7043_v37 = vrot.slane %v7041_v17, 4 }
  0xa4   : > { %v728_v36 = vsel %vm23119_vm5, %v723_v28, %v727_v22  ;;  %v7049_v38 = vrot.slane %v7047_v30, 5  ;;  %v735_v39 = vshll.u32 %v238_v9, 16  ;;  %v731_v46 = vrot.slane %v729_v34, 4  ;;  %v241_v30 = vld [vmem:[%s23101_s5 + $0xb4] sm:$0xf] }
  0xa5   : > { %20653 = vmatprep.mubr.msk.bf16.mxu0 %vm1887_vm4, %v18288_v31  ;;  %v17484_v42 = vcombine.low %v718_v32, %v728_v36  ;;  %v7035_v45 = vrot.slane %v7034_v33, 4  ;;  %v739_v43 = vshrl.u32 %v238_v9, 16  ;;  %v7044_v47 = vor.u32 %v7043_v37, %v7039_v25 }
  0xa6   : > { %v737_v48 = vrot.slane %v735_v39, 5  ;;  %v745_v49 = vshll.u32 %v239_v20, 16  ;;  %v7051_v44 = vshrl.u32 %v18167_v11, 16  ;;  %v732_v50 = vor.u32 %v731_v46, %v727_v22  ;;  %v242_v39 = vld [vmem:[%s23101_s5 + $0xb8] sm:$0xf] }
  0xa7   : > { %20134 = vmatmul.mubr.msk.bf16.gmra.mrb[32].mxu1 %vm1887_vm4, %v17484_v42  ;;  %v7040_v41 = vsel %vm23119_vm5, %v7035_v45, %v7039_v25  ;;  %v741_v51 = vrot.slane %v739_v43, 4  ;;  %v7057_v52 = vshll.u32 %v18168_v10, 16  ;;  %v7045_v53 = vrot.slane %v7044_v47, 4  ;;  %v18171_v25 = vld [vmem:[%s23101_s5 + $0xd4] sm:$0x1] }
  0xa8   : > { %v747_v54 = vrot.slane %v745_v49, 5  ;;  %v7053_v58 = vrot.slane %v7051_v44, 4  ;;  %v7061_v55 = vshrl.u32 %v18168_v10, 16  ;;  %v733_v59 = vrot.slane %v732_v50, 4 }
  0xa9   : > { %v742_v60 = vor.u32 %v741_v51, %v737_v48  ;;  %v7059_v62 = vrot.slane %v7057_v52, 5  ;;  %v7067_v63 = vshll.u32 %v18169_v40, 16  ;;  %v7050_v3 = vsel %vm23119_vm5, %v7045_v53, %v7049_v38  ;;  %v243_v51 = vld [vmem:[%s23101_s5 + $0xbc] sm:$0xf] }
  0xaa   : > { %v7054_v7 = vor.u32 %v7053_v58, %v7049_v38  ;;  %v7063_v11 = vrot.slane %v7061_v55, 4  ;;  %v749_v8 = vshrl.u32 %v239_v20, 16  ;;  %v18289_v12 = vcombine.low %v7040_v41, %v7050_v3 }
  0xab   : > { %v738_v9 = vsel %vm23119_vm5, %v733_v59, %v737_v48  ;;  %v743_v14 = vrot.slane %v742_v60, 4  ;;  %v7069_v15 = vrot.slane %v7067_v63, 5  ;;  %v755_v24 = vshll.u32 %v240_v57, 16 }
  0xac   : > { %v7055_v16 = vrot.slane %v7054_v7, 4  ;;  %v7064_v18 = vor.u32 %v7063_v11, %v7059_v62  ;;  %v751_v22 = vrot.slane %v749_v8, 4  ;;  %20654 = vmatmul.mubr.msk.bf16.gmra.mrb[32].mxu0 %vm1887_vm4, %v18289_v12  ;;  %v759_v20 = vshrl.u32 %v240_v57, 16  ;;  %v18172_v57 = vld [vmem:[%s23101_s5 + $0xd8] sm:$0xf] }
  0xad   : > { %v748_v27 = vsel %vm23119_vm5, %v743_v14, %v747_v54  ;;  %v765_v28 = vshll.u32 %v334_v5, 16  ;;  %v7071_v17 = vshrl.u32 %v18169_v40, 16  ;;  %v757_v34 = vrot.slane %v755_v24, 5  ;;  %v18173_v5 = vld [vmem:[%s23101_s5 + $0xdc] sm:$0xf] }
  0xae   : > { %v17485_v10 = vcombine.low %v738_v9, %v748_v27  ;;  %v7060_v31 = vsel %vm23119_vm5, %v7055_v16, %v7059_v62  ;;  %v7065_v32 = vrot.slane %v7064_v18, 4  ;;  %v752_v33 = vor.u32 %v751_v22, %v747_v54  ;;  %v18174_v12 = vld [vmem:[%s23101_s5 + $0xe0] sm:$0xf] }
  0xaf   : > { %v761_v36 = vrot.slane %v759_v20, 4  ;;  %v767_v37 = vrot.slane %v765_v28, 5  ;;  %v7073_v38 = vrot.slane %v7071_v17, 4  ;;  %v7077_v40 = vshll.u32 %v18170_v13, 16 }
  0xb0   : > { %20137 = vmatprep.mubr.msk.bf16.mxu1 %vm1887_vm4, %v17485_v10  ;;  %v7070_v42 = vsel %vm23119_vm5, %v7065_v32, %v7069_v15  ;;  %v753_v45 = vrot.slane %v752_v33, 4  ;;  %v7081_v46 = vshrl.u32 %v18170_v13, 16  ;;  %v7087_v49 = vshll.u32 %v18171_v25, 16  ;;  %v244_v25 = vld [vmem:[%s23101_s5 + $0xc0] sm:$0xf] }
  0xb1   : > { %v18290_v43 = vcombine.low %v7060_v31, %v7070_v42  ;;  %v762_v47 = vor.u32 %v761_v36, %v757_v34  ;;  %v7074_v48 = vor.u32 %v7073_v38, %v7069_v15  ;;  %v7079_v41 = vrot.slane %v7077_v40, 5  ;;  %v245_v33 = vld [vmem:[%s23101_s5 + $0xc4] sm:$0xf] }
  0xb2   : > { %v758_v44 = vsel %vm23119_vm5, %v753_v45, %v757_v34  ;;  %v7083_v50 = vrot.slane %v7081_v46, 4  ;;  %v770_v52 = vshrl.u32 %v241_v30, 16  ;;  %v7089_v58 = vrot.slane %v7087_v49, 5 }
  0xb3   : > { %20657 = vmatprep.mubr.msk.bf16.mxu0 %vm1887_vm4, %v18290_v43  ;;  %v763_v53 = vrot.slane %v762_v47, 4  ;;  %v7075_v54 = vrot.slane %v7074_v48, 4  ;;  %v773_v55 = vshll.u32 %v241_v30, 16  ;;  %v779_v62 = vshll.u32 %v242_v39, 16 }
  0xb4   : > { %v7084_v59 = vor.u32 %v7083_v50, %v7079_v41  ;;  %v772_v60 = vrot.slane %v770_v52, 4  ;;  %v783_v63 = vshrl.u32 %v242_v39, 16  ;;  %v789_v8 = vshll.u32 %v243_v51, 16  ;;  %v18175_v39 = vld [vmem:[%s23101_s5 + $0xe4] sm:$0xf] }
  0xb5   : > { %v768_v3 = vsel %vm23119_vm5, %v763_v53, %v767_v37  ;;  %v7080_v7 = vsel %vm23119_vm5, %v7075_v54, %v7079_v41  ;;  %v775_v11 = vrot.slane %v773_v55, 5  ;;  %v781_v15 = vrot.slane %v779_v62, 5 }
  0xb6   : > { %v17486_v9 = vcombine.low %v758_v44, %v768_v3  ;;  %v7085_v14 = vrot.slane %v7084_v59, 4  ;;  %v785_v13 = vrot.slane %v783_v63, 4  ;;  %v791_v18 = vrot.slane %v789_v8, 5  ;;  %v18176_v59 = vld [vmem:[%s23101_s5 + $0xe8] sm:$0xf] }
  0xb7   : > { %v776_v16 = vor.u32 %v775_v11, %v772_v60  ;;  %v7092_v22 = vshrl.u32 %v18172_v57, 16  ;;  %v7095_v24 = vshll.u32 %v18172_v57, 16  ;;  %v7101_v28 = vshll.u32 %v18173_v5, 16  ;;  %v246_v63 = vld [vmem:[%s23101_s5 + $0xc8] sm:$0xf] }
  0xb8   : > { %20138 = vmatmul.mubr.msk.bf16.gmra.mrb[36].mxu1 %vm1887_vm4, %v17486_v9  ;;  %v7090_v27 = vsel %vm23119_vm5, %v7085_v14, %v7089_v58  ;;  %v786_v20 = vor.u32 %v785_v13, %v781_v15  ;;  %v7105_v17 = vshrl.u32 %v18173_v5, 16  ;;  %v7111_v38 = vshll.u32 %v18174_v12, 16 }
  0xb9   : > { %v18291_v30 = vcombine.low %v7080_v7, %v7090_v27  ;;  %v777_v10 = vrot.slane %v776_v16, 4  ;;  %v7094_v31 = vrot.slane %v7092_v22, 4  ;;  %v7097_v32 = vrot.slane %v7095_v24, 5 }
  0xba   : > { %v787_v34 = vrot.slane %v786_v20, 4  ;;  %v7103_v36 = vrot.slane %v7101_v28, 5  ;;  %v7107_v37 = vrot.slane %v7105_v17, 4  ;;  %v793_v40 = vshrl.u32 %v243_v51, 16  ;;  %v18177_v28 = vld [vmem:[%s23101_s5 + $0xec] sm:$0xf] }
  0xbb   : > { %20658 = vmatmul.mubr.msk.bf16.gmra.mrb[36].mxu0 %vm1887_vm4, %v18291_v30  ;;  %v782_v42 = vsel %vm23119_vm5, %v777_v10, %v781_v15  ;;  %v7098_v45 = vor.u32 %v7097_v32, %v7094_v31  ;;  %v799_v46 = vshll.u32 %v244_v25, 16  ;;  %v7113_v48 = vrot.slane %v7111_v38, 5  ;;  %v18178_v32 = vld [vmem:[%s23101_s5 + $0xf0] sm:$0xf] }
  0xbc   : > { %v792_v43 = vsel %vm23119_vm5, %v787_v34, %v791_v18  ;;  %v7108_v47 = vor.u32 %v7107_v37, %v7103_v36  ;;  %v803_v49 = vshrl.u32 %v244_v25, 16  ;;  %v795_v50 = vrot.slane %v793_v40, 4  ;;  %v248_v38 = vld [vmem:[%s23101_s5 + $0xd0] sm:$0xf] }
  0xbd   : > { %v17487_v44 = vcombine.low %v782_v42, %v792_v43  ;;  %v7099_v41 = vrot.slane %v7098_v45, 4  ;;  %v801_v52 = vrot.slane %v799_v46, 5  ;;  %v809_v58 = vshll.u32 %v245_v33, 16 }
  0xbe   : > { %v7109_v53 = vrot.slane %v7108_v47, 4  ;;  %v805_v54 = vrot.slane %v803_v49, 4  ;;  %v7115_v55 = vshrl.u32 %v18174_v12, 16  ;;  %v796_v57 = vor.u32 %v795_v50, %v791_v18  ;;  %v247_v18 = vld [vmem:[%s23101_s5 + $0xcc] sm:$0xf] }
  0xbf   : > { %20141 = vmatprep.mubr.msk.bf16.mxu1 %vm1887_vm4, %v17487_v44  ;;  %v7104_v51 = vsel %vm23119_vm5, %v7099_v41, %v7103_v36  ;;  %v7121_v60 = vshll.u32 %v18175_v39, 16  ;;  %v7125_v62 = vshrl.u32 %v18175_v39, 16  ;;  %v811_v7 = vrot.slane %v809_v58, 5 }
  0xc0   : > { %v7114_v5 = vsel %vm23119_vm5, %v7109_v53, %v7113_v48  ;;  %v806_v3 = vor.u32 %v805_v54, %v801_v52  ;;  %v7117_v11 = vrot.slane %v7115_v55, 4  ;;  %v797_v12 = vrot.slane %v796_v57, 4  ;;  %v335_v57 = vld [vmem:[%s23101_s5 + $0xd4] sm:$0x1] }
  0xc1   : > { %v18292_v8 = vcombine.low %v7104_v51, %v7114_v5  ;;  %v7123_v9 = vrot.slane %v7121_v60, 5  ;;  %v7127_v14 = vrot.slane %v7125_v62, 4  ;;  %v7131_v16 = vshll.u32 %v18176_v59, 16  ;;  %v18179_v62 = vld [vmem:[%s23101_s5 + $0xf4] sm:$0xf] }
  0xc2   : > { %v807_v15 = vrot.slane %v806_v3, 4  ;;  %v7118_v13 = vor.u32 %v7117_v11, %v7113_v48  ;;  %v813_v22 = vshrl.u32 %v245_v33, 16  ;;  %v802_v24 = vsel %vm23119_vm5, %v797_v12, %v801_v52 }
  0xc3   : > { %20661 = vmatprep.mubr.msk.bf16.mxu0 %vm1887_vm4, %v18292_v8  ;;  %v7128_v25 = vor.u32 %v7127_v14, %v7123_v9  ;;  %v819_v27 = vshll.u32 %v246_v63, 16  ;;  %v823_v20 = vshrl.u32 %v246_v63, 16  ;;  %v7133_v10 = vrot.slane %v7131_v16, 5  ;;  %v18180_v14 = vld [vmem:[%s23101_s5 + $0xf8] sm:$0x1] }
  0xc4   : > { %v812_v17 = vsel %vm23119_vm5, %v807_v15, %v811_v7  ;;  %v7119_v30 = vrot.slane %v7118_v13, 4  ;;  %v815_v31 = vrot.slane %v813_v22, 4  ;;  %v829_v45 = vshll.u32 %v247_v18, 16  ;;  %v249_v15 = vld [vmem:[%s23101_s5 + $0xd8] sm:$0xf] }
  0xc5   : > { %v17488_v34 = vcombine.low %v802_v24, %v812_v17  ;;  %v7129_v36 = vrot.slane %v7128_v25, 4  ;;  %v821_v33 = vrot.slane %v819_v27, 5  ;;  %v825_v37 = vrot.slane %v823_v20, 4 }
  0xc6   : > { %v7124_v39 = vsel %vm23119_vm5, %v7119_v30, %v7123_v9  ;;  %v816_v42 = vor.u32 %v815_v31, %v811_v7  ;;  %v7135_v40 = vshrl.u32 %v18176_v59, 16  ;;  %v7141_v47 = vshll.u32 %v18177_v28, 16 }
  0xc7   : > { %20142 = vmatmul.mubr.msk.bf16.gmra.mrb[40].mxu1 %vm1887_vm4, %v17488_v34  ;;  %v7134_v46 = vsel %vm23119_vm5, %v7129_v36, %v7133_v10  ;;  %v826_v43 = vor.u32 %v825_v37, %v821_v33  ;;  %v7145_v48 = vshrl.u32 %v18177_v28, 16  ;;  %v831_v41 = vrot.slane %v829_v45, 5  ;;  %v250_v28 = vld [vmem:[%s23101_s5 + $0xdc] sm:$0xf]  ;;  %v251_v37 = vld [vmem:[%s23101_s5 + $0xe0] sm:$0xf] }
  0xc8   : > { %v18293_v49 = vcombine.low %v7124_v39, %v7134_v46  ;;  %v817_v44 = vrot.slane %v816_v42, 4  ;;  %v7137_v50 = vrot.slane %v7135_v40, 4  ;;  %v7143_v53 = vrot.slane %v7141_v47, 5  ;;  %v18182_v46 = vld [vmem:[%s23101_s5 + $0x100] sm:$0xf] }
  0xc9   : > { %v827_v52 = vrot.slane %v826_v43, 4  ;;  %v7147_v54 = vrot.slane %v7145_v48, 4  ;;  %v7151_v58 = vshll.u32 %v18178_v32, 16  ;;  %v833_v59 = vshrl.u32 %v247_v18, 16 }
  0xca   : > { %20662 = vmatmul.mubr.msk.bf16.gmra.mrb[40].mxu0 %vm1887_vm4, %v18293_v49  ;;  %v822_v55 = vsel %vm23119_vm5, %v817_v44, %v821_v33  ;;  %v7138_v51 = vor.u32 %v7137_v50, %v7133_v10  ;;  %v839_v60 = vshll.u32 %v248_v38, 16  ;;  %v843_v7 = vshrl.u32 %v248_v38, 16  ;;  %v18181_v38 = vld [vmem:[%s23101_s5 + $0xfc] sm:$0xf] }
  0xcb   : > { %v832_v63 = vsel %vm23119_vm5, %v827_v52, %v831_v41  ;;  %v7148_v5 = vor.u32 %v7147_v54, %v7143_v53  ;;  %v7153_v3 = vrot.slane %v7151_v58, 5  ;;  %v835_v12 = vrot.slane %v833_v59, 4 }
  0xcc   : > { %v17489_v11 = vcombine.low %v822_v55, %v832_v63  ;;  %v7139_v8 = vrot.slane %v7138_v51, 4  ;;  %v841_v9 = vrot.slane %v839_v60, 5  ;;  %v845_v16 = vrot.slane %v843_v7, 4 }
  0xcd   : > { %v7149_v13 = vrot.slane %v7148_v5, 4  ;;  %v849_v22 = vshll.u32 %v335_v57, 16  ;;  %v7155_v18 = vshrl.u32 %v18178_v32, 16  ;;  %v836_v25 = vor.u32 %v835_v12, %v831_v41  ;;  %v18183_v5 = vld [vmem:[%s23101_s5 + $0x104] sm:$0xf] }
  0xce   : > { %20145 = vmatprep.mubr.msk.bf16.mxu1 %vm1887_vm4, %v17489_v11  ;;  %v7144_v24 = vsel %vm23119_vm5, %v7139_v8, %v7143_v53  ;;  %v7161_v27 = vshll.u32 %v18179_v62, 16  ;;  %v7165_v20 = vshrl.u32 %v18179_v62, 16  ;;  %v846_v30 = vor.u32 %v845_v16, %v841_v9  ;;  %v252_v11 = vld [vmem:[%s23101_s5 + $0xe4] sm:$0xf] }
  0xcf   : > { %v7154_v17 = vsel %vm23119_vm5, %v7149_v13, %v7153_v3  ;;  %v851_v10 = vrot.slane %v849_v22, 5  ;;  %v7157_v31 = vrot.slane %v7155_v18, 4  ;;  %v837_v36 = vrot.slane %v836_v25, 4  ;;  %v253_v25 = vld [vmem:[%s23101_s5 + $0xe8] sm:$0xf] }
  0xd0   : > { %v18294_v34 = vcombine.low %v7144_v24, %v7154_v17  ;;  %v7163_v32 = vrot.slane %v7161_v27, 5  ;;  %v7167_v33 = vrot.slane %v7165_v20, 4  ;;  %v847_v39 = vrot.slane %v846_v30, 4 }
  0xd1   : > { %v7158_v42 = vor.u32 %v7157_v31, %v7153_v3  ;;  %v7171_v45 = vshll.u32 %v18180_v14, 16  ;;  %v854_v40 = vshrl.u32 %v249_v15, 16  ;;  %v842_v43 = vsel %vm23119_vm5, %v837_v36, %v841_v9  ;;  %v18184_v31 = vld [vmem:[%s23101_s5 + $0x108] sm:$0xf] }
  0xd2   : > { %20665 = vmatprep.mubr.msk.bf16.mxu0 %vm1887_vm4, %v18294_v34  ;;  %v7168_v47 = vor.u32 %v7167_v33, %v7163_v32  ;;  %v857_v48 = vshll.u32 %v249_v15, 16  ;;  %v863_v49 = vshll.u32 %v250_v28, 16  ;;  %v852_v44 = vsel %vm23119_vm5, %v847_v39, %v851_v10 }
  0xd3   : > { %v7159_v41 = vrot.slane %v7158_v42, 4  ;;  %v7173_v50 = vrot.slane %v7171_v45, 5  ;;  %v856_v52 = vrot.slane %v854_v40, 4  ;;  %v17490_v53 = vcombine.low %v842_v43, %v852_v44 }
  0xd4   : > { %v7169_v54 = vrot.slane %v7168_v47, 4  ;;  %v859_v58 = vrot.slane %v857_v48, 5  ;;  %v865_v55 = vrot.slane %v863_v49, 5  ;;  %v867_v57 = vshrl.u32 %v250_v28, 16 }
  0xd5   : > { %v7164_v51 = vsel %vm23119_vm5, %v7159_v41, %v7163_v32  ;;  %v873_v59 = vshll.u32 %v251_v37, 16  ;;  %v7176_v60 = vshrl.u32 %v18181_v38, 16  ;;  %20146 = vmatmul.mubr.msk.bf16.gmra.mrb[44].mxu1 %vm1887_vm4, %v17490_v53  ;;  %v7179_v3 = vshll.u32 %v18181_v38, 16  ;;  %v18185_v38 = vld [vmem:[%s23101_s5 + $0x10c] sm:$0xf] }
  0xd6   : > { %v7174_v62 = vsel %vm23119_vm5, %v7169_v54, %v7173_v50  ;;  %v860_v63 = vor.u32 %v859_v58, %v856_v52  ;;  %v7185_v7 = vshll.u32 %v18182_v46, 16  ;;  %v869_v12 = vrot.slane %v867_v57, 4  ;;  %v254_v58 = vld [vmem:[%s23101_s5 + $0xec] sm:$0xf] }
  0xd7   : > { %v18295_v8 = vcombine.low %v7164_v51, %v7174_v62  ;;  %v875_v9 = vrot.slane %v873_v59, 5  ;;  %v7178_v14 = vrot.slane %v7176_v60, 4  ;;  %v7181_v13 = vrot.slane %v7179_v3, 5  ;;  %v255_v60 = vld [vmem:[%s23101_s5 + $0xf0] sm:$0xf] }
  0xd8   : > { %v861_v15 = vrot.slane %v860_v63, 4  ;;  %v7187_v16 = vrot.slane %v7185_v7, 5  ;;  %v7189_v22 = vshrl.u32 %v18182_v46, 16  ;;  %v870_v18 = vor.u32 %v869_v12, %v865_v55  ;;  %v18186_v7 = vld [vmem:[%s23101_s5 + $0x110] sm:$0xf] }
  0xd9   : > { %20666 = vmatmul.mubr.msk.bf16.gmra.mrb[44].mxu0 %vm1887_vm4, %v18295_v8  ;;  %v7195_v24 = vshll.u32 %v18183_v5, 16  ;;  %v877_v27 = vshrl.u32 %v251_v37, 16  ;;  %v883_v20 = vshll.u32 %v252_v11, 16  ;;  %v7182_v17 = vor.u32 %v7181_v13, %v7178_v14 }
  0xda   : > { %v866_v28 = vsel %vm23119_vm5, %v861_v15, %v865_v55  ;;  %v7191_v30 = vrot.slane %v7189_v22, 4  ;;  %v887_v10 = vshrl.u32 %v252_v11, 16  ;;  %v871_v34 = vrot.slane %v870_v18, 4 }
  0xdb   : > { %v7197_v36 = vrot.slane %v7195_v24, 5  ;;  %v879_v32 = vrot.slane %v877_v27, 4  ;;  %v885_v33 = vrot.slane %v883_v20, 5  ;;  %v7183_v39 = vrot.slane %v7182_v17, 4  ;;  %v18187_v27 = vld [vmem:[%s23101_s5 + $0x114] sm:$0xf] }
  0xdc   : > { %v7192_v42 = vor.u32 %v7191_v30, %v7187_v16  ;;  %v889_v45 = vrot.slane %v887_v10, 4  ;;  %v893_v40 = vshll.u32 %v253_v25, 16  ;;  %v876_v37 = vsel %vm23119_vm5, %v871_v34, %v875_v9  ;;  %v256_v10 = vld [vmem:[%s23101_s5 + $0xf4] sm:$0xf] }
  0xdd   : > { %v880_v46 = vor.u32 %v879_v32, %v875_v9  ;;  %v7199_v43 = vshrl.u32 %v18183_v5, 16  ;;  %v7205_v47 = vshll.u32 %v18184_v31, 16  ;;  %v17491_v48 = vcombine.low %v866_v28, %v876_v37 }
  0xde   : > { %v7188_v49 = vsel %vm23119_vm5, %v7183_v39, %v7187_v16  ;;  %v7193_v44 = vrot.slane %v7192_v42, 4  ;;  %v890_v41 = vor.u32 %v889_v45, %v885_v33  ;;  %v895_v52 = vrot.slane %v893_v40, 5 }
  0xdf   : > { %v881_v50 = vrot.slane %v880_v46, 4  ;;  %v7201_v53 = vrot.slane %v7199_v43, 4  ;;  %v7207_v54 = vrot.slane %v7205_v47, 5  ;;  %20149 = vmatprep.mubr.msk.bf16.mxu1 %vm1887_vm4, %v17491_v48  ;;  %v7209_v57 = vshrl.u32 %v18184_v31, 16 }
  0xe0   : > { %v7198_v55 = vsel %vm23119_vm5, %v7193_v44, %v7197_v36  ;;  %v891_v51 = vrot.slane %v890_v41, 4  ;;  %v7215_v59 = vshll.u32 %v18185_v38, 16  ;;  %v897_v3 = vshrl.u32 %v253_v25, 16 }
  0xe1   : > { %v18296_v62 = vcombine.low %v7188_v49, %v7198_v55  ;;  %v886_v63 = vsel %vm23119_vm5, %v881_v50, %v885_v33  ;;  %v7202_v5 = vor.u32 %v7201_v53, %v7197_v36  ;;  %v7211_v8 = vrot.slane %v7209_v57, 4  ;;  %v336_v33 = vld [vmem:[%s23101_s5 + $0xf8] sm:$0x1] }
  0xe2   : > { %v896_v11 = vsel %vm23119_vm5, %v891_v51, %v895_v52  ;;  %v7217_v12 = vrot.slane %v7215_v59, 5  ;;  %v903_v9 = vshll.u32 %v254_v58, 16  ;;  %v899_v13 = vrot.slane %v897_v3, 4  ;;  %v18188_v51 = vld [vmem:[%s23101_s5 + $0x118] sm:$0xf] }
  0xe3   : > { %20669 = vmatprep.mubr.msk.bf16.mxu0 %vm1887_vm4, %v18296_v62  ;;  %v17492_v14 = vcombine.low %v886_v63, %v896_v11  ;;  %v7203_v15 = vrot.slane %v7202_v5, 4  ;;  %v907_v16 = vshrl.u32 %v254_v58, 16  ;;  %v7212_v22 = vor.u32 %v7211_v8, %v7207_v54  ;;  %v18189_v5 = vld [vmem:[%s23101_s5 + $0x11c] sm:$0x1] }
  0xe4   : > { %v905_v18 = vrot.slane %v903_v9, 5  ;;  %v913_v24 = vshll.u32 %v255_v60, 16  ;;  %v7219_v25 = vshrl.u32 %v18185_v38, 16  ;;  %v900_v28 = vor.u32 %v899_v13, %v895_v52  ;;  %v257_v3 = vld [vmem:[%s23101_s5 + $0xfc] sm:$0xf] }
  0xe5   : > { %20150 = vmatmul.mubr.msk.bf16.gmra.mrb[48].mxu1 %vm1887_vm4, %v17492_v14  ;;  %v7208_v20 = vsel %vm23119_vm5, %v7203_v15, %v7207_v54  ;;  %v909_v17 = vrot.slane %v907_v16, 4  ;;  %v7225_v30 = vshll.u32 %v18186_v7, 16  ;;  %v7213_v31 = vrot.slane %v7212_v22, 4  ;;  %v258_v9 = vld [vmem:[%s23101_s5 + $0x100] sm:$0xf] }
  0xe6   : > { %v915_v34 = vrot.slane %v913_v24, 5  ;;  %v7221_v36 = vrot.slane %v7219_v25, 4  ;;  %v7229_v32 = vshrl.u32 %v18186_v7, 16  ;;  %v901_v39 = vrot.slane %v900_v28, 4  ;;  %v259_v25 = vld [vmem:[%s23101_s5 + $0x104] sm:$0xf] }
  0xe7   : > { %v910_v42 = vor.u32 %v909_v17, %v905_v18  ;;  %v7227_v45 = vrot.slane %v7225_v30, 5  ;;  %v7235_v40 = vshll.u32 %v18187_v27, 16  ;;  %v7218_v38 = vsel %vm23119_vm5, %v7213_v31, %v7217_v12 }
  0xe8   : > { %v7222_v37 = vor.u32 %v7221_v36, %v7217_v12  ;;  %v7231_v46 = vrot.slane %v7229_v32, 4  ;;  %v917_v43 = vshrl.u32 %v255_v60, 16  ;;  %v18297_v47 = vcombine.low %v7208_v20, %v7218_v38 }
  0xe9   : > { %v906_v48 = vsel %vm23119_vm5, %v901_v39, %v905_v18  ;;  %v911_v49 = vrot.slane %v910_v42, 4  ;;  %v7237_v44 = vrot.slane %v7235_v40, 5  ;;  %v923_v53 = vshll.u32 %v256_v10, 16 }
  0xea   : > { %v7223_v41 = vrot.slane %v7222_v37, 4  ;;  %v7232_v50 = vor.u32 %v7231_v46, %v7227_v45  ;;  %v919_v52 = vrot.slane %v917_v43, 4  ;;  %20670 = vmatmul.mubr.msk.bf16.gmra.mrb[48].mxu0 %vm1887_vm4, %v18297_v47  ;;  %v927_v58 = vshrl.u32 %v256_v10, 16  ;;  %v18190_v10 = vld [vmem:[%s23101_s5 + $0x120] sm:$0xf] }
  0xeb   : > { %v916_v54 = vsel %vm23119_vm5, %v911_v49, %v915_v34  ;;  %v933_v55 = vshll.u32 %v336_v33, 16  ;;  %v7239_v57 = vshrl.u32 %v18187_v27, 16  ;;  %v925_v7 = vrot.slane %v923_v53, 5  ;;  %v18191_v33 = vld [vmem:[%s23101_s5 + $0x124] sm:$0xf] }
  0xec   : > { %v17493_v59 = vcombine.low %v906_v48, %v916_v54  ;;  %v7228_v60 = vsel %vm23119_vm5, %v7223_v41, %v7227_v45  ;;  %v7233_v62 = vrot.slane %v7232_v50, 4  ;;  %v920_v63 = vor.u32 %v919_v52, %v915_v34  ;;  %v18192_v47 = vld [vmem:[%s23101_s5 + $0x128] sm:$0xf] }
  0xed   : > { %v929_v11 = vrot.slane %v927_v58, 4  ;;  %v935_v8 = vrot.slane %v933_v55, 5  ;;  %v7241_v12 = vrot.slane %v7239_v57, 4  ;;  %v7245_v13 = vshll.u32 %v18188_v51, 16 }
  0xee   : > { %20153 = vmatprep.mubr.msk.bf16.mxu1 %vm1887_vm4, %v17493_v59  ;;  %v7238_v14 = vsel %vm23119_vm5, %v7233_v62, %v7237_v44  ;;  %v921_v15 = vrot.slane %v920_v63, 4  ;;  %v7249_v16 = vshrl.u32 %v18188_v51, 16  ;;  %v7255_v27 = vshll.u32 %v18189_v5, 16  ;;  %v260_v59 = vld [vmem:[%s23101_s5 + $0x108] sm:$0xf] }
  0xef   : > { %v18298_v22 = vcombine.low %v7228_v60, %v7238_v14  ;;  %v930_v18 = vor.u32 %v929_v11, %v925_v7  ;;  %v7242_v24 = vor.u32 %v7241_v12, %v7237_v44  ;;  %v7247_v28 = vrot.slane %v7245_v13, 5  ;;  %v261_v12 = vld [vmem:[%s23101_s5 + $0x10c] sm:$0xf] }
  0xf0   : > { %v926_v20 = vsel %vm23119_vm5, %v921_v15, %v925_v7  ;;  %v7251_v17 = vrot.slane %v7249_v16, 4  ;;  %v938_v30 = vshrl.u32 %v257_v3, 16  ;;  %v7257_v36 = vrot.slane %v7255_v27, 5 }
  0xf1   : > { %20673 = vmatprep.mubr.msk.bf16.mxu0 %vm1887_vm4, %v18298_v22  ;;  %v931_v31 = vrot.slane %v930_v18, 4  ;;  %v7243_v34 = vrot.slane %v7242_v24, 4  ;;  %v941_v32 = vshll.u32 %v257_v3, 16  ;;  %v947_v45 = vshll.u32 %v258_v9, 16 }
  0xf2   : > { %v7252_v39 = vor.u32 %v7251_v17, %v7247_v28  ;;  %v940_v42 = vrot.slane %v938_v30, 4  ;;  %v951_v40 = vshrl.u32 %v258_v9, 16  ;;  %v957_v43 = vshll.u32 %v259_v25, 16  ;;  %v18193_v9 = vld [vmem:[%s23101_s5 + $0x12c] sm:$0xf] }
  0xf3   : > { %v936_v38 = vsel %vm23119_vm5, %v931_v31, %v935_v8  ;;  %v7248_v37 = vsel %vm23119_vm5, %v7243_v34, %v7247_v28  ;;  %v943_v46 = vrot.slane %v941_v32, 5  ;;  %v949_v44 = vrot.slane %v947_v45, 5 }
  0xf4   : > { %v17494_v48 = vcombine.low %v926_v20, %v936_v38  ;;  %v7253_v49 = vrot.slane %v7252_v39, 4  ;;  %v953_v41 = vrot.slane %v951_v40, 4  ;;  %v959_v52 = vrot.slane %v957_v43, 5 }
  0xf5   : > { %v944_v50 = vor.u32 %v943_v46, %v940_v42  ;;  %v7260_v53 = vshrl.u32 %v18190_v10, 16  ;;  %v7263_v54 = vshll.u32 %v18190_v10, 16  ;;  %v7269_v51 = vshll.u32 %v18191_v33, 16  ;;  %v18194_v10 = vld [vmem:[%s23101_s5 + $0x130] sm:$0xf] }
  0xf6   : > { %20154 = vmatmul.mubr.msk.bf16.gmra.mrb[52].mxu1 %vm1887_vm4, %v17494_v48  ;;  %v7258_v58 = vsel %vm23119_vm5, %v7253_v49, %v7257_v36  ;;  %v954_v55 = vor.u32 %v953_v41, %v949_v44  ;;  %v7273_v57 = vshrl.u32 %v18191_v33, 16  ;;  %v7279_v8 = vshll.u32 %v18192_v47, 16  ;;  %v262_v33 = vld [vmem:[%s23101_s5 + $0x110] sm:$0xf] }
  0xf7   : > { %v18299_v60 = vcombine.low %v7248_v37, %v7258_v58  ;;  %v945_v62 = vrot.slane %v944_v50, 4  ;;  %v7262_v63 = vrot.slane %v7260_v53, 4  ;;  %v7265_v5 = vrot.slane %v7263_v54, 5  ;;  %v263_v58 = vld [vmem:[%s23101_s5 + $0x114] sm:$0xf] }
  0xf8   : > { %v955_v3 = vrot.slane %v954_v55, 4  ;;  %v7271_v7 = vrot.slane %v7269_v51, 5  ;;  %v7275_v11 = vrot.slane %v7273_v57, 4  ;;  %v961_v13 = vshrl.u32 %v259_v25, 16  ;;  %v18195_v57 = vld [vmem:[%s23101_s5 + $0x134] sm:$0xf] }
  0xf9   : > { %20674 = vmatmul.mubr.msk.bf16.gmra.mrb[52].mxu0 %vm1887_vm4, %v18299_v60  ;;  %v950_v14 = vsel %vm23119_vm5, %v945_v62, %v949_v44  ;;  %v7266_v15 = vor.u32 %v7265_v5, %v7262_v63  ;;  %v967_v16 = vshll.u32 %v260_v59, 16  ;;  %v7281_v24 = vrot.slane %v7279_v8, 5  ;;  %v18196_v5 = vld [vmem:[%s23101_s5 + $0x138] sm:$0xf] }
  0xfa   : > { %v960_v22 = vsel %vm23119_vm5, %v955_v3, %v959_v52  ;;  %v7276_v18 = vor.u32 %v7275_v11, %v7271_v7  ;;  %v971_v27 = vshrl.u32 %v260_v59, 16  ;;  %v963_v17 = vrot.slane %v961_v13, 4 }
  0xfb   : > { %v17495_v20 = vcombine.low %v950_v14, %v960_v22  ;;  %v7267_v28 = vrot.slane %v7266_v15, 4  ;;  %v969_v30 = vrot.slane %v967_v16, 5  ;;  %v977_v36 = vshll.u32 %v261_v12, 16 }
  0xfc   : > { %v7277_v31 = vrot.slane %v7276_v18, 4  ;;  %v973_v34 = vrot.slane %v971_v27, 4  ;;  %v7283_v32 = vshrl.u32 %v18192_v47, 16  ;;  %v964_v39 = vor.u32 %v963_v17, %v959_v52 }
  0xfd   : > { %20157 = vmatprep.mubr.msk.bf16.mxu1 %vm1887_vm4, %v17495_v20  ;;  %v7272_v25 = vsel %vm23119_vm5, %v7267_v28, %v7271_v7  ;;  %v7289_v42 = vshll.u32 %v18193_v9, 16  ;;  %v7293_v45 = vshrl.u32 %v18193_v9, 16  ;;  %v979_v37 = vrot.slane %v977_v36, 5 }
  0xfe   : > { %v7282_v40 = vsel %vm23119_vm5, %v7277_v31, %v7281_v24  ;;  %v974_v38 = vor.u32 %v973_v34, %v969_v30  ;;  %v7285_v46 = vrot.slane %v7283_v32, 4  ;;  %v965_v48 = vrot.slane %v964_v39, 4  ;;  %v337_v32 = vld [vmem:[%s23101_s5 + $0x11c] sm:$0x1] }
  0xff   : > { %v18300_v43 = vcombine.low %v7272_v25, %v7282_v40  ;;  %v7291_v47 = vrot.slane %v7289_v42, 5  ;;  %v7295_v49 = vrot.slane %v7293_v45, 4  ;;  %v7299_v50 = vshll.u32 %v18194_v10, 16 }
 0x100   : > { %v975_v44 = vrot.slane %v974_v38, 4  ;;  %v7286_v41 = vor.u32 %v7285_v46, %v7281_v24  ;;  %v981_v53 = vshrl.u32 %v261_v12, 16  ;;  %v970_v52 = vsel %vm23119_vm5, %v965_v48, %v969_v30  ;;  %v264_v12 = vld [vmem:[%s23101_s5 + $0x118] sm:$0xf] }
 0x101   : > { %20677 = vmatprep.mubr.msk.bf16.mxu0 %vm1887_vm4, %v18300_v43  ;;  %v7296_v54 = vor.u32 %v7295_v49, %v7291_v47  ;;  %v987_v55 = vshll.u32 %v262_v33, 16  ;;  %v991_v51 = vshrl.u32 %v262_v33, 16  ;;  %v7301_v62 = vrot.slane %v7299_v50, 5  ;;  %v18197_v33 = vld [vmem:[%s23101_s5 + $0x13c] sm:$0xf] }
 0x102   : > { %v980_v59 = vsel %vm23119_vm5, %v975_v44, %v979_v37  ;;  %v7287_v60 = vrot.slane %v7286_v41, 4  ;;  %v983_v63 = vrot.slane %v981_v53, 4  ;;  %v997_v15 = vshll.u32 %v263_v58, 16  ;;  %v18198_v49 = vld [vmem:[%s23101_s5 + $0x140] sm:$0x1] }
 0x103   : > { %v17496_v3 = vcombine.low %v970_v52, %v980_v59  ;;  %v7297_v7 = vrot.slane %v7296_v54, 4  ;;  %v989_v11 = vrot.slane %v987_v55, 5  ;;  %v993_v8 = vrot.slane %v991_v51, 4  ;;  %v265_v51 = vld [vmem:[%s23101_s5 + $0x120] sm:$0xf] }
 0x104   : > { %v7292_v9 = vsel %vm23119_vm5, %v7287_v60, %v7291_v47  ;;  %v984_v14 = vor.u32 %v983_v63, %v979_v37  ;;  %v7303_v13 = vshrl.u32 %v18194_v10, 16  ;;  %v7309_v18 = vshll.u32 %v18195_v57, 16  ;;  %v266_v63 = vld [vmem:[%s23101_s5 + $0x124] sm:$0xf] }
 0x105   : > { %20158 = vmatmul.mubr.msk.bf16.gmra.mrb[56].mxu1 %vm1887_vm4, %v17496_v3  ;;  %v7302_v16 = vsel %vm23119_vm5, %v7297_v7, %v7301_v62  ;;  %v994_v22 = vor.u32 %v993_v8, %v989_v11  ;;  %v7313_v24 = vshrl.u32 %v18195_v57, 16  ;;  %v999_v28 = vrot.slane %v997_v15, 5  ;;  %v267_v8 = vld [vmem:[%s23101_s5 + $0x128] sm:$0xf] }
 0x106   : > { %v18301_v27 = vcombine.low %v7292_v9, %v7302_v16  ;;  %v985_v20 = vrot.slane %v984_v14, 4  ;;  %v7305_v17 = vrot.slane %v7303_v13, 4  ;;  %v7311_v31 = vrot.slane %v7309_v18, 5  ;;  %v18400_v13 = vld [vmem:[%s23101_s5 + $0x24] sm:$0xe] }
 0x107   : > { %v995_v30 = vrot.slane %v994_v22, 4  ;;  %v7315_v34 = vrot.slane %v7313_v24, 4  ;;  %v7319_v36 = vshll.u32 %v18196_v5, 16  ;;  %v1001_v39 = vshrl.u32 %v263_v58, 16 }
 0x108   : > { %20678 = vmatmul.mubr.msk.bf16.gmra.mrb[56].mxu0 %vm1887_vm4, %v18301_v27  ;;  %v990_v10 = vsel %vm23119_vm5, %v985_v20, %v989_v11  ;;  %v7306_v25 = vor.u32 %v7305_v17, %v7301_v62  ;;  %v1007_v42 = vshll.u32 %v264_v12, 16  ;;  %v1011_v37 = vshrl.u32 %v264_v12, 16 }
 0x109   : > { %v1000_v45 = vsel %vm23119_vm5, %v995_v30, %v999_v28  ;;  %v7316_v40 = vor.u32 %v7315_v34, %v7311_v31  ;;  %v7321_v38 = vrot.slane %v7319_v36, 5  ;;  %v1003_v48 = vrot.slane %v1001_v39, 4  ;;  %v18691_v30 = vld [vmem:[%s29137_s1 + $0xc] sm:$0x3] }
 0x10a   : > { %v17497_v46 = vcombine.low %v990_v10, %v1000_v45  ;;  %v7307_v43 = vrot.slane %v7306_v25, 4  ;;  %v1009_v47 = vrot.slane %v1007_v42, 5  ;;  %v1013_v41 = vrot.slane %v1011_v37, 4  ;;  %v269_v42 = vld [vmem:[%s23101_s5 + $0x130] sm:$0xf] }
 0x10b   : > { %v7317_v44 = vrot.slane %v7316_v40, 4  ;;  %v1017_v50 = vshll.u32 %v337_v32, 16  ;;  %v7323_v53 = vshrl.u32 %v18196_v5, 16  ;;  %v1004_v54 = vor.u32 %v1003_v48, %v999_v28 }
 0x10c   : > { %20161 = vmatprep.mubr.msk.bf16.mxu1 %vm1887_vm4, %v17497_v46  ;;  %v7312_v52 = vsel %vm23119_vm5, %v7307_v43, %v7311_v31  ;;  %v7329_v58 = vshll.u32 %v18197_v33, 16  ;;  %v7333_v55 = vshrl.u32 %v18197_v33, 16  ;;  %v1014_v59 = vor.u32 %v1013_v41, %v1009_v47  ;;  %v268_v33 = vld [vmem:[%s23101_s5 + $0x12c] sm:$0xf] }
 0x10d   : > { %v7322_v57 = vsel %vm23119_vm5, %v7317_v44, %v7321_v38  ;;  %v1019_v60 = vrot.slane %v1017_v50, 5  ;;  %v7325_v62 = vrot.slane %v7323_v53, 4  ;;  %v1005_v5 = vrot.slane %v1004_v54, 4 }
 0x10e   : > { %v18302_v3 = vcombine.low %v7312_v52, %v7322_v57  ;;  %v7331_v7 = vrot.slane %v7329_v58, 5  ;;  %v7335_v11 = vrot.slane %v7333_v55, 4  ;;  %v1015_v12 = vrot.slane %v1014_v59, 4  ;;  %v270_v57 = vld [vmem:[%s23101_s5 + $0x134] sm:$0xf] }
 0x10f   : > { %v7326_v9 = vor.u32 %v7325_v62, %v7321_v38  ;;  %v7339_v14 = vshll.u32 %v18198_v49, 16  ;;  %v1022_v15 = vshrl.u32 %v265_v51, 16  ;;  %v1010_v16 = vsel %vm23119_vm5, %v1005_v5, %v1009_v47  ;;  %v271_v59 = vld [vmem:[%s23101_s5 + $0x138] sm:$0xf] }
 0x110   : > { %20681 = vmatprep.mubr.msk.bf16.mxu0 %vm1887_vm4, %v18302_v3  ;;  %v7336_v22 = vor.u32 %v7335_v11, %v7331_v7  ;;  %v1025_v18 = vshll.u32 %v265_v51, 16  ;;  %v1031_v24 = vshll.u32 %v266_v63, 16  ;;  %v1020_v27 = vsel %vm23119_vm5, %v1015_v12, %v1019_v60 }
 0x111   : > { %v7327_v20 = vrot.slane %v7326_v9, 4  ;;  %v7341_v28 = vrot.slane %v7339_v14, 5  ;;  %v1024_v17 = vrot.slane %v1022_v15, 4  ;;  %v17498_v31 = vcombine.low %v1010_v16, %v1020_v27  ;;  %v272_v15 = vld [vmem:[%s23101_s5 + $0x13c] sm:$0xf] }
 0x112   : > { %v7337_v34 = vrot.slane %v7336_v22, 4  ;;  %v1027_v36 = vrot.slane %v1025_v18, 5  ;;  %v1033_v32 = vrot.slane %v1031_v24, 5  ;;  %v1035_v25 = vshrl.u32 %v266_v63, 16  ;;  %v338_v18 = vld [vmem:[%s23101_s5 + $0x140] sm:$0x1] }
 0x113   : > { %v7332_v10 = vsel %vm23119_vm5, %v7327_v20, %v7331_v7  ;;  %v1041_v39 = vshll.u32 %v267_v8, 16  ;;  %20162 = vmatmul.mubr.msk.bf16.gmra.mrb[60].mxu1 %vm1887_vm4, %v17498_v31  ;;  %v18416_v38 = vrot.slane %v18400_v13, 9  ;;  %v9241_v47 = vrot.slane %v9239_v0, 4 }
 0x114   : > { %v7342_v45 = vsel %vm23119_vm5, %v7337_v34, %v7341_v28  ;;  %v1028_v40 = vor.u32 %v1027_v36, %v1024_v17  ;;  %v1037_v46 = vrot.slane %v1035_v25, 4  ;;  %v11346_v41 = vand.u32 %v18691_v30, %v23074_v4  ;;  %v22529_v28 = vld [vmem:[%s23101_s5 + $0x38] sm:$0xf]  ;;  %v22530_v34 = vld [vmem:[%s23101_s5 + $0x3c] sm:$0xf] }
 0x115   : > { %v18303_v37 = vcombine.low %v7332_v10, %v7342_v45  ;;  %v1043_v43 = vrot.slane %v1041_v39, 5  ;;  %v9240_v44 = vsel %vm23613_vm8, %v18416_v38, %v9239_v0  ;;  %v1045_v50 = vshrl.u32 %v267_v8, 16 }
 0x116   : > { %v1029_v49 = vrot.slane %v1028_v40, 4  ;;  %v1038_v53 = vor.u32 %v1037_v46, %v1033_v32  ;;  %v9243_v52 = vsel %vm23613_vm8, %v9241_v47, %v9242_v56  ;;  %v1051_v54 = vshll.u32 %v268_v33, 16  ;;  %20879 = vmatprep.subr.bf16.mxu0 %v11346_v41 }
 0x117   : > { %20682 = vmatmul.mubr.msk.bf16.gmra.mrb[60].mxu0 %vm1887_vm4, %v18303_v37  ;;  %v1055_v58 = vshrl.u32 %v268_v33, 16  ;;  %v18433_v21 = vcombine.low %v9240_v44, %v9243_v52  ;;  %v1047_v51 = vrot.slane %v1045_v50, 4  ;;  %v1061_v0 = vshll.u32 %v269_v42, 16 }
 0x118   : > { %v1034_v55 = vsel %vm23119_vm5, %v1029_v49, %v1033_v32  ;;  %v1039_v60 = vrot.slane %v1038_v53, 4  ;;  %v1053_v62 = vrot.slane %v1051_v54, 5  ;;  %v9246_v26 = vsel %vm23613_vm8, %v23141_v1, %v9245_v19  ;;  %v22531_v54 = vld [vmem:[%s23101_s5 + $0x40] sm:$0xf] }
 0x119   : > { %v1057_v63 = vrot.slane %v1055_v58, 4  ;;  %20751 = vmatprep.mubr.msk.bf16.mxu0 %vm1887_vm4, %v18433_v21  ;;  %v1048_v56 = vor.u32 %v1047_v51, %v1043_v43  ;;  %v1063_v3 = vrot.slane %v1061_v0, 5  ;;  %v9249_v5 = vsel %vm23613_vm8, %v23160_v29, %v9248_v23  ;;  %v275_v21 = vld [vmem:[%s23101_s5 + $0x14c] sm:$0xf] }
 0x11a   : > { %v1065_v7 = vshrl.u32 %v269_v42, 16  ;;  %v1044_v11 = vsel %vm23119_vm5, %v1039_v60, %v1043_v43  ;;  %v18434_v8 = vcombine.low %v9246_v26, %v9249_v5  ;;  %v1071_v12 = vshll.u32 %v270_v57, 16 }
 0x11b   : > { %v1058_v61 = vor.u32 %v1057_v63, %v1053_v62  ;;  %v17499_v1 = vcombine.low %v1034_v55, %v1044_v11  ;;  %v1049_v19 = vrot.slane %v1048_v56, 4  ;;  %v1075_v14 = vshrl.u32 %v270_v57, 16  ;;  %v274_v55 = vld [vmem:[%s23101_s5 + $0x148] sm:$0xf] }
 0x11c   : > { %v1067_v9 = vrot.slane %v1065_v7, 4  ;;  %v1073_v16 = vrot.slane %v1071_v12, 5  ;;  %v1081_v22 = vshll.u32 %v271_v59, 16  ;;  %v9250_v29 = vrot.slane %v9248_v23, 4 }
 0x11d   : > { %v1059_v13 = vrot.slane %v1058_v61, 4  ;;  %20165 = vmatprep.mubr.msk.bf16.mxu1 %vm1887_vm4, %v17499_v1  ;;  %v1054_v24 = vsel %vm23119_vm5, %v1049_v19, %v1053_v62  ;;  %v1077_v20 = vrot.slane %v1075_v14, 4  ;;  %v9251_v17 = vrot.slane %v22529_v28, 5  ;;  %v18401_v62 = vld [vmem:[%s23101_s5 + $0x48] sm:$0xe] }
 0x11e   : > { %v1068_v27 = vor.u32 %v1067_v9, %v1063_v3  ;;  %v1083_v31 = vrot.slane %v1081_v22, 5  ;;  %v9254_v36 = vrot.slane %v22530_v34, 5  ;;  %v1085_v2 = vshrl.u32 %v271_v59, 16  ;;  %v22532_v59 = vld [vmem:[%s23101_s5 + $0x44] sm:$0x1] }
 0x11f   : > { %v1064_v30 = vsel %vm23119_vm5, %v1059_v13, %v1063_v3  ;;  %20752 = vmatmul.mubr.msk.bf16.vlgmr.msra.gmra.mrb[0].mxu0 %vm1887_vm4, %v18434_v8  ;;  %v1078_v33 = vor.u32 %v1077_v20, %v1073_v16  ;;  %v9252_v10 = vsel %vm23613_vm8, %v9250_v29, %v9251_v17  ;;  %v9253_v25 = vrot.slane %v9251_v17, 4  ;;  %v276_v8 = vld [vmem:[%s23101_s5 + $0x150] sm:$0xf]  ;;  %v277_v14 = vld [vmem:[%s23101_s5 + $0x154] sm:$0xf] }
 0x120   : > { %v17500_v23 = vcombine.low %v1054_v24, %v1064_v30  ;;  %20880 = vmatpush3.bf16.msra.mxu0 %v11346_v41  ;;  %v1069_v32 = vrot.slane %v1068_v27, 4  ;;  %v1087_v39 = vrot.slane %v1085_v2, 4  ;;  %v1091_v42 = vshll.u32 %v272_v15, 16  ;;  %v273_v41 = vld [vmem:[%s23101_s5 + $0x144] sm:$0xf] }
 0x121   : > { %v1095_v45 = vshrl.u32 %v272_v15, 16  ;;  %v1079_v38 = vrot.slane %v1078_v33, 4  ;;  %v1101_v37 = vshll.u32 %v338_v18, 16  ;;  %v9256_v46 = vrot.slane %v9254_v36, 4  ;;  %v22533_v28 = vld [vmem:[%s23101_s5 + $0x4c] sm:$0xf] }
 0x122   : > { %20166 = vmatmul.mubr.msk.bf16.gmra.mrb[64].mxu1 %vm1887_vm4, %v17500_v23  ;;  %v1074_v40 = vsel %vm23119_vm5, %v1069_v32, %v1073_v16  ;;  %v9255_v43 = vsel %vm23613_vm8, %v9253_v25, %v9254_v36  ;;  %v1088_v47 = vor.u32 %v1087_v39, %v1083_v31  ;;  %v1093_v49 = vrot.slane %v1091_v42, 5  ;;  %v22534_v30 = vld [vmem:[%s23101_s5 + $0x50] sm:$0xf] }
 0x123   : > { %v1097_v44 = vrot.slane %v1095_v45, 4  ;;  %v1084_v50 = vsel %vm23119_vm5, %v1079_v38, %v1083_v31  ;;  %v18435_v53 = vcombine.low %v9252_v10, %v9255_v43  ;;  %v1103_v52 = vrot.slane %v1101_v37, 5  ;;  %v278_v37 = vld [vmem:[%s23101_s5 + $0x158] sm:$0xf] }
 0x124   : > { %v9257_v58 = vrot.slane %v22531_v54, 5  ;;  %v17501_v51 = vcombine.low %v1074_v40, %v1084_v50  ;;  %v1089_v0 = vrot.slane %v1088_v47, 4  ;;  %v9260_v60 = vrot.slane %v22532_v59, 5  ;;  %v279_v54 = vld [vmem:[%s23101_s5 + $0x15c] sm:$0xf] }
 0x125   : > { %v1098_v57 = vor.u32 %v1097_v44, %v1093_v49  ;;  %20755 = vmatprep.mubr.msk.bf16.mxu0 %vm1887_vm4, %v18435_v53  ;;  %v1106_v56 = vshrl.u32 %v273_v41, 16  ;;  %v1109_v3 = vshll.u32 %v273_v41, 16  ;;  %v1115_v11 = vshll.u32 %v274_v55, 16  ;;  %v22535_v53 = vld [vmem:[%s23101_s5 + $0x54] sm:$0xf] }
 0x126   : > { %v9258_v63 = vsel %vm23613_vm8, %v9256_v46, %v9257_v58  ;;  %v9259_v26 = vrot.slane %v9257_v58, 4  ;;  %20169 = vmatprep.mubr.msk.bf16.mxu1 %vm1887_vm4, %v17501_v51  ;;  %v1094_v5 = vsel %vm23119_vm5, %v1089_v0, %v1093_v49  ;;  %v1119_v61 = vshrl.u32 %v274_v55, 16  ;;  %v22536_v55 = vld [vmem:[%s23101_s5 + $0x58] sm:$0xf] }
 0x127   : > { %v1099_v7 = vrot.slane %v1098_v57, 4  ;;  %v1108_v1 = vrot.slane %v1106_v56, 4  ;;  %v1111_v19 = vrot.slane %v1109_v3, 5  ;;  %v1125_v9 = vshll.u32 %v275_v21, 16 }
 0x128   : > { %v9261_v12 = vsel %vm23613_vm8, %v9259_v26, %v9260_v60  ;;  %v1117_v16 = vrot.slane %v1115_v11, 5  ;;  %v1121_v22 = vrot.slane %v1119_v61, 4  ;;  %v18417_v27 = vrot.slane %v18401_v62, 9 }
 0x129   : > { %v1104_v15 = vsel %vm23119_vm5, %v1099_v7, %v1103_v52  ;;  %v18436_v13 = vcombine.low %v9258_v63, %v9261_v12  ;;  %v1112_v18 = vor.u32 %v1111_v19, %v1108_v1  ;;  %v1127_v24 = vrot.slane %v1125_v9, 5  ;;  %v339_v12 = vld [vmem:[%s23101_s5 + $0x164] sm:$0x1] }
 0x12a   : > { %v17502_v29 = vcombine.low %v1094_v5, %v1104_v15  ;;  %v1122_v20 = vor.u32 %v1121_v22, %v1117_v16  ;;  %v9264_v17 = vrot.slane %v22533_v28, 5  ;;  %v9267_v31 = vrot.slane %v22534_v30, 5  ;;  %v280_v5 = vld [vmem:[%s23101_s5 + $0x160] sm:$0xf] }
 0x12b   : > { %20756 = vmatmul.mubr.msk.bf16.gmra.mrb[4].mxu0 %vm1887_vm4, %v18436_v13  ;;  %v1129_v34 = vshrl.u32 %v275_v21, 16  ;;  %v1113_v36 = vrot.slane %v1112_v18, 4  ;;  %v1135_v2 = vshll.u32 %v276_v8, 16  ;;  %v1139_v23 = vshrl.u32 %v276_v8, 16  ;;  %v22537_v13 = vld [vmem:[%s23101_s5 + $0x5c] sm:$0xf] }
 0x12c   : > { %20170 = vmatmul.mubr.msk.bf16.gmra.mrb[68].mxu1 %vm1887_vm4, %v17502_v29  ;;  %v1145_v32 = vshll.u32 %v277_v14, 16  ;;  %v1123_v33 = vrot.slane %v1122_v20, 4  ;;  %v9265_v10 = vsel %vm23613_vm8, %v18417_v27, %v9264_v17  ;;  %v9266_v25 = vrot.slane %v9264_v17, 4  ;;  %v22538_v22 = vld [vmem:[%s23101_s5 + $0x60] sm:$0xf] }
 0x12d   : > { %v1131_v39 = vrot.slane %v1129_v34, 4  ;;  %v1118_v42 = vsel %vm23119_vm5, %v1113_v36, %v1117_v16  ;;  %v1137_v45 = vrot.slane %v1135_v2, 5  ;;  %v1141_v40 = vrot.slane %v1139_v23, 4 }
 0x12e   : > { %v1147_v38 = vrot.slane %v1145_v32, 5  ;;  %v1128_v46 = vsel %vm23119_vm5, %v1123_v33, %v1127_v24  ;;  %v9268_v43 = vsel %vm23613_vm8, %v9266_v25, %v9267_v31  ;;  %v9269_v49 = vrot.slane %v9267_v31, 4  ;;  %v281_v33 = vld [vmem:[%s23101_s5 + $0x168] sm:$0xf] }
 0x12f   : > { %v1132_v47 = vor.u32 %v1131_v39, %v1127_v24  ;;  %v17503_v44 = vcombine.low %v1118_v42, %v1128_v46  ;;  %v18437_v41 = vcombine.low %v9265_v10, %v9268_v43  ;;  %v1142_v50 = vor.u32 %v1141_v40, %v1137_v45  ;;  %v283_v40 = vld [vmem:[%s23101_s5 + $0x170] sm:$0xf]  ;;  %v22539_v43 = vld [vmem:[%s23101_s5 + $0x64] sm:$0xf] }
 0x130   : > { %v9270_v52 = vrot.slane %v22535_v53, 5  ;;  %v9273_v21 = vrot.slane %v22536_v55, 5  ;;  %v1149_v51 = vshrl.u32 %v277_v14, 16  ;;  %v1155_v0 = vshll.u32 %v278_v37, 16 }
 0x131   : > { %v1133_v58 = vrot.slane %v1132_v47, 4  ;;  %20173 = vmatprep.mubr.msk.bf16.mxu1 %vm1887_vm4, %v17503_v44  ;;  %20759 = vmatprep.mubr.msk.bf16.mxu0 %vm1887_vm4, %v18437_v41  ;;  %v1143_v57 = vrot.slane %v1142_v50, 4  ;;  %v1159_v62 = vshrl.u32 %v278_v37, 16  ;;  %v1165_v3 = vshll.u32 %v279_v54, 16  ;;  %v22540_v44 = vld [vmem:[%s23101_s5 + $0x68] sm:$0x1] }
 0x132   : > { %v9271_v59 = vsel %vm23613_vm8, %v9269_v49, %v9270_v52  ;;  %v9272_v60 = vrot.slane %v9270_v52, 4  ;;  %v1151_v26 = vrot.slane %v1149_v51, 4  ;;  %v1157_v56 = vrot.slane %v1155_v0, 5 }
 0x133   : > { %v1138_v63 = vsel %vm23119_vm5, %v1133_v58, %v1137_v45  ;;  %v1148_v7 = vsel %vm23119_vm5, %v1143_v57, %v1147_v38  ;;  %v1161_v61 = vrot.slane %v1159_v62, 4  ;;  %v9275_v8 = vrot.slane %v9273_v21, 4  ;;  %v282_v45 = vld [vmem:[%s23101_s5 + $0x16c] sm:$0xf]  ;;  %v285_v62 = vld [vmem:[%s23101_s5 + $0x178] sm:$0xf] }
 0x134   : > { %v9274_v11 = vsel %vm23613_vm8, %v9272_v60, %v9273_v21  ;;  %v17504_v1 = vcombine.low %v1138_v63, %v1148_v7  ;;  %v1152_v9 = vor.u32 %v1151_v26, %v1147_v38  ;;  %v1167_v14 = vrot.slane %v1165_v3, 5  ;;  %v284_v21 = vld [vmem:[%s23101_s5 + $0x174] sm:$0xf]  ;;  %v18402_v60 = vld [vmem:[%s23101_s5 + $0x6c] sm:$0xe] }
 0x135   : > { %v18438_v19 = vcombine.low %v9271_v59, %v9274_v11  ;;  %v1162_v15 = vor.u32 %v1161_v61, %v1157_v56  ;;  %v9276_v16 = vrot.slane %v22537_v13, 5  ;;  %v9279_v29 = vrot.slane %v22538_v22, 5 }
 0x136   : > { %v1169_v18 = vshrl.u32 %v279_v54, 16  ;;  %20174 = vmatmul.mubr.msk.bf16.gmra.mrb[72].mxu1 %vm1887_vm4, %v17504_v1  ;;  %v1153_v24 = vrot.slane %v1152_v9, 4  ;;  %v1175_v27 = vshll.u32 %v280_v5, 16  ;;  %v1179_v20 = vshrl.u32 %v280_v5, 16  ;;  %v22541_v1 = vld [vmem:[%s23101_s5 + $0x70] sm:$0xf] }
 0x137   : > { %20760 = vmatmul.mubr.msk.bf16.gmra.mrb[8].mxu0 %vm1887_vm4, %v18438_v19  ;;  %v1185_v28 = vshll.u32 %v339_v12, 16  ;;  %v1163_v17 = vrot.slane %v1162_v15, 4  ;;  %v9277_v30 = vsel %vm23613_vm8, %v9275_v8, %v9276_v16  ;;  %v9278_v31 = vrot.slane %v9276_v16, 4  ;;  %v22542_v9 = vld [vmem:[%s23101_s5 + $0x74] sm:$0xf] }
 0x138   : > { %v1171_v34 = vrot.slane %v1169_v18, 4  ;;  %v1158_v36 = vsel %vm23119_vm5, %v1153_v24, %v1157_v56  ;;  %v1177_v2 = vrot.slane %v1175_v27, 5  ;;  %v1181_v23 = vrot.slane %v1179_v20, 4  ;;  %v286_v20 = vld [vmem:[%s23101_s5 + $0x17c] sm:$0xf] }
 0x139   : > { %v1187_v32 = vrot.slane %v1185_v28, 5  ;;  %v1168_v10 = vsel %vm23119_vm5, %v1163_v17, %v1167_v14  ;;  %v9280_v25 = vsel %vm23613_vm8, %v9278_v31, %v9279_v29  ;;  %v9281_v42 = vrot.slane %v9279_v29, 4 }
 0x13a   : > { %v1172_v39 = vor.u32 %v1171_v34, %v1167_v14  ;;  %v17505_v38 = vcombine.low %v1158_v36, %v1168_v10  ;;  %v18439_v37 = vcombine.low %v9277_v30, %v9280_v25  ;;  %v1182_v46 = vor.u32 %v1181_v23, %v1177_v2  ;;  %v287_v34 = vld [vmem:[%s23101_s5 + $0x180] sm:$0xf] }
 0x13b   : > { %v9282_v47 = vrot.slane %v22539_v43, 5  ;;  %v9285_v41 = vrot.slane %v22540_v44, 5  ;;  %v1190_v50 = vshrl.u32 %v281_v33, 16  ;;  %v1193_v53 = vshll.u32 %v281_v33, 16 }
 0x13c   : > { %v1173_v49 = vrot.slane %v1172_v39, 4  ;;  %20177 = vmatprep.mubr.msk.bf16.mxu1 %vm1887_vm4, %v17505_v38  ;;  %20763 = vmatprep.mubr.msk.bf16.mxu0 %vm1887_vm4, %v18439_v37  ;;  %v1183_v52 = vrot.slane %v1182_v46, 4  ;;  %v1199_v55 = vshll.u32 %v282_v45, 16  ;;  %v1203_v59 = vshrl.u32 %v282_v45, 16  ;;  %v22543_v39 = vld [vmem:[%s23101_s5 + $0x78] sm:$0xf] }
 0x13d   : > { %v9283_v54 = vsel %vm23613_vm8, %v9281_v42, %v9282_v47  ;;  %v9284_v58 = vrot.slane %v9282_v47, 4  ;;  %v1192_v0 = vrot.slane %v1190_v50, 4  ;;  %v1195_v57 = vrot.slane %v1193_v53, 5  ;;  %v22544_v38 = vld [vmem:[%s23101_s5 + $0x7c] sm:$0xf] }
 0x13e   : > { %v1178_v51 = vsel %vm23119_vm5, %v1173_v49, %v1177_v2  ;;  %v1188_v63 = vsel %vm23119_vm5, %v1183_v52, %v1187_v32  ;;  %v1201_v56 = vrot.slane %v1199_v55, 5  ;;  %v1209_v3 = vshll.u32 %v283_v40, 16 }
 0x13f   : > { %v9286_v26 = vsel %vm23613_vm8, %v9284_v58, %v9285_v41  ;;  %v17506_v5 = vcombine.low %v1178_v51, %v1188_v63  ;;  %v1196_v11 = vor.u32 %v1195_v57, %v1192_v0  ;;  %v1205_v61 = vrot.slane %v1203_v59, 4  ;;  %v288_v51 = vld [vmem:[%s23101_s5 + $0x184] sm:$0xf] }
 0x140   : > { %v18440_v7 = vcombine.low %v9283_v54, %v9286_v26  ;;  %v1211_v8 = vrot.slane %v1209_v3, 5  ;;  %v18418_v12 = vrot.slane %v18402_v60, 9  ;;  %v9289_v19 = vrot.slane %v22541_v1, 5  ;;  %v289_v1 = vld [vmem:[%s23101_s5 + $0x18c] sm:$0xf] }
 0x141   : > { %v9292_v14 = vrot.slane %v22542_v9, 5  ;;  %20178 = vmatmul.mubr.msk.bf16.gmra.mrb[76].mxu1 %vm1887_vm4, %v17506_v5  ;;  %v1197_v15 = vrot.slane %v1196_v11, 4  ;;  %v1206_v13 = vor.u32 %v1205_v61, %v1201_v56  ;;  %v1213_v16 = vshrl.u32 %v283_v40, 16  ;;  %v22546_v5 = vld [vmem:[%s23101_s5 + $0x84] sm:$0xf] }
 0x142   : > { %20764 = vmatmul.mubr.msk.bf16.gmra.mrb[12].mxu0 %vm1887_vm4, %v18440_v7  ;;  %v1219_v22 = vshll.u32 %v284_v21, 16  ;;  %v9290_v29 = vsel %vm23613_vm8, %v18418_v12, %v9289_v19  ;;  %v9291_v18 = vrot.slane %v9289_v19, 4  ;;  %v1223_v24 = vshrl.u32 %v284_v21, 16 }
 0x143   : > { %v1229_v27 = vshll.u32 %v285_v62, 16  ;;  %v1202_v28 = vsel %vm23119_vm5, %v1197_v15, %v1201_v56  ;;  %v1207_v17 = vrot.slane %v1206_v13, 4  ;;  %v1215_v30 = vrot.slane %v1213_v16, 4  ;;  %v22545_v56 = vld [vmem:[%s23101_s5 + $0x80] sm:$0xf] }
 0x144   : > { %v1221_v31 = vrot.slane %v1219_v22, 5  ;;  %v9293_v36 = vsel %vm23613_vm8, %v9291_v18, %v9292_v14  ;;  %v1225_v2 = vrot.slane %v1223_v24, 4  ;;  %v9294_v32 = vrot.slane %v9292_v14, 4 }
 0x145   : > { %v1231_v23 = vrot.slane %v1229_v27, 5  ;;  %v1212_v33 = vsel %vm23119_vm5, %v1207_v17, %v1211_v8  ;;  %v18441_v10 = vcombine.low %v9290_v29, %v9293_v36  ;;  %v1216_v25 = vor.u32 %v1215_v30, %v1211_v8  ;;  %v290_v36 = vld [vmem:[%s23101_s5 + $0x190] sm:$0xf] }
 0x146   : > { %v9295_v42 = vrot.slane %v22543_v39, 5  ;;  %v17507_v45 = vcombine.low %v1202_v28, %v1212_v33  ;;  %v1226_v40 = vor.u32 %v1225_v2, %v1221_v31  ;;  %v9298_v37 = vrot.slane %v22544_v38, 5  ;;  %v291_v2 = vld [vmem:[%s23101_s5 + $0x194] sm:$0xf]  ;;  %v22548_v33 = vld [vmem:[%s23101_s5 + $0x8c] sm:$0x1] }
 0x147   : > { %v1233_v46 = vshrl.u32 %v285_v62, 16  ;;  %20767 = vmatprep.mubr.msk.bf16.mxu0 %vm1887_vm4, %v18441_v10  ;;  %v1217_v43 = vrot.slane %v1216_v25, 4  ;;  %v1239_v44 = vshll.u32 %v286_v20, 16  ;;  %v1243_v53 = vshrl.u32 %v286_v20, 16  ;;  %v340_v62 = vld [vmem:[%s23101_s5 + $0x188] sm:$0x1] }
 0x148   : > { %v9296_v47 = vsel %vm23613_vm8, %v9294_v32, %v9295_v42  ;;  %v9297_v49 = vrot.slane %v9295_v42, 4  ;;  %20181 = vmatprep.mubr.msk.bf16.mxu1 %vm1887_vm4, %v17507_v45  ;;  %v1227_v41 = vrot.slane %v1226_v40, 4  ;;  %v1249_v52 = vshll.u32 %v287_v34, 16  ;;  %v18403_v38 = vld [vmem:[%s23101_s5 + $0x90] sm:$0xe] }
 0x149   : > { %v1235_v50 = vrot.slane %v1233_v46, 4  ;;  %v1222_v54 = vsel %vm23119_vm5, %v1217_v43, %v1221_v31  ;;  %v1241_v55 = vrot.slane %v1239_v44, 5  ;;  %v9300_v21 = vrot.slane %v9298_v37, 4  ;;  %v22547_v31 = vld [vmem:[%s23101_s5 + $0x88] sm:$0xf] }
 0x14a   : > { %v9299_v58 = vsel %vm23613_vm8, %v9297_v49, %v9298_v37  ;;  %v1232_v0 = vsel %vm23119_vm5, %v1227_v41, %v1231_v23  ;;  %v1245_v60 = vrot.slane %v1243_v53, 4  ;;  %v1251_v26 = vrot.slane %v1249_v52, 5  ;;  %v292_v49 = vld [vmem:[%s23101_s5 + $0x198] sm:$0xf]  ;;  %v293_v44 = vld [vmem:[%s23101_s5 + $0x19c] sm:$0xf] }
 0x14b   : > { %v18442_v57 = vcombine.low %v9296_v47, %v9299_v58  ;;  %v1236_v59 = vor.u32 %v1235_v50, %v1231_v23  ;;  %v17508_v63 = vcombine.low %v1222_v54, %v1232_v0  ;;  %v9301_v3 = vrot.slane %v22545_v56, 5 }
 0x14c   : > { %v9304_v7 = vrot.slane %v22546_v5, 5  ;;  %v1246_v61 = vor.u32 %v1245_v60, %v1241_v55  ;;  %v1253_v8 = vshrl.u32 %v287_v34, 16  ;;  %v1259_v12 = vshll.u32 %v288_v51, 16 }
 0x14d   : > { %20768 = vmatmul.mubr.msk.bf16.gmra.mrb[16].mxu0 %vm1887_vm4, %v18442_v57  ;;  %v1237_v11 = vrot.slane %v1236_v59, 4  ;;  %20182 = vmatmul.mubr.msk.bf16.gmra.mrb[80].mxu1 %vm1887_vm4, %v17508_v63  ;;  %v9302_v19 = vsel %vm23613_vm8, %v9300_v21, %v9301_v3  ;;  %v9303_v9 = vrot.slane %v9301_v3, 4  ;;  %v1263_v14 = vshrl.u32 %v288_v51, 16 }
 0x14e   : > { %v1269_v15 = vshll.u32 %v340_v62, 16  ;;  %v1247_v16 = vrot.slane %v1246_v61, 4  ;;  %v1255_v22 = vrot.slane %v1253_v8, 4  ;;  %v1261_v29 = vrot.slane %v1259_v12, 5  ;;  %v22549_v62 = vld [vmem:[%s23101_s5 + $0x94] sm:$0xf] }
 0x14f   : > { %v1242_v13 = vsel %vm23119_vm5, %v1237_v11, %v1241_v55  ;;  %v9305_v18 = vsel %vm23613_vm8, %v9303_v9, %v9304_v7  ;;  %v1265_v24 = vrot.slane %v1263_v14, 4  ;;  %v9306_v20 = vrot.slane %v9304_v7, 4 }
 0x150   : > { %v1271_v27 = vrot.slane %v1269_v15, 5  ;;  %v1252_v28 = vsel %vm23119_vm5, %v1247_v16, %v1251_v26  ;;  %v18443_v17 = vcombine.low %v9302_v19, %v9305_v18  ;;  %v1256_v30 = vor.u32 %v1255_v22, %v1251_v26  ;;  %v22550_v26 = vld [vmem:[%s23101_s5 + $0x98] sm:$0xf]  ;;  %v294_v16 = vld [vmem:[%s23101_s5 + $0x1a0] sm:$0xf] }
 0x151   : > { %v9307_v34 = vrot.slane %v22547_v31, 5  ;;  %v17509_v23 = vcombine.low %v1242_v13, %v1252_v28  ;;  %v1266_v32 = vor.u32 %v1265_v24, %v1261_v29  ;;  %v9310_v10 = vrot.slane %v22548_v33, 5 }
 0x152   : > { %v1274_v25 = vshrl.u32 %v289_v1, 16  ;;  %20771 = vmatprep.mubr.msk.bf16.mxu0 %vm1887_vm4, %v18443_v17  ;;  %v1257_v39 = vrot.slane %v1256_v30, 4  ;;  %v1277_v40 = vshll.u32 %v289_v1, 16  ;;  %v1283_v43 = vshll.u32 %v290_v36, 16  ;;  %v22551_v30 = vld [vmem:[%s23101_s5 + $0x9c] sm:$0xf] }
 0x153   : > { %v9308_v42 = vsel %vm23613_vm8, %v9306_v20, %v9307_v34  ;;  %v9309_v45 = vrot.slane %v9307_v34, 4  ;;  %20185 = vmatprep.mubr.msk.bf16.mxu1 %vm1887_vm4, %v17509_v23  ;;  %v1267_v37 = vrot.slane %v1266_v32, 4  ;;  %v1287_v47 = vshrl.u32 %v290_v36, 16  ;;  %v22552_v36 = vld [vmem:[%s23101_s5 + $0xa0] sm:$0xf] }
 0x154   : > { %v1276_v46 = vrot.slane %v1274_v25, 4  ;;  %v1262_v41 = vsel %vm23119_vm5, %v1257_v39, %v1261_v29  ;;  %v1279_v53 = vrot.slane %v1277_v40, 5  ;;  %v1293_v52 = vshll.u32 %v291_v2, 16 }
 0x155   : > { %v9311_v50 = vsel %vm23613_vm8, %v9309_v45, %v9310_v10  ;;  %v1272_v54 = vsel %vm23119_vm5, %v1267_v37, %v1271_v27  ;;  %v1285_v55 = vrot.slane %v1283_v43, 5  ;;  %v1289_v21 = vrot.slane %v1287_v47, 4  ;;  %v295_v27 = vld [vmem:[%s23101_s5 + $0x1a4] sm:$0xf] }
 0x156   : > { %v18444_v58 = vcombine.low %v9308_v42, %v9311_v50  ;;  %v17510_v51 = vcombine.low %v1262_v41, %v1272_v54  ;;  %v1280_v0 = vor.u32 %v1279_v53, %v1276_v46  ;;  %v1295_v57 = vrot.slane %v1293_v52, 5 }
 0x157   : > { %v18419_v59 = vrot.slane %v18403_v38, 9  ;;  %v1290_v60 = vor.u32 %v1289_v21, %v1285_v55  ;;  %v9314_v63 = vrot.slane %v22549_v62, 5  ;;  %v9317_v56 = vrot.slane %v22550_v26, 5  ;;  %v22554_v21 = vld [vmem:[%s23101_s5 + $0xa8] sm:$0xf] }
 0x158   : > { %20772 = vmatmul.mubr.msk.bf16.gmra.mrb[20].mxu0 %vm1887_vm4, %v18444_v58  ;;  %v1297_v3 = vshrl.u32 %v291_v2, 16  ;;  %20186 = vmatmul.mubr.msk.bf16.gmra.mrb[84].mxu1 %vm1887_vm4, %v17510_v51  ;;  %v1281_v5 = vrot.slane %v1280_v0, 4  ;;  %v1303_v7 = vshll.u32 %v292_v49, 16  ;;  %v1307_v11 = vshrl.u32 %v292_v49, 16  ;;  %v296_v49 = vld [vmem:[%s23101_s5 + $0x1a8] sm:$0xf] }
 0x159   : > { %v1313_v61 = vshll.u32 %v293_v44, 16  ;;  %v1291_v8 = vrot.slane %v1290_v60, 4  ;;  %v9315_v12 = vsel %vm23613_vm8, %v18419_v59, %v9314_v63  ;;  %v9316_v1 = vrot.slane %v9314_v63, 4  ;;  %v22553_v58 = vld [vmem:[%s23101_s5 + $0xa4] sm:$0xf] }
 0x15a   : > { %v1299_v19 = vrot.slane %v1297_v3, 4  ;;  %v1286_v9 = vsel %vm23119_vm5, %v1281_v5, %v1285_v55  ;;  %v1305_v14 = vrot.slane %v1303_v7, 5  ;;  %v1309_v15 = vrot.slane %v1307_v11, 4  ;;  %v297_v63 = vld [vmem:[%s23101_s5 + $0x1b0] sm:$0xf] }
 0x15b   : > { %v1315_v13 = vrot.slane %v1313_v61, 5  ;;  %v1296_v22 = vsel %vm23119_vm5, %v1291_v8, %v1295_v57  ;;  %v9318_v29 = vsel %vm23613_vm8, %v9316_v1, %v9317_v56  ;;  %v9319_v24 = vrot.slane %v9317_v56, 4  ;;  %v298_v7 = vld [vmem:[%s23101_s5 + $0x1b4] sm:$0xf] }
 0x15c   : > { %v1300_v18 = vor.u32 %v1299_v19, %v1295_v57  ;;  %v17511_v20 = vcombine.low %v1286_v9, %v1296_v22  ;;  %v18445_v28 = vcombine.low %v9315_v12, %v9318_v29  ;;  %v1310_v17 = vor.u32 %v1309_v15, %v1305_v14  ;;  %v22555_v22 = vld [vmem:[%s23101_s5 + $0xac] sm:$0xf] }
 0x15d   : > { %v9320_v31 = vrot.slane %v22551_v30, 5  ;;  %v9323_v2 = vrot.slane %v22552_v36, 5  ;;  %v1317_v23 = vshrl.u32 %v293_v44, 16  ;;  %v1323_v32 = vshll.u32 %v294_v16, 16  ;;  %v341_v44 = vld [vmem:[%s23101_s5 + $0x1ac] sm:$0x1] }
 0x15e   : > { %v1301_v34 = vrot.slane %v1300_v18, 4  ;;  %20189 = vmatprep.mubr.msk.bf16.mxu1 %vm1887_vm4, %v17511_v20  ;;  %20775 = vmatprep.mubr.msk.bf16.mxu0 %vm1887_vm4, %v18445_v28  ;;  %v1311_v33 = vrot.slane %v1310_v17, 4  ;;  %v1327_v39 = vshrl.u32 %v294_v16, 16  ;;  %v1333_v38 = vshll.u32 %v295_v27, 16  ;;  %v299_v20 = vld [vmem:[%s23101_s5 + $0x1b8] sm:$0xf] }
 0x15f   : > { %v9321_v10 = vsel %vm23613_vm8, %v9319_v24, %v9320_v31  ;;  %v9322_v25 = vrot.slane %v9320_v31, 4  ;;  %v1319_v45 = vrot.slane %v1317_v23, 4  ;;  %v1325_v40 = vrot.slane %v1323_v32, 5  ;;  %v22556_v24 = vld [vmem:[%s23101_s5 + $0xb0] sm:$0x1] }
 0x160   : > { %v1306_v42 = vsel %vm23119_vm5, %v1301_v34, %v1305_v14  ;;  %v1316_v37 = vsel %vm23119_vm5, %v1311_v33, %v1315_v13  ;;  %v1329_v43 = vrot.slane %v1327_v39, 4  ;;  %v9325_v47 = vrot.slane %v9323_v2, 4 }
 0x161   : > { %v9324_v46 = vsel %vm23613_vm8, %v9322_v25, %v9323_v2  ;;  %v17512_v41 = vcombine.low %v1306_v42, %v1316_v37  ;;  %v1320_v53 = vor.u32 %v1319_v45, %v1315_v13  ;;  %v1335_v52 = vrot.slane %v1333_v38, 5  ;;  %v300_v2 = vld [vmem:[%s23101_s5 + $0x1bc] sm:$0xf]  ;;  %v18404_v25 = vld [vmem:[%s23101_s5 + $0xb4] sm:$0xe] }
 0x162   : > { %v18446_v50 = vcombine.low %v9321_v10, %v9324_v46  ;;  %v1330_v54 = vor.u32 %v1329_v43, %v1325_v40  ;;  %v9326_v55 = vrot.slane %v22553_v58, 5  ;;  %v9329_v51 = vrot.slane %v22554_v21, 5  ;;  %v301_v38 = vld [vmem:[%s23101_s5 + $0x1c0] sm:$0xf] }
 0x163   : > { %v1337_v0 = vshrl.u32 %v295_v27, 16  ;;  %20190 = vmatmul.mubr.msk.bf16.gmra.mrb[88].mxu1 %vm1887_vm4, %v17512_v41  ;;  %v1321_v57 = vrot.slane %v1320_v53, 4  ;;  %v1343_v59 = vshll.u32 %v296_v49, 16  ;;  %v1347_v60 = vshrl.u32 %v296_v49, 16  ;;  %v22557_v41 = vld [vmem:[%s23101_s5 + $0xb8] sm:$0xf] }
 0x164   : > { %20776 = vmatmul.mubr.msk.bf16.gmra.mrb[24].mxu0 %vm1887_vm4, %v18446_v50  ;;  %v1353_v62 = vshll.u32 %v341_v44, 16  ;;  %v1331_v26 = vrot.slane %v1330_v54, 4  ;;  %v9327_v56 = vsel %vm23613_vm8, %v9325_v47, %v9326_v55  ;;  %v9328_v3 = vrot.slane %v9326_v55, 4  ;;  %v22558_v53 = vld [vmem:[%s23101_s5 + $0xbc] sm:$0xf] }
 0x165   : > { %v1339_v5 = vrot.slane %v1337_v0, 4  ;;  %v1326_v11 = vsel %vm23119_vm5, %v1321_v57, %v1325_v40  ;;  %v1345_v61 = vrot.slane %v1343_v59, 5  ;;  %v1349_v8 = vrot.slane %v1347_v60, 4 }
 0x166   : > { %v1355_v12 = vrot.slane %v1353_v62, 5  ;;  %v1336_v1 = vsel %vm23119_vm5, %v1331_v26, %v1335_v52  ;;  %v9330_v19 = vsel %vm23613_vm8, %v9328_v3, %v9329_v51  ;;  %v9331_v14 = vrot.slane %v9329_v51, 4 }
 0x167   : > { %v1340_v9 = vor.u32 %v1339_v5, %v1335_v52  ;;  %v17513_v15 = vcombine.low %v1326_v11, %v1336_v1  ;;  %v18447_v13 = vcombine.low %v9327_v56, %v9330_v19  ;;  %v1350_v16 = vor.u32 %v1349_v8, %v1345_v61  ;;  %v302_v11 = vld [vmem:[%s23101_s5 + $0x1c4] sm:$0xf]  ;;  %v22559_v1 = vld [vmem:[%s23101_s5 + $0xc0] sm:$0xf] }
 0x168   : > { %v9332_v29 = vrot.slane %v22555_v22, 5  ;;  %v9335_v27 = vrot.slane %v22556_v24, 5  ;;  %v1358_v28 = vshrl.u32 %v297_v63, 16  ;;  %v1361_v17 = vshll.u32 %v297_v63, 16 }
 0x169   : > { %v1341_v18 = vrot.slane %v1340_v9, 4  ;;  %20193 = vmatprep.mubr.msk.bf16.mxu1 %vm1887_vm4, %v17513_v15  ;;  %20779 = vmatprep.mubr.msk.bf16.mxu0 %vm1887_vm4, %v18447_v13  ;;  %v1351_v30 = vrot.slane %v1350_v16, 4  ;;  %v1367_v36 = vshll.u32 %v298_v7, 16  ;;  %v1371_v10 = vshrl.u32 %v298_v7, 16  ;;  %v303_v9 = vld [vmem:[%s23101_s5 + $0x1c8] sm:$0xf] }
 0x16a   : > { %v9333_v31 = vsel %vm23613_vm8, %v9331_v14, %v9332_v29  ;;  %v9334_v34 = vrot.slane %v9332_v29, 4  ;;  %v1360_v32 = vrot.slane %v1358_v28, 4  ;;  %v1363_v33 = vrot.slane %v1361_v17, 5  ;;  %v22560_v13 = vld [vmem:[%s23101_s5 + $0xc4] sm:$0xf] }
 0x16b   : > { %v1346_v23 = vsel %vm23119_vm5, %v1341_v18, %v1345_v61  ;;  %v1356_v39 = vsel %vm23119_vm5, %v1351_v30, %v1355_v12  ;;  %v1369_v45 = vrot.slane %v1367_v36, 5  ;;  %v1377_v40 = vshll.u32 %v299_v20, 16 }
 0x16c   : > { %v9336_v42 = vsel %vm23613_vm8, %v9334_v34, %v9335_v27  ;;  %v17514_v37 = vcombine.low %v1346_v23, %v1356_v39  ;;  %v1364_v43 = vor.u32 %v1363_v33, %v1360_v32  ;;  %v1373_v47 = vrot.slane %v1371_v10, 4  ;;  %v342_v39 = vld [vmem:[%s23101_s5 + $0x1d0] sm:$0x1] }
 0x16d   : > { %v18448_v46 = vcombine.low %v9333_v31, %v9336_v42  ;;  %v1379_v49 = vrot.slane %v1377_v40, 5  ;;  %v18420_v44 = vrot.slane %v18404_v25, 9  ;;  %v9339_v50 = vrot.slane %v22557_v41, 5  ;;  %v22561_v40 = vld [vmem:[%s23101_s5 + $0xc8] sm:$0xf] }
 0x16e   : > { %v9342_v52 = vrot.slane %v22558_v53, 5  ;;  %20194 = vmatmul.mubr.msk.bf16.gmra.mrb[92].mxu1 %vm1887_vm4, %v17514_v37  ;;  %v1365_v54 = vrot.slane %v1364_v43, 4  ;;  %v1374_v58 = vor.u32 %v1373_v47, %v1369_v45  ;;  %v1381_v55 = vshrl.u32 %v299_v20, 16  ;;  %v304_v20 = vld [vmem:[%s23101_s5 + $0x1cc] sm:$0xf] }
 0x16f   : > { %20780 = vmatmul.mubr.msk.bf16.gmra.mrb[28].mxu0 %vm1887_vm4, %v18448_v46  ;;  %v1387_v21 = vshll.u32 %v300_v2, 16  ;;  %v9340_v51 = vsel %vm23613_vm8, %v18420_v44, %v9339_v50  ;;  %v9341_v0 = vrot.slane %v9339_v50, 4  ;;  %v1391_v57 = vshrl.u32 %v300_v2, 16  ;;  %v22562_v37 = vld [vmem:[%s23101_s5 + $0xcc] sm:$0xf] }
 0x170   : > { %v1397_v59 = vshll.u32 %v301_v38, 16  ;;  %v1370_v60 = vsel %vm23119_vm5, %v1365_v54, %v1369_v45  ;;  %v1375_v62 = vrot.slane %v1374_v58, 4  ;;  %v1383_v63 = vrot.slane %v1381_v55, 4  ;;  %v305_v54 = vld [vmem:[%s23101_s5 + $0x1d4] sm:$0xf] }
 0x171   : > { %v1389_v26 = vrot.slane %v1387_v21, 5  ;;  %v9343_v56 = vsel %vm23613_vm8, %v9341_v0, %v9342_v52  ;;  %v1393_v3 = vrot.slane %v1391_v57, 4  ;;  %v9344_v7 = vrot.slane %v9342_v52, 4  ;;  %v306_v0 = vld [vmem:[%s23101_s5 + $0x1d8] sm:$0xf] }
 0x172   : > { %v1399_v5 = vrot.slane %v1397_v59, 5  ;;  %v1380_v61 = vsel %vm23119_vm5, %v1375_v62, %v1379_v49  ;;  %v18449_v8 = vcombine.low %v9340_v51, %v9343_v56  ;;  %v1384_v12 = vor.u32 %v1383_v63, %v1379_v49  ;;  %v307_v63 = vld [vmem:[%s23101_s5 + $0x1dc] sm:$0xf] }
 0x173   : > { %v9345_v19 = vrot.slane %v22559_v1, 5  ;;  %v17515_v14 = vcombine.low %v1370_v60, %v1380_v61  ;;  %v1394_v15 = vor.u32 %v1393_v3, %v1389_v26  ;;  %v9348_v16 = vrot.slane %v22560_v13, 5 }
 0x174   : > { %v1401_v22 = vshrl.u32 %v301_v38, 16  ;;  %20783 = vmatprep.mubr.msk.bf16.mxu0 %vm1887_vm4, %v18449_v8  ;;  %v1385_v29 = vrot.slane %v1384_v12, 4  ;;  %v1407_v27 = vshll.u32 %v302_v11, 16  ;;  %v1411_v30 = vshrl.u32 %v302_v11, 16  ;;  %v22564_v8 = vld [vmem:[%s23101_s5 + $0xd4] sm:$0x1] }
 0x175   : > { %v9346_v18 = vsel %vm23613_vm8, %v9344_v7, %v9345_v19  ;;  %v9347_v24 = vrot.slane %v9345_v19, 4  ;;  %20197 = vmatprep.mubr.msk.bf16.mxu1 %vm1887_vm4, %v17515_v14  ;;  %v1395_v28 = vrot.slane %v1394_v15, 4  ;;  %v1417_v31 = vshll.u32 %v303_v9, 16 }
 0x176   : > { %v1403_v17 = vrot.slane %v1401_v22, 4  ;;  %v1390_v34 = vsel %vm23119_vm5, %v1385_v29, %v1389_v26  ;;  %v1409_v2 = vrot.slane %v1407_v27, 5  ;;  %v9350_v23 = vrot.slane %v9348_v16, 4 }
 0x177   : > { %v9349_v36 = vsel %vm23613_vm8, %v9347_v24, %v9348_v16  ;;  %v1400_v32 = vsel %vm23119_vm5, %v1395_v28, %v1399_v5  ;;  %v1413_v25 = vrot.slane %v1411_v30, 4  ;;  %v1419_v45 = vrot.slane %v1417_v31, 5 }
 0x178   : > { %v18450_v33 = vcombine.low %v9346_v18, %v9349_v36  ;;  %v1404_v10 = vor.u32 %v1403_v17, %v1399_v5  ;;  %v17516_v42 = vcombine.low %v1390_v34, %v1400_v32  ;;  %v9351_v38 = vrot.slane %v22561_v40, 5  ;;  %v22563_v5 = vld [vmem:[%s23101_s5 + $0xd0] sm:$0xf]  ;;  %v18405_v18 = vld [vmem:[%s23101_s5 + $0xd8] sm:$0xe] }
 0x179   : > { %v9354_v46 = vrot.slane %v22562_v37, 5  ;;  %v1414_v47 = vor.u32 %v1413_v25, %v1409_v2  ;;  %v1421_v49 = vshrl.u32 %v303_v9, 16  ;;  %v1427_v44 = vshll.u32 %v304_v20, 16  ;;  %v308_v17 = vld [vmem:[%s23101_s5 + $0x1e0] sm:$0xf] }
 0x17a   : > { %20784 = vmatmul.mubr.msk.bf16.gmra.mrb[32].mxu0 %vm1887_vm4, %v18450_v33  ;;  %v1405_v43 = vrot.slane %v1404_v10, 4  ;;  %20198 = vmatmul.mubr.msk.bf16.gmra.mrb[96].mxu1 %vm1887_vm4, %v17516_v42  ;;  %v9352_v41 = vsel %vm23613_vm8, %v9350_v23, %v9351_v38  ;;  %v9353_v50 = vrot.slane %v9351_v38, 4  ;;  %v1431_v53 = vshrl.u32 %v304_v20, 16 }
 0x17b   : > { %v1437_v52 = vshll.u32 %v342_v39, 16  ;;  %v1415_v55 = vrot.slane %v1414_v47, 4  ;;  %v1423_v21 = vrot.slane %v1421_v49, 4  ;;  %v1429_v51 = vrot.slane %v1427_v44, 5  ;;  %v22565_v39 = vld [vmem:[%s23101_s5 + $0xdc] sm:$0xf] }
 0x17c   : > { %v1410_v58 = vsel %vm23119_vm5, %v1405_v43, %v1409_v2  ;;  %v9355_v57 = vsel %vm23613_vm8, %v9353_v50, %v9354_v46  ;;  %v1433_v59 = vrot.slane %v1431_v53, 4  ;;  %v9356_v62 = vrot.slane %v9354_v46, 4  ;;  %v309_v2 = vld [vmem:[%s23101_s5 + $0x1e4] sm:$0xf] }
 0x17d   : > { %v1439_v60 = vrot.slane %v1437_v52, 5  ;;  %v1420_v26 = vsel %vm23119_vm5, %v1415_v55, %v1419_v45  ;;  %v18451_v56 = vcombine.low %v9352_v41, %v9355_v57  ;;  %v1424_v3 = vor.u32 %v1423_v21, %v1419_v45  ;;  %v22566_v45 = vld [vmem:[%s23101_s5 + $0xe0] sm:$0xf]  ;;  %v310_v55 = vld [vmem:[%s23101_s5 + $0x1e8] sm:$0xf] }
 0x17e   : > { %v9357_v7 = vrot.slane %v22563_v5, 5  ;;  %v17517_v11 = vcombine.low %v1410_v58, %v1420_v26  ;;  %v1434_v61 = vor.u32 %v1433_v59, %v1429_v51  ;;  %v9360_v12 = vrot.slane %v22564_v8, 5  ;;  %v22568_v5 = vld [vmem:[%s23101_s5 + $0xe8] sm:$0xf] }
 0x17f   : > { %v1442_v1 = vshrl.u32 %v305_v54, 16  ;;  %20787 = vmatprep.mubr.msk.bf16.mxu0 %vm1887_vm4, %v18451_v56  ;;  %v1425_v19 = vrot.slane %v1424_v3, 4  ;;  %v1445_v15 = vshll.u32 %v305_v54, 16  ;;  %v1451_v22 = vshll.u32 %v306_v0, 16  ;;  %v311_v56 = vld [vmem:[%s23101_s5 + $0x1ec] sm:$0xf] }
 0x180   : > { %v9358_v9 = vsel %vm23613_vm8, %v9356_v62, %v9357_v7  ;;  %v9359_v14 = vrot.slane %v9357_v7, 4  ;;  %20201 = vmatprep.mubr.msk.bf16.mxu1 %vm1887_vm4, %v17517_v11  ;;  %v1435_v13 = vrot.slane %v1434_v61, 4  ;;  %v1455_v29 = vshrl.u32 %v306_v0, 16 }
 0x181   : > { %v1444_v16 = vrot.slane %v1442_v1, 4  ;;  %v1430_v24 = vsel %vm23119_vm5, %v1425_v19, %v1429_v51  ;;  %v1447_v20 = vrot.slane %v1445_v15, 5  ;;  %v1461_v28 = vshll.u32 %v307_v63, 16 }
 0x182   : > { %v9361_v27 = vsel %vm23613_vm8, %v9359_v14, %v9360_v12  ;;  %v1440_v30 = vsel %vm23119_vm5, %v1435_v13, %v1439_v60  ;;  %v1453_v34 = vrot.slane %v1451_v22, 5  ;;  %v1457_v36 = vrot.slane %v1455_v29, 4 }
 0x183   : > { %v18452_v31 = vcombine.low %v9358_v9, %v9361_v27  ;;  %v17518_v23 = vcombine.low %v1430_v24, %v1440_v30  ;;  %v1448_v32 = vor.u32 %v1447_v20, %v1444_v16  ;;  %v1463_v33 = vrot.slane %v1461_v28, 5  ;;  %v312_v24 = vld [vmem:[%s23101_s5 + $0x1f0] sm:$0xf]  ;;  %v343_v27 = vld [vmem:[%s23101_s5 + $0x1f4] sm:$0x1] }
 0x184   : > { %v18421_v10 = vrot.slane %v18405_v18, 9  ;;  %v1458_v25 = vor.u32 %v1457_v36, %v1453_v34  ;;  %v9364_v42 = vrot.slane %v22565_v39, 5  ;;  %v9367_v40 = vrot.slane %v22566_v45, 5 }
 0x185   : > { %20788 = vmatmul.mubr.msk.bf16.gmra.mrb[36].mxu0 %vm1887_vm4, %v18452_v31  ;;  %v1465_v38 = vshrl.u32 %v307_v63, 16  ;;  %20202 = vmatmul.mubr.msk.bf16.gmra.mrb[100].mxu1 %vm1887_vm4, %v17518_v23  ;;  %v1449_v37 = vrot.slane %v1448_v32, 4  ;;  %v1471_v46 = vshll.u32 %v308_v17, 16  ;;  %v1475_v43 = vshrl.u32 %v308_v17, 16  ;;  %v22567_v63 = vld [vmem:[%s23101_s5 + $0xe4] sm:$0xf] }
 0x186   : > { %v1481_v47 = vshll.u32 %v309_v2, 16  ;;  %v1459_v49 = vrot.slane %v1458_v25, 4  ;;  %v9365_v44 = vsel %vm23613_vm8, %v18421_v10, %v9364_v42  ;;  %v9366_v41 = vrot.slane %v9364_v42, 4 }
 0x187   : > { %v1467_v50 = vrot.slane %v1465_v38, 4  ;;  %v1454_v53 = vsel %vm23119_vm5, %v1449_v37, %v1453_v34  ;;  %v1473_v52 = vrot.slane %v1471_v46, 5  ;;  %v1477_v54 = vrot.slane %v1475_v43, 4  ;;  %v22569_v34 = vld [vmem:[%s23101_s5 + $0xec] sm:$0xf] }
 0x188   : > { %v1483_v58 = vrot.slane %v1481_v47, 5  ;;  %v1464_v21 = vsel %vm23119_vm5, %v1459_v49, %v1463_v33  ;;  %v9368_v51 = vsel %vm23613_vm8, %v9366_v41, %v9367_v40  ;;  %v9369_v57 = vrot.slane %v9367_v40, 4  ;;  %v313_v49 = vld [vmem:[%s23101_s5 + $0x1f8] sm:$0xf] }
 0x189   : > { %v1468_v0 = vor.u32 %v1467_v50, %v1463_v33  ;;  %v17519_v59 = vcombine.low %v1454_v53, %v1464_v21  ;;  %v18453_v60 = vcombine.low %v9365_v44, %v9368_v51  ;;  %v1478_v62 = vor.u32 %v1477_v54, %v1473_v52  ;;  %v22571_v21 = vld [vmem:[%s23101_s5 + $0xf4] sm:$0xf] }
 0x18a   : > { %v9370_v26 = vrot.slane %v22567_v63, 5  ;;  %v9373_v7 = vrot.slane %v22568_v5, 5  ;;  %v1485_v11 = vshrl.u32 %v309_v2, 16  ;;  %v1491_v61 = vshll.u32 %v310_v55, 16  ;;  %v22570_v2 = vld [vmem:[%s23101_s5 + $0xf0] sm:$0xf] }
 0x18b   : > { %v1469_v3 = vrot.slane %v1468_v0, 4  ;;  %20205 = vmatprep.mubr.msk.bf16.mxu1 %vm1887_vm4, %v17519_v59  ;;  %20791 = vmatprep.mubr.msk.bf16.mxu0 %vm1887_vm4, %v18453_v60  ;;  %v1479_v8 = vrot.slane %v1478_v62, 4  ;;  %v1495_v19 = vshrl.u32 %v310_v55, 16  ;;  %v1501_v13 = vshll.u32 %v311_v56, 16  ;;  %v315_v60 = vld [vmem:[%s23101_s5 + $0x200] sm:$0xf] }
 0x18c   : > { %v9371_v12 = vsel %vm23613_vm8, %v9369_v57, %v9370_v26  ;;  %v9372_v1 = vrot.slane %v9370_v26, 4  ;;  %v1487_v14 = vrot.slane %v1485_v11, 4  ;;  %v1493_v15 = vrot.slane %v1491_v61, 5  ;;  %v22572_v57 = vld [vmem:[%s23101_s5 + $0xf8] sm:$0x1] }
 0x18d   : > { %v1474_v9 = vsel %vm23119_vm5, %v1469_v3, %v1473_v52  ;;  %v1484_v16 = vsel %vm23119_vm5, %v1479_v8, %v1483_v58  ;;  %v1497_v29 = vrot.slane %v1495_v19, 4  ;;  %v9375_v18 = vrot.slane %v9373_v7, 4  ;;  %v314_v52 = vld [vmem:[%s23101_s5 + $0x1fc] sm:$0xf] }
 0x18e   : > { %v9374_v22 = vsel %vm23613_vm8, %v9372_v1, %v9373_v7  ;;  %v17520_v20 = vcombine.low %v1474_v9, %v1484_v16  ;;  %v1488_v17 = vor.u32 %v1487_v14, %v1483_v58  ;;  %v1503_v30 = vrot.slane %v1501_v13, 5 }
 0x18f   : > { %v18454_v28 = vcombine.low %v9371_v12, %v9374_v22  ;;  %v1498_v31 = vor.u32 %v1497_v29, %v1493_v15  ;;  %v9376_v36 = vrot.slane %v22569_v34, 5  ;;  %v9379_v23 = vrot.slane %v22570_v2, 5  ;;  %v18406_v12 = vld [vmem:[%s23101_s5 + $0xfc] sm:$0xe] }
 0x190   : > { %v1505_v32 = vshrl.u32 %v311_v56, 16  ;;  %20206 = vmatmul.mubr.msk.bf16.gmra.mrb[104].mxu1 %vm1887_vm4, %v17520_v20  ;;  %v1489_v33 = vrot.slane %v1488_v17, 4  ;;  %v1511_v10 = vshll.u32 %v312_v24, 16  ;;  %v1515_v25 = vshrl.u32 %v312_v24, 16  ;;  %v22573_v20 = vld [vmem:[%s23101_s5 + $0x100] sm:$0xf] }
 0x191   : > { %20792 = vmatmul.mubr.msk.bf16.gmra.mrb[40].mxu0 %vm1887_vm4, %v18454_v28  ;;  %v1521_v39 = vshll.u32 %v343_v27, 16  ;;  %v1499_v42 = vrot.slane %v1498_v31, 4  ;;  %v9377_v45 = vsel %vm23613_vm8, %v9375_v18, %v9376_v36  ;;  %v9378_v40 = vrot.slane %v9376_v36, 4  ;;  %v317_v18 = vld [vmem:[%s23101_s5 + $0x208] sm:$0xf] }
 0x192   : > { %v1507_v38 = vrot.slane %v1505_v32, 4  ;;  %v1494_v37 = vsel %vm23119_vm5, %v1489_v33, %v1493_v15  ;;  %v1513_v46 = vrot.slane %v1511_v10, 5  ;;  %v1517_v43 = vrot.slane %v1515_v25, 4  ;;  %v316_v15 = vld [vmem:[%s23101_s5 + $0x204] sm:$0xf] }
 0x193   : > { %v1523_v47 = vrot.slane %v1521_v39, 5  ;;  %v1504_v44 = vsel %vm23119_vm5, %v1499_v42, %v1503_v30  ;;  %v9380_v41 = vsel %vm23613_vm8, %v9378_v40, %v9379_v23  ;;  %v9381_v53 = vrot.slane %v9379_v23, 4  ;;  %v22574_v17 = vld [vmem:[%s23101_s5 + $0x104] sm:$0xf] }
 0x194   : > { %v1508_v50 = vor.u32 %v1507_v38, %v1503_v30  ;;  %v17521_v54 = vcombine.low %v1494_v37, %v1504_v44  ;;  %v18455_v58 = vcombine.low %v9377_v45, %v9380_v41  ;;  %v1518_v55 = vor.u32 %v1517_v43, %v1513_v46  ;;  %v318_v43 = vld [vmem:[%s23101_s5 + $0x20c] sm:$0xf]  ;;  %v22575_v41 = vld [vmem:[%s23101_s5 + $0x108] sm:$0xf] }
 0x195   : > { %v9382_v51 = vrot.slane %v22571_v21, 5  ;;  %v9385_v59 = vrot.slane %v22572_v57, 5  ;;  %v1526_v62 = vshrl.u32 %v313_v49, 16  ;;  %v1529_v63 = vshll.u32 %v313_v49, 16 }
 0x196   : > { %v1509_v0 = vrot.slane %v1508_v50, 4  ;;  %20209 = vmatprep.mubr.msk.bf16.mxu1 %vm1887_vm4, %v17521_v54  ;;  %20795 = vmatprep.mubr.msk.bf16.mxu0 %vm1887_vm4, %v18455_v58  ;;  %v1519_v26 = vrot.slane %v1518_v55, 4  ;;  %v1535_v5 = vshll.u32 %v314_v52, 16  ;;  %v1539_v8 = vshrl.u32 %v314_v52, 16  ;;  %v22576_v58 = vld [vmem:[%s23101_s5 + $0x10c] sm:$0xf] }
 0x197   : > { %v9383_v56 = vsel %vm23613_vm8, %v9381_v53, %v9382_v51  ;;  %v9384_v3 = vrot.slane %v9382_v51, 4  ;;  %v1528_v11 = vrot.slane %v1526_v62, 4  ;;  %v1531_v61 = vrot.slane %v1529_v63, 5  ;;  %v319_v53 = vld [vmem:[%s23101_s5 + $0x210] sm:$0xf] }
 0x198   : > { %v1514_v7 = vsel %vm23119_vm5, %v1509_v0, %v1513_v46  ;;  %v1524_v1 = vsel %vm23119_vm5, %v1519_v26, %v1523_v47  ;;  %v1537_v9 = vrot.slane %v1535_v5, 5  ;;  %v1545_v14 = vshll.u32 %v315_v60, 16 }
 0x199   : > { %v9386_v19 = vsel %vm23613_vm8, %v9384_v3, %v9385_v59  ;;  %v17522_v13 = vcombine.low %v1514_v7, %v1524_v1  ;;  %v1532_v22 = vor.u32 %v1531_v61, %v1528_v11  ;;  %v1541_v29 = vrot.slane %v1539_v8, 4  ;;  %v320_v11 = vld [vmem:[%s23101_s5 + $0x214] sm:$0xf] }
 0x19a   : > { %v18456_v16 = vcombine.low %v9383_v56, %v9386_v19  ;;  %v1547_v24 = vrot.slane %v1545_v14, 5  ;;  %v18422_v27 = vrot.slane %v18406_v12, 9  ;;  %v9389_v28 = vrot.slane %v22573_v20, 5  ;;  %v344_v19 = vld [vmem:[%s23101_s5 + $0x218] sm:$0x1] }
 0x19b   : > { %v9392_v30 = vrot.slane %v22574_v17, 5  ;;  %20210 = vmatmul.mubr.msk.bf16.gmra.mrb[108].mxu1 %vm1887_vm4, %v17522_v13  ;;  %v1533_v31 = vrot.slane %v1532_v22, 4  ;;  %v1542_v34 = vor.u32 %v1541_v29, %v1537_v9  ;;  %v1549_v36 = vshrl.u32 %v315_v60, 16 }
 0x19c   : > { %20796 = vmatmul.mubr.msk.bf16.gmra.mrb[44].mxu0 %vm1887_vm4, %v18456_v16  ;;  %v1555_v2 = vshll.u32 %v316_v15, 16  ;;  %v9390_v23 = vsel %vm23613_vm8, %v18422_v27, %v9389_v28  ;;  %v9391_v32 = vrot.slane %v9389_v28, 4  ;;  %v1559_v33 = vshrl.u32 %v316_v15, 16  ;;  %v22577_v15 = vld [vmem:[%s23101_s5 + $0x110] sm:$0xf] }
 0x19d   : > { %v1565_v10 = vshll.u32 %v317_v18, 16  ;;  %v1538_v25 = vsel %vm23119_vm5, %v1533_v31, %v1537_v9  ;;  %v1543_v39 = vrot.slane %v1542_v34, 4  ;;  %v1551_v42 = vrot.slane %v1549_v36, 4  ;;  %v22578_v16 = vld [vmem:[%s23101_s5 + $0x114] sm:$0xf] }
 0x19e   : > { %v1557_v45 = vrot.slane %v1555_v2, 5  ;;  %v9393_v40 = vsel %vm23613_vm8, %v9391_v32, %v9392_v30  ;;  %v1561_v38 = vrot.slane %v1559_v33, 4  ;;  %v9394_v46 = vrot.slane %v9392_v30, 4 }
 0x19f   : > { %v1567_v37 = vrot.slane %v1565_v10, 5  ;;  %v1548_v47 = vsel %vm23119_vm5, %v1543_v39, %v1547_v24  ;;  %v18457_v49 = vcombine.low %v9390_v23, %v9393_v40  ;;  %v1552_v44 = vor.u32 %v1551_v42, %v1547_v24  ;;  %v321_v23 = vld [vmem:[%s23101_s5 + $0x21c] sm:$0xf]  ;;  %v22579_v40 = vld [vmem:[%s23101_s5 + $0x118] sm:$0xf] }
 0x1a0   : > { %v9395_v50 = vrot.slane %v22575_v41, 5  ;;  %v17523_v52 = vcombine.low %v1538_v25, %v1548_v47  ;;  %v1562_v54 = vor.u32 %v1561_v38, %v1557_v45  ;;  %v9398_v55 = vrot.slane %v22576_v58, 5  ;;  %v22580_v47 = vld [vmem:[%s23101_s5 + $0x11c] sm:$0x1] }
 0x1a1   : > { %v1569_v21 = vshrl.u32 %v317_v18, 16  ;;  %20799 = vmatprep.mubr.msk.bf16.mxu0 %vm1887_vm4, %v18457_v49  ;;  %v1553_v51 = vrot.slane %v1552_v44, 4  ;;  %v1575_v59 = vshll.u32 %v318_v43, 16  ;;  %v1579_v63 = vshrl.u32 %v318_v43, 16  ;;  %v323_v44 = vld [vmem:[%s23101_s5 + $0x224] sm:$0xf] }
 0x1a2   : > { %v9396_v0 = vsel %vm23613_vm8, %v9394_v46, %v9395_v50  ;;  %v9397_v57 = vrot.slane %v9395_v50, 4  ;;  %20213 = vmatprep.mubr.msk.bf16.mxu1 %vm1887_vm4, %v17523_v52  ;;  %v1563_v60 = vrot.slane %v1562_v54, 4  ;;  %v1585_v26 = vshll.u32 %v319_v53, 16 }
 0x1a3   : > { %v1571_v62 = vrot.slane %v1569_v21, 4  ;;  %v1558_v56 = vsel %vm23119_vm5, %v1553_v51, %v1557_v45  ;;  %v1577_v5 = vrot.slane %v1575_v59, 5  ;;  %v9400_v7 = vrot.slane %v9398_v55, 4 }
 0x1a4   : > { %v9399_v3 = vsel %vm23613_vm8, %v9397_v57, %v9398_v55  ;;  %v1568_v61 = vsel %vm23119_vm5, %v1563_v60, %v1567_v37  ;;  %v1581_v1 = vrot.slane %v1579_v63, 4  ;;  %v1587_v14 = vrot.slane %v1585_v26, 5 }
 0x1a5   : > { %v18458_v8 = vcombine.low %v9396_v0, %v9399_v3  ;;  %v1572_v12 = vor.u32 %v1571_v62, %v1567_v37  ;;  %v17524_v9 = vcombine.low %v1558_v56, %v1568_v61  ;;  %v9401_v13 = vrot.slane %v22577_v15, 5  ;;  %v322_v37 = vld [vmem:[%s23101_s5 + $0x220] sm:$0xf] }
 0x1a6   : > { %v9404_v22 = vrot.slane %v22578_v16, 5  ;;  %v1582_v18 = vor.u32 %v1581_v1, %v1577_v5  ;;  %v1589_v24 = vshrl.u32 %v319_v53, 16  ;;  %v1595_v27 = vshll.u32 %v320_v11, 16  ;;  %v18407_v0 = vld [vmem:[%s23101_s5 + $0x120] sm:$0xe] }
 0x1a7   : > { %20800 = vmatmul.mubr.msk.bf16.gmra.mrb[48].mxu0 %vm1887_vm4, %v18458_v8  ;;  %v1573_v29 = vrot.slane %v1572_v12, 4  ;;  %20214 = vmatmul.mubr.msk.bf16.gmra.mrb[112].mxu1 %vm1887_vm4, %v17524_v9  ;;  %v9402_v20 = vsel %vm23613_vm8, %v9400_v7, %v9401_v13  ;;  %v9403_v28 = vrot.slane %v9401_v13, 4  ;;  %v1599_v17 = vshrl.u32 %v320_v11, 16  ;;  %v325_v7 = vld [vmem:[%s23101_s5 + $0x22c] sm:$0xf] }
 0x1a8   : > { %v1605_v30 = vshll.u32 %v344_v19, 16  ;;  %v1583_v34 = vrot.slane %v1582_v18, 4  ;;  %v1591_v36 = vrot.slane %v1589_v24, 4  ;;  %v1597_v2 = vrot.slane %v1595_v27, 5  ;;  %v22581_v19 = vld [vmem:[%s23101_s5 + $0x124] sm:$0xf] }
 0x1a9   : > { %v1578_v31 = vsel %vm23119_vm5, %v1573_v29, %v1577_v5  ;;  %v9405_v32 = vsel %vm23613_vm8, %v9403_v28, %v9404_v22  ;;  %v1601_v33 = vrot.slane %v1599_v17, 4  ;;  %v9406_v25 = vrot.slane %v9404_v22, 4  ;;  %v324_v5 = vld [vmem:[%s23101_s5 + $0x228] sm:$0xf] }
 0x1aa   : > { %v1607_v10 = vrot.slane %v1605_v30, 5  ;;  %v1588_v39 = vsel %vm23119_vm5, %v1583_v34, %v1587_v14  ;;  %v18459_v42 = vcombine.low %v9402_v20, %v9405_v32  ;;  %v1592_v45 = vor.u32 %v1591_v36, %v1587_v14  ;;  %v22582_v14 = vld [vmem:[%s23101_s5 + $0x128] sm:$0xf]  ;;  %v326_v36 = vld [vmem:[%s23101_s5 + $0x230] sm:$0xf] }
 0x1ab   : > { %v9407_v38 = vrot.slane %v22579_v40, 5  ;;  %v17525_v46 = vcombine.low %v1578_v31, %v1588_v39  ;;  %v1602_v43 = vor.u32 %v1601_v33, %v1597_v2  ;;  %v9410_v49 = vrot.slane %v22580_v47, 5  ;;  %v327_v40 = vld [vmem:[%s23101_s5 + $0x234] sm:$0xf] }
 0x1ac   : > { %v1610_v41 = vshrl.u32 %v321_v23, 16  ;;  %20803 = vmatprep.mubr.msk.bf16.mxu0 %vm1887_vm4, %v18459_v42  ;;  %v1593_v50 = vrot.slane %v1592_v45, 4  ;;  %v1613_v54 = vshll.u32 %v321_v23, 16  ;;  %v1619_v21 = vshll.u32 %v322_v37, 16  ;;  %v22583_v42 = vld [vmem:[%s23101_s5 + $0x12c] sm:$0xf] }
 0x1ad   : > { %v9408_v53 = vsel %vm23613_vm8, %v9406_v25, %v9407_v38  ;;  %v9409_v52 = vrot.slane %v9407_v38, 4  ;;  %20217 = vmatprep.mubr.msk.bf16.mxu1 %vm1887_vm4, %v17525_v46  ;;  %v1603_v58 = vrot.slane %v1602_v43, 4  ;;  %v1623_v51 = vshrl.u32 %v322_v37, 16  ;;  %v22584_v37 = vld [vmem:[%s23101_s5 + $0x130] sm:$0xf] }
 0x1ae   : > { %v1612_v55 = vrot.slane %v1610_v41, 4  ;;  %v1598_v57 = vsel %vm23119_vm5, %v1593_v50, %v1597_v2  ;;  %v1615_v60 = vrot.slane %v1613_v54, 5  ;;  %v1629_v62 = vshll.u32 %v323_v44, 16 }
 0x1af   : > { %v9411_v59 = vsel %vm23613_vm8, %v9409_v52, %v9410_v49  ;;  %v1608_v63 = vsel %vm23119_vm5, %v1603_v58, %v1607_v10  ;;  %v1621_v56 = vrot.slane %v1619_v21, 5  ;;  %v1625_v3 = vrot.slane %v1623_v51, 4 }
 0x1b0   : > { %v18460_v26 = vcombine.low %v9408_v53, %v9411_v59  ;;  %v17526_v11 = vcombine.low %v1598_v57, %v1608_v63  ;;  %v1616_v61 = vor.u32 %v1615_v60, %v1612_v55  ;;  %v1631_v8 = vrot.slane %v1629_v62, 5  ;;  %v328_v57 = vld [vmem:[%s23101_s5 + $0x238] sm:$0xf]  ;;  %v345_v59 = vld [vmem:[%s23101_s5 + $0x23c] sm:$0x1] }
 0x1b1   : > { %v18423_v12 = vrot.slane %v18407_v0, 9  ;;  %v1626_v1 = vor.u32 %v1625_v3, %v1621_v56  ;;  %v9414_v9 = vrot.slane %v22581_v19, 5  ;;  %v9417_v15 = vrot.slane %v22582_v14, 5  ;;  %v22585_v3 = vld [vmem:[%s23101_s5 + $0x134] sm:$0xf] }
 0x1b2   : > { %20804 = vmatmul.mubr.msk.bf16.gmra.mrb[52].mxu0 %vm1887_vm4, %v18460_v26  ;;  %v1633_v13 = vshrl.u32 %v323_v44, 16  ;;  %20218 = vmatmul.mubr.msk.bf16.gmra.mrb[116].mxu1 %vm1887_vm4, %v17526_v11  ;;  %v1617_v16 = vrot.slane %v1616_v61, 4  ;;  %v1639_v22 = vshll.u32 %v324_v5, 16  ;;  %v1643_v29 = vshrl.u32 %v324_v5, 16 }
 0x1b3   : > { %v1649_v18 = vshll.u32 %v325_v7, 16  ;;  %v1627_v24 = vrot.slane %v1626_v1, 4  ;;  %v9415_v27 = vsel %vm23613_vm8, %v18423_v12, %v9414_v9  ;;  %v9416_v20 = vrot.slane %v9414_v9, 4 }
 0x1b4   : > { %v1635_v28 = vrot.slane %v1633_v13, 4  ;;  %v1622_v17 = vsel %vm23119_vm5, %v1617_v16, %v1621_v56  ;;  %v1641_v30 = vrot.slane %v1639_v22, 5  ;;  %v1645_v31 = vrot.slane %v1643_v29, 4 }
 0x1b5   : > { %v1651_v34 = vrot.slane %v1649_v18, 5  ;;  %v1632_v2 = vsel %vm23119_vm5, %v1627_v24, %v1631_v8  ;;  %v9418_v23 = vsel %vm23613_vm8, %v9416_v20, %v9417_v15  ;;  %v9419_v33 = vrot.slane %v9417_v15, 4  ;;  %v17739_v24 = vld [vmem:[%s29137_s1 + $0x4] sm:$0x3] }
 0x1b6   : > { %v1636_v32 = vor.u32 %v1635_v28, %v1631_v8  ;;  %v17527_v10 = vcombine.low %v1622_v17, %v1632_v2  ;;  %v18461_v25 = vcombine.low %v9415_v27, %v9418_v23  ;;  %v1646_v39 = vor.u32 %v1645_v31, %v1641_v30  ;;  %v22587_v2 = vld [vmem:[%s23101_s5 + $0x13c] sm:$0xf] }
 0x1b7   : > { %v9420_v45 = vrot.slane %v22583_v42, 5  ;;  %v9423_v46 = vrot.slane %v22584_v37, 5  ;;  %v1653_v43 = vshrl.u32 %v325_v7, 16  ;;  %v1659_v47 = vshll.u32 %v326_v36, 16  ;;  %v22586_v7 = vld [vmem:[%s23101_s5 + $0x138] sm:$0xf] }
 0x1b8   : > { %v1637_v38 = vrot.slane %v1636_v32, 4  ;;  %20221 = vmatprep.mubr.msk.bf16.mxu1 %vm1887_vm4, %v17527_v10  ;;  %20807 = vmatprep.mubr.msk.bf16.mxu0 %vm1887_vm4, %v18461_v25  ;;  %v1647_v49 = vrot.slane %v1646_v39, 4  ;;  %v1663_v50 = vshrl.u32 %v326_v36, 16  ;;  %v1669_v58 = vshll.u32 %v327_v40, 16  ;;  %v18200_v32 = vld [vmem:[%s23101_s5 + $0x148] sm:$0xf] }
 0x1b9   : > { %v9421_v44 = vsel %vm23613_vm8, %v9419_v33, %v9420_v45  ;;  %v9422_v41 = vrot.slane %v9420_v45, 4  ;;  %v1655_v52 = vrot.slane %v1653_v43, 4  ;;  %v1661_v54 = vrot.slane %v1659_v47, 5  ;;  %v18201_v33 = vld [vmem:[%s23101_s5 + $0x14c] sm:$0xf] }
 0x1ba   : > { %v1642_v53 = vsel %vm23119_vm5, %v1637_v38, %v1641_v30  ;;  %v1652_v55 = vsel %vm23119_vm5, %v1647_v49, %v1651_v34  ;;  %v1665_v51 = vrot.slane %v1663_v50, 4  ;;  %v9425_v0 = vrot.slane %v9423_v46, 4  ;;  %v18408_v30 = vld [vmem:[%s23101_s5 + $0x144] sm:$0xe]  ;;  %v22588_v25 = vld [vmem:[%s23101_s5 + $0x140] sm:$0x1] }
 0x1bb   : > { %v9424_v21 = vsel %vm23613_vm8, %v9422_v41, %v9423_v46  ;;  %v17528_v60 = vcombine.low %v1642_v53, %v1652_v55  ;;  %v1656_v63 = vor.u32 %v1655_v52, %v1651_v34  ;;  %v1671_v26 = vrot.slane %v1669_v58, 5  ;;  %v22589_v41 = vld [vmem:[%s23101_s5] sm:$0xf]  ;;  %v22590_v50 = vld [vmem:[%s23101_s5 + $0x4] sm:$0xf] }
 0x1bc   : > { %v18462_v62 = vcombine.low %v9421_v44, %v9424_v21  ;;  %v1666_v56 = vor.u32 %v1665_v51, %v1661_v54  ;;  %v9426_v5 = vrot.slane %v22585_v3, 5  ;;  %v9429_v11 = vrot.slane %v22586_v7, 5  ;;  %v18202_v52 = vld [vmem:[%s23101_s5 + $0x150] sm:$0xf] }
 0x1bd   : > { %v1673_v61 = vshrl.u32 %v327_v40, 16  ;;  %20222 = vmatmul.mubr.msk.bf16.gmra.mrb[120].mxu1 %vm1887_vm4, %v17528_v60  ;;  %v1657_v8 = vrot.slane %v1656_v63, 4  ;;  %v1679_v12 = vshll.u32 %v328_v57, 16  ;;  %v1683_v1 = vshrl.u32 %v328_v57, 16  ;;  %v18205_v57 = vld [vmem:[%s23101_s5 + $0x15c] sm:$0xf] }
 0x1be   : > { %20808 = vmatmul.mubr.msk.bf16.gmra.mrb[56].mxu0 %vm1887_vm4, %v18462_v62  ;;  %v1689_v19 = vshll.u32 %v345_v59, 16  ;;  %v1667_v9 = vrot.slane %v1666_v56, 4  ;;  %v9427_v14 = vsel %vm23613_vm8, %v9425_v0, %v9426_v5  ;;  %v9428_v15 = vrot.slane %v9426_v5, 4  ;;  %v18204_v0 = vld [vmem:[%s23101_s5 + $0x158] sm:$0xf] }
 0x1bf   : > { %v1675_v13 = vrot.slane %v1673_v61, 4  ;;  %v1662_v16 = vsel %vm23119_vm5, %v1657_v8, %v1661_v54  ;;  %v1681_v22 = vrot.slane %v1679_v12, 5  ;;  %v1685_v29 = vrot.slane %v1683_v1, 4  ;;  %v18203_v54 = vld [vmem:[%s23101_s5 + $0x154] sm:$0xf] }
 0x1c0   : > { %v1691_v18 = vrot.slane %v1689_v19, 5  ;;  %v1672_v27 = vsel %vm23119_vm5, %v1667_v9, %v1671_v26  ;;  %v9430_v20 = vsel %vm23613_vm8, %v9428_v15, %v9429_v11  ;;  %v9431_v17 = vrot.slane %v9429_v11, 4  ;;  %v18207_v8 = vld [vmem:[%s23101_s5 + $0x164] sm:$0x1]  ;;  %v18209_v12 = vld [vmem:[%s23101_s5 + $0x16c] sm:$0xf] }
 0x1c1   : > { %v1676_v28 = vor.u32 %v1675_v13, %v1671_v26  ;;  %v17529_v31 = vcombine.low %v1662_v16, %v1672_v27  ;;  %v18463_v34 = vcombine.low %v9427_v14, %v9430_v20  ;;  %v1686_v36 = vor.u32 %v1685_v29, %v1681_v22  ;;  %v18206_v26 = vld [vmem:[%s23101_s5 + $0x160] sm:$0xf]  ;;  %v24114_v1 = vld [vmem:[%s23101_s5 + $0x8] sm:$0xf]  ;;  %v24117_v19 = vld [vmem:[%s23101_s5 + $0xc] sm:$0xf] }
 0x1c2   : > { %v9432_v23 = vrot.slane %v22587_v2, 5  ;;  %v9435_v39 = vrot.slane %v22588_v25, 5  ;;  %v24082_v42 = vand.u32 %v17739_v24, %v23074_v4  ;;  %v18424_v37 = vrot.slane %v18408_v30, 9  ;;  %v18210_v13 = vld [vmem:[%s23101_s5 + $0x170] sm:$0xf] }
 0x1c3   : > { %v1677_v10 = vrot.slane %v1676_v28, 4  ;;  %20225 = vmatprep.mubr.msk.bf16.mxu1 %vm1887_vm4, %v17529_v31  ;;  %20811 = vmatprep.mubr.msk.bf16.mxu0 %vm1887_vm4, %v18463_v34  ;;  %v1687_v45 = vrot.slane %v1686_v36, 4  ;;  %v9439_v43 = vrot.slane %v18200_v32, 5  ;;  %v9442_v47 = vrot.slane %v18201_v33, 5  ;;  %v18409_v16 = vld [vmem:[%s23101_s5 + $0x168] sm:$0xe] }
 0x1c4   : > { %v9433_v40 = vsel %vm23613_vm8, %v9431_v17, %v9432_v23  ;;  %v9434_v38 = vrot.slane %v9432_v23, 4  ;;  %20359 = vmatprep.subr.bf16.mxu1 %v24082_v42  ;;  %v17595_v53 = vcombine.low %v22589_v41, %v22590_v50  ;;  %v9445_v62 = vrot.slane %v18202_v52, 5  ;;  %v24127_v29 = vld [vmem:[%s23101_s5 + $0x10] sm:$0xf]  ;;  %v18211_v32 = vld [vmem:[%s23101_s5 + $0x174] sm:$0xf] }
 0x1c5   : > { %v1682_v46 = vsel %vm23119_vm5, %v1677_v10, %v1681_v22  ;;  %v1692_v49 = vsel %vm23119_vm5, %v1687_v45, %v1691_v18  ;;  %v9440_v21 = vsel %vm23613_vm8, %v18424_v37, %v9439_v43  ;;  %v9441_v51 = vrot.slane %v9439_v43, 4  ;;  %v24130_v18 = vld [vmem:[%s23101_s5 + $0x14] sm:$0xf]  ;;  %v18213_v33 = vld [vmem:[%s23101_s5 + $0x17c] sm:$0xf] }
 0x1c6   : > { %v9436_v44 = vsel %vm23613_vm8, %v9434_v38, %v9435_v39  ;;  %v17530_v58 = vcombine.low %v1682_v46, %v1692_v49  ;;  %v9444_v59 = vrot.slane %v9442_v47, 4  ;;  %v9448_v63 = vrot.slane %v18203_v54, 5  ;;  %v18212_v45 = vld [vmem:[%s23101_s5 + $0x178] sm:$0xf]  ;;  %v18214_v46 = vld [vmem:[%s23101_s5 + $0x180] sm:$0xf] }
 0x1c7   : > { %v18464_v55 = vcombine.low %v9433_v40, %v9436_v44  ;;  %v9443_v60 = vsel %vm23613_vm8, %v9441_v51, %v9442_v47  ;;  %v9451_v3 = vrot.slane %v18204_v0, 5  ;;  %v9454_v5 = vrot.slane %v18205_v57, 5  ;;  %v24156_v43 = vld [vmem:[%s23101_s5 + $0x18] sm:$0xf]  ;;  %v24159_v47 = vld [vmem:[%s23101_s5 + $0x1c] sm:$0xf] }
 0x1c8   : > { %20226 = vmatmul.mubr.msk.bf16.gmra.mrb[124].mxu1 %vm1887_vm4, %v17530_v58  ;;  %v18465_v56 = vcombine.low %v9440_v21, %v9443_v60  ;;  %v9446_v7 = vsel %vm23613_vm8, %v9444_v59, %v9445_v62  ;;  %v9447_v11 = vrot.slane %v9445_v62, 4  ;;  %v9450_v61 = vrot.slane %v9448_v63, 4  ;;  %v22597_v50 = vld [vmem:[%s23101_s5 + $0x24] sm:$0xf]  ;;  %v18218_v59 = vld [vmem:[%s23101_s5 + $0x190] sm:$0xf] }
 0x1c9   : > { %20812 = vmatmul.mubr.msk.bf16.gmra.mrb[60].mxu0 %vm1887_vm4, %v18464_v55  ;;  %20231 = vmatprep.mubr.msk.bf16.mxu1 %vm1887_vm4, %v17595_v53  ;;  %v17596_v9 = vcombine.low %v24114_v1, %v24117_v19  ;;  %v9453_v14 = vrot.slane %v9451_v3, 4  ;;  %v9457_v15 = vrot.slane %v18206_v26, 5  ;;  %v17597_v24 = vcombine.low %v24127_v29, %v24130_v18  ;;  %v24165_v53 = vld [vmem:[%s23101_s5 + $0x28] sm:$0xf]  ;;  %v18215_v57 = vld [vmem:[%s23101_s5 + $0x184] sm:$0xf] }
 0x1ca   : > { %20815 = vmatprep.mubr.msk.bf16.mxu0 %vm1887_vm4, %v18465_v56  ;;  %v9449_v22 = vsel %vm23613_vm8, %v9447_v11, %v9448_v63  ;;  %v9452_v27 = vsel %vm23613_vm8, %v9450_v61, %v9451_v3  ;;  %v9456_v20 = vrot.slane %v9454_v5, 4  ;;  %v9460_v31 = vrot.slane %v18207_v8, 5  ;;  %v18216_v3 = vld [vmem:[%s23101_s5 + $0x188] sm:$0x1]  ;;  %v18410_v11 = vld [vmem:[%s23101_s5 + $0x18c] sm:$0xe] }
 0x1cb   : > { %v18466_v28 = vcombine.low %v9446_v7, %v9449_v22  ;;  %v9455_v17 = vsel %vm23613_vm8, %v9453_v14, %v9454_v5  ;;  %v9459_v30 = vrot.slane %v9457_v15, 4  ;;  %v18425_v36 = vrot.slane %v18409_v16, 9  ;;  %v18219_v7 = vld [vmem:[%s23101_s5 + $0x194] sm:$0xf]  ;;  %v24186_v61 = vld [vmem:[%s23101_s5 + $0x2c] sm:$0xf] }
 0x1cc   : > { %v18467_v34 = vcombine.low %v9452_v27, %v9455_v17  ;;  %v9464_v2 = vrot.slane %v18209_v12, 5  ;;  %v9467_v23 = vrot.slane %v18210_v13, 5  ;;  %v9458_v25 = vsel %vm23613_vm8, %v9456_v20, %v9457_v15  ;;  %v24189_v8 = vld [vmem:[%s23101_s5 + $0x30] sm:$0xf]  ;;  %v24194_v14 = vld [vmem:[%s23101_s5 + $0x34] sm:$0xf] }
 0x1cd   : > { %v9461_v39 = vsel %vm23613_vm8, %v9459_v30, %v9460_v31  ;;  %v9470_v40 = vrot.slane %v18211_v32, 5  ;;  %v9476_v37 = vrot.slane %v18213_v33, 5  ;;  %v17598_v49 = vcombine.low %v24156_v43, %v24159_v47  ;;  %v24197_v15 = vld [vmem:[%s23101_s5 + $0x38] sm:$0xf]  ;;  %v18222_v31 = vld [vmem:[%s23101_s5 + $0x1a0] sm:$0xf] }
 0x1ce   : > { %v9466_v10 = vrot.slane %v9464_v2, 4  ;;  %v9465_v38 = vsel %vm23613_vm8, %v18425_v36, %v9464_v2  ;;  %v18468_v44 = vcombine.low %v9458_v25, %v9461_v39  ;;  %v9473_v41 = vrot.slane %v18212_v45, 5  ;;  %v18220_v30 = vld [vmem:[%s23101_s5 + $0x198] sm:$0xf]  ;;  %v18221_v2 = vld [vmem:[%s23101_s5 + $0x19c] sm:$0xf] }
 0x1cf   : > { %v17599_v52 = vcombine.low %v22597_v50, %v24165_v53  ;;  %v9469_v58 = vrot.slane %v9467_v23, 4  ;;  %v9472_v55 = vrot.slane %v9470_v40, 4  ;;  %v9478_v51 = vrot.slane %v9476_v37, 4  ;;  %v18223_v25 = vld [vmem:[%s23101_s5 + $0x1a4] sm:$0xf] }
 0x1d0   : > { %20232 = vmatmul.mubr.msk.bf16.vlgmr.msra.gmra.mrb[0].mxu1 %vm1887_vm4, %v17596_v9  ;;  %v9475_v21 = vrot.slane %v9473_v41, 4  ;;  %v9479_v0 = vrot.slane %v18214_v46, 5  ;;  %v9482_v63 = vrot.slane %v18215_v57, 5  ;;  %v9489_v5 = vrot.slane %v18218_v59, 5  ;;  %v24218_v39 = vld [vmem:[%s23101_s5 + $0x3c] sm:$0xf] }
 0x1d1   : > { %20816 = vmatmul.mubr.msk.bf16.gmra.mrb[64].mxu0 %vm1887_vm4, %v18466_v28  ;;  %20360 = vmatpush3.bf16.msra.mxu1 %v24082_v42  ;;  %v9468_v42 = vsel %vm23613_vm8, %v9466_v10, %v9467_v23  ;;  %v9471_v60 = vsel %vm23613_vm8, %v9469_v58, %v9470_v40  ;;  %v9474_v62 = vsel %vm23613_vm8, %v9472_v55, %v9473_v41  ;;  %v9485_v27 = vrot.slane %v18216_v3, 5  ;;  %v24221_v45 = vld [vmem:[%s23101_s5 + $0x40] sm:$0xf]  ;;  %v24227_v46 = vld [vmem:[%s23101_s5 + $0x4c] sm:$0xf] }
 0x1d2   : > { %20235 = vmatprep.mubr.msk.bf16.mxu1 %vm1887_vm4, %v17597_v24  ;;  %20819 = vmatprep.mubr.msk.bf16.mxu0 %vm1887_vm4, %v18467_v34  ;;  %v18469_v54 = vcombine.low %v9465_v38, %v9468_v42  ;;  %v9477_v26 = vsel %vm23613_vm8, %v9475_v21, %v9476_v37  ;;  %v9480_v56 = vsel %vm23613_vm8, %v9478_v51, %v9479_v0  ;;  %v9481_v22 = vrot.slane %v9479_v0, 4  ;;  %v22605_v37 = vld [vmem:[%s23101_s5 + $0x48] sm:$0xf]  ;;  %v18227_v21 = vld [vmem:[%s23101_s5 + $0x1b4] sm:$0xf] }
 0x1d3   : > { %v17600_v12 = vcombine.low %v24186_v61, %v24189_v8  ;;  %v18470_v9 = vcombine.low %v9471_v60, %v9474_v62  ;;  %v17601_v13 = vcombine.low %v24194_v14, %v24197_v15  ;;  %v18471_v16 = vcombine.low %v9477_v26, %v9480_v56  ;;  %v18224_v55 = vld [vmem:[%s23101_s5 + $0x1a8] sm:$0xf]  ;;  %v18225_v62 = vld [vmem:[%s23101_s5 + $0x1ac] sm:$0x1]  ;;  %v18228_v26 = vld [vmem:[%s23101_s5 + $0x1b8] sm:$0xf] }
 0x1d4   : > { %v9484_v24 = vrot.slane %v9482_v63, 4  ;;  %v18426_v20 = vrot.slane %v18410_v11, 9  ;;  %v9491_v28 = vrot.slane %v9489_v5, 4  ;;  %v9492_v17 = vrot.slane %v18219_v7, 5  ;;  %v18411_v56 = vld [vmem:[%s23101_s5 + $0x1b0] sm:$0xe] }
 0x1d5   : > { %v9483_v34 = vsel %vm23613_vm8, %v9481_v22, %v9482_v63  ;;  %v9495_v23 = vrot.slane %v18220_v30, 5  ;;  %v9501_v10 = vrot.slane %v18222_v31, 5  ;;  %v17602_v40 = vcombine.low %v24218_v39, %v24221_v45  ;;  %v24248_v3 = vld [vmem:[%s23101_s5 + $0x50] sm:$0xf]  ;;  %v18229_v30 = vld [vmem:[%s23101_s5 + $0x1bc] sm:$0xf] }
 0x1d6   : > { %v9486_v36 = vsel %vm23613_vm8, %v9484_v24, %v9485_v27  ;;  %v9490_v32 = vsel %vm23613_vm8, %v18426_v20, %v9489_v5  ;;  %v9493_v33 = vsel %vm23613_vm8, %v9491_v28, %v9492_v17  ;;  %v9498_v42 = vrot.slane %v18221_v2, 5  ;;  %v24251_v5 = vld [vmem:[%s23101_s5 + $0x54] sm:$0xf]  ;;  %v18231_v31 = vld [vmem:[%s23101_s5 + $0x1c4] sm:$0xf] }
 0x1d7   : > { %v18472_v38 = vcombine.low %v9483_v34, %v9486_v36  ;;  %v9494_v41 = vrot.slane %v9492_v17, 4  ;;  %v9497_v50 = vrot.slane %v9495_v23, 4  ;;  %v9504_v58 = vrot.slane %v18223_v25, 5  ;;  %v18230_v2 = vld [vmem:[%s23101_s5 + $0x1c0] sm:$0xf] }
 0x1d8   : > { %20236 = vmatmul.mubr.msk.bf16.gmra.mrb[4].mxu1 %vm1887_vm4, %v17598_v49  ;;  %v17603_v49 = vcombine.low %v22605_v37, %v24227_v46  ;;  %v9507_v57 = vrot.slane %v18224_v55, 5  ;;  %v9514_v63 = vrot.slane %v18227_v21, 5  ;;  %v17604_v7 = vcombine.low %v24248_v3, %v24251_v5  ;;  %v18232_v25 = vld [vmem:[%s23101_s5 + $0x1c8] sm:$0xf] }
 0x1d9   : > { %20820 = vmatmul.mubr.msk.bf16.gmra.mrb[68].mxu0 %vm1887_vm4, %v18468_v44  ;;  %20239 = vmatprep.mubr.msk.bf16.mxu1 %vm1887_vm4, %v17599_v52  ;;  %v18473_v44 = vcombine.low %v9490_v32, %v9493_v33  ;;  %v9500_v52 = vrot.slane %v9498_v42, 4  ;;  %v9496_v51 = vsel %vm23613_vm8, %v9494_v41, %v9495_v23  ;;  %v9499_v0 = vsel %vm23613_vm8, %v9497_v50, %v9498_v42  ;;  %v24289_v41 = vld [vmem:[%s23101_s5 + $0x70] sm:$0xf] }
 0x1da   : > { %20823 = vmatprep.mubr.msk.bf16.mxu0 %vm1887_vm4, %v18469_v54  ;;  %v9503_v54 = vrot.slane %v9501_v10, 4  ;;  %v18474_v11 = vcombine.low %v9496_v51, %v9499_v0  ;;  %v9506_v22 = vrot.slane %v9504_v58, 4  ;;  %v9509_v24 = vrot.slane %v9507_v57, 4  ;;  %v18233_v0 = vld [vmem:[%s23101_s5 + $0x1cc] sm:$0xf] }
 0x1db   : > { %v9502_v59 = vsel %vm23613_vm8, %v9500_v52, %v9501_v10  ;;  %v9510_v27 = vrot.slane %v18225_v62, 5  ;;  %v18427_v20 = vrot.slane %v18411_v56, 9  ;;  %v9516_v28 = vrot.slane %v9514_v63, 4  ;;  %v18234_v56 = vld [vmem:[%s23101_s5 + $0x1d0] sm:$0x1] }
 0x1dc   : > { %v9505_v60 = vsel %vm23613_vm8, %v9503_v54, %v9504_v58  ;;  %v9517_v17 = vrot.slane %v18228_v26, 5  ;;  %v9508_v34 = vsel %vm23613_vm8, %v9506_v22, %v9507_v57  ;;  %v9520_v23 = vrot.slane %v18229_v30, 5  ;;  %v18236_v57 = vld [vmem:[%s23101_s5 + $0x1d8] sm:$0xf] }
 0x1dd   : > { %v9511_v36 = vsel %vm23613_vm8, %v9509_v24, %v9510_v27  ;;  %v9515_v32 = vsel %vm23613_vm8, %v18427_v20, %v9514_v63  ;;  %v9526_v10 = vrot.slane %v18231_v31, 5  ;;  %v9529_v51 = vrot.slane %v18232_v25, 5  ;;  %v24313_v22 = vld [vmem:[%s23101_s5 + $0x78] sm:$0xf]  ;;  %v24318_v20 = vld [vmem:[%s23101_s5 + $0x7c] sm:$0xf] }
 0x1de   : > { %v9518_v33 = vsel %vm23613_vm8, %v9516_v28, %v9517_v17  ;;  %v18476_v37 = vcombine.low %v9508_v34, %v9511_v36  ;;  %v9519_v54 = vrot.slane %v9517_v17, 4  ;;  %v9522_v58 = vrot.slane %v9520_v23, 4  ;;  %v24321_v28 = vld [vmem:[%s23101_s5 + $0x80] sm:$0xf] }
 0x1df   : > { %v18477_v52 = vcombine.low %v9515_v32, %v9518_v33  ;;  %v9528_v21 = vrot.slane %v9526_v10, 4  ;;  %v9532_v62 = vrot.slane %v18233_v0, 5  ;;  %v17609_v17 = vcombine.low %v24318_v20, %v24321_v28  ;;  %v18238_v33 = vld [vmem:[%s23101_s5 + $0x1e0] sm:$0xf] }
 0x1e0   : > { %20240 = vmatmul.mubr.msk.bf16.gmra.mrb[8].mxu1 %vm1887_vm4, %v17600_v12  ;;  %v24256_v12 = vld [vmem:[%s23101_s5 + $0x58] sm:$0xf]  ;;  %v9531_v31 = vrot.slane %v9529_v51, 4  ;;  %v9535_v36 = vrot.slane %v18234_v56, 5 }
 0x1e1   : > { %20824 = vmatmul.mubr.msk.bf16.gmra.mrb[72].mxu0 %vm1887_vm4, %v18470_v9  ;;  %20243 = vmatprep.mubr.msk.bf16.mxu1 %vm1887_vm4, %v17601_v13  ;;  %v24259_v9 = vld [vmem:[%s23101_s5 + $0x5c] sm:$0xf]  ;;  %v9530_v26 = vsel %vm23613_vm8, %v9528_v21, %v9529_v51  ;;  %v9534_v34 = vrot.slane %v9532_v62, 4  ;;  %v24348_v21 = vld [vmem:[%s23101_s5 + $0x88] sm:$0xf] }
 0x1e2   : > { %20827 = vmatprep.mubr.msk.bf16.mxu0 %vm1887_vm4, %v18471_v16  ;;  %v17605_v13 = vcombine.low %v24256_v12, %v24259_v9  ;;  %v18475_v16 = vcombine.low %v9502_v59, %v9505_v60  ;;  %v9521_v59 = vsel %vm23613_vm8, %v9519_v54, %v9520_v23  ;;  %v9533_v25 = vsel %vm23613_vm8, %v9531_v31, %v9532_v62  ;;  %v18964_v54 = vld [vmem:[%s29137_s1 + $0xe] sm:$0x3] }
 0x1e8   : > { %20244 = vmatmul.mubr.msk.bf16.gmra.mrb[12].mxu1 %vm1887_vm4, %v17602_v40  ;;  %v24280_v40 = vld [vmem:[%s23101_s5 + $0x60] sm:$0xf] }
 0x1e9   : > { %20828 = vmatmul.mubr.msk.bf16.gmra.mrb[76].mxu0 %vm1887_vm4, %v18472_v38  ;;  %20247 = vmatprep.mubr.msk.bf16.mxu1 %vm1887_vm4, %v17603_v49  ;;  %v24283_v38 = vld [vmem:[%s23101_s5 + $0x64] sm:$0xf]  ;;  %v9523_v49 = vrot.slane %v18230_v2, 5 }
 0x1ea   : > { %20831 = vmatprep.mubr.msk.bf16.mxu0 %vm1887_vm4, %v18473_v44  ;;  %v17606_v42 = vcombine.low %v24280_v40, %v24283_v38  ;;  %v22613_v44 = vld [vmem:[%s23101_s5 + $0x6c] sm:$0xf] }
 0x1eb   : > { %v17607_v50 = vcombine.low %v22613_v44, %v24289_v41  ;;  %v9525_v55 = vrot.slane %v9523_v49, 4  ;;  %v9524_v60 = vsel %vm23613_vm8, %v9522_v58, %v9523_v49  ;;  %v9545_v49 = vrot.slane %v18238_v33, 5  ;;  %v18241_v58 = vld [vmem:[%s23101_s5 + $0x1ec] sm:$0xf]  ;;  %v18246_v33 = vld [vmem:[%s23101_s5 + $0x200] sm:$0xf] }
 0x1ec   : > { %v18478_v27 = vcombine.low %v9521_v59, %v9524_v60  ;;  %v24354_v59 = vld [vmem:[%s23101_s5 + $0x94] sm:$0xf] }
 0x1ed   : > { %v9527_v63 = vsel %vm23613_vm8, %v9525_v55, %v9526_v10  ;;  %v18240_v10 = vld [vmem:[%s23101_s5 + $0x1e8] sm:$0xf]  ;;  %v24345_v55 = vld [vmem:[%s23101_s5 + $0x84] sm:$0xf]  ;;  %v9547_v56 = vrot.slane %v9545_v49, 4 }
 0x1ee   : > { %v18479_v30 = vcombine.low %v9527_v63, %v9530_v26  ;;  %v17610_v51 = vcombine.low %v24345_v55, %v24348_v21 }
 0x1f0   : > { %20248 = vmatmul.mubr.msk.bf16.gmra.mrb[16].mxu1 %vm1887_vm4, %v17604_v7  ;;  %v9539_v7 = vrot.slane %v18236_v57, 5  ;;  %v22621_v57 = vld [vmem:[%s23101_s5 + $0x90] sm:$0xf] }
 0x1f1   : > { %20832 = vmatmul.mubr.msk.bf16.gmra.mrb[80].mxu0 %vm1887_vm4, %v18474_v11  ;;  %20251 = vmatprep.mubr.msk.bf16.mxu1 %vm1887_vm4, %v17605_v13  ;;  %v18237_v11 = vld [vmem:[%s23101_s5 + $0x1dc] sm:$0xf]  ;;  %v18412_v13 = vld [vmem:[%s23101_s5 + $0x1d4] sm:$0xe]  ;;  %v17611_v60 = vcombine.low %v22621_v57, %v24354_v59 }
 0x1f2   : > { %20835 = vmatprep.mubr.msk.bf16.mxu0 %vm1887_vm4, %v18475_v16  ;;  %v24310_v16 = vld [vmem:[%s23101_s5 + $0x74] sm:$0xf]  ;;  %v18428_v2 = vrot.slane %v18412_v13, 9  ;;  %v9541_v23 = vrot.slane %v9539_v7, 4  ;;  %v9542_v32 = vrot.slane %v18237_v11, 5 }
 0x1f3   : > { %v17608_v24 = vcombine.low %v24310_v16, %v24313_v22 }
 0x1f4   : > { %v9540_v44 = vsel %vm23613_vm8, %v18428_v2, %v9539_v7  ;;  %v9544_v26 = vrot.slane %v9542_v32, 4  ;;  %v24358_v7 = vand.u32 %v18964_v54, %v23074_v4 }
 0x1f6   : > { %21009 = vmatprep.subr.bf16.mxu0 %v24358_v7 }
 0x1f8   : > { %20252 = vmatmul.mubr.msk.bf16.gmra.mrb[20].mxu1 %vm1887_vm4, %v17606_v42  ;;  %v9536_v42 = vsel %vm23613_vm8, %v9534_v34, %v9535_v36 }
 0x1f9   : > { %20836 = vmatmul.mubr.msk.bf16.gmra.mrb[84].mxu0 %vm1887_vm4, %v18476_v37  ;;  %20255 = vmatprep.mubr.msk.bf16.mxu1 %vm1887_vm4, %v17607_v50  ;;  %v18239_v37 = vld [vmem:[%s23101_s5 + $0x1e4] sm:$0xf]  ;;  %v9543_v50 = vsel %vm23613_vm8, %v9541_v23, %v9542_v32  ;;  %v18480_v0 = vcombine.low %v9533_v25, %v9536_v42  ;;  %v18243_v23 = vld [vmem:[%s23101_s5 + $0x1f4] sm:$0x1]  ;;  %v24379_v25 = vld [vmem:[%s23101_s5 + $0x98] sm:$0xf] }
 0x1fa   : > { %20839 = vmatprep.mubr.msk.bf16.mxu0 %vm1887_vm4, %v18477_v52  ;;  %v9551_v52 = vrot.slane %v18240_v10, 5  ;;  %v9548_v62 = vrot.slane %v18239_v37, 5  ;;  %v18481_v63 = vcombine.low %v9540_v44, %v9543_v50  ;;  %v18413_v10 = vld [vmem:[%s23101_s5 + $0x1f8] sm:$0xe]  ;;  %v24382_v42 = vld [vmem:[%s23101_s5 + $0x9c] sm:$0xf] }
 0x1fb   : > { %v17612_v37 = vcombine.low %v24379_v25, %v24382_v42  ;;  %v24387_v44 = vld [vmem:[%s23101_s5 + $0xa0] sm:$0xf]  ;;  %v24390_v50 = vld [vmem:[%s23101_s5 + $0xa4] sm:$0xf]  ;;  %v18429_v57 = vrot.slane %v18413_v10, 9 }
 0x1fc   : > { %v9550_v11 = vrot.slane %v9548_v62, 4  ;;  %v9553_v13 = vrot.slane %v9551_v52, 4  ;;  %v9549_v31 = vsel %vm23613_vm8, %v9547_v56, %v9548_v62  ;;  %v9567_v62 = vrot.slane %v18246_v33, 5  ;;  %v22629_v10 = vld [vmem:[%s23101_s5 + $0xb4] sm:$0xf] }
 0x1fe   : > { %v9552_v36 = vsel %vm23613_vm8, %v9550_v11, %v9551_v52  ;;  %v17613_v52 = vcombine.low %v24387_v44, %v24390_v50 }
 0x200   : > { %20256 = vmatmul.mubr.msk.bf16.gmra.mrb[24].mxu1 %vm1887_vm4, %v17608_v24  ;;  %v9554_v24 = vrot.slane %v18241_v58, 5 }
 0x201   : > { %20840 = vmatmul.mubr.msk.bf16.gmra.mrb[88].mxu0 %vm1887_vm4, %v18478_v27  ;;  %20259 = vmatprep.mubr.msk.bf16.mxu1 %vm1887_vm4, %v17609_v17  ;;  %v18242_v27 = vld [vmem:[%s23101_s5 + $0x1f0] sm:$0xf]  ;;  %v18245_v17 = vld [vmem:[%s23101_s5 + $0x1fc] sm:$0xf] }
 0x202   : > { %20843 = vmatprep.mubr.msk.bf16.mxu0 %vm1887_vm4, %v18479_v30  ;;  %v9546_v30 = vsel %vm23613_vm8, %v9544_v26, %v9545_v49  ;;  %v9557_v34 = vrot.slane %v18242_v27, 5  ;;  %v9555_v2 = vsel %vm23613_vm8, %v9553_v13, %v9554_v24  ;;  %v9564_v32 = vrot.slane %v18245_v17, 5  ;;  %v18249_v26 = vld [vmem:[%s23101_s5 + $0x20c] sm:$0xf]  ;;  %v18248_v13 = vld [vmem:[%s23101_s5 + $0x208] sm:$0xf] }
 0x203   : > { %v18482_v49 = vcombine.low %v9546_v30, %v9549_v31  ;;  %v18483_v54 = vcombine.low %v9552_v36, %v9555_v2  ;;  %v9556_v58 = vrot.slane %v9554_v24, 4  ;;  %v9576_v30 = vrot.slane %v18249_v26, 5  ;;  %v18250_v31 = vld [vmem:[%s23101_s5 + $0x210] sm:$0xf]  ;;  %v24411_v36 = vld [vmem:[%s23101_s5 + $0xa8] sm:$0xf] }
 0x204   : > { %v9565_v27 = vsel %vm23613_vm8, %v18429_v57, %v9564_v32  ;;  %v24414_v2 = vld [vmem:[%s23101_s5 + $0xac] sm:$0xf]  ;;  %v9573_v33 = vrot.slane %v18248_v13, 5  ;;  %v18251_v57 = vld [vmem:[%s23101_s5 + $0x214] sm:$0xf] }
 0x205   : > { %v9558_v56 = vsel %vm23613_vm8, %v9556_v58, %v9557_v34  ;;  %v9582_v26 = vrot.slane %v18251_v57, 5  ;;  %v18252_v13 = vld [vmem:[%s23101_s5 + $0x218] sm:$0x1] }
 0x206   : > { %v9575_v58 = vrot.slane %v9573_v33, 4 }
 0x208   : > { %20260 = vmatmul.mubr.msk.bf16.gmra.mrb[28].mxu1 %vm1887_vm4, %v17610_v51  ;;  %v9559_v51 = vrot.slane %v9557_v34, 4  ;;  %v17614_v34 = vcombine.low %v24411_v36, %v24414_v2 }
 0x209   : > { %20844 = vmatmul.mubr.msk.bf16.gmra.mrb[92].mxu0 %vm1887_vm4, %v18480_v0  ;;  %20263 = vmatprep.mubr.msk.bf16.mxu1 %vm1887_vm4, %v17611_v60  ;;  %v9560_v0 = vrot.slane %v18243_v23, 5  ;;  %v9566_v60 = vrot.slane %v9564_v32, 4 }
 0x20a   : > { %20847 = vmatprep.mubr.msk.bf16.mxu0 %vm1887_vm4, %v18481_v63  ;;  %v18247_v63 = vld [vmem:[%s23101_s5 + $0x204] sm:$0xf] }
 0x20b   : > { %v9561_v11 = vsel %vm23613_vm8, %v9559_v51, %v9560_v0  ;;  %v9570_v24 = vrot.slane %v18247_v63, 5  ;;  %v9568_v17 = vsel %vm23613_vm8, %v9566_v60, %v9567_v62  ;;  %v9578_v51 = vrot.slane %v9576_v30, 4  ;;  %v18254_v60 = vld [vmem:[%s23101_s5 + $0x220] sm:$0xf] }
 0x20c   : > { %v18484_v23 = vcombine.low %v9558_v56, %v9561_v11  ;;  %v9579_v0 = vrot.slane %v18250_v31, 5  ;;  %v9577_v56 = vsel %vm23613_vm8, %v9575_v58, %v9576_v30  ;;  %v18414_v31 = vld [vmem:[%s23101_s5 + $0x21c] sm:$0xe]  ;;  %v24452_v30 = vld [vmem:[%s23101_s5 + $0xc8] sm:$0xf]  ;;  %v9585_v58 = vrot.slane %v18252_v13, 5 }
 0x20d   : > { %29200 = vst [vmem:[#allocation6_spill] sm:$0xff] %v24452_v30 }
 0x20e   : > { %v9580_v11 = vsel %vm23613_vm8, %v9578_v51, %v9579_v0  ;;  %v18430_v51 = vrot.slane %v18414_v31, 9 }
 0x210   : > { %20264 = vmatmul.mubr.msk.bf16.gmra.mrb[32].mxu1 %vm1887_vm4, %v17612_v37  ;;  %v24420_v37 = vld [vmem:[%s23101_s5 + $0xb8] sm:$0xf] }
 0x211   : > { %20848 = vmatmul.mubr.msk.bf16.gmra.mrb[96].mxu0 %vm1887_vm4, %v18482_v49  ;;  %20267 = vmatprep.mubr.msk.bf16.mxu1 %vm1887_vm4, %v17613_v52  ;;  %v17615_v32 = vcombine.low %v22629_v10, %v24420_v37  ;;  %v18485_v49 = vcombine.low %v9565_v27, %v9568_v17  ;;  %v9569_v52 = vrot.slane %v9567_v62, 4  ;;  %v9589_v27 = vrot.slane %v18254_v60, 5  ;;  %v18255_v17 = vld [vmem:[%s23101_s5 + $0x224] sm:$0xf] }
 0x212   : > { %20851 = vmatprep.mubr.msk.bf16.mxu0 %vm1887_vm4, %v18483_v54  ;;  %v9572_v54 = vrot.slane %v9570_v24, 4  ;;  %v24449_v10 = vld [vmem:[%s23101_s5 + $0xc4] sm:$0xf]  ;;  %v9592_v60 = vrot.slane %v18255_v17, 5 }
 0x213   : > { %v9571_v62 = vsel %vm23613_vm8, %v9569_v52, %v9570_v24  ;;  %29199 = vst [vmem:[#allocation5_spill] sm:$0xff] %v24449_v10  ;;  %v9581_v52 = vrot.slane %v9579_v0, 4  ;;  %v9591_v57 = vrot.slane %v9589_v27, 4  ;;  %v9590_v13 = vsel %vm23613_vm8, %v18430_v51, %v9589_v27 }
 0x214   : > { %v9574_v63 = vsel %vm23613_vm8, %v9572_v54, %v9573_v33  ;;  %v9584_v54 = vrot.slane %v9582_v26, 4  ;;  %v9594_v51 = vrot.slane %v9592_v60, 4 }
 0x215   : > { %v18486_v33 = vcombine.low %v9571_v62, %v9574_v63  ;;  %v18258_v62 = vld [vmem:[%s23101_s5 + $0x230] sm:$0xf]  ;;  %v9583_v0 = vsel %vm23613_vm8, %v9581_v52, %v9582_v26  ;;  %v9593_v17 = vsel %vm23613_vm8, %v9591_v57, %v9592_v60 }
 0x216   : > { %v9586_v63 = vsel %vm23613_vm8, %v9584_v54, %v9585_v58  ;;  %v9601_v31 = vrot.slane %v18258_v62, 5  ;;  %v24482_v54 = vld [vmem:[%s23101_s5 + $0xdc] sm:$0xf]  ;;  %v18489_v58 = vcombine.low %v9590_v13, %v9593_v17 }
 0x217   : > { %29203 = vst [vmem:[#allocation9_spill] sm:$0xff] %v24482_v54  ;;  %v18261_v17 = vld [vmem:[%s23101_s5 + $0x23c] sm:$0x1] }
 0x218   : > { %20268 = vmatmul.mubr.msk.bf16.gmra.mrb[36].mxu1 %vm1887_vm4, %v17614_v34  ;;  %v24441_v34 = vld [vmem:[%s23101_s5 + $0xbc] sm:$0xf] }
 0x219   : > { %20852 = vmatmul.mubr.msk.bf16.gmra.mrb[100].mxu0 %vm1887_vm4, %v18484_v23  ;;  %20271 = vmatprep.mubr.msk.bf16.mxu1 %vm1887_vm4, %v17615_v32  ;;  %v24444_v23 = vld [vmem:[%s23101_s5 + $0xc0] sm:$0xf]  ;;  %v17617_v32 = vcombine.low %v24449_v10, %v24452_v30  ;;  %v9603_v10 = vrot.slane %v9601_v31, 4 }
 0x21a   : > { %20855 = vmatprep.mubr.msk.bf16.mxu0 %vm1887_vm4, %v18485_v49  ;;  %29198 = vst [vmem:[#allocation4_spill] sm:$0xff] %v24444_v23  ;;  %v17616_v24 = vcombine.low %v24441_v34, %v24444_v23  ;;  %v18487_v49 = vcombine.low %v9577_v56, %v9580_v11  ;;  %v18257_v56 = vld [vmem:[%s23101_s5 + $0x22c] sm:$0xf]  ;;  %v9595_v11 = vrot.slane %v18256_v35, 5  ;;  %v22637_v35 = vld [vmem:[%s23101_s5 + $0xd8] sm:$0xf] }
 0x21b   : > { %v9598_v52 = vrot.slane %v18257_v56, 5  ;;  %v17619_v27 = vcombine.low %v22637_v35, %v24482_v54  ;;  %v18260_v23 = vld [vmem:[%s23101_s5 + $0x238] sm:$0xf]  ;;  %v24503_v35 = vld [vmem:[%s23101_s5 + $0xe0] sm:$0xf] }
 0x21c   : > { %v9597_v57 = vrot.slane %v9595_v11, 4  ;;  %v9596_v60 = vsel %vm23613_vm8, %v9594_v51, %v9595_v11  ;;  %29204 = vst [vmem:[#allocation10_spill] sm:$0xff] %v24503_v35 }
 0x21d   : > { %v9600_v62 = vrot.slane %v9598_v52, 4 }
 0x21f   : > { %v9602_v56 = vsel %vm23613_vm8, %v9600_v62, %v9601_v31  ;;  %v24514_v31 = vld [vmem:[%s23101_s5 + $0xec] sm:$0xf] }
 0x220   : > { %20272 = vmatmul.mubr.msk.bf16.gmra.mrb[40].mxu1 %vm1887_vm4, %v17616_v24  ;;  %v18259_v24 = vld [vmem:[%s23101_s5 + $0x234] sm:$0xf]  ;;  %29207 = vst [vmem:[#allocation13_spill] sm:$0xff] %v24514_v31 }
 0x221   : > { %20856 = vmatmul.mubr.msk.bf16.gmra.mrb[104].mxu0 %vm1887_vm4, %v18486_v33  ;;  %20275 = vmatprep.mubr.msk.bf16.mxu1 %vm1887_vm4, %v17617_v32  ;;  %v24473_v33 = vld [vmem:[%s23101_s5 + $0xcc] sm:$0xf]  ;;  %v24476_v32 = vld [vmem:[%s23101_s5 + $0xd0] sm:$0xf]  ;;  %v9604_v30 = vrot.slane %v18259_v24, 5 }
 0x222   : > { %20859 = vmatprep.mubr.msk.bf16.mxu0 %vm1887_vm4, %v18487_v49  ;;  %29201 = vst [vmem:[#allocation7_spill] sm:$0xff] %v24473_v33  ;;  %29202 = vst [vmem:[#allocation8_spill] sm:$0xff] %v24476_v32  ;;  %v17618_v26 = vcombine.low %v24473_v33, %v24476_v32  ;;  %v18488_v49 = vcombine.low %v9583_v0, %v9586_v63  ;;  %v18263_v32 = vld [vmem:[%s23101_s5 + $0x244] sm:$0xf]  ;;  %v9599_v0 = vsel %vm23613_vm8, %v9597_v57, %v9598_v52  ;;  %v24511_v52 = vld [vmem:[%s23101_s5 + $0xe8] sm:$0xf] }
 0x223   : > { %v9607_v63 = vrot.slane %v18260_v23, 5  ;;  %v9605_v13 = vsel %vm23613_vm8, %v9603_v10, %v9604_v30  ;;  %v9614_v24 = vrot.slane %v18263_v32, 5  ;;  %v18490_v23 = vcombine.low %v9596_v60, %v9599_v0  ;;  %29206 = vst [vmem:[#allocation12_spill] sm:$0xff] %v24511_v52  ;;  %v18267_v60 = vld [vmem:[%s23101_s5 + $0x254] sm:$0xf] }
 0x224   : > { %v17621_v10 = vcombine.low %v24511_v52, %v24514_v31  ;;  %v18491_v32 = vcombine.low %v9602_v56, %v9605_v13  ;;  %v9610_v57 = vrot.slane %v18261_v17, 5  ;;  %v18266_v56 = vld [vmem:[%s23101_s5 + $0x250] sm:$0xf] }
 0x225   : > { %v9609_v51 = vrot.slane %v9607_v63, 4  ;;  %v9616_v54 = vrot.slane %v9614_v24, 4 }
 0x227   : > { %v9611_v0 = vsel %vm23613_vm8, %v9609_v51, %v9610_v57  ;;  %v22645_v51 = vld [vmem:[%s23101_s5 + $0xfc] sm:$0xf] }
 0x228   : > { %20276 = vmatmul.mubr.msk.bf16.gmra.mrb[44].mxu1 %vm1887_vm4, %v17618_v26  ;;  %v18264_v26 = vld [vmem:[%s23101_s5 + $0x248] sm:$0xf] }
 0x229   : > { %20860 = vmatmul.mubr.msk.bf16.gmra.mrb[108].mxu0 %vm1887_vm4, %v18488_v49  ;;  %20279 = vmatprep.mubr.msk.bf16.mxu1 %vm1887_vm4, %v17619_v27  ;;  %v18415_v49 = vld [vmem:[%s23101_s5 + $0x240] sm:$0xe]  ;;  %v24506_v27 = vld [vmem:[%s23101_s5 + $0xe4] sm:$0xf]  ;;  %v9617_v33 = vrot.slane %v18264_v26, 5 }
 0x22a   : > { %20863 = vmatprep.mubr.msk.bf16.mxu0 %vm1887_vm4, %v18489_v58  ;;  %29205 = vst [vmem:[#allocation11_spill] sm:$0xff] %v24506_v27  ;;  %v17620_v11 = vcombine.low %v24503_v35, %v24506_v27  ;;  %v9606_v58 = vrot.slane %v9604_v30, 4  ;;  %v18431_v62 = vrot.slane %v18415_v49, 9  ;;  %v18265_v27 = vld [vmem:[%s23101_s5 + $0x24c] sm:$0xf]  ;;  %v9626_v49 = vrot.slane %v18267_v60, 5 }
 0x22b   : > { %v9620_v13 = vrot.slane %v18265_v27, 5  ;;  %v9618_v26 = vsel %vm23613_vm8, %v9616_v54, %v9617_v33  ;;  %v24544_v27 = vld [vmem:[%s23101_s5 + $0x100] sm:$0xf]  ;;  %v9619_v54 = vrot.slane %v9617_v33, 4  ;;  %v18269_v35 = vld [vmem:[%s23101_s5 + $0x25c] sm:$0xf] }
 0x22c   : > { %v9608_v30 = vsel %vm23613_vm8, %v9606_v58, %v9607_v63  ;;  %v9615_v17 = vsel %vm23613_vm8, %v18431_v62, %v9614_v24  ;;  %v9623_v58 = vrot.slane %v18266_v56, 5  ;;  %v17623_v24 = vcombine.low %v22645_v51, %v24544_v27  ;;  %v24570_v51 = vld [vmem:[%s23101_s5 + $0x10c] sm:$0xf] }
 0x22d   : > { %v18493_v57 = vcombine.low %v9615_v17, %v9618_v26  ;;  %v9622_v62 = vrot.slane %v9620_v13, 4  ;;  %v9628_v52 = vrot.slane %v9626_v49, 4  ;;  %v9621_v33 = vsel %vm23613_vm8, %v9619_v54, %v9620_v13  ;;  %v18270_v26 = vld [vmem:[%s23101_s5 + $0x260] sm:$0x1] }
 0x22e   : > { %v9625_v60 = vrot.slane %v9623_v58, 4 }
 0x230   : > { %20280 = vmatmul.mubr.msk.bf16.gmra.mrb[48].mxu1 %vm1887_vm4, %v17620_v11  ;;  %v18268_v11 = vld [vmem:[%s23101_s5 + $0x258] sm:$0xf]  ;;  %v9627_v56 = vsel %vm23613_vm8, %v9625_v60, %v9626_v49 }
 0x231   : > { %20864 = vmatmul.mubr.msk.bf16.gmra.mrb[112].mxu0 %vm1887_vm4, %v18490_v23  ;;  %20283 = vmatprep.mubr.msk.bf16.mxu1 %vm1887_vm4, %v17621_v10  ;;  %v24535_v23 = vld [vmem:[%s23101_s5 + $0xf0] sm:$0xf]  ;;  %v24538_v10 = vld [vmem:[%s23101_s5 + $0xf4] sm:$0xf]  ;;  %v9629_v31 = vrot.slane %v18268_v11, 5 }
 0x232   : > { %20867 = vmatprep.mubr.msk.bf16.mxu0 %vm1887_vm4, %v18491_v32  ;;  %v17622_v63 = vcombine.low %v24535_v23, %v24538_v10  ;;  %v18492_v32 = vcombine.low %v9608_v30, %v9611_v0  ;;  %v9624_v30 = vsel %vm23613_vm8, %v9622_v62, %v9623_v58  ;;  %v9632_v0 = vrot.slane %v18269_v35, 5  ;;  %v24562_v11 = vld [vmem:[%s23101_s5 + $0x104] sm:$0xf]  ;;  %v24573_v35 = vld [vmem:[%s23101_s5 + $0x110] sm:$0xf] }
 0x233   : > { %v9630_v17 = vsel %vm23613_vm8, %v9628_v52, %v9629_v31  ;;  %v18494_v13 = vcombine.low %v9621_v33, %v9624_v30  ;;  %v17625_v49 = vcombine.low %v24570_v51, %v24573_v35  ;;  %v9631_v58 = vrot.slane %v9629_v31, 4  ;;  %v24586_v31 = vld [vmem:[%s23101_s5 + $0x114] sm:$0xf]  ;;  %v24589_v60 = vld [vmem:[%s23101_s5 + $0x118] sm:$0xf] }
 0x234   : > { %v18495_v52 = vcombine.low %v9627_v56, %v9630_v17  ;;  %29208 = vst [vmem:[#allocation14_spill] sm:$0xff] %v24589_v60  ;;  %v17626_v33 = vcombine.low %v24586_v31, %v24589_v60  ;;  %v22653_v56 = vld [vmem:[%s23101_s5 + $0x120] sm:$0xf]  ;;  %v24595_v17 = vld [vmem:[%s23101_s5 + $0x124] sm:$0xf] }
 0x235   : > { %v9633_v54 = vsel %vm23613_vm8, %v9631_v58, %v9632_v0  ;;  %29209 = vst [vmem:[#allocation15_spill] sm:$0xff] %v24595_v17 }
 0x238   : > { %20284 = vmatmul.mubr.msk.bf16.gmra.mrb[52].mxu1 %vm1887_vm4, %v17622_v63  ;;  %v24565_v63 = vld [vmem:[%s23101_s5 + $0x108] sm:$0xf] }
 0x239   : > { %20868 = vmatmul.mubr.msk.bf16.gmra.mrb[116].mxu0 %vm1887_vm4, %v18492_v32  ;;  %20287 = vmatprep.mubr.msk.bf16.mxu1 %vm1887_vm4, %v17623_v24  ;;  %v17624_v32 = vcombine.low %v24562_v11, %v24565_v63  ;;  %v9634_v24 = vrot.slane %v9632_v0, 4  ;;  %v17627_v0 = vcombine.low %v22653_v56, %v24595_v17  ;;  %v24637_v56 = vld [vmem:[%s23101_s5 + $0x13c] sm:$0xf]  ;;  %v22430_v17 = vld [vmem:[%s23101_s5 + $0x154] sm:$0xff]  }
 0x23a   : > { %20871 = vmatprep.mubr.msk.bf16.mxu0 %vm1887_vm4, %v18493_v57  ;;  %v9635_v57 = vrot.slane %v18270_v26, 5  ;;  %v22370_v26 = vld [vmem:[%s23101_s5 + $0x48] sm:$0xff]   ;;  %29215 = vst [vmem:[#allocation21_spill] sm:$0xff] %v24637_v56 }
 0x23c   : > { %v9636_v62 = vsel %vm23613_vm8, %v9634_v24, %v9635_v57  ;;  %v22372_v24 = vld [vmem:[%s23101_s5 + $0x50] sm:$0xff]  }
 0x23d   : > { %v18496_v30 = vcombine.low %v9633_v54, %v9636_v62  ;;  %v24620_v57 = vld [vmem:[%s23101_s5 + $0x130] sm:$0xf]  ;;  %v24623_v54 = vld [vmem:[%s23101_s5 + $0x134] sm:$0xf] }
 0x23e   : > { %29212 = vst [vmem:[#allocation18_spill] sm:$0xff] %v24620_v57  ;;  %29213 = vst [vmem:[#allocation19_spill] sm:$0xff] %v24623_v54  ;;  %v17629_v62 = vcombine.low %v24620_v57, %v24623_v54  ;;  %v22382_v54 = vld [vmem:[%s23101_s5 + $0x7c] sm:$0xff]  }
 0x240   : > { %20288 = vmatmul.mubr.msk.bf16.gmra.mrb[56].mxu1 %vm1887_vm4, %v17624_v32  ;;  %v17998_v32 = vld [vmem:[%s29137_s1 + $0x6] sm:$0x3] }
 0x241   : > { %20872 = vmatmul.mubr.msk.bf16.gmra.mrb[120].mxu0 %vm1887_vm4, %v18494_v13  ;;  %20291 = vmatprep.mubr.msk.bf16.mxu1 %vm1887_vm4, %v17625_v49  ;;  %v24607_v13 = vand.u32 %v17998_v32, %v23074_v4  ;;  %v24610_v49 = vld [vmem:[%s23101_s5 + $0x128] sm:$0xf]  ;;  %v22661_v32 = vld [vmem:[%s23101_s5 + $0x144] sm:$0xf] }
 0x242   : > { %20875 = vmatprep.mubr.msk.bf16.mxu0 %vm1887_vm4, %v18495_v52  ;;  %29210 = vst [vmem:[#allocation16_spill] sm:$0xff] %v24610_v49  ;;  %v24613_v52 = vld [vmem:[%s23101_s5 + $0x12c] sm:$0xf] }
 0x243   : > { %29211 = vst [vmem:[#allocation17_spill] sm:$0xff] %v24613_v52  ;;  %v17628_v58 = vcombine.low %v24610_v49, %v24613_v52  ;;  %20489 = vmatprep.subr.bf16.mxu1 %v24607_v13  ;;  %v22428_v52 = vld [vmem:[%s23101_s5 + $0x14c] sm:$0xff]  }
 0x244   : > { %v22714_v49 = vld [vmem:[%s23101_s5 + $0x22c] sm:$0xf] }
 0x248   : > { %20292 = vmatmul.mubr.msk.bf16.gmra.mrb[60].mxu1 %vm1887_vm4, %v17626_v33  ;;  %v22374_v33 = vld [vmem:[%s23101_s5 + $0x58] sm:$0xff]  }
 0x249   : > { %20876 = vmatmul.mubr.msk.bf16.gmra.mrb[124].mxu0 %vm1887_vm4, %v18496_v30  ;;  %20295 = vmatprep.mubr.msk.bf16.mxu1 %vm1887_vm4, %v17627_v0  ;;  %v24634_v30 = vld [vmem:[%s23101_s5 + $0x138] sm:$0xf] }
 0x24a   : > { %20881 = vmatprep.mubr.msk.bf16.mxu0 %vm1887_vm4, %v22370_v26  ;;  %29214 = vst [vmem:[#allocation20_spill] sm:$0xff] %v24634_v30  ;;  %v17630_v0 = vcombine.low %v24634_v30, %v24637_v56  ;;  %v22376_v26 = vld [vmem:[%s23101_s5 + $0x60] sm:$0xff]  }
 0x250   : > { %20296 = vmatmul.mubr.msk.bf16.gmra.mrb[64].mxu1 %vm1887_vm4, %v17628_v58  ;;  %v24644_v58 = vld [vmem:[%s23101_s5 + $0x148] sm:$0xf] }
 0x251   : > { %20882 = vmatmul.mubr.msk.bf16.vlgmr.msra.gmra.mrb[0].mxu0 %vm1887_vm4, %v22372_v24  ;;  %20299 = vmatprep.mubr.msk.bf16.mxu1 %vm1887_vm4, %v17629_v62  ;;  %29216 = vst [vmem:[#allocation22_spill] sm:$0xff] %v24644_v58  ;;  %v22378_v24 = vld [vmem:[%s23101_s5 + $0x6c] sm:$0xff]  }
 0x252   : > { %21010 = vmatpush3.bf16.msra.mxu0 %v24358_v7  ;;  %20885 = vmatprep.mubr.msk.bf16.mxu0 %vm1887_vm4, %v22374_v33  ;;  %v17631_v7 = vcombine.low %v22661_v32, %v24644_v58  ;;  %v24653_v62 = vld [vmem:[%s23101_s5 + $0x14c] sm:$0xf]  ;;  %v22664_v33 = vld [vmem:[%s23101_s5 + $0x150] sm:$0xf]  ;;  %v22380_v32 = vld [vmem:[%s23101_s5 + $0x74] sm:$0xff]  }
 0x253   : > { %29217 = vst [vmem:[#allocation23_spill] sm:$0xff] %v24653_v62  ;;  %v17632_v56 = vcombine.low %v24653_v62, %v22664_v33  ;;  %v22665_v58 = vld [vmem:[%s23101_s5 + $0x154] sm:$0xf]  ;;  %v22384_v33 = vld [vmem:[%s23101_s5 + $0x84] sm:$0xff]  }
 0x258   : > { %20300 = vmatmul.mubr.msk.bf16.gmra.mrb[68].mxu1 %vm1887_vm4, %v17630_v0  ;;  %v22666_v0 = vld [vmem:[%s23101_s5 + $0x158] sm:$0xf] }
 0x259   : > { %20886 = vmatmul.mubr.msk.bf16.gmra.mrb[4].mxu0 %vm1887_vm4, %v22376_v26  ;;  %20303 = vmatprep.mubr.msk.bf16.mxu1 %vm1887_vm4, %v17631_v7  ;;  %v17633_v30 = vcombine.low %v22665_v58, %v22666_v0  ;;  %v22667_v26 = vld [vmem:[%s23101_s5 + $0x15c] sm:$0xf]  ;;  %v22668_v7 = vld [vmem:[%s23101_s5 + $0x160] sm:$0xf]  ;;  %v22669_v58 = vld [vmem:[%s23101_s5 + $0x168] sm:$0xf] }
 0x25a   : > { %20889 = vmatprep.mubr.msk.bf16.mxu0 %vm1887_vm4, %v22378_v24  ;;  %v17634_v24 = vcombine.low %v22667_v26, %v22668_v7  ;;  %v22670_v0 = vld [vmem:[%s23101_s5 + $0x16c] sm:$0xf]  ;;  %v22388_v26 = vld [vmem:[%s23101_s5 + $0x98] sm:$0xff]  }
 0x25b   : > { %v17635_v62 = vcombine.low %v22669_v58, %v22670_v0  ;;  %v22673_v7 = vld [vmem:[%s23101_s5 + $0x178] sm:$0xf]  ;;  %v22674_v58 = vld [vmem:[%s23101_s5 + $0x17c] sm:$0xf] }
 0x25c   : > { %v17637_v0 = vcombine.low %v22673_v7, %v22674_v58  ;;  %v22678_v7 = vld [vmem:[%s23101_s5 + $0x190] sm:$0xf] }
 0x260   : > { %20304 = vmatmul.mubr.msk.bf16.gmra.mrb[72].mxu1 %vm1887_vm4, %v17632_v56  ;;  %v22386_v56 = vld [vmem:[%s23101_s5 + $0x90] sm:$0xff]  }
 0x261   : > { %20890 = vmatmul.mubr.msk.bf16.gmra.mrb[8].mxu0 %vm1887_vm4, %v22380_v32  ;;  %20307 = vmatprep.mubr.msk.bf16.mxu1 %vm1887_vm4, %v17633_v30  ;;  %v22672_v30 = vld [vmem:[%s23101_s5 + $0x174] sm:$0xf] }
 0x262   : > { %20893 = vmatprep.mubr.msk.bf16.mxu0 %vm1887_vm4, %v22382_v54  ;;  %v22671_v54 = vld [vmem:[%s23101_s5 + $0x170] sm:$0xf] }
 0x263   : > { %v17636_v32 = vcombine.low %v22671_v54, %v22672_v30  ;;  %v22392_v54 = vld [vmem:[%s23101_s5 + $0xa8] sm:$0xff]  }
 0x264   : > { %v22677_v30 = vld [vmem:[%s23101_s5 + $0x18c] sm:$0xf] }
 0x265   : > { %v17639_v58 = vcombine.low %v22677_v30, %v22678_v7  ;;  %v22682_v30 = vld [vmem:[%s23101_s5 + $0x1a0] sm:$0xf] }
 0x268   : > { %20308 = vmatmul.mubr.msk.bf16.gmra.mrb[76].mxu1 %vm1887_vm4, %v17634_v24  ;;  %v22390_v24 = vld [vmem:[%s23101_s5 + $0xa0] sm:$0xff]  }
 0x269   : > { %20894 = vmatmul.mubr.msk.bf16.gmra.mrb[12].mxu0 %vm1887_vm4, %v22384_v33  ;;  %20311 = vmatprep.mubr.msk.bf16.mxu1 %vm1887_vm4, %v17635_v62  ;;  %v22675_v62 = vld [vmem:[%s23101_s5 + $0x180] sm:$0xf]  ;;  %v22676_v33 = vld [vmem:[%s23101_s5 + $0x184] sm:$0xf] }
 0x26a   : > { %20897 = vmatprep.mubr.msk.bf16.mxu0 %vm1887_vm4, %v22386_v56  ;;  %v17638_v56 = vcombine.low %v22675_v62, %v22676_v33  ;;  %v22396_v62 = vld [vmem:[%s23101_s5 + $0xbc] sm:$0xff]  }
 0x26b   : > { %v22681_v33 = vld [vmem:[%s23101_s5 + $0x19c] sm:$0xf] }
 0x26c   : > { %v17641_v7 = vcombine.low %v22681_v33, %v22682_v30  ;;  %v22686_v33 = vld [vmem:[%s23101_s5 + $0x1b4] sm:$0xf] }
 0x270   : > { %20312 = vmatmul.mubr.msk.bf16.gmra.mrb[80].mxu1 %vm1887_vm4, %v17636_v32  ;;  %v22394_v32 = vld [vmem:[%s23101_s5 + $0xb4] sm:$0xff]  }
 0x271   : > { %20898 = vmatmul.mubr.msk.bf16.gmra.mrb[16].mxu0 %vm1887_vm4, %v22388_v26  ;;  %20315 = vmatprep.mubr.msk.bf16.mxu1 %vm1887_vm4, %v17637_v0  ;;  %v22679_v26 = vld [vmem:[%s23101_s5 + $0x194] sm:$0xf]  ;;  %v22680_v0 = vld [vmem:[%s23101_s5 + $0x198] sm:$0xf] }
 0x272   : > { %20901 = vmatprep.mubr.msk.bf16.mxu0 %vm1887_vm4, %v22390_v24  ;;  %v17640_v24 = vcombine.low %v22679_v26, %v22680_v0  ;;  %v22400_v26 = vld [vmem:[%s23101_s5 + $0xcc] sm:$0xff]  }
 0x273   : > { %v22685_v0 = vld [vmem:[%s23101_s5 + $0x1b0] sm:$0xf] }
 0x274   : > { %v17643_v30 = vcombine.low %v22685_v0, %v22686_v33  ;;  %v22690_v0 = vld [vmem:[%s23101_s5 + $0x1c4] sm:$0xf] }
 0x278   : > { %20316 = vmatmul.mubr.msk.bf16.gmra.mrb[84].mxu1 %vm1887_vm4, %v17638_v56  ;;  %v22398_v56 = vld [vmem:[%s23101_s5 + $0xc4] sm:$0xff]  }
 0x279   : > { %20902 = vmatmul.mubr.msk.bf16.gmra.mrb[20].mxu0 %vm1887_vm4, %v22392_v54  ;;  %20319 = vmatprep.mubr.msk.bf16.mxu1 %vm1887_vm4, %v17639_v58  ;;  %v22683_v54 = vld [vmem:[%s23101_s5 + $0x1a4] sm:$0xf]  ;;  %v22684_v58 = vld [vmem:[%s23101_s5 + $0x1a8] sm:$0xf] }
 0x27a   : > { %20905 = vmatprep.mubr.msk.bf16.mxu0 %vm1887_vm4, %v22394_v32  ;;  %v17642_v32 = vcombine.low %v22683_v54, %v22684_v58  ;;  %v22404_v54 = vld [vmem:[%s23101_s5 + $0xe0] sm:$0xff]  }
 0x27b   : > { %v22689_v58 = vld [vmem:[%s23101_s5 + $0x1c0] sm:$0xf] }
 0x27c   : > { %v17645_v33 = vcombine.low %v22689_v58, %v22690_v0  ;;  %v22694_v58 = vld [vmem:[%s23101_s5 + $0x1d8] sm:$0xf] }
 0x280   : > { %20320 = vmatmul.mubr.msk.bf16.gmra.mrb[88].mxu1 %vm1887_vm4, %v17640_v24  ;;  %v22402_v24 = vld [vmem:[%s23101_s5 + $0xd8] sm:$0xff]  }
 0x281   : > { %20906 = vmatmul.mubr.msk.bf16.gmra.mrb[24].mxu0 %vm1887_vm4, %v22396_v62  ;;  %20323 = vmatprep.mubr.msk.bf16.mxu1 %vm1887_vm4, %v17641_v7  ;;  %v22687_v62 = vld [vmem:[%s23101_s5 + $0x1b8] sm:$0xf]  ;;  %v22688_v7 = vld [vmem:[%s23101_s5 + $0x1bc] sm:$0xf] }
 0x282   : > { %20909 = vmatprep.mubr.msk.bf16.mxu0 %vm1887_vm4, %v22398_v56  ;;  %v17644_v56 = vcombine.low %v22687_v62, %v22688_v7  ;;  %v22408_v62 = vld [vmem:[%s23101_s5 + $0xf0] sm:$0xff]  }
 0x283   : > { %v22693_v7 = vld [vmem:[%s23101_s5 + $0x1d4] sm:$0xf] }
 0x284   : > { %v17647_v0 = vcombine.low %v22693_v7, %v22694_v58  ;;  %v22698_v7 = vld [vmem:[%s23101_s5 + $0x1e8] sm:$0xf] }
 0x288   : > { %20324 = vmatmul.mubr.msk.bf16.gmra.mrb[92].mxu1 %vm1887_vm4, %v17642_v32  ;;  %v22406_v32 = vld [vmem:[%s23101_s5 + $0xe8] sm:$0xff]  }
 0x289   : > { %20910 = vmatmul.mubr.msk.bf16.gmra.mrb[28].mxu0 %vm1887_vm4, %v22400_v26  ;;  %20327 = vmatprep.mubr.msk.bf16.mxu1 %vm1887_vm4, %v17643_v30  ;;  %v22691_v26 = vld [vmem:[%s23101_s5 + $0x1c8] sm:$0xf]  ;;  %v22692_v30 = vld [vmem:[%s23101_s5 + $0x1cc] sm:$0xf] }
 0x28a   : > { %20913 = vmatprep.mubr.msk.bf16.mxu0 %vm1887_vm4, %v22402_v24  ;;  %v17646_v24 = vcombine.low %v22691_v26, %v22692_v30  ;;  %v22412_v26 = vld [vmem:[%s23101_s5 + $0x104] sm:$0xff]  }
 0x28b   : > { %v22697_v30 = vld [vmem:[%s23101_s5 + $0x1e4] sm:$0xf] }
 0x28c   : > { %v17649_v58 = vcombine.low %v22697_v30, %v22698_v7  ;;  %v22702_v30 = vld [vmem:[%s23101_s5 + $0x1fc] sm:$0xf] }
 0x290   : > { %20328 = vmatmul.mubr.msk.bf16.gmra.mrb[96].mxu1 %vm1887_vm4, %v17644_v56  ;;  %v22410_v56 = vld [vmem:[%s23101_s5 + $0xfc] sm:$0xff]  }
 0x291   : > { %20914 = vmatmul.mubr.msk.bf16.gmra.mrb[32].mxu0 %vm1887_vm4, %v22404_v54  ;;  %20331 = vmatprep.mubr.msk.bf16.mxu1 %vm1887_vm4, %v17645_v33  ;;  %v22695_v54 = vld [vmem:[%s23101_s5 + $0x1dc] sm:$0xf]  ;;  %v22696_v33 = vld [vmem:[%s23101_s5 + $0x1e0] sm:$0xf] }
 0x292   : > { %20917 = vmatprep.mubr.msk.bf16.mxu0 %vm1887_vm4, %v22406_v32  ;;  %v17648_v32 = vcombine.low %v22695_v54, %v22696_v33  ;;  %v22416_v54 = vld [vmem:[%s23101_s5 + $0x114] sm:$0xff]  }
 0x293   : > { %v22701_v33 = vld [vmem:[%s23101_s5 + $0x1f8] sm:$0xf] }
 0x294   : > { %v17651_v7 = vcombine.low %v22701_v33, %v22702_v30  ;;  %v22706_v33 = vld [vmem:[%s23101_s5 + $0x20c] sm:$0xf] }
 0x298   : > { %20332 = vmatmul.mubr.msk.bf16.gmra.mrb[100].mxu1 %vm1887_vm4, %v17646_v24  ;;  %v22414_v24 = vld [vmem:[%s23101_s5 + $0x10c] sm:$0xff]  }
 0x299   : > { %20918 = vmatmul.mubr.msk.bf16.gmra.mrb[36].mxu0 %vm1887_vm4, %v22408_v62  ;;  %20335 = vmatprep.mubr.msk.bf16.mxu1 %vm1887_vm4, %v17647_v0  ;;  %v22699_v62 = vld [vmem:[%s23101_s5 + $0x1ec] sm:$0xf]  ;;  %v22700_v0 = vld [vmem:[%s23101_s5 + $0x1f0] sm:$0xf] }
 0x29a   : > { %20921 = vmatprep.mubr.msk.bf16.mxu0 %vm1887_vm4, %v22410_v56  ;;  %v17650_v56 = vcombine.low %v22699_v62, %v22700_v0  ;;  %v22420_v62 = vld [vmem:[%s23101_s5 + $0x128] sm:$0xff]  }
 0x29b   : > { %v22705_v0 = vld [vmem:[%s23101_s5 + $0x208] sm:$0xf] }
 0x29c   : > { %v17653_v30 = vcombine.low %v22705_v0, %v22706_v33  ;;  %v22710_v0 = vld [vmem:[%s23101_s5 + $0x220] sm:$0xf]  ;;  %v22426_v33 = vld [vmem:[%s23101_s5 + $0x144] sm:$0xff]  }
 0x2a0   : > { %20336 = vmatmul.mubr.msk.bf16.gmra.mrb[104].mxu1 %vm1887_vm4, %v17648_v32  ;;  %v22418_v32 = vld [vmem:[%s23101_s5 + $0x120] sm:$0xff]  }
 0x2a1   : > { %20922 = vmatmul.mubr.msk.bf16.gmra.mrb[40].mxu0 %vm1887_vm4, %v22412_v26  ;;  %20339 = vmatprep.mubr.msk.bf16.mxu1 %vm1887_vm4, %v17649_v58  ;;  %v22703_v26 = vld [vmem:[%s23101_s5 + $0x200] sm:$0xf]  ;;  %v22704_v58 = vld [vmem:[%s23101_s5 + $0x204] sm:$0xf] }
 0x2a2   : > { %20925 = vmatprep.mubr.msk.bf16.mxu0 %vm1887_vm4, %v22414_v24  ;;  %v17652_v24 = vcombine.low %v22703_v26, %v22704_v58  ;;  %v22424_v26 = vld [vmem:[%s23101_s5 + $0x138] sm:$0xff]  }
 0x2a3   : > { %v22709_v58 = vld [vmem:[%s23101_s5 + $0x21c] sm:$0xf] }
 0x2a8   : > { %20340 = vmatmul.mubr.msk.bf16.gmra.mrb[108].mxu1 %vm1887_vm4, %v17650_v56  ;;  %v22422_v56 = vld [vmem:[%s23101_s5 + $0x130] sm:$0xff]  }
 0x2a9   : > { %20926 = vmatmul.mubr.msk.bf16.gmra.mrb[44].mxu0 %vm1887_vm4, %v22416_v54  ;;  %20343 = vmatprep.mubr.msk.bf16.mxu1 %vm1887_vm4, %v17651_v7  ;;  %v22707_v54 = vld [vmem:[%s23101_s5 + $0x210] sm:$0xf]  ;;  %v22708_v7 = vld [vmem:[%s23101_s5 + $0x214] sm:$0xf] }
 0x2aa   : > { %20929 = vmatprep.mubr.msk.bf16.mxu0 %vm1887_vm4, %v22418_v32  ;;  %v17654_v32 = vcombine.low %v22707_v54, %v22708_v7  ;;  %v22712_v54 = vld [vmem:[%s23101_s5 + $0x224] sm:$0xf]  ;;  %v22713_v7 = vld [vmem:[%s23101_s5 + $0x228] sm:$0xf] }
 0x2ab   : > { %v17656_v57 = vcombine.low %v22712_v54, %v22713_v7  ;;  %v22717_v54 = vld [vmem:[%s23101_s5 + $0x238] sm:$0xf]  ;;  %v22432_v7 = vld [vmem:[%s23101_s5 + $0x15c] sm:$0xff]  }
 0x2b0   : > { %20344 = vmatmul.mubr.msk.bf16.gmra.mrb[112].mxu1 %vm1887_vm4, %v17652_v24  ;;  %v17655_v24 = vcombine.low %v22709_v58, %v22710_v0  ;;  %v22715_v58 = vld [vmem:[%s23101_s5 + $0x230] sm:$0xf] }
 0x2b1   : > { %20930 = vmatmul.mubr.msk.bf16.gmra.mrb[48].mxu0 %vm1887_vm4, %v22420_v62  ;;  %20347 = vmatprep.mubr.msk.bf16.mxu1 %vm1887_vm4, %v17653_v30  ;;  %v22711_v62 = vld [vmem:[%s23101_s5 + $0x4] sm:$0xf]  ;;  %v17657_v0 = vcombine.low %v22714_v49, %v22715_v58  ;;  %v3760_v58 = vrot.slane %v24156_v43, 5 }
 0x2b2   : > { %20933 = vmatprep.mubr.msk.bf16.mxu0 %vm1887_vm4, %v22422_v56  ;;  %v3745_v30 = vrot.slane %v22711_v62, 5  ;;  %v3692_v56 = vld [vmem:[%s23101_s5] sm:$0xe] }
 0x2b8   : > { %20348 = vmatmul.mubr.msk.bf16.gmra.mrb[116].mxu1 %vm1887_vm4, %v17654_v32  ;;  %v17723_v32 = vrot.slane %v3692_v56, 9  ;;  %v3757_v56 = vrot.slane %v24130_v18, 5  ;;  %v22718_v18 = vld [vmem:[%s23101_s5 + $0x20] sm:$0x1] }
 0x2b9   : > { %20934 = vmatmul.mubr.msk.bf16.gmra.mrb[52].mxu0 %vm1887_vm4, %v22424_v26  ;;  %20351 = vmatprep.mubr.msk.bf16.mxu1 %vm1887_vm4, %v17655_v24  ;;  %v3747_v26 = vrot.slane %v3745_v30, 4  ;;  %v3748_v24 = vrot.slane %v24114_v1, 5  ;;  %v3754_v1 = vrot.slane %v24127_v29, 5  ;;  %v3762_v29 = vrot.slane %v3760_v58, 4 }
 0x2ba   : > { %20937 = vmatprep.mubr.msk.bf16.mxu0 %vm1887_vm4, %v22426_v33  ;;  %v3751_v33 = vrot.slane %v24117_v19, 5  ;;  %v3746_v49 = vsel %vm23613_vm8, %v17723_v32, %v3745_v30  ;;  %v22433_v19 = vld [vmem:[%s23101_s5 + $0x168] sm:$0xff]   ;;  %v3763_v30 = vrot.slane %v24159_v47, 5 }
 0x2bb   : > { %v3749_v62 = vsel %vm23613_vm8, %v3747_v26, %v3748_v24  ;;  %v3756_v32 = vrot.slane %v3754_v1, 4  ;;  %v3759_v26 = vrot.slane %v3757_v56, 4 }
 0x2bc   : > { %v3753_v60 = vrot.slane %v3751_v33, 4 }
 0x2be   : > { %v3755_v47 = vsel %vm23613_vm8, %v3753_v60, %v3754_v1  ;;  %v22434_v60 = vld [vmem:[%s23101_s5 + $0x170] sm:$0xff]  }
 0x2c0   : > { %20352 = vmatmul.mubr.msk.bf16.gmra.mrb[120].mxu1 %vm1887_vm4, %v17656_v57  ;;  %v22716_v57 = vld [vmem:[%s23101_s5 + $0x234] sm:$0xf] }
 0x2c1   : > { %20938 = vmatmul.mubr.msk.bf16.gmra.mrb[56].mxu0 %vm1887_vm4, %v22428_v52  ;;  %20355 = vmatprep.mubr.msk.bf16.mxu1 %vm1887_vm4, %v17657_v0  ;;  %v17658_v52 = vcombine.low %v22716_v57, %v22717_v54  ;;  %v17740_v0 = vcombine.low %v3746_v49, %v3749_v62  ;;  %v3766_v57 = vrot.slane %v22718_v18, 5  ;;  %v3693_v49 = vld [vmem:[%s23101_s5 + $0x24] sm:$0xe]  ;;  %v3770_v62 = vrot.slane %v24165_v53, 5  ;;  %v19125_v54 = vld [vmem:[%s29137_s1 + $0x10] sm:$0x3] }
 0x2c2   : > { %20941 = vmatprep.mubr.msk.bf16.mxu0 %vm1887_vm4, %v22430_v17  ;;  %v3750_v17 = vrot.slane %v3748_v24, 4  ;;  %v3765_v24 = vrot.slane %v3763_v30, 4  ;;  %v17724_v1 = vrot.slane %v3693_v49, 9  ;;  %v3776_v53 = vrot.slane %v24189_v8, 5 }
 0x2c3   : > { %v3785_v18 = vrot.slane %v24218_v39, 5  ;;  %v3788_v8 = vrot.slane %v24221_v45, 5  ;;  %v3798_v45 = vrot.slane %v24248_v3, 5 }
 0x2c4   : > { %v3752_v43 = vsel %vm23613_vm8, %v3750_v17, %v3751_v33  ;;  %v24820_v33 = vand.u32 %v19125_v54, %v23074_v4  ;;  %v22435_v4 = vld [vmem:[%s23101_s5 + $0x178] sm:$0xff]  }
 0x2c5   : > { %v17741_v17 = vcombine.low %v3752_v43, %v3755_v47  ;;  %v3795_v43 = vrot.slane %v24227_v46, 5  ;;  %v3778_v47 = vrot.slane %v3776_v53, 4  ;;  %v3801_v46 = vrot.slane %v24251_v5, 5 }
 0x2c6   : > { %29218 = vst [vmem:[#allocation24_spill] sm:$0xff] %v24820_v33  ;;  %21139 = vmatprep.subr.bf16.mxu0 %v24820_v33  ;;  %v3787_v49 = vrot.slane %v3785_v18, 4  ;;  %v29237_v33 = vld [vmem:[#allocation18_spill] sm:$0xff] }
 0x2c8   : > { %20356 = vmatmul.mubr.msk.bf16.gmra.mrb[124].mxu1 %vm1887_vm4, %v17658_v52  ;;  %v3758_v52 = vsel %vm23613_vm8, %v3756_v32, %v3757_v56  ;;  %v3764_v56 = vsel %vm23613_vm8, %v3762_v29, %v3763_v30  ;;  %v3772_v32 = vrot.slane %v3770_v62, 4  ;;  %v3771_v29 = vsel %vm23613_vm8, %v17724_v1, %v3770_v62  ;;  %v22719_v62 = vld [vmem:[%s23101_s5 + $0x44] sm:$0x1] }
 0x2c9   : > { %20942 = vmatmul.mubr.msk.bf16.gmra.mrb[60].mxu0 %vm1887_vm4, %v22432_v7  ;;  %20361 = vmatprep.mubr.msk.bf16.mxu1 %vm1887_vm4, %v17740_v0  ;;  %v3761_v7 = vsel %vm23613_vm8, %v3759_v26, %v3760_v58  ;;  %v3773_v0 = vrot.slane %v24186_v61, 5  ;;  %v3767_v58 = vsel %vm23613_vm8, %v3765_v24, %v3766_v57  ;;  %v3782_v26 = vrot.slane %v24197_v15, 5  ;;  %v3694_v15 = vld [vmem:[%s23101_s5 + $0x48] sm:$0xe]  ;;  %v22436_v1 = vld [vmem:[%s23101_s5 + $0x180] sm:$0xff]  }
 0x2ca   : > { %20945 = vmatprep.mubr.msk.bf16.mxu0 %vm1887_vm4, %v22433_v19  ;;  %v17742_v19 = vcombine.low %v3758_v52, %v3761_v7  ;;  %v3779_v61 = vrot.slane %v24194_v14, 5  ;;  %v17743_v30 = vcombine.low %v3764_v56, %v3767_v58  ;;  %v3791_v54 = vrot.slane %v22719_v62, 5  ;;  %v22437_v56 = vld [vmem:[%s23101_s5 + $0x18c] sm:$0xff]  }
 0x2cb   : > { %v3775_v57 = vrot.slane %v3773_v0, 4  ;;  %v3774_v14 = vsel %vm23613_vm8, %v3772_v32, %v3773_v0  ;;  %v3784_v24 = vrot.slane %v3782_v26, 4  ;;  %v3790_v52 = vrot.slane %v3788_v8, 4 }
 0x2cc   : > { %v3781_v39 = vrot.slane %v3779_v61, 4  ;;  %v17725_v7 = vrot.slane %v3694_v15, 9  ;;  %v17744_v3 = vcombine.low %v3771_v29, %v3774_v14  ;;  %v3810_v0 = vrot.slane %v24280_v40, 5 }
 0x2cd   : > { %v3777_v5 = vsel %vm23613_vm8, %v3775_v57, %v3776_v53  ;;  %v3800_v58 = vrot.slane %v3798_v45, 4  ;;  %v3803_v32 = vrot.slane %v3801_v46, 4  ;;  %v3786_v29 = vsel %vm23613_vm8, %v3784_v24, %v3785_v18  ;;  %v3695_v18 = vld [vmem:[%s23101_s5 + $0x6c] sm:$0xe] }
 0x2ce   : > { %v3820_v57 = vrot.slane %v24289_v41, 5  ;;  %v24867_v40 = vsel %vm23613_vm8, %v3787_v49, %v3788_v8  ;;  %v3812_v41 = vrot.slane %v3810_v0, 4  ;;  %v3823_v14 = vrot.slane %v24310_v16, 5 }
 0x2cf   : > { %v3826_v49 = vrot.slane %v24313_v22, 5 }
 0x2d0   : > { %20362 = vmatmul.mubr.msk.bf16.vlgmr.msra.gmra.mrb[0].mxu1 %vm1887_vm4, %v17741_v17  ;;  %v3797_v17 = vrot.slane %v3795_v43, 4  ;;  %v3822_v24 = vrot.slane %v3820_v57, 4 }
 0x2d1   : > { %20946 = vmatmul.mubr.msk.bf16.gmra.mrb[64].mxu0 %vm1887_vm4, %v22434_v60  ;;  %20490 = vmatpush3.bf16.msra.mxu1 %v24607_v13  ;;  %v3807_v13 = vrot.slane %v24259_v9, 5  ;;  %v3804_v60 = vrot.slane %v24256_v12, 5  ;;  %v3780_v9 = vsel %vm23613_vm8, %v3778_v47, %v3779_v61  ;;  %v3783_v12 = vsel %vm23613_vm8, %v3781_v39, %v3782_v26  ;;  %v22720_v47 = vld [vmem:[%s23101_s5 + $0x68] sm:$0x1] }
 0x2d2   : > { %20365 = vmatprep.mubr.msk.bf16.mxu1 %vm1887_vm4, %v17742_v19  ;;  %20949 = vmatprep.mubr.msk.bf16.mxu0 %vm1887_vm4, %v22435_v4  ;;  %v3813_v19 = vrot.slane %v24283_v38, 5  ;;  %v24871_v38 = vsel %vm23613_vm8, %v3790_v52, %v3791_v54  ;;  %v24875_v61 = vsel %vm23613_vm8, %v17725_v7, %v3795_v43  ;;  %v24879_v26 = vsel %vm23613_vm8, %v3797_v17, %v3798_v45  ;;  %v22438_v52 = vld [vmem:[%s23101_s5 + $0x194] sm:$0xff]  }
 0x2d3   : > { %21269 = vmatprep.subr.bf16.mxu1 %v23080_v6  ;;  %v3806_v4 = vrot.slane %v3804_v60, 4  ;;  %v3809_v53 = vrot.slane %v3807_v13, 4  ;;  %v3816_v15 = vrot.slane %v22720_v47, 5  ;;  %v24890_v43 = vsel %vm23613_vm8, %v3800_v58, %v3801_v46 }
 0x2d4   : > { %v3815_v8 = vrot.slane %v3813_v19, 4  ;;  %v17726_v45 = vrot.slane %v3695_v18, 9  ;;  %v17745_v62 = vcombine.low %v3777_v5, %v3780_v9  ;;  %v17746_v54 = vcombine.low %v3783_v12, %v3786_v29 }
 0x2d5   : > { %v24898_v39 = vsel %vm23613_vm8, %v3806_v4, %v3807_v13  ;;  %v24902_v16 = vsel %vm23613_vm8, %v3809_v53, %v3810_v0  ;;  %v17747_v46 = vcombine.low %v24867_v40, %v24871_v38  ;;  %v17748_v7 = vcombine.low %v24875_v61, %v24879_v26  ;;  %v29222_v26 = vld [vmem:[#allocation7_spill] sm:$0xff] }
 0x2d6   : > { %v24912_v13 = vsel %vm23613_vm8, %v3812_v41, %v3813_v19  ;;  %v24916_v17 = vsel %vm23613_vm8, %v3815_v8, %v3816_v15  ;;  %v3829_v5 = vrot.slane %v24318_v20, 5  ;;  %v3832_v0 = vrot.slane %v24321_v28, 5 }
 0x2d7   : > { %v24927_v19 = vsel %vm23613_vm8, %v17726_v45, %v3820_v57  ;;  %v3828_v9 = vrot.slane %v3826_v49, 4  ;;  %v3835_v58 = vrot.slane %v24345_v55, 5  ;;  %v3838_v4 = vrot.slane %v24348_v21, 5  ;;  %v3696_v55 = vld [vmem:[%s23101_s5 + $0x90] sm:$0xe]  ;;  %v22440_v45 = vld [vmem:[%s23101_s5 + $0x1a4] sm:$0xff]  }
 0x2d8   : > { %20366 = vmatmul.mubr.msk.bf16.gmra.mrb[4].mxu1 %vm1887_vm4, %v17743_v30  ;;  %v24894_v30 = vsel %vm23613_vm8, %v3803_v32, %v3804_v60  ;;  %v3825_v60 = vrot.slane %v3823_v14, 4  ;;  %v17751_v32 = vcombine.low %v24912_v13, %v24916_v17  ;;  %v3845_v20 = vrot.slane %v24354_v59, 5 }
 0x2d9   : > { %20950 = vmatmul.mubr.msk.bf16.gmra.mrb[68].mxu0 %vm1887_vm4, %v22436_v1  ;;  %20369 = vmatprep.mubr.msk.bf16.mxu1 %vm1887_vm4, %v17744_v3  ;;  %v22439_v1 = vld [vmem:[%s23101_s5 + $0x19c] sm:$0xff]   ;;  %v17749_v22 = vcombine.low %v24890_v43, %v24894_v30  ;;  %v17750_v3 = vcombine.low %v24898_v39, %v24902_v16  ;;  %v3848_v28 = vrot.slane %v24379_v25, 5  ;;  %v3831_v29 = vrot.slane %v3829_v5, 4  ;;  %v29228_v16 = vld [vmem:[#allocation12_spill] sm:$0xff] }
 0x2da   : > { %20953 = vmatprep.mubr.msk.bf16.mxu0 %vm1887_vm4, %v22437_v56  ;;  %v24931_v56 = vsel %vm23613_vm8, %v3822_v24, %v3823_v14  ;;  %v24943_v12 = vsel %vm23613_vm8, %v3825_v60, %v3826_v49  ;;  %v3851_v53 = vrot.slane %v24382_v42, 5  ;;  %v3857_v57 = vrot.slane %v24390_v50, 5  ;;  %v22721_v50 = vld [vmem:[%s23101_s5 + $0x8c] sm:$0x1]  ;;  %v22722_v60 = vld [vmem:[%s23101_s5 + $0xb0] sm:$0x1] }
 0x2db   : > { %v3834_v59 = vrot.slane %v3832_v0, 4  ;;  %v3860_v25 = vrot.slane %v24411_v36, 5  ;;  %v3863_v40 = vrot.slane %v24414_v2, 5  ;;  %v24956_v38 = vsel %vm23613_vm8, %v3828_v9, %v3829_v5  ;;  %v3697_v9 = vld [vmem:[%s23101_s5 + $0xb4] sm:$0xe]  ;;  %v29227_v30 = vld [vmem:[#allocation13_spill] sm:$0xff] }
 0x2dc   : > { %v3837_v42 = vrot.slane %v3835_v58, 4  ;;  %v3841_v18 = vrot.slane %v22721_v50, 5  ;;  %v3854_v41 = vrot.slane %v24387_v44, 5  ;;  %v3840_v8 = vrot.slane %v3838_v4, 4 }
 0x2dd   : > { %v17727_v47 = vrot.slane %v3696_v55, 9  ;;  %v3847_v15 = vrot.slane %v3845_v20, 4  ;;  %v3850_v14 = vrot.slane %v3848_v28, 4  ;;  %v24963_v36 = vsel %vm23613_vm8, %v3831_v29, %v3832_v0  ;;  %v29219_v55 = vld [vmem:[#allocation4_spill] sm:$0xff] }
 0x2de   : > { %v3853_v2 = vrot.slane %v3851_v53, 4  ;;  %v3856_v24 = vrot.slane %v3854_v41, 4  ;;  %v3859_v49 = vrot.slane %v3857_v57, 4  ;;  %v3865_v44 = vrot.slane %v3863_v40, 4 }
 0x2df   : > { %v24973_v5 = vsel %vm23613_vm8, %v3837_v42, %v3838_v4  ;;  %v3870_v0 = vrot.slane %v24420_v37, 5  ;;  %v3873_v29 = vrot.slane %v24441_v34, 5  ;;  %v3876_v50 = vrot.slane %v29219_v55, 5  ;;  %v29221_v42 = vld [vmem:[#allocation5_spill] sm:$0xff] }
 0x2e0   : > { %20370 = vmatmul.mubr.msk.bf16.gmra.mrb[8].mxu1 %vm1887_vm4, %v17745_v62  ;;  %v22441_v62 = vld [vmem:[%s23101_s5 + $0x1b0] sm:$0xff]   ;;  %v24981_v21 = vsel %vm23613_vm8, %v3840_v8, %v3841_v18  ;;  %v24993_v4 = vsel %vm23613_vm8, %v3850_v14, %v3851_v53  ;;  %v24999_v37 = vsel %vm23613_vm8, %v3853_v2, %v3854_v41  ;;  %v25003_v34 = vsel %vm23613_vm8, %v3856_v24, %v3857_v57  ;;  %v22442_v2 = vld [vmem:[%s23101_s5 + $0x1b8] sm:$0xff]  }
 0x2e1   : > { %20954 = vmatmul.mubr.msk.bf16.gmra.mrb[72].mxu0 %vm1887_vm4, %v22438_v52  ;;  %20373 = vmatprep.mubr.msk.bf16.mxu1 %vm1887_vm4, %v17746_v54  ;;  %v24968_v54 = vsel %vm23613_vm8, %v3834_v59, %v3835_v58  ;;  %v3862_v52 = vrot.slane %v3860_v25, 4  ;;  %v24985_v58 = vsel %vm23613_vm8, %v17727_v47, %v3845_v20  ;;  %v24989_v59 = vsel %vm23613_vm8, %v3847_v15, %v3848_v28  ;;  %v29220_v28 = vld [vmem:[#allocation6_spill] sm:$0xff]  ;;  %v29223_v14 = vld [vmem:[#allocation8_spill] sm:$0xff] }
 0x2e2   : > { %20957 = vmatprep.mubr.msk.bf16.mxu0 %vm1887_vm4, %v22439_v1  ;;  %v3866_v1 = vrot.slane %v22722_v60, 5  ;;  %v25007_v20 = vsel %vm23613_vm8, %v3859_v49, %v3860_v25  ;;  %v3882_v53 = vrot.slane %v29220_v28, 5  ;;  %v17728_v25 = vrot.slane %v3697_v9, 9  ;;  %v22723_v24 = vld [vmem:[%s23101_s5 + $0xd4] sm:$0x1] }
 0x2e3   : > { %v3879_v18 = vrot.slane %v29221_v42, 5  ;;  %v3872_v41 = vrot.slane %v3870_v0, 4  ;;  %v3875_v8 = vrot.slane %v3873_v29, 4  ;;  %v3878_v61 = vrot.slane %v3876_v50, 4 }
 0x2e4   : > { %v25021_v57 = vsel %vm23613_vm8, %v3865_v44, %v3866_v1  ;;  %v29224_v44 = vld [vmem:[#allocation9_spill] sm:$0xff]  ;;  %v22443_v1 = vld [vmem:[%s23101_s5 + $0x1c0] sm:$0xff]   ;;  %v25046_v42 = vsel %vm23613_vm8, %v17728_v25, %v3870_v0  ;;  %v3891_v28 = vrot.slane %v22723_v24, 5  ;;  %v3926_v43 = vrot.slane %v24565_v63, 5 }
 0x2e5   : > { %v3881_v49 = vrot.slane %v3879_v18, 4  ;;  %v3895_v60 = vrot.slane %v29224_v44, 5  ;;  %v25058_v44 = vsel %vm23613_vm8, %v3878_v61, %v3879_v18  ;;  %v29226_v18 = vld [vmem:[#allocation11_spill] sm:$0xff] }
 0x2e7   : > { %v3897_v25 = vrot.slane %v3895_v60, 4 }
 0x2e8   : > { %20374 = vmatmul.mubr.msk.bf16.gmra.mrb[12].mxu1 %vm1887_vm4, %v17747_v46  ;;  %v25017_v46 = vsel %vm23613_vm8, %v3862_v52, %v3863_v40  ;;  %v3698_v52 = vld [vmem:[%s23101_s5 + $0xd8] sm:$0xe]  ;;  %v29225_v40 = vld [vmem:[#allocation10_spill] sm:$0xff] }
 0x2e9   : > { %20958 = vmatmul.mubr.msk.bf16.gmra.mrb[76].mxu0 %vm1887_vm4, %v22440_v45  ;;  %20377 = vmatprep.mubr.msk.bf16.mxu1 %vm1887_vm4, %v17748_v7  ;;  %v3885_v7 = vrot.slane %v29222_v26, 5  ;;  %v3888_v45 = vrot.slane %v29223_v14, 5  ;;  %v25050_v26 = vsel %vm23613_vm8, %v3872_v41, %v3873_v29  ;;  %v25054_v14 = vsel %vm23613_vm8, %v3875_v8, %v3876_v50 }
 0x2ea   : > { %20961 = vmatprep.mubr.msk.bf16.mxu0 %vm1887_vm4, %v22441_v62  ;;  %v3884_v62 = vrot.slane %v3882_v53, 4  ;;  %v17729_v15 = vrot.slane %v3698_v52, 9  ;;  %v3898_v0 = vrot.slane %v29225_v40, 5  ;;  %v25069_v29 = vsel %vm23613_vm8, %v3881_v49, %v3882_v53  ;;  %v22444_v40 = vld [vmem:[%s23101_s5 + $0x1c8] sm:$0xff]   ;;  %v22445_v49 = vld [vmem:[%s23101_s5 + $0x1d4] sm:$0xff]  }
 0x2eb   : > { %v3887_v55 = vrot.slane %v3885_v7, 4  ;;  %v3890_v9 = vrot.slane %v3888_v45, 4  ;;  %v3901_v41 = vrot.slane %v29226_v18, 5  ;;  %v3910_v53 = vrot.slane %v24535_v23, 5  ;;  %v18820_v18 = vld [vmem:[%s23101_s5 + $0x48] sm:$0xf] }
 0x2ec   : > { %v25073_v50 = vsel %vm23613_vm8, %v3884_v62, %v3885_v7  ;;  %v3913_v8 = vrot.slane %v24538_v10, 5  ;;  %v3920_v7 = vrot.slane %v24544_v27, 5  ;;  %v25103_v10 = vsel %vm23613_vm8, %v17729_v15, %v3895_v60 }
 0x2ed   : > { %v25090_v39 = vsel %vm23613_vm8, %v3887_v55, %v3888_v45  ;;  %v25099_v23 = vsel %vm23613_vm8, %v3890_v9, %v3891_v28  ;;  %v3900_v24 = vrot.slane %v3898_v0, 4  ;;  %v3699_v45 = vld [vmem:[%s23101_s5 + $0xfc] sm:$0xe]  ;;  %v25109_v62 = vsel %vm23613_vm8, %v3897_v25, %v3898_v0 }
 0x2ee   : > { %v3903_v27 = vrot.slane %v3901_v41, 4  ;;  %v3915_v9 = vrot.slane %v3913_v8, 4  ;;  %v3923_v28 = vrot.slane %v24562_v11, 5  ;;  %v17730_v60 = vrot.slane %v3699_v45, 9 }
 0x2ef   : > { %v3922_v61 = vrot.slane %v3920_v7, 4  ;;  %v25122_v25 = vsel %vm23613_vm8, %v3900_v24, %v3901_v41  ;;  %v12169_v47 = vshll.u32 %v18820_v18, 16  ;;  %v29229_v45 = vcombine.low %v24927_v19, %v24931_v56 }
 0x2f0   : > { %20378 = vmatmul.mubr.msk.bf16.gmra.mrb[16].mxu1 %vm1887_vm4, %v17749_v22  ;;  %v3907_v22 = vrot.slane %v29227_v30, 5  ;;  %v25156_v19 = vsel %vm23613_vm8, %v17730_v60, %v3920_v7  ;;  %v29235_v0 = vcombine.low %v24963_v36, %v24968_v54  ;;  %v22725_v54 = vld [vmem:[%s23101_s5 + $0x11c] sm:$0x1] }
 0x2f1   : > { %20962 = vmatmul.mubr.msk.bf16.gmra.mrb[80].mxu0 %vm1887_vm4, %v22442_v2  ;;  %20381 = vmatprep.mubr.msk.bf16.mxu1 %vm1887_vm4, %v17750_v3  ;;  %v3904_v3 = vrot.slane %v29228_v16, 5  ;;  %v3912_v16 = vrot.slane %v3910_v53, 4  ;;  %v18821_v2 = vld [vmem:[%s23101_s5 + $0x4c] sm:$0xf]  ;;  %v25160_v56 = vsel %vm23613_vm8, %v3922_v61, %v3923_v28 }
 0x2f2   : > { %20965 = vmatprep.mubr.msk.bf16.mxu0 %vm1887_vm4, %v22443_v1  ;;  %v22724_v1 = vld [vmem:[%s23101_s5 + $0xf8] sm:$0x1]  ;;  %v3909_v30 = vrot.slane %v3907_v22, 4  ;;  %v12175_v41 = vshll.u32 %v18821_v2, 16  ;;  %v12179_v24 = vshrl.u32 %v18821_v2, 16  ;;  %v3935_v2 = vrot.slane %v24586_v31, 5 }
 0x2f3   : > { %v3906_v52 = vrot.slane %v3904_v3, 4  ;;  %v3916_v55 = vrot.slane %v22724_v1, 5  ;;  %v12166_v1 = vshrl.u32 %v18820_v18, 16  ;;  %v25131_v11 = vsel %vm23613_vm8, %v3903_v27, %v3904_v3  ;;  %v29232_v61 = vld [vmem:[#allocation15_spill] sm:$0xff] }
 0x2f4   : > { %v25144_v13 = vsel %vm23613_vm8, %v3909_v30, %v3910_v53  ;;  %v25148_v17 = vsel %vm23613_vm8, %v3912_v16, %v3913_v8  ;;  %v3928_v53 = vrot.slane %v3926_v43, 4  ;;  %v3929_v3 = vrot.slane %v24570_v51, 5  ;;  %v18822_v8 = vld [vmem:[%s23101_s5 + $0x50] sm:$0xf]  ;;  %v22447_v51 = vld [vmem:[%s23101_s5 + $0x1e4] sm:$0xff]  }
 0x2f5   : > { %v25135_v63 = vsel %vm23613_vm8, %v3906_v52, %v3907_v22  ;;  %v3925_v22 = vrot.slane %v3923_v28, 4  ;;  %v12171_v27 = vrot.slane %v12169_v47, 5  ;;  %v22446_v52 = vld [vmem:[%s23101_s5 + $0x1dc] sm:$0xff]   ;;  %v12181_v18 = vrot.slane %v12179_v24, 4  ;;  %v18823_v16 = vld [vmem:[%s23101_s5 + $0x54] sm:$0xf] }
 0x2f6   : > { %v12185_v31 = vshll.u32 %v18822_v8, 16  ;;  %v12189_v47 = vshrl.u32 %v18822_v8, 16  ;;  %v25185_v28 = vsel %vm23613_vm8, %v3928_v53, %v3929_v3  ;;  %v3931_v60 = vrot.slane %v3929_v3, 4  ;;  %v3700_v30 = vld [vmem:[%s23101_s5 + $0x120] sm:$0xe]  ;;  %v29234_v8 = vld [vmem:[#allocation16_spill] sm:$0xff] }
 0x2f7   : > { %29230 = vst [vmem:[#allocation4_spill] sm:$0xff] %v25185_v28  ;;  %v3945_v7 = vrot.slane %v29232_v61, 5  ;;  %v3948_v53 = vrot.slane %v29234_v8, 5  ;;  %v18825_v8 = vld [vmem:[%s23101_s5 + $0x5c] sm:$0xf] }
 0x2f8   : > { %20382 = vmatmul.mubr.msk.bf16.gmra.mrb[20].mxu1 %vm1887_vm4, %v17751_v32  ;;  %v25152_v32 = vsel %vm23613_vm8, %v3915_v9, %v3916_v55  ;;  %v25171_v55 = vrot.slane %v12175_v41, 5  ;;  %v12195_v9 = vshll.u32 %v18823_v16, 16  ;;  %v12219_v28 = vshrl.u32 %v18825_v8, 16 }
 0x2f9   : > { %20966 = vmatmul.mubr.msk.bf16.gmra.mrb[84].mxu0 %vm1887_vm4, %v22444_v40  ;;  %20385 = vmatprep.mubr.msk.bf16.mxu1 %vm1887_vm4, %v29229_v45  ;;  %v3932_v40 = vrot.slane %v24573_v35, 5  ;;  %v25178_v35 = vsel %vm23613_vm8, %v3925_v22, %v3926_v43  ;;  %v3937_v45 = vrot.slane %v3935_v2, 4  ;;  %v29233_v22 = vcombine.low %v24943_v12, %v24956_v38 }
 0x2fa   : > { %20969 = vmatprep.mubr.msk.bf16.mxu0 %vm1887_vm4, %v22445_v49  ;;  %v12168_v49 = vrot.slane %v12166_v1, 4  ;;  %v29231_v1 = vld [vmem:[#allocation14_spill] sm:$0xff]  ;;  %v12182_v3 = vor.u32 %v12181_v18, %v25171_v55  ;;  %v12187_v38 = vrot.slane %v12185_v31, 5  ;;  %v3941_v18 = vrot.slane %v22725_v54, 5  ;;  %v22449_v54 = vld [vmem:[%s23101_s5 + $0x1f8] sm:$0xff]  }
 0x2fb   : > { %v3938_v41 = vrot.slane %v29231_v1, 5  ;;  %v3934_v24 = vrot.slane %v3932_v40, 4  ;;  %v12199_v1 = vshrl.u32 %v18823_v16, 16  ;;  %v25207_v61 = vsel %vm23613_vm8, %v3931_v60, %v3932_v40 }
 0x2fc   : > { %v12172_v43 = vor.u32 %v12171_v27, %v12168_v49  ;;  %v12191_v49 = vrot.slane %v12189_v47, 4  ;;  %v29236_v27 = vld [vmem:[#allocation17_spill] sm:$0xff]  ;;  %v3947_v31 = vrot.slane %v3945_v7, 4  ;;  %v12183_v40 = vrot.slane %v12182_v3, 4 }
 0x2fd   : > { %v3940_v36 = vrot.slane %v3938_v41, 4  ;;  %v25216_v16 = vsel %vm23613_vm8, %v3937_v45, %v3938_v41  ;;  %v3950_v60 = vrot.slane %v3948_v53, 4  ;;  %v25221_v12 = vrot.slane %v12195_v9, 5 }
 0x2fe   : > { %v12173_v47 = vrot.slane %v12172_v43, 4  ;;  %v12201_v15 = vrot.slane %v12199_v1, 4  ;;  %v12215_v43 = vshll.u32 %v18825_v8, 16  ;;  %v25237_v1 = vsel %vm23613_vm8, %v3947_v31, %v3948_v53 }
 0x2ff   : > { %v25229_v3 = vsel %vm23613_vm8, %v3940_v36, %v3941_v18  ;;  %v29241_v31 = vcombine.low %v24985_v58, %v24989_v59  ;;  %v12221_v58 = vrot.slane %v12219_v28, 4  ;;  %v18828_v28 = vld [vmem:[%s23101_s5 + $0x68] sm:$0x1] }
 0x300   : > { %20386 = vmatmul.mubr.msk.bf16.gmra.mrb[24].mxu1 %vm1887_vm4, %v29233_v22  ;;  %v18824_v22 = vld [vmem:[%s23101_s5 + $0x58] sm:$0xf]  ;;  %v12178_v18 = vsel %vm23119_vm5, %v12173_v47, %v25171_v55  ;;  %v12202_v53 = vor.u32 %v12201_v15, %v25221_v12  ;;  %v18827_v15 = vld [vmem:[%s23101_s5 + $0x64] sm:$0xf] }
 0x301   : > { %20970 = vmatmul.mubr.msk.bf16.gmra.mrb[88].mxu0 %vm1887_vm4, %v22446_v52  ;;  %20389 = vmatprep.mubr.msk.bf16.mxu1 %vm1887_vm4, %v29235_v0  ;;  %v3951_v52 = vrot.slane %v29236_v27, 5  ;;  %v17731_v0 = vrot.slane %v3700_v30, 9  ;;  %v22448_v27 = vld [vmem:[%s23101_s5 + $0x1ec] sm:$0xff]   ;;  %v12192_v30 = vor.u32 %v12191_v49, %v12187_v38  ;;  %v12205_v45 = vshll.u32 %v18824_v22, 16 }
 0x302   : > { %20973 = vmatprep.mubr.msk.bf16.mxu0 %vm1887_vm4, %v22447_v51  ;;  %v25212_v51 = vsel %vm23613_vm8, %v3934_v24, %v3935_v2  ;;  %v3954_v2 = vrot.slane %v29237_v33, 5  ;;  %v12209_v24 = vshrl.u32 %v18824_v22, 16  ;;  %v29238_v33 = vld [vmem:[#allocation19_spill] sm:$0xff]  ;;  %v29239_v22 = vcombine.low %v24973_v5, %v24981_v21 }
 0x303   : > { %v3953_v6 = vrot.slane %v3951_v52, 4  ;;  %v25233_v9 = vsel %vm23613_vm8, %v17731_v0, %v3945_v7  ;;  %v3957_v49 = vrot.slane %v29238_v33, 5  ;;  %v25250_v7 = vsel %vm23613_vm8, %v3950_v60, %v3951_v52  ;;  %v18826_v0 = vld [vmem:[%s23101_s5 + $0x60] sm:$0xf]  ;;  %v29243_v60 = vld [vmem:[#allocation20_spill] sm:$0xff] }
 0x304   : > { %v12188_v21 = vsel %vm23119_vm5, %v12183_v40, %v12187_v38  ;;  %v12193_v5 = vrot.slane %v12192_v30, 4  ;;  %v12211_v52 = vrot.slane %v12209_v24, 4  ;;  %v12207_v47 = vrot.slane %v12205_v45, 5  ;;  %v22450_v38 = vld [vmem:[%s23101_s5 + $0x200] sm:$0xff]   ;;  %v22451_v45 = vld [vmem:[%s23101_s5 + $0x208] sm:$0xff]  }
 0x305   : > { %v25263_v55 = vsel %vm23613_vm8, %v3953_v6, %v3954_v2  ;;  %v3956_v8 = vrot.slane %v3954_v2, 4  ;;  %v3959_v59 = vrot.slane %v3957_v49, 4  ;;  %v12225_v33 = vshll.u32 %v18826_v0, 16  ;;  %v29245_v6 = vld [vmem:[#allocation21_spill] sm:$0xff]  ;;  %v18830_v2 = vld [vmem:[%s23101_s5 + $0x70] sm:$0xf] }
 0x306   : > { %29242 = vst [vmem:[#allocation6_spill] sm:$0xff] %v25263_v55  ;;  %v12203_v40 = vrot.slane %v12202_v53, 4  ;;  %v12235_v30 = vshll.u32 %v18827_v15, 16  ;;  %v12239_v24 = vshrl.u32 %v18827_v15, 16  ;;  %v3963_v41 = vrot.slane %v29245_v6, 5 }
 0x307   : > { %v25285_v53 = vsel %vm23613_vm8, %v3956_v8, %v3957_v49 }
 0x308   : > { %20390 = vmatmul.mubr.msk.bf16.gmra.mrb[28].mxu1 %vm1887_vm4, %v29239_v22  ;;  %v12229_v22 = vshrl.u32 %v18826_v0, 16  ;;  %v18829_v0 = vld [vmem:[%s23101_s5 + $0x6c] sm:$0xf]  ;;  %29244 = vst [vmem:[#allocation5_spill] sm:$0xff] %v25285_v53  ;;  %v12208_v49 = vsel %vm23119_vm5, %v12203_v40, %v12207_v47  ;;  %v12241_v8 = vrot.slane %v12239_v24, 4  ;;  %v12245_v40 = vshll.u32 %v18828_v28, 16 }
 0x309   : > { %20974 = vmatmul.mubr.msk.bf16.gmra.mrb[92].mxu0 %vm1887_vm4, %v22448_v27  ;;  %20393 = vmatprep.mubr.msk.bf16.mxu1 %vm1887_vm4, %v29241_v31  ;;  %v25266_v27 = vrot.slane %v12215_v43, 5  ;;  %v25275_v43 = vcombine.low %v12178_v18, %v12188_v21  ;;  %v12212_v31 = vor.u32 %v12211_v52, %v12207_v47  ;;  %v25294_v21 = vrot.slane %v12225_v33, 5  ;;  %v22452_v24 = vld [vmem:[%s23101_s5 + $0x210] sm:$0xff]   ;;  %v29251_v28 = vld [vmem:[#allocation23_spill] sm:$0xff]  ;;  %v18834_v53 = vld [vmem:[%s23101_s5 + $0x80] sm:$0xf] }
 0x30a   : > { %20977 = vmatprep.mubr.msk.bf16.mxu0 %vm1887_vm4, %v22449_v54  ;;  %v3960_v54 = vrot.slane %v29243_v60, 5  ;;  %v12198_v60 = vsel %vm23119_vm5, %v12193_v5, %v25221_v12  ;;  %v12231_v55 = vrot.slane %v12229_v22, 4  ;;  %v29247_v12 = vcombine.low %v24993_v4, %v24999_v37 }
 0x30b   : > { %v12222_v15 = vor.u32 %v12221_v58, %v25266_v27  ;;  %v25304_v5 = vrot.slane %v12235_v30, 5  ;;  %v12250_v58 = vshrl.u32 %v18829_v0, 16  ;;  %v12213_v4 = vrot.slane %v12212_v31, 4  ;;  %v18831_v30 = vld [vmem:[%s23101_s5 + $0x74] sm:$0xf] }
 0x30c   : > { %v25292_v18 = vsel %vm23613_vm8, %v3959_v59, %v3960_v54  ;;  %v3962_v52 = vrot.slane %v3960_v54, 4  ;;  %v29248_v59 = vcombine.low %v25003_v34, %v25007_v20  ;;  %v12253_v37 = vshll.u32 %v18829_v0, 16  ;;  %v29250_v0 = vld [vmem:[#allocation22_spill] sm:$0xff] }
 0x30d   : > { %29246 = vst [vmem:[#allocation7_spill] sm:$0xff] %v25292_v18  ;;  %v12259_v54 = vshll.u32 %v18830_v2, 16  ;;  %v12263_v33 = vshrl.u32 %v18830_v2, 16  ;;  %v12223_v22 = vrot.slane %v12222_v15, 4  ;;  %v3965_v47 = vrot.slane %v3963_v41, 4  ;;  %v22453_v2 = vld [vmem:[%s23101_s5 + $0x21c] sm:$0xff]  }
 0x30e   : > { %v25320_v20 = vsel %vm23613_vm8, %v3962_v52, %v3963_v41  ;;  %v12242_v31 = vor.u32 %v12241_v8, %v25304_v5  ;;  %v3970_v15 = vrot.slane %v29250_v0, 5  ;;  %v12269_v41 = vshll.u32 %v18831_v30, 16  ;;  %v22727_v0 = vld [vmem:[%s23101_s5 + $0x150] sm:$0xf] }
 0x30f   : > { %v25329_v34 = vrot.slane %v12259_v54, 5  ;;  %v12265_v18 = vrot.slane %v12263_v33, 4  ;;  %v12228_v52 = vsel %vm23119_vm5, %v12223_v22, %v25294_v21 }
 0x310   : > { %20394 = vmatmul.mubr.msk.bf16.gmra.mrb[32].mxu1 %vm1887_vm4, %v29247_v12  ;;  %v25314_v12 = vcombine.low %v12198_v60, %v12208_v49  ;;  %v18832_v60 = vld [vmem:[%s23101_s5 + $0x78] sm:$0xf]  ;;  %v3701_v49 = vld [vmem:[%s23101_s5 + $0x144] sm:$0xe] }
 0x311   : > { %20978 = vmatmul.mubr.msk.bf16.gmra.mrb[96].mxu0 %vm1887_vm4, %v22450_v38  ;;  %20397 = vmatprep.mubr.msk.bf16.mxu1 %vm1887_vm4, %v29248_v59  ;;  %v22726_v38 = vld [vmem:[%s23101_s5 + $0x140] sm:$0x1]  ;;  %v3973_v59 = vrot.slane %v29251_v28, 5  ;;  %v3976_v28 = vrot.slane %v22727_v0, 5  ;;  %v12279_v54 = vshll.u32 %v18832_v60, 16  ;;  %v12283_v33 = vshrl.u32 %v18832_v60, 16 }
 0x312   : > { %20981 = vmatprep.mubr.msk.bf16.mxu0 %vm1887_vm4, %v22451_v45  ;;  %v3966_v6 = vrot.slane %v22726_v38, 5  ;;  %29249 = vst [vmem:[#allocation8_spill] sm:$0xff] %v25314_v12  ;;  %v12232_v45 = vor.u32 %v12231_v55, %v25294_v21  ;;  %v12252_v38 = vrot.slane %v12250_v58, 4  ;;  %v12255_v12 = vrot.slane %v12253_v37, 5 }
 0x313   : > { %v12218_v55 = vsel %vm23119_vm5, %v12213_v4, %v25266_v27  ;;  %v12247_v58 = vrot.slane %v12245_v40, 5  ;;  %v12273_v37 = vshrl.u32 %v18831_v30, 16  ;;  %v29252_v27 = vcombine.low %v25017_v46, %v25021_v57 }
 0x314   : > { %v25339_v8 = vsel %vm23613_vm8, %v3965_v47, %v3966_v6  ;;  %v12233_v21 = vrot.slane %v12232_v45, 4  ;;  %v12243_v4 = vrot.slane %v12242_v31, 4  ;;  %v17732_v22 = vrot.slane %v3701_v49, 9  ;;  %v22728_v45 = vld [vmem:[%s23101_s5 + $0x154] sm:$0xf] }
 0x315   : > { %v3972_v47 = vrot.slane %v3970_v15, 4  ;;  %v29253_v6 = vcombine.low %v25046_v42, %v25050_v26  ;;  %v12256_v40 = vor.u32 %v12255_v12, %v12252_v38  ;;  %v12266_v30 = vor.u32 %v12265_v18, %v25329_v34  ;;  %v22454_v12 = vld [vmem:[%s23101_s5 + $0x224] sm:$0xff]  }
 0x316   : > { %v25354_v46 = vrot.slane %v12269_v41, 5  ;;  %v3975_v57 = vrot.slane %v3973_v59, 4  ;;  %v3979_v31 = vrot.slane %v22728_v45, 5  ;;  %v12299_v49 = vshll.u32 %v18834_v53, 16  ;;  %v22455_v45 = vld [vmem:[%s23101_s5 + $0x22c] sm:$0xff]  }
 0x317   : > { %v12303_v0 = vshrl.u32 %v18834_v53, 16  ;;  %v3978_v42 = vrot.slane %v3976_v28, 4  ;;  %v12275_v26 = vrot.slane %v12273_v37, 4  ;;  %v25367_v38 = vsel %vm23613_vm8, %v17732_v22, %v3970_v15  ;;  %v18836_v18 = vld [vmem:[%s23101_s5 + $0x88] sm:$0xf] }
 0x318   : > { %20398 = vmatmul.mubr.msk.bf16.gmra.mrb[36].mxu1 %vm1887_vm4, %v29252_v27  ;;  %v25358_v27 = vrot.slane %v12279_v54, 5  ;;  %v12238_v53 = vsel %vm23119_vm5, %v12233_v21, %v25304_v5  ;;  %v12248_v37 = vsel %vm23119_vm5, %v12243_v4, %v12247_v58  ;;  %v18835_v54 = vld [vmem:[%s23101_s5 + $0x84] sm:$0xf]  ;;  %v25382_v15 = vsel %vm23613_vm8, %v3975_v57, %v3976_v28 }
 0x319   : > { %20982 = vmatmul.mubr.msk.bf16.gmra.mrb[100].mxu0 %vm1887_vm4, %v22452_v24  ;;  %20401 = vmatprep.mubr.msk.bf16.mxu1 %vm1887_vm4, %v29253_v6  ;;  %v18833_v24 = vld [vmem:[%s23101_s5 + $0x7c] sm:$0xf]  ;;  %v12285_v6 = vrot.slane %v12283_v33, 4  ;;  %v25384_v22 = vrot.slane %v12299_v49, 5  ;;  %v12267_v5 = vrot.slane %v12266_v30, 4  ;;  %v25389_v58 = vsel %vm23613_vm8, %v3978_v42, %v3979_v31 }
 0x31a   : > { %20985 = vmatprep.mubr.msk.bf16.mxu0 %vm1887_vm4, %v22453_v2  ;;  %v12293_v60 = vshrl.u32 %v18833_v24, 16  ;;  %v25361_v2 = vcombine.low %v12218_v55, %v12228_v52  ;;  %v12289_v41 = vshll.u32 %v18833_v24, 16  ;;  %v25377_v55 = vsel %vm23613_vm8, %v3972_v47, %v3973_v59  ;;  %29254 = vst [vmem:[#allocation9_spill] sm:$0xff] %v25389_v58  ;;  %v22729_v47 = vld [vmem:[%s23101_s5 + $0x158] sm:$0xf] }
 0x31b   : > { %v12257_v52 = vrot.slane %v12256_v40, 4  ;;  %v12305_v24 = vrot.slane %v12303_v0, 4  ;;  %v12276_v21 = vor.u32 %v12275_v26, %v25354_v46  ;;  %v12286_v59 = vor.u32 %v12285_v6, %v25358_v27  ;;  %v18838_v6 = vld [vmem:[%s23101_s5 + $0x90] sm:$0xf] }
 0x31c   : > { %v12295_v33 = vrot.slane %v12293_v60, 4  ;;  %v29255_v4 = vcombine.low %v25054_v14, %v25058_v44  ;;  %v25398_v28 = vrot.slane %v12289_v41, 5  ;;  %v3982_v40 = vrot.slane %v22729_v47, 5 }
 0x31d   : > { %v12309_v30 = vshll.u32 %v18835_v54, 16  ;;  %v12313_v57 = vshrl.u32 %v18835_v54, 16  ;;  %v29256_v60 = vcombine.low %v25069_v29, %v25073_v50  ;;  %v25406_v14 = vcombine.low %v12238_v53, %v12248_v37  ;;  %v18839_v53 = vld [vmem:[%s23101_s5 + $0x94] sm:$0xf]  ;;  %v22457_v54 = vld [vmem:[%s23101_s5 + $0x240] sm:$0xff]  }
 0x31e   : > { %v12319_v49 = vshll.u32 %v18836_v18, 16  ;;  %v12323_v0 = vshrl.u32 %v18836_v18, 16  ;;  %v12262_v42 = vsel %vm23119_vm5, %v12257_v52, %v25329_v34  ;;  %v3981_v29 = vrot.slane %v3979_v31, 4  ;;  %v22456_v37 = vld [vmem:[%s23101_s5 + $0x234] sm:$0xff]   ;;  %v22730_v31 = vld [vmem:[%s23101_s5 + $0x15c] sm:$0xf] }
 0x31f   : > { %v12296_v50 = vor.u32 %v12295_v33, %v25398_v28  ;;  %v12306_v26 = vor.u32 %v12305_v24, %v25384_v22  ;;  %v12287_v18 = vrot.slane %v12286_v59, 4  ;;  %v3984_v34 = vrot.slane %v3982_v40, 4  ;;  %v18837_v24 = vld [vmem:[%s23101_s5 + $0x8c] sm:$0x1] }
 0x320   : > { %20402 = vmatmul.mubr.msk.bf16.gmra.mrb[40].mxu1 %vm1887_vm4, %v29255_v4  ;;  %v3985_v52 = vrot.slane %v22730_v31, 5  ;;  %v12311_v33 = vrot.slane %v12309_v30, 5  ;;  %v12315_v4 = vrot.slane %v12313_v57, 4  ;;  %v25426_v47 = vrot.slane %v12319_v49, 5  ;;  %v18840_v49 = vld [vmem:[%s23101_s5 + $0x98] sm:$0xf] }
 0x321   : > { %20986 = vmatmul.mubr.msk.bf16.gmra.mrb[104].mxu0 %vm1887_vm4, %v22454_v12  ;;  %20405 = vmatprep.mubr.msk.bf16.mxu1 %vm1887_vm4, %v29256_v60  ;;  %v12272_v12 = vsel %vm23119_vm5, %v12267_v5, %v25354_v46  ;;  %v12325_v60 = vrot.slane %v12323_v0, 4  ;;  %v12334_v46 = vshrl.u32 %v18838_v6, 16  ;;  %v12337_v5 = vshll.u32 %v18838_v6, 16  ;;  %v18841_v6 = vld [vmem:[%s23101_s5 + $0x9c] sm:$0xf] }
 0x322   : > { %20989 = vmatprep.mubr.msk.bf16.mxu0 %vm1887_vm4, %v22455_v45  ;;  %v12277_v45 = vrot.slane %v12276_v21, 4  ;;  %v12297_v44 = vrot.slane %v12296_v50, 4  ;;  %v12307_v21 = vrot.slane %v12306_v26, 4  ;;  %v12343_v59 = vshll.u32 %v18839_v53, 16  ;;  %v22731_v50 = vld [vmem:[%s23101_s5 + $0x160] sm:$0xf] }
 0x323   : > { %v12347_v41 = vshrl.u32 %v18839_v53, 16  ;;  %v25428_v58 = vcombine.low %v12262_v42, %v12272_v12  ;;  %v12292_v30 = vsel %vm23119_vm5, %v12287_v18, %v25398_v28  ;;  %v25438_v57 = vsel %vm23613_vm8, %v3981_v29, %v3982_v40 }
 0x324   : > { %v12282_v31 = vsel %vm23119_vm5, %v12277_v45, %v25358_v27  ;;  %v29257_v0 = vcombine.low %v25090_v39, %v25099_v23  ;;  %v25448_v42 = vsel %vm23613_vm8, %v3984_v34, %v3985_v52  ;;  %v3987_v27 = vrot.slane %v3985_v52, 4  ;;  %v22458_v52 = vld [vmem:[%s23101_s5 + $0x248] sm:$0xff]  }
 0x325   : > { %v3988_v26 = vrot.slane %v22731_v50, 5  ;;  %v12329_v28 = vshll.u32 %v18837_v24, 16  ;;  %v29258_v40 = vcombine.low %v25103_v10, %v25109_v62  ;;  %v12316_v39 = vor.u32 %v12315_v4, %v12311_v33 }
 0x326   : > { %v12326_v23 = vor.u32 %v12325_v60, %v25426_v47  ;;  %v12336_v29 = vrot.slane %v12334_v46, 4  ;;  %v12339_v12 = vrot.slane %v12337_v5, 5  ;;  %v12302_v45 = vsel %vm23119_vm5, %v12297_v44, %v25384_v22  ;;  %v22732_v60 = vld [vmem:[%s23101_s5 + $0x164] sm:$0x1]  ;;  %v22733_v5 = vld [vmem:[%s23101_s5 + $0x16c] sm:$0xf] }
 0x327   : > { %v12312_v18 = vsel %vm23119_vm5, %v12307_v21, %v12311_v33  ;;  %v25463_v10 = vrot.slane %v12343_v59, 5  ;;  %v12349_v62 = vrot.slane %v12347_v41, 4  ;;  %v12353_v53 = vshll.u32 %v18840_v49, 16  ;;  %v22459_v44 = vld [vmem:[%s23101_s5 + $0x250] sm:$0xff]   ;;  %v3702_v59 = vld [vmem:[%s23101_s5 + $0x168] sm:$0xe] }
 0x328   : > { %20406 = vmatmul.mubr.msk.bf16.gmra.mrb[44].mxu1 %vm1887_vm4, %v29257_v0  ;;  %v12367_v34 = vshrl.u32 %v18841_v6, 16  ;;  %v25466_v4 = vcombine.low %v12282_v31, %v12292_v30  ;;  %v3990_v24 = vrot.slane %v3988_v26, 4  ;;  %v3991_v46 = vrot.slane %v22732_v60, 5  ;;  %v18845_v60 = vld [vmem:[%s23101_s5 + $0xac] sm:$0xf] }
 0x329   : > { %20990 = vmatmul.mubr.msk.bf16.gmra.mrb[108].mxu0 %vm1887_vm4, %v22456_v37  ;;  %20409 = vmatprep.mubr.msk.bf16.mxu1 %vm1887_vm4, %v29258_v40  ;;  %v12357_v37 = vshrl.u32 %v18840_v49, 16  ;;  %v3995_v22 = vrot.slane %v22733_v5, 5  ;;  %v12317_v0 = vrot.slane %v12316_v39, 4  ;;  %v12327_v33 = vrot.slane %v12326_v23, 4  ;;  %v18843_v23 = vld [vmem:[%s23101_s5 + $0xa4] sm:$0xf] }
 0x32a   : > { %20993 = vmatprep.mubr.msk.bf16.mxu0 %vm1887_vm4, %v22457_v54  ;;  %v12363_v54 = vshll.u32 %v18841_v6, 16  ;;  %v12331_v21 = vrot.slane %v12329_v28, 5  ;;  %v12340_v41 = vor.u32 %v12339_v12, %v12336_v29  ;;  %v25474_v50 = vcombine.low %v12302_v45, %v12312_v18  ;;  %v22734_v45 = vld [vmem:[%s23101_s5 + $0x170] sm:$0xf] }
 0x32b   : > { %v25478_v31 = vsel %vm23613_vm8, %v3987_v27, %v3988_v26  ;;  %v12350_v30 = vor.u32 %v12349_v62, %v25463_v10  ;;  %v25481_v6 = vrot.slane %v12353_v53, 5  ;;  %v12359_v40 = vrot.slane %v12357_v37, 4  ;;  %v18842_v62 = vld [vmem:[%s23101_s5 + $0xa0] sm:$0xf] }
 0x32c   : > { %v25483_v39 = vrot.slane %v12363_v54, 5  ;;  %v12369_v28 = vrot.slane %v12367_v34, 4  ;;  %v29259_v29 = vcombine.low %v25122_v25, %v25131_v11  ;;  %v25493_v27 = vsel %vm23613_vm8, %v3990_v24, %v3991_v46  ;;  %v22735_v54 = vld [vmem:[%s23101_s5 + $0x174] sm:$0xf] }
 0x32d   : > { %v17733_v26 = vrot.slane %v3702_v59, 9  ;;  %v3997_v12 = vrot.slane %v3995_v22, 4  ;;  %v3998_v18 = vrot.slane %v22734_v45, 5  ;;  %v29260_v53 = vcombine.low %v25135_v63, %v25144_v13  ;;  %v22736_v59 = vld [vmem:[%s23101_s5 + $0x17c] sm:$0xf] }
 0x32e   : > { %v12322_v25 = vsel %vm23119_vm5, %v12317_v0, %v25426_v47  ;;  %v12332_v11 = vsel %vm23119_vm5, %v12327_v33, %v12331_v21  ;;  %v12341_v37 = vrot.slane %v12340_v41, 4  ;;  %v4001_v34 = vrot.slane %v22735_v54, 5 }
 0x32f   : > { %v12377_v24 = vshrl.u32 %v18842_v62, 16  ;;  %v12383_v63 = vshll.u32 %v18843_v23, 16  ;;  %v12387_v13 = vshrl.u32 %v18843_v23, 16  ;;  %v12360_v46 = vor.u32 %v12359_v40, %v25481_v6 }
 0x330   : > { %20410 = vmatmul.mubr.msk.bf16.gmra.mrb[48].mxu1 %vm1887_vm4, %v29259_v29  ;;  %v12370_v47 = vor.u32 %v12369_v28, %v25483_v39  ;;  %v12373_v5 = vshll.u32 %v18842_v62, 16  ;;  %v25513_v0 = vcombine.low %v12322_v25, %v12332_v11  ;;  %v25517_v33 = vsel %vm23613_vm8, %v17733_v26, %v3995_v22  ;;  %v22737_v29 = vld [vmem:[%s23101_s5 + $0x178] sm:$0xf]  ;;  %v18844_v62 = vld [vmem:[%s23101_s5 + $0xa8] sm:$0xf] }
 0x331   : > { %20994 = vmatmul.mubr.msk.bf16.gmra.mrb[112].mxu0 %vm1887_vm4, %v22458_v52  ;;  %20413 = vmatprep.mubr.msk.bf16.mxu1 %vm1887_vm4, %v29260_v53  ;;  %v12351_v52 = vrot.slane %v12350_v30, 4  ;;  %v25521_v21 = vsel %vm23613_vm8, %v3997_v12, %v3998_v18  ;;  %v4007_v41 = vrot.slane %v22736_v59, 5  ;;  %v22461_v30 = vld [vmem:[%s23101_s5 + $0x264] sm:$0xff]   ;;  %v12346_v40 = vsel %vm23119_vm5, %v12341_v37, %v25463_v10 }
 0x332   : > { %20997 = vmatprep.mubr.msk.bf16.mxu0 %vm1887_vm4, %v22459_v44  ;;  %v22460_v44 = vld [vmem:[%s23101_s5 + $0x258] sm:$0xff]   ;;  %v4000_v28 = vrot.slane %v3998_v18, 4  ;;  %v4003_v23 = vrot.slane %v4001_v34, 4  ;;  %v4004_v45 = vrot.slane %v22737_v29, 5  ;;  %v12379_v26 = vrot.slane %v12377_v24, 4  ;;  %v22462_v29 = vld [vmem:[%s23101_s5 + $0x26c] sm:$0xff]  }
 0x333   : > { %v12356_v22 = vsel %vm23119_vm5, %v12351_v52, %v25481_v6  ;;  %v25533_v12 = vrot.slane %v12383_v63, 5  ;;  %v12389_v53 = vrot.slane %v12387_v13, 4  ;;  %v12361_v25 = vrot.slane %v12360_v46, 4  ;;  %v22738_v6 = vld [vmem:[%s23101_s5 + $0x180] sm:$0xf] }
 0x334   : > { %v12371_v11 = vrot.slane %v12370_v47, 4  ;;  %v12375_v54 = vrot.slane %v12373_v5, 5  ;;  %v4006_v59 = vrot.slane %v4004_v45, 4  ;;  %v29261_v10 = vcombine.low %v25148_v17, %v25152_v32  ;;  %v18847_v5 = vld [vmem:[%s23101_s5 + $0xb4] sm:$0xf] }
 0x335   : > { %v4009_v18 = vrot.slane %v4007_v41, 4  ;;  %v4010_v37 = vrot.slane %v22738_v6, 5  ;;  %v12393_v52 = vshll.u32 %v18844_v62, 16  ;;  %v12397_v24 = vshrl.u32 %v18844_v62, 16 }
 0x336   : > { %v29262_v63 = vcombine.low %v25156_v19, %v25160_v56  ;;  %v25551_v32 = vsel %vm23613_vm8, %v4000_v28, %v4001_v34  ;;  %v25555_v13 = vsel %vm23613_vm8, %v4003_v23, %v4004_v45  ;;  %v12380_v46 = vor.u32 %v12379_v26, %v12375_v54  ;;  %v22463_v45 = vld [vmem:[%s23101_s5 + $0x274] sm:$0xff]  }
 0x337   : > { %v12390_v19 = vor.u32 %v12389_v53, %v25533_v12  ;;  %v12403_v56 = vshll.u32 %v18845_v60, 16  ;;  %v12407_v47 = vshrl.u32 %v18845_v60, 16  ;;  %v12366_v34 = vsel %vm23119_vm5, %v12361_v25, %v25483_v39  ;;  %v18846_v53 = vld [vmem:[%s23101_s5 + $0xb0] sm:$0x1] }
 0x338   : > { %20414 = vmatmul.mubr.msk.bf16.gmra.mrb[52].mxu1 %vm1887_vm4, %v29261_v10  ;;  %v12376_v28 = vsel %vm23119_vm5, %v12371_v11, %v12375_v54  ;;  %v25569_v23 = vsel %vm23613_vm8, %v4006_v59, %v4007_v41  ;;  %v25575_v60 = vsel %vm23613_vm8, %v4009_v18, %v4010_v37  ;;  %v12395_v62 = vrot.slane %v12393_v52, 5 }
 0x339   : > { %20998 = vmatmul.mubr.msk.bf16.gmra.mrb[116].mxu0 %vm1887_vm4, %v22460_v44  ;;  %20417 = vmatprep.mubr.msk.bf16.mxu1 %vm1887_vm4, %v29262_v63  ;;  %v18848_v44 = vld [vmem:[%s23101_s5 + $0xb8] sm:$0xf]  ;;  %29263 = vst [vmem:[#allocation10_spill] sm:$0xff] %v25569_v23  ;;  %29264 = vst [vmem:[#allocation11_spill] sm:$0xff] %v25575_v60  ;;  %v12399_v26 = vrot.slane %v12397_v24, 4  ;;  %v12418_v39 = vshrl.u32 %v18847_v5, 16  ;;  %v25583_v52 = vcombine.low %v12366_v34, %v12376_v28 }
 0x33a   : > { %21001 = vmatprep.mubr.msk.bf16.mxu0 %vm1887_vm4, %v22461_v30  ;;  %v25560_v30 = vcombine.low %v12346_v40, %v12356_v22  ;;  %v22739_v40 = vld [vmem:[%s23101_s5 + $0x184] sm:$0xf]  ;;  %v12421_v25 = vshll.u32 %v18847_v5, 16  ;;  %v12427_v11 = vshll.u32 %v18848_v44, 16  ;;  %v12431_v54 = vshrl.u32 %v18848_v44, 16  ;;  %v29266_v5 = vld [vmem:[#allocation4_spill] sm:$0xff] }
 0x33b   : > { %v4013_v22 = vrot.slane %v22739_v40, 5  ;;  %v12381_v10 = vrot.slane %v12380_v46, 4  ;;  %v12391_v41 = vrot.slane %v12390_v19, 4  ;;  %v25579_v59 = vrot.slane %v12403_v56, 5  ;;  %29265 = vst [vmem:[#allocation13_spill] sm:$0xff] %v25583_v52 }
 0x33c   : > { %v12409_v6 = vrot.slane %v12407_v47, 4  ;;  %v4012_v63 = vrot.slane %v4010_v37, 4  ;;  %v18849_v40 = vld [vmem:[%s23101_s5 + $0xbc] sm:$0xf]  ;;  %v29267_v17 = vcombine.low %v25178_v35, %v29266_v5  ;;  %v22740_v19 = vld [vmem:[%s23101_s5 + $0x188] sm:$0x1]  ;;  %v12400_v47 = vor.u32 %v12399_v26, %v12395_v62 }
 0x33d   : > { %v4015_v46 = vrot.slane %v4013_v22, 4  ;;  %v4016_v56 = vrot.slane %v22740_v19, 5  ;;  %v12413_v44 = vshll.u32 %v18846_v53, 16  ;;  %v18850_v34 = vld [vmem:[%s23101_s5 + $0xc0] sm:$0xf]  ;;  %v29268_v37 = vcombine.low %v25207_v61, %v25212_v51 }
 0x33e   : > { %v12420_v35 = vrot.slane %v12418_v39, 4  ;;  %v25600_v28 = vrot.slane %v12427_v11, 5  ;;  %v12386_v5 = vsel %vm23119_vm5, %v12381_v10, %v25533_v12  ;;  %v12396_v26 = vsel %vm23119_vm5, %v12391_v41, %v12395_v62  ;;  %v3703_v61 = vld [vmem:[%s23101_s5 + $0x18c] sm:$0xe]  ;;  %v22741_v51 = vld [vmem:[%s23101_s5 + $0x190] sm:$0xf] }
 0x33f   : > { %v12410_v53 = vor.u32 %v12409_v6, %v25579_v59  ;;  %v4020_v19 = vrot.slane %v22741_v51, 5  ;;  %v12437_v39 = vshll.u32 %v18849_v40, 16  ;;  %v12447_v11 = vshll.u32 %v18850_v34, 16 }
 0x340   : > { %20418 = vmatmul.mubr.msk.bf16.gmra.mrb[56].mxu1 %vm1887_vm4, %v29267_v17  ;;  %v12423_v17 = vrot.slane %v12421_v25, 5  ;;  %v12441_v25 = vshrl.u32 %v18849_v40, 16  ;;  %v25614_v24 = vsel %vm23613_vm8, %v4012_v63, %v4013_v22  ;;  %v25618_v12 = vsel %vm23613_vm8, %v4015_v46, %v4016_v56  ;;  %v22743_v63 = vld [vmem:[%s23101_s5 + $0x198] sm:$0xf]  ;;  %v18851_v46 = vld [vmem:[%s23101_s5 + $0xc4] sm:$0xf] }
 0x341   : > { %21002 = vmatmul.mubr.msk.bf16.gmra.mrb[120].mxu0 %vm1887_vm4, %v22462_v29  ;;  %20421 = vmatprep.mubr.msk.bf16.mxu1 %vm1887_vm4, %v29268_v37  ;;  %v12433_v29 = vrot.slane %v12431_v54, 4  ;;  %v22464_v54 = vld [vmem:[%s23101_s5 + $0x27c] sm:$0xff]   ;;  %v25620_v62 = vrot.slane %v12413_v44, 5  ;;  %v12451_v10 = vshrl.u32 %v18850_v34, 16  ;;  %v25622_v41 = vrot.slane %v12400_v47, 4 }
 0x342   : > { %21005 = vmatprep.mubr.msk.bf16.mxu0 %vm1887_vm4, %v22463_v45  ;;  %v22742_v45 = vld [vmem:[%s23101_s5 + $0x194] sm:$0xf]  ;;  %v17734_v6 = vrot.slane %v3703_v61, 9  ;;  %v12424_v51 = vor.u32 %v12423_v17, %v12420_v35  ;;  %v25626_v18 = vcombine.low %v12386_v5, %v12396_v26  ;;  %v12411_v49 = vrot.slane %v12410_v53, 4  ;;  %v22744_v61 = vld [vmem:[%s23101_s5 + $0x19c] sm:$0xf] }
 0x343   : > { %v4023_v37 = vrot.slane %v22742_v45, 5  ;;  %v12434_v40 = vor.u32 %v12433_v29, %v25600_v28  ;;  %v18852_v45 = vld [vmem:[%s23101_s5 + $0xc8] sm:$0xf]  ;;  %v4022_v22 = vrot.slane %v4020_v19, 4  ;;  %v4026_v60 = vrot.slane %v22743_v63, 5 }
 0x344   : > { %v12439_v23 = vrot.slane %v12437_v39, 5  ;;  %v12443_v56 = vrot.slane %v12441_v25, 4  ;;  %v25630_v44 = vrot.slane %v12447_v11, 5  ;;  %v29269_v47 = vcombine.low %v25216_v16, %v25229_v3  ;;  %v18853_v25 = vld [vmem:[%s23101_s5 + $0xcc] sm:$0xf] }
 0x345   : > { %v4025_v52 = vrot.slane %v4023_v37, 4  ;;  %v12453_v34 = vrot.slane %v12451_v10, 4  ;;  %v12461_v35 = vshrl.u32 %v18851_v46, 16  ;;  %v12467_v17 = vshll.u32 %v18852_v45, 16 }
 0x346   : > { %v12471_v29 = vshrl.u32 %v18852_v45, 16  ;;  %v29270_v5 = vcombine.low %v25233_v9, %v25237_v1  ;;  %v12406_v16 = vsel %vm23119_vm5, %v25622_v41, %v25579_v59  ;;  %v25649_v3 = vsel %vm23613_vm8, %v17734_v6, %v4020_v19 }
 0x347   : > { %v12425_v26 = vrot.slane %v12424_v51, 4  ;;  %v12435_v53 = vrot.slane %v12434_v40, 4  ;;  %v12416_v9 = vsel %vm23119_vm5, %v12411_v49, %v25620_v62  ;;  %v4028_v1 = vrot.slane %v4026_v60, 4  ;;  %v18854_v51 = vld [vmem:[%s23101_s5 + $0xd0] sm:$0xf] }
 0x348   : > { %20422 = vmatmul.mubr.msk.bf16.gmra.mrb[60].mxu1 %vm1887_vm4, %v29269_v47  ;;  %v4029_v39 = vrot.slane %v22744_v61, 5  ;;  %v25658_v11 = vsel %vm23613_vm8, %v4022_v22, %v4023_v37  ;;  %v25662_v59 = vsel %vm23613_vm8, %v4025_v52, %v4026_v60  ;;  %v12444_v19 = vor.u32 %v12443_v56, %v12439_v23  ;;  %v29274_v61 = vld [vmem:[#allocation24_spill] sm:$0xff] }
 0x349   : > { %21006 = vmatmul.mubr.msk.bf16.gmra.mrb[124].mxu0 %vm1887_vm4, %v22464_v54  ;;  %20425 = vmatprep.mubr.msk.bf16.mxu1 %vm1887_vm4, %v29270_v5  ;;  %v22745_v54 = vld [vmem:[%s23101_s5 + $0x1a0] sm:$0xf]  ;;  %v12454_v41 = vor.u32 %v12453_v34, %v25630_v44  ;;  %v12463_v49 = vrot.slane %v12461_v35, 4  ;;  %v25666_v62 = vrot.slane %v12467_v17, 5  ;;  %v12473_v6 = vrot.slane %v12471_v29, 4 }
 0x34a   : > { %21011 = vmatprep.mubr.msk.bf16.mxu0 %vm1887_vm4, %v25275_v43  ;;  %v12457_v43 = vshll.u32 %v18851_v46, 16  ;;  %v4032_v10 = vrot.slane %v22745_v54, 5  ;;  %v12430_v37 = vsel %vm23119_vm5, %v12425_v26, %v25600_v28  ;;  %v12440_v40 = vsel %vm23119_vm5, %v12435_v53, %v12439_v23  ;;  %v22746_v46 = vld [vmem:[%s23101_s5 + $0x1a4] sm:$0xf]  ;;  %v29273_v23 = vld [vmem:[#allocation8_spill] sm:$0xff] }
 0x34b   : > { %v12477_v60 = vshll.u32 %v18853_v25, 16  ;;  %v12481_v52 = vshrl.u32 %v18853_v25, 16  ;;  %v25676_v45 = vsel %vm23613_vm8, %v4028_v1, %v4029_v39  ;;  %v4031_v63 = vrot.slane %v4029_v39, 4  ;;  %v29271_v29 = vld [vmem:[#allocation6_spill] sm:$0xff]  ;;  %v29275_v39 = vld [vmem:[#allocation5_spill] sm:$0xff] }
 0x34c   : > { %v12459_v22 = vrot.slane %v12457_v43, 5  ;;  %v4035_v56 = vrot.slane %v22746_v46, 5  ;;  %v12445_v47 = vrot.slane %v12444_v19, 4  ;;  %v4034_v34 = vrot.slane %v4032_v10, 4  ;;  %v29276_v43 = vld [vmem:[#allocation7_spill] sm:$0xff] }
 0x34d   : > { %v12487_v35 = vshll.u32 %v18854_v51, 16  ;;  %v12491_v17 = vshrl.u32 %v18854_v51, 16  ;;  %v29272_v28 = vcombine.low %v25250_v7, %v29271_v29  ;;  %v17783_v5 = vcombine.low %v25614_v24, %v25618_v12  ;;  %v18856_v46 = vld [vmem:[%s23101_s5 + $0xd8] sm:$0xf]  ;;  %v18857_v29 = vld [vmem:[%s23101_s5 + $0xdc] sm:$0xf] }
 0x34e   : > { %v12455_v26 = vrot.slane %v12454_v41, 4  ;;  %v12464_v53 = vor.u32 %v12463_v49, %v12459_v22  ;;  %v12474_v1 = vor.u32 %v12473_v6, %v25666_v62  ;;  %v29277_v7 = vcombine.low %v29275_v39, %v29276_v43 }
 0x34f   : > { %v25693_v25 = vcombine.low %v12406_v16, %v12416_v9  ;;  %v17784_v19 = vcombine.low %v25649_v3, %v25658_v11  ;;  %v12479_v54 = vrot.slane %v12477_v60, 5  ;;  %v12483_v51 = vrot.slane %v12481_v52, 4  ;;  %v22747_v16 = vld [vmem:[%s23101_s5 + $0x1a8] sm:$0xf]  ;;  %v22762_v3 = vld [vmem:[%s23101_s5 + $0x1ec] sm:$0xf] }
 0x350   : > { %20426 = vmatmul.mubr.msk.bf16.gmra.mrb[64].mxu1 %vm1887_vm4, %v29272_v28  ;;  %v25699_v41 = vcombine.low %v12430_v37, %v12440_v40  ;;  %v25705_v6 = vsel %vm23613_vm8, %v4031_v63, %v4032_v10  ;;  %v4038_v9 = vrot.slane %v22747_v16, 5  ;;  %v12450_v60 = vsel %vm23119_vm5, %v12445_v47, %v25630_v44  ;;  %v18855_v37 = vld [vmem:[%s23101_s5 + $0xd4] sm:$0x1]  ;;  %v3704_v16 = vld [vmem:[%s23101_s5 + $0x1b0] sm:$0xe] }
 0x351   : > { %21012 = vmatmul.mubr.msk.bf16.vlgmr.msra.gmra.mrb[0].mxu0 %vm1887_vm4, %v29273_v23  ;;  %20429 = vmatprep.mubr.msk.bf16.mxu1 %vm1887_vm4, %v29277_v7  ;;  %v25717_v40 = vrot.slane %v12487_v35, 5  ;;  %v12493_v52 = vrot.slane %v12491_v17, 4  ;;  %v12460_v10 = vsel %vm23119_vm5, %v12455_v26, %v12459_v22  ;;  %v12465_v63 = vrot.slane %v12464_v53, 4 }
 0x352   : > { %21140 = vmatpush3.bf16.msra.mxu0 %v29274_v61  ;;  %21015 = vmatprep.mubr.msk.bf16.mxu0 %vm1887_vm4, %v25361_v2  ;;  %v25714_v2 = vsel %vm23613_vm8, %v4034_v34, %v4035_v56  ;;  %v12475_v28 = vrot.slane %v12474_v1, 4  ;;  %v4037_v23 = vrot.slane %v4035_v56, 4  ;;  %v22748_v61 = vld [vmem:[%s23101_s5 + $0x1ac] sm:$0x1]  ;;  %v12484_v44 = vor.u32 %v12483_v51, %v12479_v54  ;;  %v22749_v56 = vld [vmem:[%s23101_s5 + $0x1b4] sm:$0xf] }
 0x353   : > { %v4041_v39 = vrot.slane %v22748_v61, 5  ;;  %v12502_v47 = vshrl.u32 %v18856_v46, 16  ;;  %v12505_v43 = vshll.u32 %v18856_v46, 16  ;;  %v4040_v34 = vrot.slane %v4038_v9, 4  ;;  %v18861_v61 = vld [vmem:[%s23101_s5 + $0xec] sm:$0xf] }
 0x354   : > { %v12497_v7 = vshll.u32 %v18855_v37, 16  ;;  %v12511_v35 = vshll.u32 %v18857_v29, 16  ;;  %v12515_v49 = vshrl.u32 %v18857_v29, 16  ;;  %v25724_v17 = vcombine.low %v12450_v60, %v12460_v10  ;;  %v18858_v37 = vld [vmem:[%s23101_s5 + $0xe0] sm:$0xf] }
 0x355   : > { %v17786_v22 = vcombine.low %v25705_v6, %v25714_v2  ;;  %v12494_v26 = vor.u32 %v12493_v52, %v25717_v40  ;;  %v4045_v53 = vrot.slane %v22749_v56, 5  ;;  %v29278_v1 = vcombine.low %v25320_v20, %v25339_v8  ;;  %v18876_v2 = vld [vmem:[%s23101_s5 + $0x128] sm:$0xf] }
 0x356   : > { %v12470_v51 = vsel %vm23119_vm5, %v12465_v63, %v25666_v62  ;;  %v12480_v46 = vsel %vm23119_vm5, %v12475_v28, %v12479_v54  ;;  %v25743_v60 = vsel %vm23613_vm8, %v4037_v23, %v4038_v9  ;;  %v29279_v20 = vcombine.low %v25367_v38, %v25377_v55  ;;  %v18859_v54 = vld [vmem:[%s23101_s5 + $0xe4] sm:$0xf]  ;;  %v22750_v28 = vld [vmem:[%s23101_s5 + $0x1b8] sm:$0xf] }
 0x357   : > { %v12485_v8 = vrot.slane %v12484_v44, 4  ;;  %v12504_v62 = vrot.slane %v12502_v47, 4  ;;  %v12507_v52 = vrot.slane %v12505_v43, 5  ;;  %v25755_v29 = vsel %vm23613_vm8, %v4040_v34, %v4041_v39 }
 0x358   : > { %20430 = vmatmul.mubr.msk.bf16.gmra.mrb[68].mxu1 %vm1887_vm4, %v29278_v1  ;;  %v12499_v9 = vrot.slane %v12497_v7, 5  ;;  %v25757_v10 = vrot.slane %v12511_v35, 5  ;;  %v12517_v38 = vrot.slane %v12515_v49, 4  ;;  %v12495_v55 = vrot.slane %v12494_v26, 4  ;;  %v22751_v7 = vld [vmem:[%s23101_s5 + $0x1bc] sm:$0xf] }
 0x359   : > { %21016 = vmatmul.mubr.msk.bf16.gmra.mrb[4].mxu0 %vm1887_vm4, %v25406_v14  ;;  %20433 = vmatprep.mubr.msk.bf16.mxu1 %vm1887_vm4, %v29279_v20  ;;  %v17735_v14 = vrot.slane %v3704_v16, 9  ;;  %v4047_v63 = vrot.slane %v4045_v53, 4  ;;  %v4048_v23 = vrot.slane %v22750_v28, 5  ;;  %v25761_v44 = vcombine.low %v12470_v51, %v12480_v46  ;;  %v18860_v26 = vld [vmem:[%s23101_s5 + $0xe8] sm:$0xf] }
 0x35a   : > { %21019 = vmatprep.mubr.msk.bf16.mxu0 %vm1887_vm4, %v25428_v58  ;;  %v12521_v58 = vshll.u32 %v18858_v37, 16  ;;  %v12525_v47 = vshrl.u32 %v18858_v37, 16  ;;  %v12531_v43 = vshll.u32 %v18859_v54, 16  ;;  %v12535_v16 = vshrl.u32 %v18859_v54, 16 }
 0x35b   : > { %v12490_v39 = vsel %vm23119_vm5, %v12485_v8, %v25717_v40  ;;  %v25768_v34 = vsel %vm23613_vm8, %v17735_v14, %v4045_v53  ;;  %v12508_v49 = vor.u32 %v12507_v52, %v12504_v62  ;;  %v4051_v35 = vrot.slane %v22751_v7, 5  ;;  %v29280_v8 = vld [vmem:[#allocation9_spill] sm:$0xff] }
 0x35c   : > { %v12518_v56 = vor.u32 %v12517_v38, %v25757_v10  ;;  %v12545_v1 = vshrl.u32 %v18860_v26, 16  ;;  %v12551_v51 = vshll.u32 %v18861_v61, 16  ;;  %v12555_v46 = vshrl.u32 %v18861_v61, 16 }
 0x35d   : > { %v12500_v37 = vsel %vm23119_vm5, %v12495_v55, %v12499_v9  ;;  %v25777_v40 = vsel %vm23613_vm8, %v4047_v63, %v4048_v23  ;;  %v12523_v53 = vrot.slane %v12521_v58, 5  ;;  %v4050_v20 = vrot.slane %v4048_v23, 4  ;;  %v22752_v63 = vld [vmem:[%s23101_s5 + $0x1c0] sm:$0xf] }
 0x35e   : > { %v29281_v14 = vcombine.low %v25382_v15, %v29280_v8  ;;  %v12527_v62 = vrot.slane %v12525_v47, 4  ;;  %v25785_v52 = vrot.slane %v12531_v43, 5  ;;  %v12537_v54 = vrot.slane %v12535_v16, 4 }
 0x35f   : > { %v12541_v9 = vshll.u32 %v18860_v26, 16  ;;  %v29282_v38 = vcombine.low %v25438_v57, %v25448_v42  ;;  %v12509_v15 = vrot.slane %v12508_v49, 4  ;;  %v4053_v55 = vrot.slane %v4051_v35, 4  ;;  %v18862_v49 = vld [vmem:[%s23101_s5 + $0xf0] sm:$0xf] }
 0x360   : > { %20434 = vmatmul.mubr.msk.bf16.gmra.mrb[72].mxu1 %vm1887_vm4, %v29281_v14  ;;  %v4054_v28 = vrot.slane %v22752_v63, 5  ;;  %v12519_v58 = vrot.slane %v12518_v56, 4  ;;  %v12547_v61 = vrot.slane %v12545_v1, 4  ;;  %v25795_v47 = vrot.slane %v12551_v51, 5  ;;  %v22754_v1 = vld [vmem:[%s23101_s5 + $0x1c8] sm:$0xf] }
 0x361   : > { %21020 = vmatmul.mubr.msk.bf16.gmra.mrb[8].mxu0 %vm1887_vm4, %v25466_v4  ;;  %20437 = vmatprep.mubr.msk.bf16.mxu1 %vm1887_vm4, %v29282_v38  ;;  %v22753_v4 = vld [vmem:[%s23101_s5 + $0x1c4] sm:$0xf]  ;;  %v12557_v43 = vrot.slane %v12555_v46, 4  ;;  %v17787_v57 = vcombine.low %v25743_v60, %v25755_v29  ;;  %v25799_v42 = vcombine.low %v12490_v39, %v12500_v37  ;;  %v25805_v16 = vsel %vm23613_vm8, %v4050_v20, %v4051_v35  ;;  %v18863_v46 = vld [vmem:[%s23101_s5 + $0xf4] sm:$0xf] }
 0x362   : > { %21023 = vmatprep.mubr.msk.bf16.mxu0 %vm1887_vm4, %v25474_v50  ;;  %v4057_v23 = vrot.slane %v22753_v4, 5  ;;  %v17788_v50 = vcombine.low %v25768_v34, %v25777_v40  ;;  %v12528_v7 = vor.u32 %v12527_v62, %v12523_v53  ;;  %v12538_v26 = vor.u32 %v12537_v54, %v25785_v52 }
 0x363   : > { %v25809_v56 = vrot.slane %v12541_v9, 5  ;;  %v4060_v51 = vrot.slane %v22754_v1, 5  ;;  %v12514_v39 = vsel %vm23119_vm5, %v12509_v15, %v25757_v10  ;;  %v25818_v37 = vsel %vm23613_vm8, %v4053_v55, %v4054_v28  ;;  %v22755_v9 = vld [vmem:[%s23101_s5 + $0x1cc] sm:$0xf]  ;;  %v18866_v1 = vld [vmem:[%s23101_s5 + $0x100] sm:$0xf] }
 0x364   : > { %v4056_v35 = vrot.slane %v4054_v28, 4  ;;  %v4059_v20 = vrot.slane %v4057_v23, 4  ;;  %v12524_v8 = vsel %vm23119_vm5, %v12519_v58, %v12523_v53  ;;  %v12558_v62 = vor.u32 %v12557_v43, %v25795_v47  ;;  %v18864_v43 = vld [vmem:[%s23101_s5 + $0xf8] sm:$0x1] }
 0x365   : > { %v12548_v14 = vor.u32 %v12547_v61, %v25809_v56  ;;  %v12561_v54 = vshll.u32 %v18862_v49, 16  ;;  %v4063_v38 = vrot.slane %v22755_v9, 5  ;;  %v12565_v63 = vshrl.u32 %v18862_v49, 16  ;;  %v18865_v49 = vld [vmem:[%s23101_s5 + $0xfc] sm:$0xf] }
 0x366   : > { %v12571_v10 = vshll.u32 %v18863_v46, 16  ;;  %v12575_v15 = vshrl.u32 %v18863_v46, 16  ;;  %v29283_v55 = vcombine.low %v25478_v31, %v25493_v27  ;;  %v17789_v53 = vcombine.low %v25805_v16, %v25818_v37  ;;  %v3705_v9 = vld [vmem:[%s23101_s5 + $0x1d4] sm:$0xe] }
 0x367   : > { %v12529_v28 = vrot.slane %v12528_v7, 4  ;;  %v12539_v4 = vrot.slane %v12538_v26, 4  ;;  %v4062_v58 = vrot.slane %v4060_v51, 4  ;;  %v29284_v61 = vcombine.low %v25517_v33, %v25521_v21  ;;  %v22756_v26 = vld [vmem:[%s23101_s5 + $0x1d0] sm:$0x1] }
 0x368   : > { %20438 = vmatmul.mubr.msk.bf16.gmra.mrb[76].mxu1 %vm1887_vm4, %v29283_v55  ;;  %v25839_v31 = vcombine.low %v12514_v39, %v12524_v8  ;;  %v25843_v27 = vsel %vm23613_vm8, %v4056_v35, %v4057_v23  ;;  %v12549_v33 = vrot.slane %v12548_v14, 4  ;;  %v12559_v21 = vrot.slane %v12558_v62, 4  ;;  %v18867_v35 = vld [vmem:[%s23101_s5 + $0x104] sm:$0xf] }
 0x369   : > { %21024 = vmatmul.mubr.msk.bf16.gmra.mrb[12].mxu0 %vm1887_vm4, %v25513_v0  ;;  %20441 = vmatprep.mubr.msk.bf16.mxu1 %vm1887_vm4, %v29284_v61  ;;  %v25847_v0 = vsel %vm23613_vm8, %v4059_v20, %v4060_v51  ;;  %v12563_v7 = vrot.slane %v12561_v54, 5  ;;  %v4065_v46 = vrot.slane %v4063_v38, 4  ;;  %v12567_v39 = vrot.slane %v12565_v63, 4  ;;  %v18868_v54 = vld [vmem:[%s23101_s5 + $0x108] sm:$0xf]  ;;  %v29287_v14 = vld [vmem:[#allocation10_spill] sm:$0xff] }
 0x36a   : > { %21027 = vmatprep.mubr.msk.bf16.mxu0 %vm1887_vm4, %v25560_v30  ;;  %v4066_v30 = vrot.slane %v22756_v26, 5  ;;  %v25853_v8 = vrot.slane %v12571_v10, 5  ;;  %v12577_v23 = vrot.slane %v12575_v15, 4  ;;  %v12534_v51 = vsel %vm23119_vm5, %v12529_v28, %v25785_v52 }
 0x36b   : > { %v12544_v20 = vsel %vm23119_vm5, %v12539_v4, %v25809_v56  ;;  %v25866_v62 = vsel %vm23613_vm8, %v4062_v58, %v4063_v38  ;;  %v12586_v63 = vshrl.u32 %v18865_v49, 16  ;;  %v12589_v10 = vshll.u32 %v18865_v49, 16 }
 0x36c   : > { %v12595_v15 = vshll.u32 %v18866_v1, 16  ;;  %v12599_v55 = vshrl.u32 %v18866_v1, 16  ;;  %v12554_v52 = vsel %vm23119_vm5, %v12549_v33, %v25795_v47  ;;  %v12581_v28 = vshll.u32 %v18864_v43, 16  ;;  %v29286_v1 = vld [vmem:[#allocation13_spill] sm:$0xff] }
 0x36d   : > { %v12605_v56 = vshll.u32 %v18867_v35, 16  ;;  %v12609_v4 = vshrl.u32 %v18867_v35, 16  ;;  %v12564_v61 = vsel %vm23119_vm5, %v12559_v21, %v12563_v7  ;;  %v25877_v38 = vsel %vm23613_vm8, %v4065_v46, %v4066_v30  ;;  %v22757_v43 = vld [vmem:[%s23101_s5 + $0x1d8] sm:$0xf]  ;;  %v29288_v30 = vld [vmem:[#allocation11_spill] sm:$0xff] }
 0x36e   : > { %v12568_v58 = vor.u32 %v12567_v39, %v12563_v7  ;;  %v12578_v26 = vor.u32 %v12577_v23, %v25853_v8  ;;  %v29285_v49 = vcombine.low %v25551_v32, %v25555_v13  ;;  %v17736_v47 = vrot.slane %v3705_v9, 9 }
 0x36f   : > { %v4070_v33 = vrot.slane %v22757_v43, 5  ;;  %v12615_v35 = vshll.u32 %v18868_v54, 16  ;;  %v12619_v21 = vshrl.u32 %v18868_v54, 16  ;;  %v29289_v46 = vcombine.low %v29287_v14, %v29288_v30 }
 0x370   : > { %20442 = vmatmul.mubr.msk.bf16.gmra.mrb[80].mxu1 %vm1887_vm4, %v29285_v49  ;;  %v12588_v32 = vrot.slane %v12586_v63, 4  ;;  %v12591_v13 = vrot.slane %v12589_v10, 5  ;;  %v25893_v7 = vrot.slane %v12595_v15, 5  ;;  %v12601_v39 = vrot.slane %v12599_v55, 4  ;;  %v18870_v63 = vld [vmem:[%s23101_s5 + $0x110] sm:$0xf] }
 0x371   : > { %21028 = vmatmul.mubr.msk.bf16.gmra.mrb[16].mxu0 %vm1887_vm4, %v29286_v1  ;;  %20445 = vmatprep.mubr.msk.bf16.mxu1 %vm1887_vm4, %v29289_v46  ;;  %v25895_v23 = vcombine.low %v12534_v51, %v12544_v20  ;;  %v12583_v9 = vrot.slane %v12581_v28, 5  ;;  %v25897_v49 = vrot.slane %v12605_v56, 5  ;;  %v12611_v54 = vrot.slane %v12609_v4, 4  ;;  %v22758_v15 = vld [vmem:[%s23101_s5 + $0x1dc] sm:$0xf] }
 0x372   : > { %21031 = vmatprep.mubr.msk.bf16.mxu0 %vm1887_vm4, %v25626_v18  ;;  %v25899_v14 = vcombine.low %v12554_v52, %v12564_v61  ;;  %v17791_v1 = vcombine.low %v25866_v62, %v25877_v38  ;;  %v12569_v43 = vrot.slane %v12568_v58, 4  ;;  %v12579_v18 = vrot.slane %v12578_v26, 4  ;;  %v22759_v4 = vld [vmem:[%s23101_s5 + $0x1e0] sm:$0xf]  ;;  %v18869_v58 = vld [vmem:[%s23101_s5 + $0x10c] sm:$0xf] }
 0x373   : > { %v4072_v10 = vrot.slane %v4070_v33, 4  ;;  %v4073_v55 = vrot.slane %v22758_v15, 5  ;;  %v25905_v51 = vrot.slane %v12615_v35, 5  ;;  %v12621_v20 = vrot.slane %v12619_v21, 4  ;;  %v22771_v38 = vld [vmem:[%s23101_s5 + $0x214] sm:$0xf] }
 0x374   : > { %v25909_v28 = vsel %vm23613_vm8, %v17736_v47, %v4070_v33  ;;  %v12592_v52 = vor.u32 %v12591_v13, %v12588_v32  ;;  %v12602_v56 = vor.u32 %v12601_v39, %v25893_v7  ;;  %v4076_v61 = vrot.slane %v22759_v4, 5  ;;  %v22760_v33 = vld [vmem:[%s23101_s5 + $0x1e4] sm:$0xf]  ;;  %v22761_v32 = vld [vmem:[%s23101_s5 + $0x1e8] sm:$0xf] }
 0x375   : > { %v12612_v26 = vor.u32 %v12611_v54, %v25897_v49  ;;  %v12629_v30 = vshrl.u32 %v18869_v58, 16  ;;  %v12635_v46 = vshll.u32 %v18870_v63, 16  ;;  %v12639_v15 = vshrl.u32 %v18870_v63, 16 }
 0x376   : > { %v12574_v35 = vsel %vm23119_vm5, %v12569_v43, %v25853_v8  ;;  %v12584_v47 = vsel %vm23119_vm5, %v12579_v18, %v12583_v9  ;;  %v4079_v21 = vrot.slane %v22760_v33, 5  ;;  %v4082_v13 = vrot.slane %v22761_v32, 5  ;;  %v18871_v43 = vld [vmem:[%s23101_s5 + $0x114] sm:$0xf] }
 0x377   : > { %v25930_v39 = vsel %vm23613_vm8, %v4072_v10, %v4073_v55  ;;  %v4075_v8 = vrot.slane %v4073_v55, 4  ;;  %v12622_v9 = vor.u32 %v12621_v20, %v25905_v51  ;;  %v12625_v54 = vshll.u32 %v18869_v58, 16  ;;  %v18872_v58 = vld [vmem:[%s23101_s5 + $0x118] sm:$0xf] }
 0x378   : > { %20446 = vmatmul.mubr.msk.bf16.gmra.mrb[84].mxu1 %vm1887_vm4, %v17783_v5  ;;  %v12593_v24 = vrot.slane %v12592_v52, 4  ;;  %v12603_v12 = vrot.slane %v12602_v56, 4  ;;  %v4078_v5 = vrot.slane %v4076_v61, 4  ;;  %v12613_v18 = vrot.slane %v12612_v26, 4 }
 0x379   : > { %21032 = vmatmul.mubr.msk.bf16.gmra.mrb[20].mxu0 %vm1887_vm4, %v25693_v25  ;;  %20449 = vmatprep.mubr.msk.bf16.mxu1 %vm1887_vm4, %v17784_v19  ;;  %v4081_v25 = vrot.slane %v4079_v21, 4  ;;  %v12631_v63 = vrot.slane %v12629_v30, 4  ;;  %v25940_v10 = vrot.slane %v12635_v46, 5  ;;  %v12641_v55 = vrot.slane %v12639_v15, 4 }
 0x37a   : > { %21035 = vmatprep.mubr.msk.bf16.mxu0 %vm1887_vm4, %v25699_v41  ;;  %v25942_v20 = vcombine.low %v12574_v35, %v12584_v47  ;;  %v4084_v4 = vrot.slane %v4082_v13, 4  ;;  %v4085_v11 = vrot.slane %v22762_v3, 5  ;;  %v12645_v19 = vshll.u32 %v18871_v43, 16  ;;  %v18874_v35 = vld [vmem:[%s23101_s5 + $0x120] sm:$0xf] }
 0x37b   : > { %v17792_v41 = vcombine.low %v25909_v28, %v25930_v39  ;;  %v12623_v52 = vrot.slane %v12622_v9, 4  ;;  %v12627_v56 = vrot.slane %v12625_v54, 5  ;;  %v12649_v33 = vshrl.u32 %v18871_v43, 16  ;;  %v18875_v9 = vld [vmem:[%s23101_s5 + $0x124] sm:$0xf] }
 0x37c   : > { %v12598_v26 = vsel %vm23119_vm5, %v12593_v24, %v25893_v7  ;;  %v12608_v30 = vsel %vm23119_vm5, %v12603_v12, %v25897_v49  ;;  %v25956_v46 = vsel %vm23613_vm8, %v4075_v8, %v4076_v61  ;;  %v25960_v15 = vsel %vm23613_vm8, %v4078_v5, %v4079_v21  ;;  %v22772_v39 = vld [vmem:[%s23101_s5 + $0x218] sm:$0x1] }
 0x37d   : > { %v12618_v47 = vsel %vm23119_vm5, %v12613_v18, %v25905_v51  ;;  %v25968_v7 = vsel %vm23613_vm8, %v4081_v25, %v4082_v13  ;;  %v12632_v32 = vor.u32 %v12631_v63, %v12627_v56  ;;  %v12642_v49 = vor.u32 %v12641_v55, %v25940_v10  ;;  %v22763_v55 = vld [vmem:[%s23101_s5 + $0x1f0] sm:$0xf] }
 0x37e   : > { %v25974_v61 = vsel %vm23613_vm8, %v4084_v4, %v4085_v11  ;;  %v12647_v8 = vrot.slane %v12645_v19, 5  ;;  %v12655_v21 = vshll.u32 %v18872_v58, 16  ;;  %v12659_v54 = vshrl.u32 %v18872_v58, 16  ;;  %v18873_v4 = vld [vmem:[%s23101_s5 + $0x11c] sm:$0x1] }
 0x37f   : > { %v29290_v43 = vcombine.low %v25662_v59, %v25676_v45  ;;  %v12628_v51 = vsel %vm23119_vm5, %v12623_v52, %v12627_v56  ;;  %v12651_v13 = vrot.slane %v12649_v33, 4  ;;  %v12670_v24 = vshrl.u32 %v18874_v35, 16  ;;  %v22764_v52 = vld [vmem:[%s23101_s5 + $0x1f4] sm:$0x1] }
 0x380   : > { %v12673_v12 = vshll.u32 %v18874_v35, 16  ;;  %v25990_v59 = vcombine.low %v12598_v26, %v12608_v30  ;;  %v17793_v45 = vcombine.low %v25956_v46, %v25960_v15  ;;  %v12683_v5 = vshrl.u32 %v18875_v9, 16  ;;  %v18877_v30 = vld [vmem:[%s23101_s5 + $0x12c] sm:$0xf] }
 0x381   : > { %20450 = vmatmul.mubr.msk.bf16.gmra.mrb[88].mxu1 %vm1887_vm4, %v29290_v43  ;;  %21036 = vmatmul.mubr.msk.bf16.gmra.mrb[24].mxu0 %vm1887_vm4, %v25724_v17  ;;  %v12679_v17 = vshll.u32 %v18875_v9, 16  ;;  %v12633_v25 = vrot.slane %v12632_v32, 4  ;;  %v12643_v18 = vrot.slane %v12642_v49, 4  ;;  %v4087_v63 = vrot.slane %v4085_v11, 4  ;;  %v3706_v11 = vld [vmem:[%s23101_s5 + $0x1f8] sm:$0xe] }
 0x382   : > { %20453 = vmatprep.mubr.msk.bf16.mxu1 %vm1887_vm4, %v17786_v22  ;;  %21039 = vmatprep.mubr.msk.bf16.mxu0 %vm1887_vm4, %v25761_v44  ;;  %v4088_v6 = vrot.slane %v22763_v55, 5  ;;  %v25996_v22 = vcombine.low %v12618_v47, %v12628_v51  ;;  %v17794_v44 = vcombine.low %v25968_v7, %v25974_v61  ;;  %v26001_v3 = vrot.slane %v12655_v21, 5 }
 0x383   : > { %v12661_v19 = vrot.slane %v12659_v54, 4  ;;  %v4091_v56 = vrot.slane %v22764_v52, 5  ;;  %v12652_v58 = vor.u32 %v12651_v13, %v12647_v8  ;;  %v12672_v33 = vrot.slane %v12670_v24, 4  ;;  %v22765_v13 = vld [vmem:[%s23101_s5 + $0x1fc] sm:$0xf] }
 0x384   : > { %v12675_v26 = vrot.slane %v12673_v12, 5  ;;  %v26006_v35 = vrot.slane %v12679_v17, 5  ;;  %v12685_v47 = vrot.slane %v12683_v5, 4  ;;  %v12689_v32 = vshll.u32 %v18876_v2, 16  ;;  %v22766_v5 = vld [vmem:[%s23101_s5 + $0x200] sm:$0xf] }
 0x385   : > { %v12693_v49 = vshrl.u32 %v18876_v2, 16  ;;  %v12638_v9 = vsel %vm23119_vm5, %v12633_v25, %v25940_v10  ;;  %v12648_v21 = vsel %vm23119_vm5, %v12643_v18, %v12647_v8  ;;  %v4090_v54 = vrot.slane %v4088_v6, 4  ;;  %v22767_v18 = vld [vmem:[%s23101_s5 + $0x204] sm:$0xf] }
 0x386   : > { %v12665_v43 = vshll.u32 %v18873_v4, 16  ;;  %v12662_v51 = vor.u32 %v12661_v19, %v26001_v3  ;;  %v4095_v24 = vrot.slane %v22765_v13, 5  ;;  %v12699_v12 = vshll.u32 %v18877_v30, 16 }
 0x387   : > { %v12703_v17 = vshrl.u32 %v18877_v30, 16  ;;  %v17737_v10 = vrot.slane %v3706_v11, 9  ;;  %v4098_v25 = vrot.slane %v22766_v5, 5  ;;  %v12676_v8 = vor.u32 %v12675_v26, %v12672_v33  ;;  %v22768_v11 = vld [vmem:[%s23101_s5 + $0x208] sm:$0xf] }
 0x388   : > { %v4101_v55 = vrot.slane %v22767_v18, 5  ;;  %v12653_v60 = vrot.slane %v12652_v58, 4  ;;  %v12686_v29 = vor.u32 %v12685_v47, %v26006_v35  ;;  %v26030_v2 = vcombine.low %v12638_v9, %v12648_v21  ;;  %v18879_v58 = vld [vmem:[%s23101_s5 + $0x134] sm:$0xf]  ;;  %v22769_v9 = vld [vmem:[%s23101_s5 + $0x20c] sm:$0xf] }
 0x389   : > { %20454 = vmatmul.mubr.msk.bf16.gmra.mrb[92].mxu1 %vm1887_vm4, %v17787_v57  ;;  %21040 = vmatmul.mubr.msk.bf16.gmra.mrb[28].mxu0 %vm1887_vm4, %v25799_v42  ;;  %v12691_v57 = vrot.slane %v12689_v32, 5  ;;  %v12695_v42 = vrot.slane %v12693_v49, 4  ;;  %v26034_v4 = vsel %vm23613_vm8, %v4087_v63, %v4088_v6  ;;  %v26038_v34 = vsel %vm23613_vm8, %v4090_v54, %v4091_v56  ;;  %v18878_v32 = vld [vmem:[%s23101_s5 + $0x130] sm:$0xf] }
 0x38a   : > { %20457 = vmatprep.mubr.msk.bf16.mxu1 %vm1887_vm4, %v17788_v50  ;;  %21043 = vmatprep.mubr.msk.bf16.mxu0 %vm1887_vm4, %v25839_v31  ;;  %v12667_v40 = vrot.slane %v12665_v43, 5  ;;  %v12663_v50 = vrot.slane %v12662_v51, 4  ;;  %v4097_v31 = vrot.slane %v4095_v24, 4  ;;  %v26040_v19 = vrot.slane %v12699_v12, 5 }
 0x38b   : > { %v12705_v52 = vrot.slane %v12703_v17, 4  ;;  %v12677_v33 = vrot.slane %v12676_v8, 4  ;;  %v4100_v26 = vrot.slane %v4098_v25, 4  ;;  %v4103_v30 = vrot.slane %v4101_v55, 4 }
 0x38c   : > { %v4104_v47 = vrot.slane %v22768_v11, 5  ;;  %v12658_v63 = vsel %vm23119_vm5, %v12653_v60, %v26001_v3  ;;  %v26050_v6 = vsel %vm23613_vm8, %v17737_v10, %v4095_v24  ;;  %v12687_v56 = vrot.slane %v12686_v29, 4  ;;  %v18883_v11 = vld [vmem:[%s23101_s5 + $0x144] sm:$0xf] }
 0x38d   : > { %v12696_v49 = vor.u32 %v12695_v42, %v12691_v57  ;;  %v4107_v21 = vrot.slane %v22769_v9, 5  ;;  %v12713_v54 = vshrl.u32 %v18878_v32, 16  ;;  %v12719_v43 = vshll.u32 %v18879_v58, 16 }
 0x38e   : > { %v12723_v51 = vshrl.u32 %v18879_v58, 16  ;;  %v12668_v13 = vsel %vm23119_vm5, %v12663_v50, %v12667_v40  ;;  %v26057_v12 = vsel %vm23613_vm8, %v4097_v31, %v4098_v25  ;;  %v12706_v3 = vor.u32 %v12705_v52, %v26040_v19  ;;  %v18880_v25 = vld [vmem:[%s23101_s5 + $0x138] sm:$0xf] }
 0x38f   : > { %v12709_v24 = vshll.u32 %v18878_v32, 16  ;;  %v12682_v17 = vsel %vm23119_vm5, %v12677_v33, %v26006_v35  ;;  %v26071_v10 = vsel %vm23613_vm8, %v4100_v26, %v4101_v55  ;;  %v26075_v5 = vsel %vm23613_vm8, %v4103_v30, %v4104_v47  ;;  %v22770_v35 = vld [vmem:[%s23101_s5 + $0x210] sm:$0xf] }
 0x390   : > { %v29291_v16 = vcombine.low %v25843_v27, %v25847_v0  ;;  %v12692_v37 = vsel %vm23119_vm5, %v12687_v56, %v12691_v57  ;;  %v4110_v8 = vrot.slane %v22770_v35, 5  ;;  %v4109_v18 = vrot.slane %v4107_v21, 4  ;;  %v18881_v27 = vld [vmem:[%s23101_s5 + $0x13c] sm:$0xf]  ;;  %v22773_v35 = vld [vmem:[%s23101_s5 + $0x220] sm:$0xf] }
 0x391   : > { %20458 = vmatmul.mubr.msk.bf16.gmra.mrb[96].mxu1 %vm1887_vm4, %v17789_v53  ;;  %21044 = vmatmul.mubr.msk.bf16.gmra.mrb[32].mxu0 %vm1887_vm4, %v25895_v23  ;;  %v12697_v53 = vrot.slane %v12696_v49, 4  ;;  %v4106_v23 = vrot.slane %v4104_v47, 4  ;;  %v12715_v55 = vrot.slane %v12713_v54, 4  ;;  %v26087_v60 = vrot.slane %v12719_v43, 5  ;;  %v18884_v47 = vld [vmem:[%s23101_s5 + $0x148] sm:$0xf] }
 0x392   : > { %20461 = vmatprep.mubr.msk.bf16.mxu1 %vm1887_vm4, %v29291_v16  ;;  %21047 = vmatprep.mubr.msk.bf16.mxu0 %vm1887_vm4, %v25899_v14  ;;  %v12725_v29 = vrot.slane %v12723_v51, 4  ;;  %v12707_v0 = vrot.slane %v12706_v3, 4  ;;  %v12711_v42 = vrot.slane %v12709_v24, 5  ;;  %v12729_v40 = vshll.u32 %v18880_v25, 16 }
 0x393   : > { %v12733_v50 = vshrl.u32 %v18880_v25, 16  ;;  %v17795_v14 = vcombine.low %v26034_v4, %v26038_v34  ;;  %v26092_v57 = vcombine.low %v12658_v63, %v12668_v13  ;;  %v17796_v31 = vcombine.low %v26050_v6, %v26057_v12 }
 0x394   : > { %v17797_v52 = vcombine.low %v26071_v10, %v26075_v5  ;;  %v26098_v58 = vcombine.low %v12682_v17, %v12692_v37  ;;  %v26102_v33 = vsel %vm23613_vm8, %v4106_v23, %v4107_v21  ;;  %v12739_v26 = vshll.u32 %v18881_v27, 16  ;;  %v18885_v37 = vld [vmem:[%s23101_s5 + $0x14c] sm:$0xf] }
 0x395   : > { %v12743_v30 = vshrl.u32 %v18881_v27, 16  ;;  %v12702_v32 = vsel %vm23119_vm5, %v12697_v53, %v26040_v19  ;;  %v26111_v63 = vsel %vm23613_vm8, %v4109_v18, %v4110_v8  ;;  %v12716_v56 = vor.u32 %v12715_v55, %v12711_v42  ;;  %v18882_v19 = vld [vmem:[%s23101_s5 + $0x140] sm:$0x1]  ;;  %v18886_v18 = vld [vmem:[%s23101_s5 + $0x150] sm:$0xf] }
 0x396   : > { %v12726_v49 = vor.u32 %v12725_v29, %v26087_v60  ;;  %v12712_v9 = vsel %vm23119_vm5, %v12707_v0, %v12711_v42  ;;  %v26116_v21 = vrot.slane %v12729_v40, 5  ;;  %v4112_v54 = vrot.slane %v4110_v8, 4  ;;  %v3707_v55 = vld [vmem:[%s23101_s5 + $0x21c] sm:$0xe] }
 0x397   : > { %v12735_v43 = vrot.slane %v12733_v50, 4  ;;  %v12754_v51 = vshrl.u32 %v18883_v11, 16  ;;  %v12757_v13 = vshll.u32 %v18883_v11, 16  ;;  %v12763_v3 = vshll.u32 %v18884_v47, 16 }
 0x398   : > { %v12767_v24 = vshrl.u32 %v18884_v47, 16  ;;  %v17798_v62 = vcombine.low %v26102_v33, %v26111_v63  ;;  %v12745_v17 = vrot.slane %v12743_v30, 4  ;;  %v26136_v25 = vcombine.low %v12702_v32, %v12712_v9  ;;  %v22775_v47 = vld [vmem:[%s23101_s5 + $0x228] sm:$0xf]  ;;  %v22780_v63 = vld [vmem:[%s23101_s5 + $0x23c] sm:$0x1] }
 0x399   : > { %20462 = vmatmul.mubr.msk.bf16.gmra.mrb[100].mxu1 %vm1887_vm4, %v17791_v1  ;;  %21048 = vmatmul.mubr.msk.bf16.gmra.mrb[36].mxu0 %vm1887_vm4, %v25942_v20  ;;  %v4113_v1 = vrot.slane %v22771_v38, 5  ;;  %v26134_v20 = vrot.slane %v12739_v26, 5  ;;  %v12717_v16 = vrot.slane %v12716_v56, 4  ;;  %v12727_v28 = vrot.slane %v12726_v49, 4  ;;  %v22774_v26 = vld [vmem:[%s23101_s5 + $0x224] sm:$0xf] }
 0x39a   : > { %20465 = vmatprep.mubr.msk.bf16.mxu1 %vm1887_vm4, %v17792_v41  ;;  %21051 = vmatprep.mubr.msk.bf16.mxu0 %vm1887_vm4, %v25990_v59  ;;  %v4116_v41 = vrot.slane %v22772_v39, 5  ;;  %v12736_v53 = vor.u32 %v12735_v43, %v26116_v21  ;;  %v12749_v23 = vshll.u32 %v18882_v19, 16  ;;  %v4120_v8 = vrot.slane %v22773_v35, 5  ;;  %v18888_v38 = vld [vmem:[%s23101_s5 + $0x158] sm:$0xf] }
 0x39b   : > { %v26142_v59 = vsel %vm23613_vm8, %v4112_v54, %v4113_v1  ;;  %v12756_v29 = vrot.slane %v12754_v51, 4  ;;  %v12759_v27 = vrot.slane %v12757_v13, 5  ;;  %v26148_v0 = vrot.slane %v12763_v3, 5 }
 0x39c   : > { %v12769_v42 = vrot.slane %v12767_v24, 4  ;;  %v4115_v40 = vrot.slane %v4113_v1, 4  ;;  %v12746_v50 = vor.u32 %v12745_v17, %v26134_v20  ;;  %v4123_v30 = vrot.slane %v22774_v26, 5  ;;  %v18887_v17 = vld [vmem:[%s23101_s5 + $0x154] sm:$0xf] }
 0x39d   : > { %v12773_v11 = vshll.u32 %v18885_v37, 16  ;;  %v4126_v32 = vrot.slane %v22775_v47, 5  ;;  %v12777_v56 = vshrl.u32 %v18885_v37, 16  ;;  %v12783_v49 = vshll.u32 %v18886_v18, 16 }
 0x39e   : > { %v12787_v9 = vshrl.u32 %v18886_v18, 16  ;;  %v12722_v54 = vsel %vm23119_vm5, %v12717_v16, %v26087_v60  ;;  %v12732_v43 = vsel %vm23119_vm5, %v12727_v28, %v26116_v21  ;;  %v12751_v19 = vrot.slane %v12749_v23, 5  ;;  %v22776_v21 = vld [vmem:[%s23101_s5 + $0x22c] sm:$0xf] }
 0x39f   : > { %v17738_v51 = vrot.slane %v3707_v55, 9  ;;  %v12737_v13 = vrot.slane %v12736_v53, 4  ;;  %v4122_v3 = vrot.slane %v4120_v8, 4  ;;  %v12760_v24 = vor.u32 %v12759_v27, %v12756_v29 }
 0x3a0   : > { %v12770_v60 = vor.u32 %v12769_v42, %v26148_v0  ;;  %v12747_v46 = vrot.slane %v12746_v50, 4  ;;  %v12775_v15 = vrot.slane %v12773_v11, 5  ;;  %v4129_v1 = vrot.slane %v22776_v21, 5  ;;  %v18889_v50 = vld [vmem:[%s23101_s5 + $0x15c] sm:$0xf] }
 0x3a1   : > { %20466 = vmatmul.mubr.msk.bf16.gmra.mrb[104].mxu1 %vm1887_vm4, %v17793_v45  ;;  %21052 = vmatmul.mubr.msk.bf16.gmra.mrb[40].mxu0 %vm1887_vm4, %v25996_v22  ;;  %v4125_v45 = vrot.slane %v4123_v30, 4  ;;  %v4128_v22 = vrot.slane %v4126_v32, 4  ;;  %v12779_v16 = vrot.slane %v12777_v56, 4  ;;  %v26175_v28 = vrot.slane %v12783_v49, 5  ;;  %v18892_v49 = vld [vmem:[%s23101_s5 + $0x168] sm:$0xf] }
 0x3a2   : > { %20469 = vmatprep.mubr.msk.bf16.mxu1 %vm1887_vm4, %v17794_v44  ;;  %21055 = vmatprep.mubr.msk.bf16.mxu0 %vm1887_vm4, %v26030_v2  ;;  %v12789_v39 = vrot.slane %v12787_v9, 4  ;;  %v26179_v37 = vsel %vm23613_vm8, %v4115_v40, %v4116_v41  ;;  %v12797_v7 = vshrl.u32 %v18887_v17, 16  ;;  %v12803_v61 = vshll.u32 %v18888_v38, 16 }
 0x3a3   : > { %v12807_v44 = vshrl.u32 %v18888_v38, 16  ;;  %v26181_v2 = vcombine.low %v12722_v54, %v12732_v43  ;;  %v26185_v53 = vsel %vm23613_vm8, %v17738_v51, %v4120_v8  ;;  %v12761_v23 = vrot.slane %v12760_v24, 4  ;;  %v22777_v43 = vld [vmem:[%s23101_s5 + $0x230] sm:$0xf] }
 0x3a4   : > { %v12771_v35 = vrot.slane %v12770_v60, 4  ;;  %v12742_v18 = vsel %vm23119_vm5, %v12737_v13, %v26134_v20  ;;  %v12752_v41 = vsel %vm23119_vm5, %v12747_v46, %v12751_v19  ;;  %v26194_v55 = vsel %vm23613_vm8, %v4122_v3, %v4123_v30  ;;  %v22778_v3 = vld [vmem:[%s23101_s5 + $0x234] sm:$0xf] }
 0x3a5   : > { %v12793_v29 = vshll.u32 %v18887_v17, 16  ;;  %v26198_v27 = vsel %vm23613_vm8, %v4125_v45, %v4126_v32  ;;  %v26202_v8 = vsel %vm23613_vm8, %v4128_v22, %v4129_v1  ;;  %v12780_v42 = vor.u32 %v12779_v16, %v12775_v15  ;;  %v18894_v45 = vld [vmem:[%s23101_s5 + $0x170] sm:$0xf] }
 0x3a6   : > { %v12790_v40 = vor.u32 %v12789_v39, %v26175_v28  ;;  %v17799_v20 = vcombine.low %v26142_v59, %v26179_v37  ;;  %v12799_v26 = vrot.slane %v12797_v7, 4  ;;  %v26208_v30 = vrot.slane %v12803_v61, 5 }
 0x3a7   : > { %v12809_v11 = vrot.slane %v12807_v44, 4  ;;  %v17800_v47 = vcombine.low %v26185_v53, %v26194_v55  ;;  %v12766_v32 = vsel %vm23119_vm5, %v12761_v23, %v26148_v0  ;;  %v12776_v56 = vsel %vm23119_vm5, %v12771_v35, %v12775_v15  ;;  %v18890_v0 = vld [vmem:[%s23101_s5 + $0x160] sm:$0xf]  ;;  %v22779_v23 = vld [vmem:[%s23101_s5 + $0x238] sm:$0xf] }
 0x3a8   : > { %v26229_v4 = vcombine.low %v12742_v18, %v12752_v41  ;;  %v17801_v34 = vcombine.low %v26198_v27, %v26202_v8  ;;  %v12781_v9 = vrot.slane %v12780_v42, 4  ;;  %v12791_v54 = vrot.slane %v12790_v40, 4 }
 0x3a9   : > { %20470 = vmatmul.mubr.msk.bf16.gmra.mrb[108].mxu1 %vm1887_vm4, %v17795_v14  ;;  %21056 = vmatmul.mubr.msk.bf16.gmra.mrb[44].mxu0 %vm1887_vm4, %v26092_v57  ;;  %v12795_v14 = vrot.slane %v12793_v29, 5  ;;  %v4131_v57 = vrot.slane %v4129_v1, 4  ;;  %v4132_v6 = vrot.slane %v22777_v43, 5  ;;  %v12813_v12 = vshll.u32 %v18889_v50, 16 }
 0x3aa   : > { %20473 = vmatprep.mubr.msk.bf16.mxu1 %vm1887_vm4, %v17796_v31  ;;  %21059 = vmatprep.mubr.msk.bf16.mxu0 %vm1887_vm4, %v26098_v58  ;;  %v18893_v31 = vld [vmem:[%s23101_s5 + $0x16c] sm:$0xf]  ;;  %v26237_v19 = vcombine.low %v12766_v32, %v12776_v56  ;;  %v12810_v51 = vor.u32 %v12809_v11, %v26208_v30  ;;  %v12817_v13 = vshrl.u32 %v18889_v50, 16  ;;  %v4135_v24 = vrot.slane %v22778_v3, 5 }
 0x3ab   : > { %v12800_v58 = vor.u32 %v12799_v26, %v12795_v14  ;;  %v12823_v60 = vshll.u32 %v18890_v0, 16  ;;  %v12827_v38 = vshrl.u32 %v18890_v0, 16  ;;  %v12838_v46 = vshrl.u32 %v18892_v49, 16  ;;  %v18897_v0 = vld [vmem:[%s23101_s5 + $0x17c] sm:$0xf] }
 0x3ac   : > { %v26243_v15 = vsel %vm23613_vm8, %v4131_v57, %v4132_v6  ;;  %v12841_v21 = vshll.u32 %v18892_v49, 16  ;;  %v12847_v1 = vshll.u32 %v18893_v31, 16  ;;  %v12851_v22 = vshrl.u32 %v18893_v31, 16  ;;  %v18896_v57 = vld [vmem:[%s23101_s5 + $0x178] sm:$0xf] }
 0x3ad   : > { %v12786_v17 = vsel %vm23119_vm5, %v12781_v9, %v26175_v28  ;;  %v12796_v16 = vsel %vm23119_vm5, %v12791_v54, %v12795_v14  ;;  %v4134_v39 = vrot.slane %v4132_v6, 4  ;;  %v12815_v7 = vrot.slane %v12813_v12, 5  ;;  %v18891_v28 = vld [vmem:[%s23101_s5 + $0x164] sm:$0x1] }
 0x3ae   : > { %v12801_v61 = vrot.slane %v12800_v58, 4  ;;  %v12811_v44 = vrot.slane %v12810_v51, 4  ;;  %v4138_v35 = vrot.slane %v22779_v23, 5  ;;  %v12819_v18 = vrot.slane %v12817_v13, 4 }
 0x3af   : > { %v26259_v41 = vrot.slane %v12823_v60, 5  ;;  %v12829_v29 = vrot.slane %v12827_v38, 4  ;;  %v12840_v42 = vrot.slane %v12838_v46, 4  ;;  %v12857_v40 = vshll.u32 %v18894_v45, 16 }
 0x3b0   : > { %v12843_v10 = vrot.slane %v12841_v21, 5  ;;  %v26267_v5 = vrot.slane %v12847_v1, 5  ;;  %v12861_v50 = vshrl.u32 %v18894_v45, 16  ;;  %v26270_v26 = vcombine.low %v12786_v17, %v12796_v16  ;;  %v18898_v45 = vld [vmem:[%s23101_s5 + $0x180] sm:$0xf] }
 0x3b1   : > { %20474 = vmatmul.mubr.msk.bf16.gmra.mrb[112].mxu1 %vm1887_vm4, %v17797_v52  ;;  %21060 = vmatmul.mubr.msk.bf16.gmra.mrb[48].mxu0 %vm1887_vm4, %v26136_v25  ;;  %v12853_v52 = vrot.slane %v12851_v22, 4  ;;  %v18895_v25 = vld [vmem:[%s23101_s5 + $0x174] sm:$0xf]  ;;  %v26274_v11 = vsel %vm23613_vm8, %v4134_v39, %v4135_v24  ;;  %v4137_v33 = vrot.slane %v4135_v24, 4  ;;  %v12816_v32 = vsel %vm23119_vm5, %v12811_v44, %v12815_v7  ;;  %v18899_v21 = vld [vmem:[%s23101_s5 + $0x184] sm:$0xf] }
 0x3b2   : > { %20477 = vmatprep.mubr.msk.bf16.mxu1 %vm1887_vm4, %v17798_v62  ;;  %21063 = vmatprep.mubr.msk.bf16.mxu0 %vm1887_vm4, %v26181_v2  ;;  %v4141_v62 = vrot.slane %v22780_v63, 5  ;;  %v12806_v2 = vsel %vm23119_vm5, %v12801_v61, %v26208_v30  ;;  %v4140_v56 = vrot.slane %v4138_v35, 4  ;;  %v12833_v14 = vshll.u32 %v18891_v28, 16  ;;  %v18901_v16 = vld [vmem:[%s23101_s5 + $0x18c] sm:$0xf] }
 0x3b3   : > { %v12820_v49 = vor.u32 %v12819_v18, %v12815_v7  ;;  %v12830_v9 = vor.u32 %v12829_v29, %v26259_v41  ;;  %v26285_v54 = vrot.slane %v12857_v40, 5  ;;  %v12867_v43 = vshll.u32 %v18895_v25, 16  ;;  %v18902_v39 = vld [vmem:[%s23101_s5 + $0x190] sm:$0xf] }
 0x3b4   : > { %v12844_v6 = vor.u32 %v12843_v10, %v12840_v42  ;;  %v12854_v12 = vor.u32 %v12853_v52, %v26267_v5  ;;  %v12863_v31 = vrot.slane %v12861_v50, 4  ;;  %v12871_v30 = vshrl.u32 %v18895_v25, 16 }
 0x3b5   : > { %v12877_v58 = vshll.u32 %v18896_v57, 16  ;;  %v12881_v51 = vshrl.u32 %v18896_v57, 16  ;;  %v12887_v13 = vshll.u32 %v18897_v0, 16  ;;  %v12891_v3 = vshrl.u32 %v18897_v0, 16 }
 0x3b6   : > { %v17802_v24 = vcombine.low %v26243_v15, %v26274_v11  ;;  %v18995_v60 = vcombine.low %v12806_v2, %v12816_v32  ;;  %v26292_v38 = vsel %vm23613_vm8, %v4137_v33, %v4138_v35  ;;  %v12835_v46 = vrot.slane %v12833_v14, 5 }
 0x3b7   : > { %v26304_v15 = vsel %vm23613_vm8, %v4140_v56, %v4141_v62  ;;  %v12821_v1 = vrot.slane %v12820_v49, 4  ;;  %v12831_v22 = vrot.slane %v12830_v9, 4  ;;  %v26306_v17 = vrot.slane %v12867_v43, 5  ;;  %v18900_v62 = vld [vmem:[%s23101_s5 + $0x188] sm:$0x1] }
 0x3b8   : > { %v12845_v59 = vrot.slane %v12844_v6, 4  ;;  %v12855_v37 = vrot.slane %v12854_v12, 4  ;;  %v26317_v7 = vrot.slane %v12877_v58, 5  ;;  %v12883_v61 = vrot.slane %v12881_v51, 4  ;;  %v18906_v51 = vld [vmem:[%s23101_s5 + $0x1a0] sm:$0xf] }
 0x3b9   : > { %20478 = vmatmul.mubr.msk.bf16.gmra.mrb[116].mxu1 %vm1887_vm4, %v17799_v20  ;;  %21064 = vmatmul.mubr.msk.bf16.gmra.mrb[52].mxu0 %vm1887_vm4, %v26229_v4  ;;  %v12864_v20 = vor.u32 %v12863_v31, %v26285_v54  ;;  %v12873_v4 = vrot.slane %v12871_v30, 4  ;;  %v26319_v44 = vrot.slane %v12887_v13, 5  ;;  %v12893_v23 = vrot.slane %v12891_v3, 4 }
 0x3ba   : > { %20481 = vmatprep.mubr.msk.bf16.mxu1 %vm1887_vm4, %v17800_v47  ;;  %21067 = vmatprep.mubr.msk.bf16.mxu0 %vm1887_vm4, %v26237_v19  ;;  %v12897_v35 = vshll.u32 %v18898_v45, 16  ;;  %v12901_v53 = vshrl.u32 %v18898_v45, 16  ;;  %v12907_v55 = vshll.u32 %v18899_v21, 16  ;;  %v12911_v47 = vshrl.u32 %v18899_v21, 16 }
 0x3bb   : > { %v12922_v18 = vshrl.u32 %v18901_v16, 16  ;;  %v12925_v19 = vshll.u32 %v18901_v16, 16  ;;  %v12931_v28 = vshll.u32 %v18902_v39, 16  ;;  %v12935_v29 = vshrl.u32 %v18902_v39, 16 }
 0x3bc   : > { %v12826_v42 = vsel %vm23119_vm5, %v12821_v1, %v26259_v41  ;;  %v12836_v40 = vsel %vm23119_vm5, %v12831_v22, %v12835_v46  ;;  %v12850_v10 = vsel %vm23119_vm5, %v12845_v59, %v26267_v5  ;;  %v12874_v52 = vor.u32 %v12873_v4, %v26306_v17  ;;  %v18903_v41 = vld [vmem:[%s23101_s5 + $0x194] sm:$0xf]  ;;  %v22465_v46 = vld [vmem:[%s23101_s5 + $0x24] sm:$0xff]  }
 0x3bd   : > { %v12860_v25 = vsel %vm23119_vm5, %v12855_v37, %v26285_v54  ;;  %v26333_v50 = vrot.slane %v12864_v20, 4  ;;  %v12884_v11 = vor.u32 %v12883_v61, %v26317_v7  ;;  %v12894_v33 = vor.u32 %v12893_v23, %v26319_v44 }
 0x3be   : > { %v12899_v63 = vrot.slane %v12897_v35, 5  ;;  %v12903_v2 = vrot.slane %v12901_v53, 4  ;;  %v26339_v32 = vrot.slane %v12907_v55, 5  ;;  %v12913_v5 = vrot.slane %v12911_v47, 4  ;;  %v18907_v55 = vld [vmem:[%s23101_s5 + $0x1a4] sm:$0xf] }
 0x3bf   : > { %v12924_v56 = vrot.slane %v12922_v18, 4  ;;  %v12927_v14 = vrot.slane %v12925_v19, 5  ;;  %v26347_v57 = vrot.slane %v12931_v28, 5  ;;  %v12937_v0 = vrot.slane %v12935_v29, 4 }
 0x3c0   : > { %v17803_v49 = vcombine.low %v26292_v38, %v26304_v15  ;;  %v12875_v27 = vrot.slane %v12874_v52, 4  ;;  %v12941_v8 = vshll.u32 %v18903_v41, 16  ;;  %v12945_v9 = vshrl.u32 %v18903_v41, 16  ;;  %v22466_v52 = vld [vmem:[%s23101_s5 + $0x2c] sm:$0xff]   ;;  %v18911_v41 = vld [vmem:[%s23101_s5 + $0x1b4] sm:$0xf] }
 0x3c1   : > { %20482 = vmatmul.mubr.msk.bf16.gmra.mrb[120].mxu1 %vm1887_vm4, %v17801_v34  ;;  %21068 = vmatmul.mubr.msk.bf16.gmra.mrb[56].mxu0 %vm1887_vm4, %v26270_v26  ;;  %v18904_v34 = vld [vmem:[%s23101_s5 + $0x198] sm:$0xf]  ;;  %v18996_v26 = vcombine.low %v12826_v42, %v12836_v40  ;;  %v18997_v54 = vcombine.low %v12850_v10, %v12860_v25  ;;  %v12885_v43 = vrot.slane %v12884_v11, 4  ;;  %v12917_v6 = vshll.u32 %v18900_v62, 16  ;;  %v18908_v40 = vld [vmem:[%s23101_s5 + $0x1a8] sm:$0xf] }
 0x3c2   : > { %20485 = vmatprep.mubr.msk.bf16.mxu1 %vm1887_vm4, %v17802_v24  ;;  %21071 = vmatprep.mubr.msk.bf16.mxu0 %vm1887_vm4, %v18995_v60  ;;  %v12870_v12 = vsel %vm23119_vm5, %v26333_v50, %v26306_v17  ;;  %v12895_v31 = vrot.slane %v12894_v33, 4  ;;  %v12904_v30 = vor.u32 %v12903_v2, %v12899_v63  ;;  %v12914_v58 = vor.u32 %v12913_v5, %v26339_v32  ;;  %v18905_v24 = vld [vmem:[%s23101_s5 + $0x19c] sm:$0xf]  ;;  %v18910_v10 = vld [vmem:[%s23101_s5 + $0x1b0] sm:$0xf] }
 0x3c3   : > { %v12928_v13 = vor.u32 %v12927_v14, %v12924_v56  ;;  %v12938_v3 = vor.u32 %v12937_v0, %v26347_v57  ;;  %v12951_v60 = vshll.u32 %v18904_v34, 16  ;;  %v12955_v38 = vshrl.u32 %v18904_v34, 16 }
 0x3c4   : > { %v12880_v45 = vsel %vm23119_vm5, %v12875_v27, %v26317_v7  ;;  %v12943_v21 = vrot.slane %v12941_v8, 5  ;;  %v12947_v15 = vrot.slane %v12945_v9, 4  ;;  %v12965_v1 = vshrl.u32 %v18905_v24, 16 }
 0x3c5   : > { %v12890_v22 = vsel %vm23119_vm5, %v12885_v43, %v26319_v44  ;;  %v12919_v17 = vrot.slane %v12917_v6, 5  ;;  %v12971_v16 = vshll.u32 %v18906_v51, 16  ;;  %v12975_v59 = vshrl.u32 %v18906_v51, 16  ;;  %v29292_v6 = vld [vmem:[#allocation2_spill] sm:$0xff]  ;;  %v18913_v51 = vld [vmem:[%s23101_s5 + $0x1bc] sm:$0xf] }
 0x3c6   : > { %v12900_v37 = vsel %vm23119_vm5, %v12895_v31, %v12899_v63  ;;  %v12905_v20 = vrot.slane %v12904_v30, 4  ;;  %v12915_v4 = vrot.slane %v12914_v58, 4  ;;  %v12961_v39 = vshll.u32 %v18905_v24, 16  ;;  %v22467_v63 = vld [vmem:[%s23101_s5 + $0x34] sm:$0xff]  }
 0x3c7   : > { %v12929_v7 = vrot.slane %v12928_v13, 4  ;;  %v12939_v61 = vrot.slane %v12938_v3, 4  ;;  %v26373_v44 = vrot.slane %v12951_v60, 5  ;;  %v12957_v23 = vrot.slane %v12955_v38, 4  ;;  %v18915_v38 = vld [vmem:[%s23101_s5 + $0x1c4] sm:$0xf] }
 0x3c8   : > { %v12948_v35 = vor.u32 %v12947_v15, %v12943_v21  ;;  %v12967_v53 = vrot.slane %v12965_v1, 4  ;;  %v26378_v47 = vrot.slane %v12971_v16, 5  ;;  %v12977_v18 = vrot.slane %v12975_v59, 4  ;;  %v18914_v15 = vld [vmem:[%s23101_s5 + $0x1c0] sm:$0xf] }
 0x3c9   : > { %20486 = vmatmul.mubr.msk.bf16.gmra.mrb[124].mxu1 %vm1887_vm4, %v17803_v49  ;;  %21072 = vmatmul.mubr.msk.bf16.gmra.mrb[60].mxu0 %vm1887_vm4, %v18996_v26  ;;  %v18998_v19 = vcombine.low %v12870_v12, %v12880_v45  ;;  %v18999_v28 = vcombine.low %v12890_v22, %v12900_v37  ;;  %v12910_v29 = vsel %vm23119_vm5, %v12905_v20, %v26339_v32  ;;  %v26383_v42 = vrot.slane %v12961_v39, 5  ;;  %v18909_v26 = vld [vmem:[%s23101_s5 + $0x1ac] sm:$0x1]  ;;  %v22468_v22 = vld [vmem:[%s23101_s5 + $0x3c] sm:$0xff]  }
 0x3ca   : > { %20491 = vmatprep.mubr.msk.bf16.mxu1 %vm1887_vm4, %v22465_v46  ;;  %21075 = vmatprep.mubr.msk.bf16.mxu0 %vm1887_vm4, %v18997_v54  ;;  %v12920_v25 = vsel %vm23119_vm5, %v12915_v4, %v12919_v17  ;;  %v12934_v50 = vsel %vm23119_vm5, %v12929_v7, %v26347_v57  ;;  %v12944_v11 = vsel %vm23119_vm5, %v12939_v61, %v12943_v21  ;;  %v26398_v62 = vrot.slane %v12948_v35, 4  ;;  %v18912_v54 = vld [vmem:[%s23101_s5 + $0x1b8] sm:$0xf]  ;;  %v22469_v20 = vld [vmem:[%s23101_s5 + $0x48] sm:$0xff]  }
 0x3cb   : > { %v12958_v33 = vor.u32 %v12957_v23, %v26373_v44  ;;  %v12968_v2 = vor.u32 %v12967_v53, %v26383_v42  ;;  %v12981_v32 = vshll.u32 %v18907_v55, 16  ;;  %v12985_v5 = vshrl.u32 %v18907_v55, 16  ;;  %v18916_v55 = vld [vmem:[%s23101_s5 + $0x1c8] sm:$0xf] }
 0x3cc   : > { %v12978_v56 = vor.u32 %v12977_v18, %v26378_v47  ;;  %v12991_v14 = vshll.u32 %v18908_v40, 16  ;;  %v12995_v0 = vshrl.u32 %v18908_v40, 16  ;;  %v13006_v57 = vshrl.u32 %v18910_v10, 16 }
 0x3cd   : > { %v13009_v49 = vshll.u32 %v18910_v10, 16  ;;  %v13015_v27 = vshll.u32 %v18911_v41, 16  ;;  %v19000_v8 = vcombine.low %v12910_v29, %v12920_v25  ;;  %v19001_v34 = vcombine.low %v12934_v50, %v12944_v11 }
 0x3ce   : > { %v12959_v9 = vrot.slane %v12958_v33, 4  ;;  %v13019_v43 = vshrl.u32 %v18911_v41, 16  ;;  %v12954_v12 = vsel %vm23119_vm5, %v26398_v62, %v26373_v44  ;;  %v12969_v31 = vrot.slane %v12968_v2, 4 }
 0x3cf   : > { %v12983_v30 = vrot.slane %v12981_v32, 5  ;;  %v12987_v58 = vrot.slane %v12985_v5, 4  ;;  %v12979_v13 = vrot.slane %v12978_v56, 4  ;;  %v26414_v3 = vrot.slane %v12991_v14, 5 }
 0x3d0   : > { %v12997_v24 = vrot.slane %v12995_v0, 4  ;;  %v13008_v60 = vrot.slane %v13006_v57, 4  ;;  %v13011_v46 = vrot.slane %v13009_v49, 5  ;;  %v26417_v45 = vrot.slane %v13015_v27, 5  ;;  %v18919_v0 = vld [vmem:[%s23101_s5 + $0x1d4] sm:$0xf] }
 0x3d1   : > { %20492 = vmatmul.mubr.msk.bf16.vlgmr.msra.gmra.mrb[0].mxu1 %vm1887_vm4, %v22466_v52  ;;  %21076 = vmatmul.mubr.msk.bf16.gmra.mrb[64].mxu0 %vm1887_vm4, %v18998_v19  ;;  %v13025_v21 = vshll.u32 %v18912_v54, 16  ;;  %v13029_v1 = vshrl.u32 %v18912_v54, 16  ;;  %v13021_v17 = vrot.slane %v13019_v43, 4  ;;  %v13035_v16 = vshll.u32 %v18913_v51, 16  ;;  %v22470_v57 = vld [vmem:[%s23101_s5 + $0x50] sm:$0xff]  }
 0x3d2   : > { %21270 = vmatpush3.bf16.msra.mxu1 %v29292_v6  ;;  %20495 = vmatprep.mubr.msk.bf16.mxu1 %vm1887_vm4, %v22467_v63  ;;  %v13039_v59 = vshrl.u32 %v18913_v51, 16  ;;  %v13049_v37 = vshrl.u32 %v18914_v15, 16  ;;  %v12964_v4 = vsel %vm23119_vm5, %v12959_v9, %v26383_v42  ;;  %v13001_v39 = vshll.u32 %v18909_v26, 16  ;;  %v18917_v42 = vld [vmem:[%s23101_s5 + $0x1cc] sm:$0xf]  ;;  %v22471_v26 = vld [vmem:[%s23101_s5 + $0x58] sm:$0xff]  }
 0x3d3   : > { %21079 = vmatprep.mubr.msk.bf16.mxu0 %vm1887_vm4, %v18999_v28  ;;  %v13055_v7 = vshll.u32 %v18915_v38, 16  ;;  %v13059_v61 = vshrl.u32 %v18915_v38, 16  ;;  %v12974_v44 = vsel %vm23119_vm5, %v12969_v31, %v26378_v47  ;;  %v12984_v23 = vsel %vm23119_vm5, %v12979_v13, %v12983_v30  ;;  %v18920_v9 = vld [vmem:[%s23101_s5 + $0x1d8] sm:$0xf]  ;;  %v18918_v31 = vld [vmem:[%s23101_s5 + $0x1d0] sm:$0x1] }
 0x3d4   : > { %v12988_v35 = vor.u32 %v12987_v58, %v12983_v30  ;;  %v12998_v53 = vor.u32 %v12997_v24, %v26414_v3  ;;  %v13012_v18 = vor.u32 %v13011_v46, %v13008_v60  ;;  %v26432_v19 = vrot.slane %v13025_v21, 5 }
 0x3d5   : > { %v13031_v28 = vrot.slane %v13029_v1, 4  ;;  %v13045_v29 = vshll.u32 %v18914_v15, 16  ;;  %v13022_v40 = vor.u32 %v13021_v17, %v26417_v45  ;;  %v26438_v47 = vrot.slane %v13035_v16, 5 }
 0x3d6   : > { %v13041_v10 = vrot.slane %v13039_v59, 4  ;;  %v13051_v52 = vrot.slane %v13049_v37, 4  ;;  %v26442_v25 = vrot.slane %v13055_v7, 5  ;;  %v13061_v50 = vrot.slane %v13059_v61, 4  ;;  %v18922_v37 = vld [vmem:[%s23101_s5 + $0x1e0] sm:$0xf] }
 0x3d7   : > { %v13065_v11 = vshll.u32 %v18916_v55, 16  ;;  %v13069_v33 = vshrl.u32 %v18916_v55, 16  ;;  %v19002_v41 = vcombine.low %v12954_v12, %v12964_v4  ;;  %v13003_v63 = vrot.slane %v13001_v39, 5 }
 0x3d8   : > { %v13075_v62 = vshll.u32 %v18917_v42, 16  ;;  %v13079_v2 = vshrl.u32 %v18917_v42, 16  ;;  %v19003_v32 = vcombine.low %v12974_v44, %v12984_v23  ;;  %v12989_v5 = vrot.slane %v12988_v35, 4  ;;  %v22472_v35 = vld [vmem:[%s23101_s5 + $0x60] sm:$0xff]  }
 0x3d9   : > { %20496 = vmatmul.mubr.msk.bf16.gmra.mrb[4].mxu1 %vm1887_vm4, %v22468_v22  ;;  %21080 = vmatmul.mubr.msk.bf16.gmra.mrb[68].mxu0 %vm1887_vm4, %v19000_v8  ;;  %v12999_v56 = vrot.slane %v12998_v53, 4  ;;  %v26444_v14 = vrot.slane %v13045_v29, 5  ;;  %v13013_v49 = vrot.slane %v13012_v18, 4  ;;  %v13023_v27 = vrot.slane %v13022_v40, 4  ;;  %v18921_v22 = vld [vmem:[%s23101_s5 + $0x1dc] sm:$0xf] }
 0x3da   : > { %20499 = vmatprep.mubr.msk.bf16.mxu1 %vm1887_vm4, %v22469_v20  ;;  %21083 = vmatprep.mubr.msk.bf16.mxu0 %vm1887_vm4, %v19001_v34  ;;  %v13032_v8 = vor.u32 %v13031_v28, %v26432_v19  ;;  %v13042_v34 = vor.u32 %v13041_v10, %v26438_v47  ;;  %v13062_v43 = vor.u32 %v13061_v50, %v26442_v25  ;;  %v26454_v6 = vrot.slane %v13065_v11, 5 }
 0x3db   : > { %v13052_v54 = vor.u32 %v13051_v52, %v26444_v14  ;;  %v13071_v12 = vrot.slane %v13069_v33, 4  ;;  %v26457_v30 = vrot.slane %v13075_v62, 5  ;;  %v13081_v58 = vrot.slane %v13079_v2, 4  ;;  %v18924_v33 = vld [vmem:[%s23101_s5 + $0x1e8] sm:$0xf] }
 0x3dc   : > { %v13090_v51 = vshrl.u32 %v18919_v0, 16  ;;  %v13093_v13 = vshll.u32 %v18919_v0, 16  ;;  %v12994_v24 = vsel %vm23119_vm5, %v12989_v5, %v26414_v3  ;;  %v13099_v60 = vshll.u32 %v18920_v9, 16  ;;  %v18923_v62 = vld [vmem:[%s23101_s5 + $0x1e4] sm:$0xf] }
 0x3dd   : > { %v13103_v38 = vshrl.u32 %v18920_v9, 16  ;;  %v13004_v46 = vsel %vm23119_vm5, %v12999_v56, %v13003_v63  ;;  %v13018_v21 = vsel %vm23119_vm5, %v13013_v49, %v26417_v45  ;;  %v13033_v15 = vrot.slane %v13032_v8, 4  ;;  %v18925_v56 = vld [vmem:[%s23101_s5 + $0x1ec] sm:$0xf] }
 0x3de   : > { %v13043_v1 = vrot.slane %v13042_v34, 4  ;;  %v13028_v3 = vsel %vm23119_vm5, %v13023_v27, %v26432_v19  ;;  %v13053_v17 = vrot.slane %v13052_v54, 4  ;;  %v13063_v16 = vrot.slane %v13062_v43, 4  ;;  %v22473_v19 = vld [vmem:[%s23101_s5 + $0x6c] sm:$0xff]  }
 0x3df   : > { %v13085_v59 = vshll.u32 %v18918_v31, 16  ;;  %v13072_v20 = vor.u32 %v13071_v12, %v26454_v6  ;;  %v13082_v45 = vor.u32 %v13081_v58, %v26457_v30  ;;  %v13092_v4 = vrot.slane %v13090_v51, 4  ;;  %v18926_v34 = vld [vmem:[%s23101_s5 + $0x1f0] sm:$0xf]  ;;  %v22474_v12 = vld [vmem:[%s23101_s5 + $0x74] sm:$0xff]  }
 0x3e0   : > { %v13095_v39 = vrot.slane %v13093_v13, 5  ;;  %v26478_v7 = vrot.slane %v13099_v60, 5  ;;  %v13105_v61 = vrot.slane %v13103_v38, 4  ;;  %v13109_v44 = vshll.u32 %v18921_v22, 16  ;;  %v22475_v60 = vld [vmem:[%s23101_s5 + $0x7c] sm:$0xff]  }
 0x3e1   : > { %20500 = vmatmul.mubr.msk.bf16.gmra.mrb[8].mxu1 %vm1887_vm4, %v22470_v57  ;;  %21084 = vmatmul.mubr.msk.bf16.gmra.mrb[72].mxu0 %vm1887_vm4, %v19002_v41  ;;  %v13113_v23 = vshrl.u32 %v18921_v22, 16  ;;  %v19004_v53 = vcombine.low %v12994_v24, %v13004_v46  ;;  %v13119_v55 = vshll.u32 %v18922_v37, 16  ;;  %v13123_v18 = vshrl.u32 %v18922_v37, 16  ;;  %v18929_v24 = vld [vmem:[%s23101_s5 + $0x1fc] sm:$0xf] }
 0x3e2   : > { %20503 = vmatprep.mubr.msk.bf16.mxu1 %vm1887_vm4, %v22471_v26  ;;  %21087 = vmatprep.mubr.msk.bf16.mxu0 %vm1887_vm4, %v19003_v32  ;;  %v19005_v28 = vcombine.low %v13018_v21, %v13028_v3  ;;  %v13038_v29 = vsel %vm23119_vm5, %v13033_v15, %v26438_v47  ;;  %v13048_v42 = vsel %vm23119_vm5, %v13043_v1, %v26444_v14  ;;  %v26494_v52 = vrot.slane %v13072_v20, 4  ;;  %v18930_v22 = vld [vmem:[%s23101_s5 + $0x200] sm:$0xf] }
 0x3e3   : > { %v13058_v40 = vsel %vm23119_vm5, %v13053_v17, %v26442_v25  ;;  %v13068_v10 = vsel %vm23119_vm5, %v13063_v16, %v26454_v6  ;;  %v26496_v50 = vrot.slane %v13085_v59, 5  ;;  %v13096_v11 = vor.u32 %v13095_v39, %v13092_v4  ;;  %v18928_v6 = vld [vmem:[%s23101_s5 + $0x1f8] sm:$0xf] }
 0x3e4   : > { %v13083_v47 = vrot.slane %v13082_v45, 4  ;;  %v13106_v41 = vor.u32 %v13105_v61, %v26478_v7  ;;  %v26500_v63 = vrot.slane %v13109_v44, 5  ;;  %v13115_v2 = vrot.slane %v13113_v23, 4  ;;  %v18927_v44 = vld [vmem:[%s23101_s5 + $0x1f4] sm:$0x1] }
 0x3e5   : > { %v26505_v25 = vrot.slane %v13119_v55, 5  ;;  %v13125_v32 = vrot.slane %v13123_v18, 4  ;;  %v13133_v5 = vshrl.u32 %v18923_v62, 16  ;;  %v13139_v14 = vshll.u32 %v18924_v33, 16 }
 0x3e6   : > { %v13143_v0 = vshrl.u32 %v18924_v33, 16  ;;  %v19006_v57 = vcombine.low %v13038_v29, %v13048_v42  ;;  %v19007_v49 = vcombine.low %v13058_v40, %v13068_v10  ;;  %v13097_v27 = vrot.slane %v13096_v11, 4  ;;  %v18931_v10 = vld [vmem:[%s23101_s5 + $0x204] sm:$0xf] }
 0x3e7   : > { %v13129_v8 = vshll.u32 %v18923_v62, 16  ;;  %v13078_v9 = vsel %vm23119_vm5, %v26494_v52, %v26457_v30  ;;  %v13088_v26 = vsel %vm23119_vm5, %v13083_v47, %v26496_v50  ;;  %v13107_v54 = vrot.slane %v13106_v41, 4  ;;  %v22476_v52 = vld [vmem:[%s23101_s5 + $0x84] sm:$0xff]   ;;  %v18933_v41 = vld [vmem:[%s23101_s5 + $0x20c] sm:$0xf] }
 0x3e8   : > { %v13116_v43 = vor.u32 %v13115_v2, %v26500_v63  ;;  %v13126_v31 = vor.u32 %v13125_v32, %v26505_v25  ;;  %v13135_v58 = vrot.slane %v13133_v5, 4  ;;  %v13149_v51 = vshll.u32 %v18925_v56, 16 }
 0x3e9   : > { %20504 = vmatmul.mubr.msk.bf16.gmra.mrb[12].mxu1 %vm1887_vm4, %v22472_v35  ;;  %21088 = vmatmul.mubr.msk.bf16.gmra.mrb[76].mxu0 %vm1887_vm4, %v19004_v53  ;;  %v13153_v13 = vshrl.u32 %v18925_v56, 16  ;;  %v26524_v38 = vrot.slane %v13139_v14, 5  ;;  %v13145_v30 = vrot.slane %v13143_v0, 4  ;;  %v13159_v46 = vshll.u32 %v18926_v34, 16  ;;  %v18932_v56 = vld [vmem:[%s23101_s5 + $0x208] sm:$0xf] }
 0x3ea   : > { %20507 = vmatprep.mubr.msk.bf16.mxu1 %vm1887_vm4, %v22473_v19  ;;  %21091 = vmatprep.mubr.msk.bf16.mxu0 %vm1887_vm4, %v19005_v28  ;;  %v13163_v21 = vshrl.u32 %v18926_v34, 16  ;;  %v13102_v15 = vsel %vm23119_vm5, %v13097_v27, %v26478_v7  ;;  %v13131_v1 = vrot.slane %v13129_v8, 5  ;;  %v13174_v3 = vshrl.u32 %v18928_v6, 16 }
 0x3eb   : > { %v13177_v17 = vshll.u32 %v18928_v6, 16  ;;  %v13112_v16 = vsel %vm23119_vm5, %v13107_v54, %v26500_v63  ;;  %v13117_v59 = vrot.slane %v13116_v43, 4  ;;  %v13183_v37 = vshll.u32 %v18929_v24, 16  ;;  %v22477_v63 = vld [vmem:[%s23101_s5 + $0x90] sm:$0xff]  }
 0x3ec   : > { %v13187_v20 = vshrl.u32 %v18929_v24, 16  ;;  %v13127_v45 = vrot.slane %v13126_v31, 4  ;;  %v13136_v4 = vor.u32 %v13135_v58, %v13131_v1  ;;  %v26535_v39 = vrot.slane %v13149_v51, 5  ;;  %v18934_v54 = vld [vmem:[%s23101_s5 + $0x210] sm:$0xf] }
 0x3ed   : > { %v13155_v7 = vrot.slane %v13153_v13, 4  ;;  %v13146_v61 = vor.u32 %v13145_v30, %v26524_v38  ;;  %v26541_v23 = vrot.slane %v13159_v46, 5  ;;  %v13165_v35 = vrot.slane %v13163_v21, 4  ;;  %v18935_v51 = vld [vmem:[%s23101_s5 + $0x214] sm:$0xf] }
 0x3ee   : > { %v13193_v53 = vshll.u32 %v18930_v22, 16  ;;  %v13176_v55 = vrot.slane %v13174_v3, 4  ;;  %v13179_v18 = vrot.slane %v13177_v17, 5  ;;  %v13197_v19 = vshrl.u32 %v18930_v22, 16 }
 0x3ef   : > { %v19008_v28 = vcombine.low %v13078_v9, %v13088_v26  ;;  %v13122_v29 = vsel %vm23119_vm5, %v13117_v59, %v26505_v25  ;;  %v26546_v42 = vrot.slane %v13183_v37, 5  ;;  %v13189_v40 = vrot.slane %v13187_v20, 4  ;;  %v22479_v59 = vld [vmem:[%s23101_s5 + $0xa0] sm:$0xff]  }
 0x3f0   : > { %v19009_v50 = vcombine.low %v13102_v15, %v13112_v16  ;;  %v13132_v11 = vsel %vm23119_vm5, %v13127_v45, %v13131_v1  ;;  %v13137_v33 = vrot.slane %v13136_v4, 4  ;;  %v13169_v47 = vshll.u32 %v18927_v44, 16  ;;  %v22478_v1 = vld [vmem:[%s23101_s5 + $0x98] sm:$0xff]  }
 0x3f1   : > { %20508 = vmatmul.mubr.msk.bf16.gmra.mrb[16].mxu1 %vm1887_vm4, %v22474_v12  ;;  %21092 = vmatmul.mubr.msk.bf16.gmra.mrb[80].mxu0 %vm1887_vm4, %v19006_v57  ;;  %v13147_v62 = vrot.slane %v13146_v61, 4  ;;  %v13156_v2 = vor.u32 %v13155_v7, %v26535_v39  ;;  %v13166_v25 = vor.u32 %v13165_v35, %v26541_v23  ;;  %v26556_v32 = vrot.slane %v13193_v53, 5  ;;  %v18937_v61 = vld [vmem:[%s23101_s5 + $0x21c] sm:$0xf] }
 0x3f2   : > { %20511 = vmatprep.mubr.msk.bf16.mxu1 %vm1887_vm4, %v22475_v60  ;;  %21095 = vmatprep.mubr.msk.bf16.mxu0 %vm1887_vm4, %v19007_v49  ;;  %v13180_v5 = vor.u32 %v13179_v18, %v13176_v55  ;;  %v13199_v14 = vrot.slane %v13197_v19, 4  ;;  %v13203_v0 = vshll.u32 %v18931_v10, 16  ;;  %v13207_v57 = vshrl.u32 %v18931_v10, 16  ;;  %v18938_v55 = vld [vmem:[%s23101_s5 + $0x220] sm:$0xf] }
 0x3f3   : > { %v13190_v49 = vor.u32 %v13189_v40, %v26546_v42  ;;  %v13217_v27 = vshrl.u32 %v18932_v56, 16  ;;  %v13223_v8 = vshll.u32 %v18933_v41, 16  ;;  %v19010_v34 = vcombine.low %v13122_v29, %v13132_v11 }
 0x3f4   : > { %v13142_v9 = vsel %vm23119_vm5, %v13137_v33, %v26524_v38  ;;  %v13171_v26 = vrot.slane %v13169_v47, 5  ;;  %v13227_v43 = vshrl.u32 %v18933_v41, 16  ;;  %v13152_v6 = vsel %vm23119_vm5, %v13147_v62, %v26535_v39 }
 0x3f5   : > { %v13157_v12 = vrot.slane %v13156_v2, 4  ;;  %v13167_v31 = vrot.slane %v13166_v25, 4  ;;  %v13213_v58 = vshll.u32 %v18932_v56, 16  ;;  %v13181_v13 = vrot.slane %v13180_v5, 4  ;;  %v18940_v2 = vld [vmem:[%s23101_s5 + $0x228] sm:$0xf] }
 0x3f6   : > { %v13200_v24 = vor.u32 %v13199_v14, %v26556_v32  ;;  %v26573_v60 = vrot.slane %v13203_v0, 5  ;;  %v13209_v38 = vrot.slane %v13207_v57, 4  ;;  %v13191_v30 = vrot.slane %v13190_v49, 4  ;;  %v22480_v25 = vld [vmem:[%s23101_s5 + $0xa8] sm:$0xff]   ;;  %v18942_v0 = vld [vmem:[%s23101_s5 + $0x230] sm:$0xf] }
 0x3f7   : > { %v13219_v46 = vrot.slane %v13217_v27, 4  ;;  %v26575_v21 = vrot.slane %v13223_v8, 5  ;;  %v13233_v15 = vshll.u32 %v18934_v54, 16  ;;  %v13229_v22 = vrot.slane %v13227_v43, 4  ;;  %v22481_v57 = vld [vmem:[%s23101_s5 + $0xb4] sm:$0xff]  }
 0x3f8   : > { %v13237_v3 = vshrl.u32 %v18934_v54, 16  ;;  %v13243_v17 = vshll.u32 %v18935_v51, 16  ;;  %v13247_v16 = vshrl.u32 %v18935_v51, 16  ;;  %v19011_v37 = vcombine.low %v13142_v9, %v13152_v6  ;;  %v18941_v54 = vld [vmem:[%s23101_s5 + $0x22c] sm:$0xf] }
 0x3f9   : > { %20512 = vmatmul.mubr.msk.bf16.gmra.mrb[20].mxu1 %vm1887_vm4, %v22476_v52  ;;  %21096 = vmatmul.mubr.msk.bf16.gmra.mrb[84].mxu0 %vm1887_vm4, %v19008_v28  ;;  %v26579_v20 = vrot.slane %v13213_v58, 5  ;;  %v13162_v45 = vsel %vm23119_vm5, %v13157_v12, %v26541_v23  ;;  %v13172_v4 = vsel %vm23119_vm5, %v13167_v31, %v13171_v26  ;;  %v13186_v39 = vsel %vm23119_vm5, %v13181_v13, %v26546_v42  ;;  %v18936_v42 = vld [vmem:[%s23101_s5 + $0x218] sm:$0x1] }
 0x3fa   : > { %20515 = vmatprep.mubr.msk.bf16.mxu1 %vm1887_vm4, %v22477_v63  ;;  %21099 = vmatprep.mubr.msk.bf16.mxu0 %vm1887_vm4, %v19009_v50  ;;  %v26589_v7 = vrot.slane %v13200_v24, 4  ;;  %v13196_v44 = vsel %vm23119_vm5, %v13191_v30, %v26556_v32  ;;  %v13210_v35 = vor.u32 %v13209_v38, %v26573_v60  ;;  %v26597_v53 = vrot.slane %v13233_v15, 5  ;;  %v18939_v50 = vld [vmem:[%s23101_s5 + $0x224] sm:$0xf] }
 0x3fb   : > { %v13220_v23 = vor.u32 %v13219_v46, %v26579_v20  ;;  %v13230_v18 = vor.u32 %v13229_v22, %v26575_v21  ;;  %v13239_v19 = vrot.slane %v13237_v3, 4  ;;  %v26603_v28 = vrot.slane %v13243_v17, 5  ;;  %v18943_v22 = vld [vmem:[%s23101_s5 + $0x234] sm:$0xf] }
 0x3fc   : > { %v13249_v29 = vrot.slane %v13247_v16, 4  ;;  %v13258_v40 = vshrl.u32 %v18937_v61, 16  ;;  %v13261_v10 = vshll.u32 %v18937_v61, 16  ;;  %v19012_v52 = vcombine.low %v13162_v45, %v13172_v4  ;;  %v22482_v45 = vld [vmem:[%s23101_s5 + $0xbc] sm:$0xff]  }
 0x3fd   : > { %v13267_v11 = vshll.u32 %v18938_v55, 16  ;;  %v13271_v33 = vshrl.u32 %v18938_v55, 16  ;;  %v19013_v47 = vcombine.low %v13186_v39, %v13196_v44  ;;  %v13206_v41 = vsel %vm23119_vm5, %v26589_v7, %v26573_v60  ;;  %v18944_v7 = vld [vmem:[%s23101_s5 + $0x238] sm:$0xf]  ;;  %v22483_v44 = vld [vmem:[%s23101_s5 + $0xc4] sm:$0xff]  }
 0x3fe   : > { %v13211_v63 = vrot.slane %v13210_v35, 4  ;;  %v13221_v62 = vrot.slane %v13220_v23, 4  ;;  %v13231_v32 = vrot.slane %v13230_v18, 4  ;;  %v13240_v5 = vor.u32 %v13239_v19, %v26597_v53  ;;  %v18946_v18 = vld [vmem:[%s23101_s5 + $0x240] sm:$0xf] }
 0x3ff   : > { %v13250_v56 = vor.u32 %v13249_v29, %v26603_v28  ;;  %v13253_v14 = vshll.u32 %v18936_v42, 16  ;;  %v13260_v49 = vrot.slane %v13258_v40, 4  ;;  %v13263_v27 = vrot.slane %v13261_v10, 5 }
 0x400   : > { %v13277_v8 = vshll.u32 %v18939_v50, 16  ;;  %v26619_v9 = vrot.slane %v13267_v11, 5  ;;  %v13273_v26 = vrot.slane %v13271_v33, 4  ;;  %v13287_v43 = vshll.u32 %v18940_v2, 16  ;;  %v18947_v33 = vld [vmem:[%s23101_s5 + $0x244] sm:$0xf] }
 0x401   : > { %20516 = vmatmul.mubr.msk.bf16.gmra.mrb[24].mxu1 %vm1887_vm4, %v22478_v1  ;;  %21100 = vmatmul.mubr.msk.bf16.gmra.mrb[88].mxu0 %vm1887_vm4, %v19010_v34  ;;  %v13281_v34 = vshrl.u32 %v18939_v50, 16  ;;  %v13291_v6 = vshrl.u32 %v18940_v2, 16  ;;  %v13216_v12 = vsel %vm23119_vm5, %v13211_v63, %v26579_v20  ;;  %v13301_v31 = vshrl.u32 %v18941_v54, 16 }
 0x402   : > { %20519 = vmatprep.mubr.msk.bf16.mxu1 %vm1887_vm4, %v22479_v59  ;;  %21103 = vmatprep.mubr.msk.bf16.mxu0 %vm1887_vm4, %v19011_v37  ;;  %v13307_v58 = vshll.u32 %v18942_v0, 16  ;;  %v13311_v51 = vshrl.u32 %v18942_v0, 16  ;;  %v13226_v13 = vsel %vm23119_vm5, %v13221_v62, %v26575_v21  ;;  %v13236_v24 = vsel %vm23119_vm5, %v13231_v32, %v26597_v53  ;;  %v18948_v32 = vld [vmem:[%s23101_s5 + $0x248] sm:$0xf] }
 0x403   : > { %v13241_v60 = vrot.slane %v13240_v5, 4  ;;  %v13255_v38 = vrot.slane %v13253_v14, 5  ;;  %v13264_v30 = vor.u32 %v13263_v27, %v13260_v49  ;;  %v13279_v46 = vrot.slane %v13277_v8, 5 }
 0x404   : > { %v13283_v15 = vrot.slane %v13281_v34, 4  ;;  %v13297_v1 = vshll.u32 %v18941_v54, 16  ;;  %v13251_v3 = vrot.slane %v13250_v56, 4  ;;  %v13274_v21 = vor.u32 %v13273_v26, %v26619_v9  ;;  %v18949_v34 = vld [vmem:[%s23101_s5 + $0x24c] sm:$0xf] }
 0x405   : > { %v26637_v17 = vrot.slane %v13287_v43, 5  ;;  %v13293_v16 = vrot.slane %v13291_v6, 4  ;;  %v13303_v59 = vrot.slane %v13301_v31, 4  ;;  %v26639_v37 = vrot.slane %v13307_v58, 5  ;;  %v22484_v26 = vld [vmem:[%s23101_s5 + $0xcc] sm:$0xff]   ;;  %v22485_v31 = vld [vmem:[%s23101_s5 + $0xd8] sm:$0xff]  }
 0x406   : > { %v13313_v20 = vrot.slane %v13311_v51, 4  ;;  %v19014_v4 = vcombine.low %v13206_v41, %v13216_v12  ;;  %v13317_v39 = vshll.u32 %v18943_v22, 16  ;;  %v13321_v61 = vshrl.u32 %v18943_v22, 16  ;;  %v18945_v54 = vld [vmem:[%s23101_s5 + $0x23c] sm:$0x1] }
 0x407   : > { %v19015_v35 = vcombine.low %v13226_v13, %v13236_v24  ;;  %v13265_v23 = vrot.slane %v13264_v30, 4  ;;  %v13284_v53 = vor.u32 %v13283_v15, %v13279_v46  ;;  %v26644_v55 = vrot.slane %v13297_v1, 5 }
 0x408   : > { %v13246_v19 = vsel %vm23119_vm5, %v13241_v60, %v26603_v28  ;;  %v13256_v29 = vsel %vm23119_vm5, %v13251_v3, %v13255_v38  ;;  %v13275_v42 = vrot.slane %v13274_v21, 4  ;;  %v13294_v40 = vor.u32 %v13293_v16, %v26637_v17 }
 0x409   : > { %20520 = vmatmul.mubr.msk.bf16.gmra.mrb[28].mxu1 %vm1887_vm4, %v22480_v25  ;;  %21104 = vmatmul.mubr.msk.bf16.gmra.mrb[92].mxu0 %vm1887_vm4, %v19012_v52  ;;  %v13304_v10 = vor.u32 %v13303_v59, %v26644_v55  ;;  %v13314_v52 = vor.u32 %v13313_v20, %v26639_v37  ;;  %v13327_v50 = vshll.u32 %v18944_v7, 16  ;;  %v13331_v11 = vshrl.u32 %v18944_v7, 16  ;;  %v18950_v20 = vld [vmem:[%s23101_s5 + $0x250] sm:$0xf] }
 0x40a   : > { %20523 = vmatprep.mubr.msk.bf16.mxu1 %vm1887_vm4, %v22481_v57  ;;  %21107 = vmatprep.mubr.msk.bf16.mxu0 %vm1887_vm4, %v19013_v47  ;;  %v13319_v47 = vrot.slane %v13317_v39, 5  ;;  %v13323_v28 = vrot.slane %v13321_v61, 4  ;;  %v13342_v41 = vshrl.u32 %v18946_v18, 16  ;;  %v13345_v63 = vshll.u32 %v18946_v18, 16  ;;  %v22486_v18 = vld [vmem:[%s23101_s5 + $0xe0] sm:$0xff]  }
 0x40b   : > { %v19016_v62 = vcombine.low %v13246_v19, %v13256_v29  ;;  %v13270_v2 = vsel %vm23119_vm5, %v13265_v23, %v26619_v9  ;;  %v13285_v25 = vrot.slane %v13284_v53, 4  ;;  %v13280_v5 = vsel %vm23119_vm5, %v13275_v42, %v13279_v46  ;;  %v18951_v46 = vld [vmem:[%s23101_s5 + $0x254] sm:$0xf] }
 0x40c   : > { %v13295_v56 = vrot.slane %v13294_v40, 4  ;;  %v13351_v14 = vshll.u32 %v18947_v33, 16  ;;  %v13355_v0 = vshrl.u32 %v18947_v33, 16  ;;  %v13305_v57 = vrot.slane %v13304_v10, 4  ;;  %v18953_v10 = vld [vmem:[%s23101_s5 + $0x25c] sm:$0xf] }
 0x40d   : > { %v13315_v49 = vrot.slane %v13314_v52, 4  ;;  %v26666_v27 = vrot.slane %v13327_v50, 5  ;;  %v13333_v8 = vrot.slane %v13331_v11, 4  ;;  %v13324_v43 = vor.u32 %v13323_v28, %v13319_v47  ;;  %v18955_v52 = vld [vmem:[%s23101_s5 + $0x264] sm:$0xf]  ;;  %v22487_v50 = vld [vmem:[%s23101_s5 + $0xe8] sm:$0xff]  }
 0x40e   : > { %v13344_v9 = vrot.slane %v13342_v41, 4  ;;  %v13347_v6 = vrot.slane %v13345_v63, 5  ;;  %v13361_v12 = vshll.u32 %v18948_v32, 16  ;;  %v19017_v58 = vcombine.low %v13270_v2, %v13280_v5  ;;  %v18956_v41 = vld [vmem:[%s23101_s5 + $0x268] sm:$0xf] }
 0x40f   : > { %v13290_v51 = vsel %vm23119_vm5, %v13285_v25, %v26637_v17  ;;  %v13365_v13 = vshrl.u32 %v18948_v32, 16  ;;  %v26675_v24 = vrot.slane %v13351_v14, 5  ;;  %v13357_v60 = vrot.slane %v13355_v0, 4 }
 0x410   : > { %v13371_v38 = vshll.u32 %v18949_v34, 16  ;;  %v13375_v30 = vshrl.u32 %v18949_v34, 16  ;;  %v13300_v15 = vsel %vm23119_vm5, %v13295_v56, %v26644_v55  ;;  %v13310_v1 = vsel %vm23119_vm5, %v13305_v57, %v26639_v37  ;;  %v18952_v55 = vld [vmem:[%s23101_s5 + $0x258] sm:$0xf] }
 0x411   : > { %20524 = vmatmul.mubr.msk.bf16.gmra.mrb[32].mxu1 %vm1887_vm4, %v22482_v45  ;;  %21108 = vmatmul.mubr.msk.bf16.gmra.mrb[96].mxu0 %vm1887_vm4, %v19014_v4  ;;  %v13334_v22 = vor.u32 %v13333_v8, %v26666_v27  ;;  %v13337_v3 = vshll.u32 %v18945_v54, 16  ;;  %v13320_v21 = vsel %vm23119_vm5, %v13315_v49, %v13319_v47  ;;  %v13325_v17 = vrot.slane %v13324_v43, 4 }
 0x412   : > { %20527 = vmatprep.mubr.msk.bf16.mxu1 %vm1887_vm4, %v22483_v44  ;;  %21111 = vmatprep.mubr.msk.bf16.mxu0 %vm1887_vm4, %v19015_v35  ;;  %v13348_v16 = vor.u32 %v13347_v6, %v13344_v9  ;;  %v26689_v59 = vrot.slane %v13361_v12, 5  ;;  %v13367_v37 = vrot.slane %v13365_v13, 4  ;;  %v13385_v45 = vshrl.u32 %v18950_v20, 16  ;;  %v18954_v12 = vld [vmem:[%s23101_s5 + $0x260] sm:$0x1] }
 0x413   : > { %v13391_v4 = vshll.u32 %v18951_v46, 16  ;;  %v13395_v39 = vshrl.u32 %v18951_v46, 16  ;;  %v13358_v7 = vor.u32 %v13357_v60, %v26675_v24  ;;  %v26695_v61 = vrot.slane %v13371_v38, 5 }
 0x414   : > { %v13377_v44 = vrot.slane %v13375_v30, 4  ;;  %v13335_v35 = vrot.slane %v13334_v22, 4  ;;  %v13339_v23 = vrot.slane %v13337_v3, 5  ;;  %v13381_v53 = vshll.u32 %v18950_v20, 16  ;;  %v22489_v22 = vld [vmem:[%s23101_s5 + $0xfc] sm:$0xff]  }
 0x415   : > { %v19018_v19 = vcombine.low %v13290_v51, %v13300_v15  ;;  %v19019_v29 = vcombine.low %v13310_v1, %v13320_v21  ;;  %v13330_v42 = vsel %vm23119_vm5, %v13325_v17, %v26666_v27  ;;  %v13349_v40 = vrot.slane %v13348_v16, 4  ;;  %v18958_v1 = vld [vmem:[%s23101_s5 + $0x270] sm:$0xf] }
 0x416   : > { %v13368_v11 = vor.u32 %v13367_v37, %v26689_v59  ;;  %v13387_v33 = vrot.slane %v13385_v45, 4  ;;  %v26706_v47 = vrot.slane %v13391_v4, 5  ;;  %v13397_v28 = vrot.slane %v13395_v39, 4 }
 0x417   : > { %v13359_v63 = vrot.slane %v13358_v7, 4  ;;  %v13401_v2 = vshll.u32 %v18952_v55, 16  ;;  %v13405_v25 = vshrl.u32 %v18952_v55, 16  ;;  %v13340_v32 = vsel %vm23119_vm5, %v13335_v35, %v13339_v23 }
 0x418   : > { %v13383_v5 = vrot.slane %v13381_v53, 5  ;;  %v13411_v56 = vshll.u32 %v18953_v10, 16  ;;  %v13415_v14 = vshrl.u32 %v18953_v10, 16  ;;  %v13426_v0 = vshrl.u32 %v18955_v52, 16 }
 0x419   : > { %20528 = vmatmul.mubr.msk.bf16.gmra.mrb[36].mxu1 %vm1887_vm4, %v22484_v26  ;;  %21112 = vmatmul.mubr.msk.bf16.gmra.mrb[100].mxu0 %vm1887_vm4, %v19016_v62  ;;  %v13378_v62 = vor.u32 %v13377_v44, %v26695_v61  ;;  %v13429_v57 = vshll.u32 %v18955_v52, 16  ;;  %v13435_v49 = vshll.u32 %v18956_v41, 16  ;;  %v13439_v27 = vshrl.u32 %v18956_v41, 16  ;;  %v18960_v44 = vld [vmem:[%s23101_s5 + $0x278] sm:$0xf]  ;;  %v22490_v41 = vld [vmem:[%s23101_s5 + $0x104] sm:$0xff]  }
 0x41a   : > { %20531 = vmatprep.mubr.msk.bf16.mxu1 %vm1887_vm4, %v22485_v31  ;;  %21115 = vmatprep.mubr.msk.bf16.mxu0 %vm1887_vm4, %v19017_v58  ;;  %v13354_v8 = vsel %vm23119_vm5, %v13349_v40, %v26675_v24  ;;  %v13369_v34 = vrot.slane %v13368_v11, 4  ;;  %v13388_v26 = vor.u32 %v13387_v33, %v13383_v5  ;;  %v13398_v54 = vor.u32 %v13397_v28, %v26706_v47  ;;  %v22488_v58 = vld [vmem:[%s23101_s5 + $0xf0] sm:$0xff]   ;;  %v18957_v24 = vld [vmem:[%s23101_s5 + $0x26c] sm:$0xf] }
 0x41b   : > { %v13364_v43 = vsel %vm23119_vm5, %v13359_v63, %v26689_v59  ;;  %v13379_v9 = vrot.slane %v13378_v62, 4  ;;  %v13403_v6 = vrot.slane %v13401_v2, 5  ;;  %v13407_v31 = vrot.slane %v13405_v25, 4  ;;  %v22491_v25 = vld [vmem:[%s23101_s5 + $0x10c] sm:$0xff]  }
 0x41c   : > { %v19020_v51 = vcombine.low %v13330_v42, %v13340_v32  ;;  %v26725_v13 = vrot.slane %v13411_v56, 5  ;;  %v13417_v60 = vrot.slane %v13415_v14, 4  ;;  %v13428_v38 = vrot.slane %v13426_v0, 4 }
 0x41d   : > { %v13431_v30 = vrot.slane %v13429_v57, 5  ;;  %v26728_v46 = vrot.slane %v13435_v49, 5  ;;  %v13441_v15 = vrot.slane %v13439_v27, 4  ;;  %v19021_v3 = vcombine.low %v13354_v8, %v13364_v43  ;;  %v18962_v57 = vld [vmem:[%s23101_s5 + $0x280] sm:$0xf] }
 0x41e   : > { %v13389_v21 = vrot.slane %v13388_v26, 4  ;;  %v13399_v17 = vrot.slane %v13398_v54, 4  ;;  %v13421_v16 = vshll.u32 %v18954_v12, 16  ;;  %v13374_v59 = vsel %vm23119_vm5, %v13369_v34, %v26695_v61 }
 0x41f   : > { %v13384_v20 = vsel %vm23119_vm5, %v13379_v9, %v13383_v5  ;;  %v13408_v37 = vor.u32 %v13407_v31, %v13403_v6  ;;  %v13418_v45 = vor.u32 %v13417_v60, %v26725_v13  ;;  %v13445_v4 = vshll.u32 %v18957_v24, 16  ;;  %v18961_v5 = vld [vmem:[%s23101_s5 + $0x27c] sm:$0xf] }
 0x420   : > { %v13449_v39 = vshrl.u32 %v18957_v24, 16  ;;  %v13455_v7 = vshll.u32 %v18958_v1, 16  ;;  %v13432_v35 = vor.u32 %v13431_v30, %v13428_v38  ;;  %v13442_v23 = vor.u32 %v13441_v15, %v26728_v46  ;;  %v22493_v24 = vld [vmem:[%s23101_s5 + $0x120] sm:$0xff]  }
 0x421   : > { %20532 = vmatmul.mubr.msk.bf16.gmra.mrb[40].mxu1 %vm1887_vm4, %v22486_v18  ;;  %21116 = vmatmul.mubr.msk.bf16.gmra.mrb[104].mxu0 %vm1887_vm4, %v19018_v19  ;;  %v13459_v53 = vshrl.u32 %v18958_v1, 16  ;;  %v19022_v61 = vcombine.low %v13374_v59, %v13384_v20  ;;  %v13394_v55 = vsel %vm23119_vm5, %v13389_v21, %v26706_v47  ;;  %v13404_v18 = vsel %vm23119_vm5, %v13399_v17, %v13403_v6  ;;  %v18963_v1 = vld [vmem:[%s23101_s5 + $0x284] sm:$0x1] }
 0x422   : > { %20535 = vmatprep.mubr.msk.bf16.mxu1 %vm1887_vm4, %v22487_v50  ;;  %21119 = vmatprep.mubr.msk.bf16.mxu0 %vm1887_vm4, %v19019_v29  ;;  %v13423_v19 = vrot.slane %v13421_v16, 5  ;;  %v18959_v29 = vld [vmem:[%s23101_s5 + $0x274] sm:$0xf]  ;;  %v13409_v42 = vrot.slane %v13408_v37, 4  ;;  %v13475_v10 = vshll.u32 %v18960_v44, 16  ;;  %v13479_v52 = vshrl.u32 %v18960_v44, 16 }
 0x423   : > { %v13469_v40 = vshrl.u32 %v18959_v29, 16  ;;  %v13419_v50 = vrot.slane %v13418_v45, 4  ;;  %v13447_v11 = vrot.slane %v13445_v4, 5  ;;  %v13451_v33 = vrot.slane %v13449_v39, 4  ;;  %v19093_v39 = vld [vmem:[%s23101_s5 + $0x48] sm:$0xe] }
 0x424   : > { %v13457_v28 = vrot.slane %v13455_v7, 5  ;;  %v13433_v63 = vrot.slane %v13432_v35, 4  ;;  %v13443_v62 = vrot.slane %v13442_v23, 4  ;;  %v13461_v47 = vrot.slane %v13459_v53, 4  ;;  %v22781_v7 = vld [vmem:[%s23101_s5 + $0x4c] sm:$0xf] }
 0x425   : > { %v13465_v2 = vshll.u32 %v18959_v29, 16  ;;  %v19023_v32 = vcombine.low %v13394_v55, %v13404_v18  ;;  %v13471_v56 = vrot.slane %v13469_v40, 4  ;;  %v13477_v14 = vrot.slane %v13475_v10, 5  ;;  %v22495_v10 = vld [vmem:[%s23101_s5 + $0x130] sm:$0xff]  }
 0x426   : > { %v13481_v0 = vrot.slane %v13479_v52, 4  ;;  %v13414_v49 = vsel %vm23119_vm5, %v13409_v42, %v26725_v13  ;;  %v13424_v27 = vsel %vm23119_vm5, %v13419_v50, %v13423_v19  ;;  %v13452_v8 = vor.u32 %v13451_v33, %v13447_v11  ;;  %v22492_v13 = vld [vmem:[%s23101_s5 + $0x114] sm:$0xff]   ;;  %v22782_v19 = vld [vmem:[%s23101_s5 + $0x50] sm:$0xf] }
 0x427   : > { %v13438_v34 = vsel %vm23119_vm5, %v13433_v63, %v26728_v46  ;;  %v13448_v26 = vsel %vm23119_vm5, %v13443_v62, %v13447_v11  ;;  %v13462_v54 = vor.u32 %v13461_v47, %v13457_v28  ;;  %v13467_v43 = vrot.slane %v13465_v2, 5  ;;  %v22783_v42 = vld [vmem:[%s23101_s5 + $0x54] sm:$0xf]  ;;  %v22785_v63 = vld [vmem:[%s23101_s5 + $0x150] sm:$0xf] }
 0x428   : > { %v13485_v9 = vshll.u32 %v18961_v5, 16  ;;  %v13489_v6 = vshrl.u32 %v18961_v5, 16  ;;  %v13495_v12 = vshll.u32 %v18962_v57, 16  ;;  %v13499_v31 = vshrl.u32 %v18962_v57, 16  ;;  %v22786_v5 = vld [vmem:[%s23101_s5 + $0x58] sm:$0xf] }
 0x429   : > { %20536 = vmatmul.mubr.msk.bf16.gmra.mrb[44].mxu1 %vm1887_vm4, %v22488_v58  ;;  %21120 = vmatmul.mubr.msk.bf16.gmra.mrb[108].mxu0 %vm1887_vm4, %v19020_v51  ;;  %v13472_v58 = vor.u32 %v13471_v56, %v13467_v43  ;;  %v13482_v51 = vor.u32 %v13481_v0, %v13477_v14  ;;  %v19024_v60 = vcombine.low %v13414_v49, %v13424_v27  ;;  %v13453_v30 = vrot.slane %v13452_v8, 4  ;;  %v22787_v49 = vld [vmem:[%s23101_s5 + $0x60] sm:$0xf] }
 0x42a   : > { %20539 = vmatprep.mubr.msk.bf16.mxu1 %vm1887_vm4, %v22489_v22  ;;  %21123 = vmatprep.mubr.msk.bf16.mxu0 %vm1887_vm4, %v19021_v3  ;;  %v19025_v38 = vcombine.low %v13438_v34, %v13448_v26  ;;  %v13463_v46 = vrot.slane %v13462_v54, 4  ;;  %v13487_v15 = vrot.slane %v13485_v9, 5  ;;  %v13491_v22 = vrot.slane %v13489_v6, 4  ;;  %v22496_v6 = vld [vmem:[%s23101_s5 + $0x138] sm:$0xff]  }
 0x42b   : > { %v13497_v3 = vrot.slane %v13495_v12, 5  ;;  %v13501_v21 = vrot.slane %v13499_v31, 4  ;;  %v13473_v17 = vrot.slane %v13472_v58, 4  ;;  %v13483_v16 = vrot.slane %v13482_v51, 4  ;;  %v22497_v31 = vld [vmem:[%s23101_s5 + $0x144] sm:$0xff]  }
 0x42c   : > { %v13458_v59 = vsel %vm23119_vm5, %v13453_v30, %v13457_v28  ;;  %v13468_v20 = vsel %vm23119_vm5, %v13463_v46, %v13467_v43  ;;  %v13505_v37 = vshll.u32 %v18963_v1, 16  ;;  %v13492_v45 = vor.u32 %v13491_v22, %v13487_v15  ;;  %v22784_v28 = vld [vmem:[%s23101_s5 + $0x5c] sm:$0xf]  ;;  %v26810_v43 = vld [vmem:[%s23101_s5 + $0x154] sm:$0xf] }
 0x42d   : > { %v13502_v4 = vor.u32 %v13501_v21, %v13497_v3  ;;  %v14733_v44 = vrot.slane %v22781_v7, 5  ;;  %v13478_v35 = vsel %vm23119_vm5, %v13473_v17, %v13477_v14  ;;  %v13488_v23 = vsel %vm23119_vm5, %v13483_v16, %v13487_v15  ;;  %v19094_v30 = vld [vmem:[%s23101_s5 + $0x6c] sm:$0xe]  ;;  %v22790_v46 = vld [vmem:[%s23101_s5 + $0x70] sm:$0xf] }
 0x42e   : > { %v19026_v53 = vcombine.low %v13458_v59, %v13468_v20  ;;  %v13507_v55 = vrot.slane %v13505_v37, 5  ;;  %v19109_v18 = vrot.slane %v19093_v39, 9  ;;  %v14736_v29 = vrot.slane %v22782_v19, 5  ;;  %v22791_v1 = vld [vmem:[%s23101_s5 + $0x74] sm:$0xf] }
 0x42f   : > { %v14739_v40 = vrot.slane %v22783_v42, 5  ;;  %v19027_v52 = vcombine.low %v13478_v35, %v13488_v23  ;;  %v13493_v50 = vrot.slane %v13492_v45, 4  ;;  %v13503_v11 = vrot.slane %v13502_v4, 4  ;;  %v22792_v17 = vld [vmem:[%s23101_s5 + $0x78] sm:$0xf] }
 0x430   : > { %v14735_v33 = vrot.slane %v14733_v44, 4  ;;  %v7373_v62 = vshll.u32 %v22785_v63, 16  ;;  %v7377_v47 = vshrl.u32 %v22785_v63, 16  ;;  %v14734_v2 = vsel %vm23613_vm8, %v19109_v18, %v14733_v44  ;;  %v22793_v59 = vld [vmem:[%s23101_s5 + $0x80] sm:$0xf] }
 0x431   : > { %20540 = vmatmul.mubr.msk.bf16.gmra.mrb[48].mxu1 %vm1887_vm4, %v22490_v41  ;;  %21124 = vmatmul.mubr.msk.bf16.gmra.mrb[112].mxu0 %vm1887_vm4, %v19022_v61  ;;  %v22494_v61 = vld [vmem:[%s23101_s5 + $0x128] sm:$0xff]   ;;  %v14745_v41 = vrot.slane %v22784_v28, 5  ;;  %v14742_v56 = vrot.slane %v22786_v5, 5  ;;  %v13498_v14 = vsel %vm23119_vm5, %v13493_v50, %v13497_v3  ;;  %v13508_v0 = vsel %vm23119_vm5, %v13503_v11, %v13507_v55  ;;  %v22795_v7 = vld [vmem:[%s23101_s5 + $0x84] sm:$0xf] }
 0x432   : > { %20543 = vmatprep.mubr.msk.bf16.mxu1 %vm1887_vm4, %v22491_v25  ;;  %21127 = vmatprep.mubr.msk.bf16.mxu0 %vm1887_vm4, %v19023_v32  ;;  %v14738_v25 = vrot.slane %v14736_v29, 4  ;;  %v14741_v32 = vrot.slane %v14739_v40, 4  ;;  %v14737_v57 = vsel %vm23613_vm8, %v14735_v33, %v14736_v29  ;;  %v14748_v27 = vrot.slane %v22787_v49, 5  ;;  %v22794_v4 = vld [vmem:[%s23101_s5 + $0x68] sm:$0x1]  ;;  %v22499_v49 = vld [vmem:[%s23101_s5 + $0x154] sm:$0xff]  }
 0x433   : > { %v14744_v8 = vrot.slane %v14742_v56, 4  ;;  %v14747_v34 = vrot.slane %v14745_v41, 4  ;;  %v26805_v26 = vrot.slane %v7373_v62, 5  ;;  %v26807_v54 = vrot.slane %v7377_v47, 4  ;;  %v22796_v23 = vld [vmem:[%s23101_s5 + $0x7c] sm:$0xf] }
 0x434   : > { %v7383_v9 = vshll.u32 %v26810_v43, 16  ;;  %v19028_v12 = vcombine.low %v13498_v14, %v13508_v0  ;;  %v19126_v58 = vcombine.low %v14734_v2, %v14737_v57  ;;  %v26817_v51 = vsel %vm23613_vm8, %v14738_v25, %v14739_v40  ;;  %v19095_v18 = vld [vmem:[%s23101_s5 + $0x90] sm:$0xe]  ;;  %v22798_v19 = vld [vmem:[%s23101_s5 + $0x94] sm:$0xf] }
 0x435   : > { %v14758_v15 = vrot.slane %v22790_v46, 5  ;;  %v14761_v22 = vrot.slane %v22791_v1, 5  ;;  %v26829_v3 = vsel %vm23613_vm8, %v14744_v8, %v14745_v41  ;;  %v26833_v21 = vsel %vm23613_vm8, %v14747_v34, %v14748_v27  ;;  %v22799_v62 = vld [vmem:[%s23101_s5 + $0x98] sm:$0xf]  ;;  %v22800_v2 = vld [vmem:[%s23101_s5 + $0x9c] sm:$0xf] }
 0x436   : > { %v14764_v16 = vrot.slane %v22792_v17, 5  ;;  %v14770_v20 = vrot.slane %v22793_v59, 5  ;;  %v26837_v37 = vrot.slane %v7383_v9, 5  ;;  %v14754_v39 = vrot.slane %v22794_v4, 5  ;;  %v22801_v14 = vld [vmem:[%s23101_s5 + $0x8c] sm:$0x1] }
 0x437   : > { %v14773_v44 = vrot.slane %v22795_v7, 5  ;;  %v19110_v35 = vrot.slane %v19094_v30, 9  ;;  %v14783_v29 = vrot.slane %v22798_v19, 5  ;;  %v19128_v42 = vcombine.low %v26829_v3, %v26833_v21  ;;  %v22802_v9 = vld [vmem:[%s23101_s5 + $0xa4] sm:$0xf] }
 0x438   : > { %v14766_v11 = vrot.slane %v14764_v16, 4  ;;  %v14772_v28 = vrot.slane %v14770_v20, 4  ;;  %v19111_v63 = vrot.slane %v19095_v18, 9  ;;  %v14786_v47 = vrot.slane %v22799_v62, 5  ;;  %v22805_v59 = vld [vmem:[%s23101_s5 + $0xac] sm:$0xf] }
 0x439   : > { %20544 = vmatmul.mubr.msk.bf16.gmra.mrb[52].mxu1 %vm1887_vm4, %v22492_v13  ;;  %21128 = vmatmul.mubr.msk.bf16.gmra.mrb[116].mxu0 %vm1887_vm4, %v19024_v60  ;;  %v26821_v13 = vsel %vm23613_vm8, %v14741_v32, %v14742_v56  ;;  %v14750_v60 = vrot.slane %v14748_v27, 4  ;;  %v14775_v41 = vrot.slane %v14773_v44, 4  ;;  %v14789_v25 = vrot.slane %v22800_v2, 5  ;;  %v22498_v32 = vld [vmem:[%s23101_s5 + $0x14c] sm:$0xff]   ;;  %v19096_v7 = vld [vmem:[%s23101_s5 + $0xb4] sm:$0xe] }
 0x43a   : > { %20547 = vmatprep.mubr.msk.bf16.mxu1 %vm1887_vm4, %v22493_v24  ;;  %21131 = vmatprep.mubr.msk.bf16.mxu0 %vm1887_vm4, %v19025_v38  ;;  %v22789_v24 = vld [vmem:[%s23101_s5 + $0x64] sm:$0xf]  ;;  %v19127_v45 = vcombine.low %v26817_v51, %v26821_v13  ;;  %v26862_v5 = vsel %vm23613_vm8, %v19110_v35, %v14758_v15  ;;  %v14779_v0 = vrot.slane %v22801_v14, 5  ;;  %v14785_v57 = vrot.slane %v14783_v29, 4  ;;  %v22803_v51 = vld [vmem:[%s23101_s5 + $0xa0] sm:$0xf] }
 0x43b   : > { %v14751_v38 = vrot.slane %v22789_v24, 5  ;;  %v14792_v13 = vrot.slane %v22803_v51, 5  ;;  %v26898_v24 = vsel %vm23613_vm8, %v19111_v63, %v14783_v29  ;;  %v14791_v30 = vrot.slane %v14789_v25, 4  ;;  %v22500_v18 = vld [vmem:[%s23101_s5 + $0x15c] sm:$0xff]   ;;  %v22810_v2 = vld [vmem:[%s23101_s5 + $0xc8] sm:$0xf] }
 0x43d   : > { %v14753_v40 = vrot.slane %v14751_v38, 4  ;;  %v26855_v50 = vsel %vm23613_vm8, %v14750_v60, %v14751_v38  ;;  %v14788_v38 = vrot.slane %v14786_v47, 4  ;;  %v14794_v1 = vrot.slane %v14792_v13, 4 }
 0x43f   : > { %v26868_v27 = vsel %vm23613_vm8, %v14753_v40, %v14754_v39 }
 0x440   : > { %v19129_v17 = vcombine.low %v26855_v50, %v26868_v27  ;;  %v22501_v50 = vld [vmem:[%s23101_s5 + $0x168] sm:$0xff]  }
 0x441   : > { %20548 = vmatmul.mubr.msk.bf16.gmra.mrb[56].mxu1 %vm1887_vm4, %v22494_v61  ;;  %21132 = vmatmul.mubr.msk.bf16.gmra.mrb[120].mxu0 %vm1887_vm4, %v19026_v53  ;;  %v14767_v53 = vrot.slane %v22796_v23, 5  ;;  %v22797_v61 = vld [vmem:[%s23101_s5 + $0x88] sm:$0xf] }
 0x442   : > { %20551 = vmatprep.mubr.msk.bf16.mxu1 %vm1887_vm4, %v22495_v10  ;;  %21135 = vmatprep.mubr.msk.bf16.mxu0 %vm1887_vm4, %v19027_v52  ;;  %v14776_v55 = vrot.slane %v22797_v61, 5  ;;  %v14760_v10 = vrot.slane %v14758_v15, 4  ;;  %v14763_v52 = vrot.slane %v14761_v22, 4  ;;  %v26908_v15 = vsel %vm23613_vm8, %v14785_v57, %v14786_v47 }
 0x443   : > { %v14769_v33 = vrot.slane %v14767_v53, 4  ;;  %v26932_v61 = vsel %vm23613_vm8, %v14788_v38, %v14789_v25  ;;  %v14820_v25 = vrot.slane %v22810_v2, 5  ;;  %v19097_v38 = vld [vmem:[%s23101_s5 + $0xd8] sm:$0xe] }
 0x444   : > { %v14778_v56 = vrot.slane %v14776_v55, 4  ;;  %v26872_v8 = vsel %vm23613_vm8, %v14760_v10, %v14761_v22  ;;  %v26876_v34 = vsel %vm23613_vm8, %v14763_v52, %v14764_v16  ;;  %v26894_v60 = vsel %vm23613_vm8, %v14775_v41, %v14776_v55  ;;  %v22804_v22 = vld [vmem:[%s23101_s5 + $0xa8] sm:$0xf]  ;;  %v22808_v10 = vld [vmem:[%s23101_s5 + $0xbc] sm:$0xf] }
 0x445   : > { %v14798_v3 = vrot.slane %v22804_v22, 5  ;;  %v26936_v55 = vsel %vm23613_vm8, %v14791_v30, %v14792_v13  ;;  %v14811_v52 = vrot.slane %v22808_v10, 5  ;;  %v22809_v41 = vld [vmem:[%s23101_s5 + $0xc0] sm:$0xf]  ;;  %v22816_v30 = vld [vmem:[%s23101_s5 + $0xe4] sm:$0xf] }
 0x446   : > { %v26904_v46 = vsel %vm23613_vm8, %v14778_v56, %v14779_v0  ;;  %v14814_v63 = vrot.slane %v22809_v41, 5  ;;  %v19135_v62 = vcombine.low %v26932_v61, %v26936_v55  ;;  %v22812_v56 = vld [vmem:[%s23101_s5 + $0xc4] sm:$0xf]  ;;  %v22813_v0 = vld [vmem:[%s23101_s5 + $0xd0] sm:$0xf]  ;;  %v22503_v41 = vld [vmem:[%s23101_s5 + $0x178] sm:$0xff]  }
 0x447   : > { %v19133_v23 = vcombine.low %v26894_v60, %v26904_v46  ;;  %v14800_v29 = vrot.slane %v14798_v3, 4  ;;  %v14817_v14 = vrot.slane %v22812_v56, 5  ;;  %v14826_v57 = vrot.slane %v22813_v0, 5  ;;  %v22819_v56 = vld [vmem:[%s23101_s5 + $0xec] sm:$0xf] }
 0x448   : > { %v14813_v13 = vrot.slane %v14811_v52, 4  ;;  %v14845_v0 = vrot.slane %v22819_v56, 5  ;;  %v22840_v55 = vld [vmem:[%s23101_s5 + $0x14c] sm:$0xf] }
 0x449   : > { %20552 = vmatmul.mubr.msk.bf16.gmra.mrb[60].mxu1 %vm1887_vm4, %v22496_v6  ;;  %21136 = vmatmul.mubr.msk.bf16.gmra.mrb[124].mxu0 %vm1887_vm4, %v19028_v12  ;;  %v14795_v6 = vrot.slane %v22802_v9, 5  ;;  %v26881_v12 = vsel %vm23613_vm8, %v14766_v11, %v14767_v53  ;;  %v19134_v53 = vcombine.low %v26898_v24, %v26908_v15  ;;  %v22836_v24 = vld [vmem:[%s23101_s5 + $0x11c] sm:$0x1] }
 0x44a   : > { %20555 = vmatprep.mubr.msk.bf16.mxu1 %vm1887_vm4, %v22497_v31  ;;  %21141 = vmatprep.mubr.msk.bf16.mxu0 %vm1887_vm4, %v19126_v58  ;;  %v26885_v31 = vsel %vm23613_vm8, %v14769_v33, %v14770_v20  ;;  %v26889_v58 = vsel %vm23613_vm8, %v14772_v28, %v14773_v44  ;;  %v14801_v20 = vrot.slane %v22805_v59, 5  ;;  %v19131_v4 = vcombine.low %v26876_v34, %v26881_v12  ;;  %v22806_v44 = vld [vmem:[%s23101_s5 + $0xb8] sm:$0xf]  ;;  %v22832_v34 = vld [vmem:[%s23101_s5 + $0x12c] sm:$0xf] }
 0x44b   : > { %v14797_v16 = vrot.slane %v14795_v6, 4  ;;  %v19132_v39 = vcombine.low %v26885_v31, %v26889_v58  ;;  %v14808_v35 = vrot.slane %v22806_v44, 5  ;;  %v26941_v19 = vsel %vm23613_vm8, %v14794_v1, %v14795_v6  ;;  %v22817_v44 = vld [vmem:[%s23101_s5 + $0xd4] sm:$0x1]  ;;  %v22826_v31 = vld [vmem:[%s23101_s5 + $0x110] sm:$0xf] }
 0x44c   : > { %v14803_v33 = vrot.slane %v14801_v20, 4  ;;  %v19112_v28 = vrot.slane %v19096_v7, 9  ;;  %v26965_v51 = vsel %vm23613_vm8, %v14800_v29, %v14801_v20  ;;  %v14839_v1 = vrot.slane %v22816_v30, 5 }
 0x44d   : > { %v26948_v11 = vsel %vm23613_vm8, %v14797_v16, %v14798_v3  ;;  %v14810_v47 = vrot.slane %v14808_v35, 4  ;;  %v14819_v16 = vrot.slane %v14817_v14, 4  ;;  %v14822_v20 = vrot.slane %v14820_v25, 4 }
 0x44e   : > { %v19136_v6 = vcombine.low %v26941_v19, %v26948_v11  ;;  %v26977_v3 = vsel %vm23613_vm8, %v19112_v28, %v14808_v35  ;;  %v19113_v29 = vrot.slane %v19097_v38, 9  ;;  %v22502_v35 = vld [vmem:[%s23101_s5 + $0x170] sm:$0xff]   ;;  %v14870_v58 = vrot.slane %v22826_v31, 5 }
 0x44f   : > { %v26981_v59 = vsel %vm23613_vm8, %v14810_v47, %v14811_v52  ;;  %v14841_v52 = vrot.slane %v14839_v1, 4  ;;  %v22828_v31 = vld [vmem:[%s23101_s5 + $0x114] sm:$0xf]  ;;  %v14879_v15 = vrot.slane %v22836_v24, 5  ;;  %v22507_v47 = vld [vmem:[%s23101_s5 + $0x19c] sm:$0xff]  }
 0x451   : > { %20556 = vmatmul.mubr.msk.bf16.gmra.mrb[64].mxu1 %vm1887_vm4, %v22498_v32  ;;  %21142 = vmatmul.mubr.msk.bf16.vlgmr.msra.gmra.mrb[0].mxu0 %vm1887_vm4, %v19127_v45  ;;  %v19130_v45 = vcombine.low %v26862_v5, %v26872_v8  ;;  %v22811_v32 = vld [vmem:[%s23101_s5 + $0xcc] sm:$0xf]  ;;  %v22815_v8 = vld [vmem:[%s23101_s5 + $0xe0] sm:$0xf] }
 0x452   : > { %20559 = vmatprep.mubr.msk.bf16.mxu1 %vm1887_vm4, %v22499_v49  ;;  %21145 = vmatprep.mubr.msk.bf16.mxu0 %vm1887_vm4, %v19128_v42  ;;  %v22807_v42 = vld [vmem:[%s23101_s5 + $0xb0] sm:$0x1]  ;;  %v14823_v5 = vrot.slane %v22811_v32, 5  ;;  %v22814_v49 = vld [vmem:[%s23101_s5 + $0xdc] sm:$0xf]  ;;  %v14836_v9 = vrot.slane %v22815_v8, 5  ;;  %v27001_v32 = vsel %vm23613_vm8, %v14819_v16, %v14820_v25 }
 0x453   : > { %v14804_v40 = vrot.slane %v22807_v42, 5  ;;  %v14833_v27 = vrot.slane %v22814_v49, 5  ;;  %v22820_v8 = vld [vmem:[%s23101_s5 + $0xf0] sm:$0xf]  ;;  %v22822_v16 = vld [vmem:[%s23101_s5 + $0x100] sm:$0xf] }
 0x454   : > { %v14825_v7 = vrot.slane %v14823_v5, 4 }
 0x455   : > { %v26973_v22 = vsel %vm23613_vm8, %v14803_v33, %v14804_v40  ;;  %v14835_v42 = vrot.slane %v14833_v27, 4  ;;  %v14838_v40 = vrot.slane %v14836_v9, 4  ;;  %v22818_v33 = vld [vmem:[%s23101_s5 + $0xe8] sm:$0xf]  ;;  %v27020_v30 = vsel %vm23613_vm8, %v19113_v29, %v14833_v27 }
 0x456   : > { %v14842_v28 = vrot.slane %v22818_v33, 5  ;;  %v27010_v49 = vsel %vm23613_vm8, %v14825_v7, %v14826_v57  ;;  %v22823_v7 = vld [vmem:[%s23101_s5 + $0x104] sm:$0xf] }
 0x458   : > { %v27037_v27 = vsel %vm23613_vm8, %v14841_v52, %v14842_v28  ;;  %v22829_v52 = vld [vmem:[%s23101_s5 + $0x118] sm:$0xf] }
 0x459   : > { %20560 = vmatmul.mubr.msk.bf16.gmra.mrb[68].mxu1 %vm1887_vm4, %v22500_v18  ;;  %21146 = vmatmul.mubr.msk.bf16.gmra.mrb[4].mxu0 %vm1887_vm4, %v19129_v17  ;;  %v14816_v17 = vrot.slane %v14814_v63, 4  ;;  %v14828_v18 = vrot.slane %v14826_v57, 4  ;;  %v27028_v57 = vsel %vm23613_vm8, %v14838_v40, %v14839_v1  ;;  %v14861_v1 = vrot.slane %v22823_v7, 5  ;;  %v22505_v7 = vld [vmem:[%s23101_s5 + $0x18c] sm:$0xff]  }
 0x45a   : > { %20563 = vmatprep.mubr.msk.bf16.mxu1 %vm1887_vm4, %v22501_v50  ;;  %21149 = vmatprep.mubr.msk.bf16.mxu0 %vm1887_vm4, %v19130_v45  ;;  %v14829_v45 = vrot.slane %v22817_v44, 5  ;;  %v26989_v50 = vsel %vm23613_vm8, %v14813_v13, %v14814_v63  ;;  %v27006_v63 = vsel %vm23613_vm8, %v14822_v20, %v14823_v5  ;;  %v22821_v13 = vld [vmem:[%s23101_s5 + $0xf4] sm:$0xf]  ;;  %v27024_v5 = vsel %vm23613_vm8, %v14835_v42, %v14836_v9  ;;  %v19098_v9 = vld [vmem:[%s23101_s5 + $0xfc] sm:$0xe] }
 0x45b   : > { %v26997_v2 = vsel %vm23613_vm8, %v14816_v17, %v14817_v14  ;;  %v14848_v14 = vrot.slane %v22820_v8, 5  ;;  %v14851_v38 = vrot.slane %v22821_v13, 5  ;;  %v14844_v17 = vrot.slane %v14842_v28, 4  ;;  %v22824_v44 = vld [vmem:[%s23101_s5 + $0x108] sm:$0xf]  ;;  %v22504_v28 = vld [vmem:[%s23101_s5 + $0x180] sm:$0xff]  }
 0x45c   : > { %v27016_v25 = vsel %vm23613_vm8, %v14828_v18, %v14829_v45  ;;  %v14858_v20 = vrot.slane %v22822_v16, 5  ;;  %v14864_v45 = vrot.slane %v22824_v44, 5  ;;  %v22825_v42 = vld [vmem:[%s23101_s5 + $0xf8] sm:$0x1]  ;;  %v19114_v33 = vrot.slane %v19098_v9, 9 }
 0x45d   : > { %v14850_v18 = vrot.slane %v14848_v14, 4  ;;  %v14853_v29 = vrot.slane %v14851_v38, 4  ;;  %v14854_v40 = vrot.slane %v22825_v42, 5  ;;  %v14863_v8 = vrot.slane %v14861_v1, 4  ;;  %v22827_v13 = vld [vmem:[%s23101_s5 + $0x10c] sm:$0xf] }
 0x45e   : > { %v14860_v56 = vrot.slane %v14858_v20, 4  ;;  %v14867_v16 = vrot.slane %v22827_v13, 5  ;;  %v14866_v42 = vrot.slane %v14864_v45, 4  ;;  %v14873_v9 = vrot.slane %v22828_v31, 5 }
 0x460   : > { %v14869_v13 = vrot.slane %v14867_v16, 4  ;;  %v27111_v60 = vsel %vm23613_vm8, %v14866_v42, %v14867_v16  ;;  %v14875_v46 = vrot.slane %v14873_v9, 4 }
 0x461   : > { %20564 = vmatmul.mubr.msk.bf16.gmra.mrb[72].mxu1 %vm1887_vm4, %v22502_v35  ;;  %21150 = vmatmul.mubr.msk.bf16.gmra.mrb[8].mxu0 %vm1887_vm4, %v19131_v4  ;;  %v14847_v4 = vrot.slane %v14845_v0, 4  ;;  %v14876_v35 = vrot.slane %v22829_v52, 5  ;;  %v22831_v52 = vld [vmem:[%s23101_s5 + $0x128] sm:$0xf] }
 0x462   : > { %20567 = vmatprep.mubr.msk.bf16.mxu1 %vm1887_vm4, %v22503_v41  ;;  %21153 = vmatprep.mubr.msk.bf16.mxu0 %vm1887_vm4, %v19132_v39  ;;  %v27063_v41 = vsel %vm23613_vm8, %v14844_v17, %v14845_v0  ;;  %v27075_v0 = vsel %vm23613_vm8, %v14850_v18, %v14851_v38  ;;  %v27079_v17 = vsel %vm23613_vm8, %v14853_v29, %v14854_v40  ;;  %v14872_v39 = vrot.slane %v14870_v58, 4  ;;  %v19099_v29 = vld [vmem:[%s23101_s5 + $0x120] sm:$0xe]  ;;  %v22833_v40 = vld [vmem:[%s23101_s5 + $0x134] sm:$0xf] }
 0x463   : > { %v27069_v44 = vsel %vm23613_vm8, %v14847_v4, %v14848_v14  ;;  %v27083_v14 = vsel %vm23613_vm8, %v19114_v33, %v14858_v20  ;;  %v22830_v4 = vld [vmem:[%s23101_s5 + $0x124] sm:$0xf]  ;;  %v14886_v12 = vrot.slane %v22831_v52, 5  ;;  %v14889_v38 = vrot.slane %v22832_v34, 5  ;;  %v22834_v33 = vld [vmem:[%s23101_s5 + $0x138] sm:$0xf] }
 0x464   : > { %v14883_v31 = vrot.slane %v22830_v4, 5  ;;  %v27095_v18 = vsel %vm23613_vm8, %v14860_v56, %v14861_v1  ;;  %v27099_v20 = vsel %vm23613_vm8, %v14863_v8, %v14864_v45  ;;  %v14895_v34 = vrot.slane %v22833_v40, 5  ;;  %v22835_v1 = vld [vmem:[%s23101_s5 + $0x13c] sm:$0xf]  ;;  %v22506_v40 = vld [vmem:[%s23101_s5 + $0x194] sm:$0xff]  }
 0x465   : > { %v14901_v45 = vrot.slane %v22835_v1, 5  ;;  %v27116_v56 = vsel %vm23613_vm8, %v14869_v13, %v14870_v58  ;;  %v27120_v8 = vsel %vm23613_vm8, %v14872_v39, %v14873_v9  ;;  %v19115_v16 = vrot.slane %v19099_v29, 9  ;;  %v22838_v29 = vld [vmem:[%s23101_s5 + $0x140] sm:$0x1] }
 0x466   : > { %v14885_v42 = vrot.slane %v14883_v31, 4  ;;  %v14888_v4 = vrot.slane %v14886_v12, 4  ;;  %v14891_v52 = vrot.slane %v14889_v38, 4  ;;  %v14897_v58 = vrot.slane %v14895_v34, 4 }
 0x467   : > { %v14903_v24 = vrot.slane %v14901_v45, 4  ;;  %v27139_v10 = vsel %vm23613_vm8, %v14875_v46, %v14876_v35  ;;  %v27147_v9 = vsel %vm23613_vm8, %v19115_v16, %v14883_v31  ;;  %v18199_v46 = vld [vmem:[%s23101_s5 + $0x144] sm:$0xf] }
 0x468   : > { %v7344_v11 = vshrl.u32 %v18199_v46, 16 }
 0x469   : > { %20568 = vmatmul.mubr.msk.bf16.gmra.mrb[76].mxu1 %vm1887_vm4, %v22504_v28  ;;  %21154 = vmatmul.mubr.msk.bf16.gmra.mrb[12].mxu0 %vm1887_vm4, %v19133_v23  ;;  %v14898_v28 = vrot.slane %v22834_v33, 5  ;;  %v14878_v23 = vrot.slane %v14876_v35, 4  ;;  %v27155_v33 = vsel %vm23613_vm8, %v14888_v4, %v14889_v38 }
 0x46a   : > { %20571 = vmatprep.mubr.msk.bf16.mxu1 %vm1887_vm4, %v22505_v7  ;;  %21157 = vmatprep.mubr.msk.bf16.mxu0 %vm1887_vm4, %v19134_v53  ;;  %v22837_v53 = vld [vmem:[%s23101_s5 + $0x130] sm:$0xf]  ;;  %29293 = vst [vmem:[#allocation12_spill] sm:$0xff] %v27155_v33  ;;  %v7346_v19 = vrot.slane %v7344_v11, 4  ;;  %v29300_v33 = vor.u32 %v26807_v54, %v26805_v26 }
 0x46b   : > { %v14892_v7 = vrot.slane %v22837_v53, 5  ;;  %v14900_v13 = vrot.slane %v14898_v28, 4  ;;  %v14904_v53 = vrot.slane %v22838_v29, 5  ;;  %v27143_v39 = vsel %vm23613_vm8, %v14878_v23, %v14879_v15  ;;  %v19100_v23 = vld [vmem:[%s23101_s5 + $0x144] sm:$0xe] }
 0x46c   : > { %v27151_v29 = vsel %vm23613_vm8, %v14885_v42, %v14886_v12  ;;  %v27173_v31 = vsel %vm23613_vm8, %v14897_v58, %v14898_v28  ;;  %v22839_v15 = vld [vmem:[%s23101_s5 + $0x148] sm:$0xf]  ;;  %v19116_v4 = vrot.slane %v19100_v23, 9 }
 0x46d   : > { %v14894_v1 = vrot.slane %v14892_v7, 4  ;;  %v27159_v35 = vsel %vm23613_vm8, %v14891_v52, %v14892_v7  ;;  %29296 = vst [vmem:[#allocation16_spill] sm:$0xff] %v27173_v31  ;;  %v27177_v38 = vsel %vm23613_vm8, %v14900_v13, %v14901_v45  ;;  %v14908_v7 = vrot.slane %v22839_v15, 5  ;;  %v22842_v45 = vld [vmem:[%s23101_s5 + $0x158] sm:$0xf]  ;;  %v22508_v13 = vld [vmem:[%s23101_s5 + $0x1a4] sm:$0xff]  }
 0x46e   : > { %29294 = vst [vmem:[#allocation14_spill] sm:$0xff] %v27159_v35  ;;  %29297 = vst [vmem:[#allocation17_spill] sm:$0xff] %v27177_v38  ;;  %v27188_v61 = vsel %vm23613_vm8, %v14903_v24, %v14904_v53  ;;  %v14920_v16 = vrot.slane %v22842_v45, 5  ;;  %v22843_v52 = vld [vmem:[%s23101_s5 + $0x154] sm:$0xf]  ;;  %v29299_v31 = vcombine.low %v26965_v51, %v26973_v22  ;;  %v29301_v51 = vcombine.low %v26977_v3, %v26981_v59 }
 0x46f   : > { %v27169_v12 = vsel %vm23613_vm8, %v14894_v1, %v14895_v34  ;;  %29298 = vst [vmem:[#allocation18_spill] sm:$0xff] %v27188_v61  ;;  %v22841_v34 = vld [vmem:[%s23101_s5 + $0x150] sm:$0xf]  ;;  %v22844_v1 = vld [vmem:[%s23101_s5 + $0x15c] sm:$0xf]  ;;  %v14910_v15 = vrot.slane %v14908_v7, 4  ;;  %v27211_v24 = vsel %vm23613_vm8, %v19116_v4, %v14908_v7 }
 0x470   : > { %29295 = vst [vmem:[#allocation15_spill] sm:$0xff] %v27169_v12  ;;  %v14914_v28 = vrot.slane %v22841_v34, 5  ;;  %v14923_v58 = vrot.slane %v22844_v1, 5  ;;  %v22509_v34 = vld [vmem:[%s23101_s5 + $0x1b0] sm:$0xff]   ;;  %v22847_v61 = vld [vmem:[%s23101_s5 + $0x14c] sm:$0xf] }
 0x471   : > { %20572 = vmatmul.mubr.msk.bf16.gmra.mrb[80].mxu1 %vm1887_vm4, %v22506_v40  ;;  %21158 = vmatmul.mubr.msk.bf16.gmra.mrb[16].mxu0 %vm1887_vm4, %v19135_v62  ;;  %v14911_v62 = vrot.slane %v22840_v55, 5  ;;  %v14917_v40 = vrot.slane %v22843_v52, 5  ;;  %v22845_v55 = vld [vmem:[%s23101_s5 + $0x160] sm:$0xf]  ;;  %v14922_v52 = vrot.slane %v14920_v16, 4  ;;  %v7363_v38 = vshll.u32 %v22847_v61, 16 }
 0x472   : > { %20575 = vmatprep.mubr.msk.bf16.mxu1 %vm1887_vm4, %v22507_v47  ;;  %21161 = vmatprep.mubr.msk.bf16.mxu0 %vm1887_vm4, %v19136_v6  ;;  %v7347_v6 = vshll.u32 %v18199_v46, 16  ;;  %v14926_v46 = vrot.slane %v22845_v55, 5  ;;  %v14916_v42 = vrot.slane %v14914_v28, 4  ;;  %v22846_v47 = vld [vmem:[%s23101_s5 + $0x148] sm:$0xf]  ;;  %v14925_v53 = vrot.slane %v14923_v58, 4 }
 0x473   : > { %v14913_v45 = vrot.slane %v14911_v62, 4  ;;  %v14919_v23 = vrot.slane %v14917_v40, 4  ;;  %v7353_v21 = vshll.u32 %v22846_v47, 16  ;;  %v7357_v35 = vshrl.u32 %v22846_v47, 16  ;;  %v22849_v4 = vld [vmem:[%s23101_s5 + $0x16c] sm:$0xf] }
 0x474   : > { %v7349_v1 = vrot.slane %v7347_v6, 5  ;;  %v7367_v55 = vshrl.u32 %v22847_v61, 16  ;;  %v27221_v11 = vsel %vm23613_vm8, %v14910_v15, %v14911_v62  ;;  %v14928_v47 = vrot.slane %v14926_v46, 4  ;;  %v22848_v6 = vld [vmem:[%s23101_s5 + $0x164] sm:$0x1]  ;;  %v22510_v15 = vld [vmem:[%s23101_s5 + $0x1b8] sm:$0xff]  }
 0x475   : > { %v14929_v7 = vrot.slane %v22848_v6, 5  ;;  %v14933_v12 = vrot.slane %v22849_v4, 5  ;;  %v27228_v61 = vrot.slane %v29300_v33, 4  ;;  %v27237_v22 = vsel %vm23613_vm8, %v14913_v45, %v14914_v28  ;;  %v19101_v33 = vld [vmem:[%s23101_s5 + $0x168] sm:$0xe]  ;;  %v22511_v45 = vld [vmem:[%s23101_s5 + $0x1c0] sm:$0xff]  }
 0x476   : > { %29302 = vst [vmem:[#allocation19_spill] sm:$0xff] %v27237_v22  ;;  %v27245_v54 = vsel %vm23613_vm8, %v14919_v23, %v14920_v16  ;;  %v27250_v3 = vsel %vm23613_vm8, %v14922_v52, %v14923_v58  ;;  %v7350_v59 = vor.u32 %v7349_v1, %v7346_v19  ;;  %v27252_v62 = vrot.slane %v7353_v21, 5  ;;  %v22856_v4 = vld [vmem:[%s23101_s5 + $0x17c] sm:$0xf]  ;;  %v22513_v23 = vld [vmem:[%s23101_s5 + $0x1d4] sm:$0xff]  }
 0x477   : > { %29304 = vst [vmem:[#allocation20_spill] sm:$0xff] %v27245_v54  ;;  %29305 = vst [vmem:[#allocation21_spill] sm:$0xff] %v27250_v3  ;;  %v7359_v28 = vrot.slane %v7357_v35, 4  ;;  %v27260_v16 = vrot.slane %v7363_v38, 5  ;;  %v27265_v58 = vsel %vm23613_vm8, %v14928_v47, %v14929_v7  ;;  %v19117_v19 = vrot.slane %v19101_v33, 9  ;;  %v22515_v54 = vld [vmem:[%s23101_s5 + $0x1e4] sm:$0xff]  }
 0x478   : > { %29307 = vst [vmem:[#allocation23_spill] sm:$0xff] %v27265_v58  ;;  %v14935_v21 = vrot.slane %v14933_v12, 4  ;;  %v22850_v35 = vld [vmem:[%s23101_s5 + $0x170] sm:$0xf]  ;;  %v7387_v52 = vshrl.u32 %v26810_v43, 16  ;;  %v27275_v1 = vrot.slane %v7350_v59, 4  ;;  %v29308_v43 = vcombine.low %v26989_v50, %v26997_v2 }
 0x479   : > { %20576 = vmatmul.mubr.msk.bf16.gmra.mrb[84].mxu1 %vm1887_vm4, %v22508_v13  ;;  %21162 = vmatmul.mubr.msk.bf16.gmra.mrb[20].mxu0 %vm1887_vm4, %v29299_v31  ;;  %v27241_v31 = vsel %vm23613_vm8, %v14916_v42, %v14917_v40  ;;  %v27258_v42 = vsel %vm23613_vm8, %v14925_v53, %v14926_v46  ;;  %v7369_v40 = vrot.slane %v7367_v55, 4  ;;  %v22851_v53 = vld [vmem:[%s23101_s5 + $0x174] sm:$0xf]  ;;  %v7360_v55 = vor.u32 %v7359_v28, %v27252_v62  ;;  %v22852_v47 = vld [vmem:[%s23101_s5 + $0x158] sm:$0xf] }
 0x47a   : > { %20579 = vmatprep.mubr.msk.bf16.mxu1 %vm1887_vm4, %v22509_v34  ;;  %21165 = vmatprep.mubr.msk.bf16.mxu0 %vm1887_vm4, %v29301_v51  ;;  %29303 = vst [vmem:[#allocation3_spill] sm:$0xff] %v27241_v31  ;;  %29306 = vst [vmem:[#allocation22_spill] sm:$0xff] %v27258_v42  ;;  %v14936_v34 = vrot.slane %v22850_v35, 5  ;;  %v14939_v46 = vrot.slane %v22851_v53, 5  ;;  %v7393_v6 = vshll.u32 %v22852_v47, 16  ;;  %v7397_v7 = vshrl.u32 %v22852_v47, 16 }
 0x47b   : > { %v7370_v51 = vor.u32 %v7369_v40, %v27260_v16  ;;  %v22853_v33 = vld [vmem:[%s23101_s5 + $0x15c] sm:$0xf]  ;;  %v27290_v59 = vsel %vm23613_vm8, %v19117_v19, %v14933_v12  ;;  %v22854_v40 = vld [vmem:[%s23101_s5 + $0x160] sm:$0xf]  ;;  %v22855_v12 = vld [vmem:[%s23101_s5 + $0x178] sm:$0xf] }
 0x47c   : > { %v7403_v35 = vshll.u32 %v22853_v33, 16  ;;  %v7407_v38 = vshrl.u32 %v22853_v33, 16  ;;  %29309 = vst [vmem:[#allocation4_spill] sm:$0xff] %v27290_v59  ;;  %v27294_v28 = vsel %vm23613_vm8, %v14935_v21, %v14936_v34  ;;  %v7413_v53 = vshll.u32 %v22854_v40, 16  ;;  %v22863_v42 = vld [vmem:[%s23101_s5 + $0x190] sm:$0xf] }
 0x47d   : > { %29310 = vst [vmem:[#allocation6_spill] sm:$0xff] %v27294_v28  ;;  %v7417_v47 = vshrl.u32 %v22854_v40, 16  ;;  %v14938_v50 = vrot.slane %v14936_v34, 4  ;;  %v14941_v2 = vrot.slane %v14939_v46, 4  ;;  %v14942_v19 = vrot.slane %v22855_v12, 5  ;;  %v22512_v12 = vld [vmem:[%s23101_s5 + $0x1c8] sm:$0xff]  }
 0x47e   : > { %v7389_v33 = vrot.slane %v7387_v52, 4  ;;  %v27312_v40 = vrot.slane %v7370_v51, 4  ;;  %v7409_v52 = vrot.slane %v7407_v38, 4  ;;  %v14958_v3 = vrot.slane %v22863_v42, 5  ;;  %v22864_v31 = vld [vmem:[%s23101_s5 + $0x174] sm:$0xf] }
 0x47f   : > { %v7419_v51 = vrot.slane %v7417_v47, 4  ;;  %v27329_v34 = vsel %vm23613_vm8, %v14938_v50, %v14939_v46  ;;  %v14944_v28 = vrot.slane %v14942_v19, 4  ;;  %v27340_v46 = vsel %vm23613_vm8, %v14941_v2, %v14942_v19  ;;  %v22859_v19 = vld [vmem:[%s23101_s5 + $0x164] sm:$0x1] }
 0x481   : > { %20580 = vmatmul.mubr.msk.bf16.gmra.mrb[88].mxu1 %vm1887_vm4, %v22510_v15  ;;  %21166 = vmatmul.mubr.msk.bf16.gmra.mrb[24].mxu0 %vm1887_vm4, %v29308_v43  ;;  %v29311_v15 = vcombine.low %v27001_v32, %v27006_v63  ;;  %v27307_v43 = vrot.slane %v7360_v55, 4  ;;  %v7399_v32 = vrot.slane %v7397_v7, 4  ;;  %v18208_v63 = vld [vmem:[%s23101_s5 + $0x168] sm:$0xf]  ;;  %v27324_v7 = vrot.slane %v7413_v53, 5 }
 0x482   : > { %20583 = vmatprep.mubr.msk.bf16.mxu1 %vm1887_vm4, %v22511_v45  ;;  %v27309_v45 = vrot.slane %v7393_v6, 5  ;;  %v14945_v6 = vrot.slane %v22856_v4, 5  ;;  %v7428_v38 = vshrl.u32 %v18208_v63, 16  ;;  %v7431_v13 = vshll.u32 %v18208_v63, 16  ;;  %v22857_v55 = vld [vmem:[%s23101_s5 + $0x16c] sm:$0xf] }
 0x483   : > { %21169 = vmatprep.mubr.msk.bf16.mxu0 %vm1887_vm4, %v29311_v15  ;;  %v27316_v15 = vrot.slane %v7403_v35, 5  ;;  %v7390_v35 = vor.u32 %v7389_v33, %v26837_v37  ;;  %v7437_v59 = vshll.u32 %v22857_v55, 16  ;;  %v7441_v58 = vshrl.u32 %v22857_v55, 16  ;;  %v22858_v53 = vld [vmem:[%s23101_s5 + $0x180] sm:$0xf] }
 0x484   : > { %v7400_v21 = vor.u32 %v7399_v32, %v27309_v45  ;;  %v14948_v47 = vrot.slane %v22858_v53, 5  ;;  %v29312_v33 = vcombine.low %v27010_v49, %v27016_v25  ;;  %v7376_v32 = vsel %vm23119_vm5, %v27312_v40, %v26805_v26  ;;  %v22860_v25 = vld [vmem:[%s23101_s5 + $0x184] sm:$0xf] }
 0x485   : > { %v7410_v50 = vor.u32 %v7409_v52, %v27316_v15  ;;  %v14947_v63 = vrot.slane %v14945_v6, 4  ;;  %v7420_v2 = vor.u32 %v7419_v51, %v27324_v7  ;;  %v7423_v55 = vshll.u32 %v22859_v19, 16 }
 0x486   : > { %v29313_v52 = vcombine.low %v27020_v30, %v27024_v5  ;;  %v7391_v49 = vrot.slane %v7390_v35, 4  ;;  %v7430_v53 = vrot.slane %v7428_v38, 4  ;;  %v7433_v26 = vrot.slane %v7431_v13, 5  ;;  %v22861_v35 = vld [vmem:[%s23101_s5 + $0x170] sm:$0xf] }
 0x487   : > { %v7401_v40 = vrot.slane %v7400_v21, 4  ;;  %v27363_v51 = vsel %vm23613_vm8, %v14944_v28, %v14945_v6  ;;  %v7411_v30 = vrot.slane %v7410_v50, 4  ;;  %v14950_v5 = vrot.slane %v14948_v47, 4  ;;  %v22862_v13 = vld [vmem:[%s23101_s5 + $0x188] sm:$0x1] }
 0x488   : > { %v7447_v19 = vshll.u32 %v22861_v35, 16  ;;  %v7421_v38 = vrot.slane %v7420_v2, 4  ;;  %v7425_v4 = vrot.slane %v7423_v55, 5  ;;  %v14954_v21 = vrot.slane %v22862_v13, 5 }
 0x489   : > { %20584 = vmatmul.mubr.msk.bf16.gmra.mrb[92].mxu1 %vm1887_vm4, %v22512_v12  ;;  %21170 = vmatmul.mubr.msk.bf16.gmra.mrb[28].mxu0 %vm1887_vm4, %v29312_v33  ;;  %v14951_v12 = vrot.slane %v22860_v25, 5  ;;  %v7443_v33 = vrot.slane %v7441_v58, 4  ;;  %v22514_v25 = vld [vmem:[%s23101_s5 + $0x1dc] sm:$0xff]   ;;  %v7434_v6 = vor.u32 %v7433_v26, %v7430_v53  ;;  %v7457_v58 = vshll.u32 %v22864_v31, 16 }
 0x48a   : > { %20587 = vmatprep.mubr.msk.bf16.mxu1 %vm1887_vm4, %v22513_v23  ;;  %21173 = vmatprep.mubr.msk.bf16.mxu0 %vm1887_vm4, %v29313_v52  ;;  %v27365_v23 = vrot.slane %v7437_v59, 5  ;;  %v7451_v52 = vshrl.u32 %v22861_v35, 16  ;;  %v19102_v59 = vld [vmem:[%s23101_s5 + $0x18c] sm:$0xe]  ;;  %v7461_v50 = vshrl.u32 %v22864_v31, 16  ;;  %v7396_v22 = vsel %vm23119_vm5, %v7391_v49, %v27309_v45 }
 0x48b   : > { %v14953_v28 = vrot.slane %v14951_v12, 4  ;;  %v7406_v2 = vsel %vm23119_vm5, %v7401_v40, %v27316_v15  ;;  %v27382_v55 = vsel %vm23613_vm8, %v14947_v63, %v14948_v47  ;;  %v7416_v53 = vsel %vm23119_vm5, %v7411_v30, %v27324_v7  ;;  %v22865_v7 = vld [vmem:[%s23101_s5 + $0x194] sm:$0xf]  ;;  %v22866_v35 = vld [vmem:[%s23101_s5 + $0x178] sm:$0xf] }
 0x48c   : > { %v7444_v42 = vor.u32 %v7443_v33, %v27365_v23  ;;  %v27390_v31 = vsel %vm23613_vm8, %v14950_v5, %v14951_v12  ;;  %v7449_v26 = vrot.slane %v7447_v19, 5  ;;  %v7453_v45 = vrot.slane %v7451_v52, 4 }
 0x48d   : > { %v29314_v15 = vcombine.low %v27028_v57, %v27037_v27  ;;  %v7426_v47 = vsel %vm23119_vm5, %v7421_v38, %v7425_v4  ;;  %v19118_v63 = vrot.slane %v19102_v59, 9  ;;  %v14960_v49 = vrot.slane %v14958_v3, 4 }
 0x48e   : > { %v14961_v40 = vrot.slane %v22865_v7, 5  ;;  %v29315_v12 = vcombine.low %v27063_v41, %v27069_v44  ;;  %v27407_v57 = vsel %vm23613_vm8, %v14953_v28, %v14954_v21  ;;  %v7435_v27 = vrot.slane %v7434_v6, 4 }
 0x48f   : > { %v27409_v33 = vrot.slane %v7457_v58, 5  ;;  %v7463_v4 = vrot.slane %v7461_v50, 4  ;;  %v29316_v30 = vsel %vm23119_vm5, %v27307_v43, %v27260_v16  ;;  %v29317_v41 = vsel %vm23119_vm5, %v27275_v1, %v27252_v62  ;;  %v22516_v43 = vld [vmem:[%s23101_s5 + $0x1ec] sm:$0xff]   ;;  %v22867_v58 = vld [vmem:[%s23101_s5 + $0x198] sm:$0xf] }
 0x490   : > { %v27421_v44 = vcombine.low %v29317_v41, %v29316_v30  ;;  %v7445_v5 = vrot.slane %v7444_v42, 4  ;;  %v7467_v19 = vshll.u32 %v22866_v35, 16  ;;  %v29318_v52 = vsel %vm23119_vm5, %v27228_v61, %v26837_v37 }
 0x491   : > { %20588 = vmatmul.mubr.msk.bf16.gmra.mrb[96].mxu1 %vm1887_vm4, %v22514_v25  ;;  %21174 = vmatmul.mubr.msk.bf16.gmra.mrb[32].mxu0 %vm1887_vm4, %v29314_v15  ;;  %v27431_v25 = vcombine.low %v7376_v32, %v29318_v52  ;;  %v27433_v16 = vcombine.low %v7396_v22, %v7406_v2  ;;  %v7454_v1 = vor.u32 %v7453_v45, %v7449_v26  ;;  %v22517_v22 = vld [vmem:[%s23101_s5 + $0x1f8] sm:$0xff]   ;;  %v14963_v28 = vrot.slane %v14961_v40, 4 }
 0x492   : > { %20591 = vmatprep.mubr.msk.bf16.mxu1 %vm1887_vm4, %v22515_v54  ;;  %21177 = vmatprep.mubr.msk.bf16.mxu0 %vm1887_vm4, %v29315_v12  ;;  %v27438_v38 = vcombine.low %v7416_v53, %v7426_v47  ;;  %v27444_v37 = vsel %vm23613_vm8, %v19118_v63, %v14958_v3  ;;  %v27448_v61 = vsel %vm23613_vm8, %v14960_v49, %v14961_v40  ;;  %v7471_v6 = vshrl.u32 %v22866_v35, 16  ;;  %v22868_v2 = vld [vmem:[%s23101_s5 + $0x17c] sm:$0xf]  ;;  %v18217_v63 = vld [vmem:[%s23101_s5 + $0x18c] sm:$0xf] }
 0x493   : > { %v7440_v32 = vsel %vm23119_vm5, %v7435_v27, %v27365_v23  ;;  %v7464_v21 = vor.u32 %v7463_v4, %v27409_v33  ;;  %v7450_v59 = vsel %vm23119_vm5, %v7445_v5, %v7449_v26  ;;  %v27457_v3 = vrot.slane %v7467_v19, 5  ;;  %v22869_v23 = vld [vmem:[%s23101_s5 + $0x19c] sm:$0xf]  ;;  %v22870_v49 = vld [vmem:[%s23101_s5 + $0x180] sm:$0xf] }
 0x494   : > { %v14964_v50 = vrot.slane %v22867_v58, 5  ;;  %v7477_v42 = vshll.u32 %v22868_v2, 16  ;;  %v7455_v45 = vrot.slane %v7454_v1, 4  ;;  %v14967_v15 = vrot.slane %v22869_v23, 5  ;;  %v22871_v12 = vld [vmem:[%s23101_s5 + $0x184] sm:$0xf] }
 0x495   : > { %v7481_v47 = vshrl.u32 %v22868_v2, 16  ;;  %v29319_v26 = vcombine.low %v27075_v0, %v27079_v17  ;;  %v7487_v7 = vshll.u32 %v22870_v49, 16  ;;  %v7491_v40 = vshrl.u32 %v22870_v49, 16 }
 0x496   : > { %v7497_v27 = vshll.u32 %v22871_v12, 16  ;;  %v7501_v4 = vshrl.u32 %v22871_v12, 16  ;;  %v29320_v30 = vcombine.low %v27083_v14, %v27095_v18  ;;  %v27477_v41 = vcombine.low %v7440_v32, %v7450_v59  ;;  %v22875_v12 = vld [vmem:[%s23101_s5 + $0x188] sm:$0x1] }
 0x497   : > { %v7465_v0 = vrot.slane %v7464_v21, 4  ;;  %v27481_v17 = vsel %vm23613_vm8, %v14963_v28, %v14964_v50  ;;  %v7473_v5 = vrot.slane %v7471_v6, 4  ;;  %v14966_v35 = vrot.slane %v14964_v50, 4  ;;  %v22518_v21 = vld [vmem:[%s23101_s5 + $0x200] sm:$0xff]   ;;  %v22519_v50 = vld [vmem:[%s23101_s5 + $0x208] sm:$0xff]  }
 0x498   : > { %v27483_v19 = vrot.slane %v7477_v42, 5  ;;  %v7512_v52 = vshrl.u32 %v18217_v63, 16  ;;  %v7515_v1 = vshll.u32 %v18217_v63, 16  ;;  %v7460_v14 = vsel %vm23119_vm5, %v7455_v45, %v27409_v33  ;;  %v22873_v45 = vld [vmem:[%s23101_s5 + $0x1a0] sm:$0xf] }
 0x499   : > { %20592 = vmatmul.mubr.msk.bf16.gmra.mrb[100].mxu1 %vm1887_vm4, %v22516_v43  ;;  %21178 = vmatmul.mubr.msk.bf16.gmra.mrb[36].mxu0 %vm1887_vm4, %v29319_v26  ;;  %v7483_v18 = vrot.slane %v7481_v47, 4  ;;  %v22872_v43 = vld [vmem:[%s23101_s5 + $0x190] sm:$0xf]  ;;  %v27490_v28 = vrot.slane %v7487_v7, 5  ;;  %v7493_v6 = vrot.slane %v7491_v40, 4  ;;  %v27492_v59 = vrot.slane %v7497_v27, 5 }
 0x49a   : > { %20595 = vmatprep.mubr.msk.bf16.mxu1 %vm1887_vm4, %v22517_v22  ;;  %21181 = vmatprep.mubr.msk.bf16.mxu0 %vm1887_vm4, %v29320_v30  ;;  %v7521_v22 = vshll.u32 %v22872_v43, 16  ;;  %v7525_v32 = vshrl.u32 %v22872_v43, 16  ;;  %v7503_v58 = vrot.slane %v7501_v4, 4  ;;  %v7470_v2 = vsel %vm23119_vm5, %v7465_v0, %v27457_v3  ;;  %v22874_v63 = vld [vmem:[%s23101_s5 + $0x1a4] sm:$0xf] }
 0x49b   : > { %v7474_v33 = vor.u32 %v7473_v5, %v27457_v3  ;;  %v14969_v42 = vrot.slane %v14967_v15, 4  ;;  %v14970_v23 = vrot.slane %v22873_v45, 5  ;;  %v27502_v47 = vsel %vm23613_vm8, %v14966_v35, %v14967_v15  ;;  %v22876_v35 = vld [vmem:[%s23101_s5 + $0x1a8] sm:$0xf] }
 0x49c   : > { %v14973_v26 = vrot.slane %v22874_v63, 5  ;;  %v7514_v49 = vrot.slane %v7512_v52, 4  ;;  %v7517_v7 = vrot.slane %v7515_v1, 5  ;;  %v7484_v40 = vor.u32 %v7483_v18, %v27483_v19  ;;  %v22877_v18 = vld [vmem:[%s23101_s5 + $0x194] sm:$0xf] }
 0x49d   : > { %v7507_v27 = vshll.u32 %v22875_v12, 16  ;;  %v27507_v4 = vrot.slane %v7521_v22, 5  ;;  %v7527_v3 = vrot.slane %v7525_v32, 4  ;;  %v29321_v30 = vcombine.low %v27099_v20, %v27111_v60  ;;  %v22520_v63 = vld [vmem:[%s23101_s5 + $0x210] sm:$0xff]  }
 0x49e   : > { %v27514_v15 = vcombine.low %v7460_v14, %v7470_v2  ;;  %v7494_v0 = vor.u32 %v7493_v6, %v27490_v28  ;;  %v7504_v5 = vor.u32 %v7503_v58, %v27492_v59  ;;  %v14976_v52 = vrot.slane %v22876_v35, 5  ;;  %v22880_v20 = vld [vmem:[%s23101_s5 + $0x1b4] sm:$0xf] }
 0x49f   : > { %v29322_v1 = vcombine.low %v27116_v56, %v27120_v8  ;;  %v27526_v60 = vrot.slane %v7474_v33, 4  ;;  %v14972_v14 = vrot.slane %v14970_v23, 4  ;;  %v7531_v43 = vshll.u32 %v22877_v18, 16 }
 0x4a0   : > { %v7518_v22 = vor.u32 %v7517_v7, %v7514_v49  ;;  %v7535_v32 = vshrl.u32 %v22877_v18, 16  ;;  %v7485_v56 = vrot.slane %v7484_v40, 4  ;;  %v7509_v8 = vrot.slane %v7507_v27, 5  ;;  %v22879_v7 = vld [vmem:[%s23101_s5 + $0x1ac] sm:$0x1]  ;;  %v22521_v18 = vld [vmem:[%s23101_s5 + $0x21c] sm:$0xff]  }
 0x4a1   : > { %20596 = vmatmul.mubr.msk.bf16.gmra.mrb[104].mxu1 %vm1887_vm4, %v22518_v21  ;;  %21182 = vmatmul.mubr.msk.bf16.gmra.mrb[40].mxu0 %vm1887_vm4, %v29321_v30  ;;  %v22878_v21 = vld [vmem:[%s23101_s5 + $0x198] sm:$0xf]  ;;  %v14975_v2 = vrot.slane %v14973_v26, 4  ;;  %v7528_v33 = vor.u32 %v7527_v3, %v27507_v4  ;;  %v7495_v12 = vrot.slane %v7494_v0, 4  ;;  %v7505_v30 = vrot.slane %v7504_v5, 4 }
 0x4a2   : > { %20599 = vmatprep.mubr.msk.bf16.mxu1 %vm1887_vm4, %v22519_v50  ;;  %21185 = vmatprep.mubr.msk.bf16.mxu0 %vm1887_vm4, %v29322_v1  ;;  %v7541_v6 = vshll.u32 %v22878_v21, 16  ;;  %v7545_v58 = vshrl.u32 %v22878_v21, 16  ;;  %v14978_v49 = vrot.slane %v14976_v52, 4  ;;  %v14979_v35 = vrot.slane %v22879_v7, 5  ;;  %v19103_v21 = vld [vmem:[%s23101_s5 + $0x1b0] sm:$0xe] }
 0x4a3   : > { %v7480_v40 = vsel %vm23119_vm5, %v27526_v60, %v27483_v19  ;;  %v27546_v27 = vsel %vm23613_vm8, %v14969_v42, %v14970_v23  ;;  %v7533_v3 = vrot.slane %v7531_v43, 5  ;;  %v14983_v0 = vrot.slane %v22880_v20, 5 }
 0x4a4   : > { %v27530_v50 = vpop.f32.mrb[0].mxu1  ;;  %v7519_v53 = vrot.slane %v7518_v22, 4  ;;  %v7537_v7 = vrot.slane %v7535_v32, 4  ;;  %v27552_v13 = vrot.slane %v7541_v6, 5  ;;  %v7547_v62 = vrot.slane %v7545_v58, 4 }
 0x4a5   : > { %29323 = vst [vmem:[#allocation8_spill] sm:$0xff] %v27530_v50  ;;  %v27533_v45 = vpop.f32.mrb[1].mxu1  ;;  %v7490_v19 = vsel %vm23119_vm5, %v7485_v56, %v27490_v28  ;;  %v27559_v42 = vsel %vm23613_vm8, %v14972_v14, %v14973_v26  ;;  %v27563_v23 = vsel %vm23613_vm8, %v14975_v2, %v14976_v52  ;;  %v7529_v20 = vrot.slane %v7528_v33, 4  ;;  %v22883_v2 = vld [vmem:[%s23101_s5 + $0x1bc] sm:$0xf] }
 0x4a6   : > { %29324 = vst [vmem:[#allocation24_spill] sm:$0xff] %v27533_v45  ;;  %v27537_v1 = vpop.f32.mrb[2].mxu1  ;;  %v29327_v60 = vcombine.low %v27139_v10, %v27143_v39  ;;  %v7500_v28 = vsel %vm23119_vm5, %v7495_v12, %v27492_v59  ;;  %v7510_v26 = vsel %vm23119_vm5, %v7505_v30, %v7509_v8  ;;  %v27577_v52 = vsel %vm23613_vm8, %v14978_v49, %v14979_v35  ;;  %v22881_v39 = vld [vmem:[%s23101_s5 + $0x1b8] sm:$0xf]  ;;  %v22882_v59 = vld [vmem:[%s23101_s5 + $0x19c] sm:$0xf] }
 0x4a7   : > { %29325 = vst [vmem:[#allocation5_spill] sm:$0xff] %v27537_v1  ;;  %v27550_v5 = vpop.f32.mrb[3].mxu1  ;;  %v29328_v14 = vcombine.low %v27147_v9, %v27151_v29  ;;  %v19119_v10 = vrot.slane %v19103_v21, 9  ;;  %v14986_v43 = vrot.slane %v22881_v39, 5  ;;  %v7551_v22 = vshll.u32 %v22882_v59, 16  ;;  %v22522_v35 = vld [vmem:[%s23101_s5 + $0x224] sm:$0xff]  }
 0x4a8   : > { %29326 = vst [vmem:[#allocation7_spill] sm:$0xff] %v27550_v5  ;;  %v7555_v32 = vshrl.u32 %v22882_v59, 16  ;;  %v7524_v6 = vsel %vm23119_vm5, %v7519_v53, %v27507_v4  ;;  %v14985_v58 = vrot.slane %v14983_v0, 4  ;;  %v7538_v56 = vor.u32 %v7537_v7, %v7533_v3  ;;  %v22523_v21 = vld [vmem:[%s23101_s5 + $0x22c] sm:$0xff]  }
 0x4a9   : > { %20600 = vmatmul.mubr.msk.bf16.gmra.mrb[108].mxu1 %vm1887_vm4, %v22520_v63  ;;  %21186 = vmatmul.mubr.msk.bf16.gmra.mrb[44].mxu0 %vm1887_vm4, %v29327_v60  ;;  %v7548_v8 = vor.u32 %v7547_v62, %v27552_v13  ;;  %v7534_v29 = vsel %vm23119_vm5, %v7529_v20, %v7533_v3  ;;  %v14989_v33 = vrot.slane %v22883_v2, 5  ;;  %v22884_v63 = vld [vmem:[%s23101_s5 + $0x1a0] sm:$0xf]  ;;  %v27599_v53 = vcombine.low %v7480_v40, %v7490_v19  ;;  %v18226_v59 = vld [vmem:[%s23101_s5 + $0x1b0] sm:$0xf] }
 0x4aa   : > { %20603 = vmatprep.mubr.msk.bf16.mxu1 %vm1887_vm4, %v22521_v18  ;;  %21189 = vmatprep.mubr.msk.bf16.mxu0 %vm1887_vm4, %v29328_v14  ;;  %v7561_v12 = vshll.u32 %v22884_v63, 16  ;;  %v7565_v30 = vshrl.u32 %v22884_v63, 16  ;;  %v27603_v62 = vcombine.low %v7500_v28, %v7510_v26  ;;  %v27612_v7 = vsel %vm23613_vm8, %v19119_v10, %v14983_v0  ;;  %v22885_v63 = vld [vmem:[%s23101_s5 + $0x1c0] sm:$0xf] }
 0x4ab   : > { %v7553_v20 = vrot.slane %v7551_v22, 5  ;;  %v14988_v40 = vrot.slane %v14986_v43, 4  ;;  %v7557_v19 = vrot.slane %v7555_v32, 4  ;;  %v27616_v14 = vcombine.low %v7524_v6, %v7534_v29  ;;  %v29333_v32 = vld [vmem:[#allocation12_spill] sm:$0xff]  ;;  %v29334_v18 = vld [vmem:[#allocation14_spill] sm:$0xff] }
 0x4ac   : > { %v27590_v9 = vpop.f32.mrb[4].mxu1  ;;  %v27620_v28 = vsel %vm23613_vm8, %v14985_v58, %v14986_v43  ;;  %v7539_v26 = vrot.slane %v7538_v56, 4  ;;  %v7549_v39 = vrot.slane %v7548_v8, 4  ;;  %v14991_v2 = vrot.slane %v14989_v33, 4  ;;  %v22886_v6 = vld [vmem:[%s23101_s5 + $0x1a4] sm:$0xf] }
 0x4ad   : > { %29329 = vst [vmem:[#allocation9_spill] sm:$0xff] %v27590_v9  ;;  %v27596_v49 = vpop.f32.mrb[5].mxu1  ;;  %v14992_v0 = vrot.slane %v22885_v63, 5  ;;  %v27624_v10 = vrot.slane %v7561_v12, 5  ;;  %v7567_v22 = vrot.slane %v7565_v30, 4  ;;  %v29335_v4 = vcombine.low %v29333_v32, %v29334_v18  ;;  %v29336_v12 = vld [vmem:[#allocation15_spill] sm:$0xff] }
 0x4ae   : > { %29330 = vst [vmem:[#allocation13_spill] sm:$0xff] %v27596_v49  ;;  %v27607_v3 = vpop.f32.mrb[6].mxu1  ;;  %v7571_v43 = vshll.u32 %v22886_v6, 16  ;;  %v7575_v58 = vshrl.u32 %v22886_v6, 16  ;;  %v22887_v56 = vld [vmem:[%s23101_s5 + $0x1a8] sm:$0xf]  ;;  %v7544_v6 = vsel %vm23119_vm5, %v7539_v26, %v27552_v13 }
 0x4af   : > { %29331 = vst [vmem:[#allocation10_spill] sm:$0xff] %v27607_v3  ;;  %v27614_v60 = vpop.f32.mrb[7].mxu1  ;;  %v7581_v8 = vshll.u32 %v22887_v56, 16  ;;  %v7585_v29 = vshrl.u32 %v22887_v56, 16  ;;  %v29337_v63 = vld [vmem:[#allocation16_spill] sm:$0xff]  ;;  %v7596_v18 = vshrl.u32 %v18226_v59, 16 }
 0x4b0   : > { %29332 = vst [vmem:[#allocation11_spill] sm:$0xff] %v27614_v60  ;;  %v29338_v30 = vcombine.low %v29336_v12, %v29337_v63  ;;  %v7599_v32 = vshll.u32 %v18226_v59, 16  ;;  %v22888_v56 = vld [vmem:[%s23101_s5 + $0x1b4] sm:$0xf]  ;;  %v22889_v59 = vld [vmem:[%s23101_s5 + $0x1c4] sm:$0xf] }
 0x4b1   : > { %20604 = vmatmul.mubr.msk.bf16.gmra.mrb[112].mxu1 %vm1887_vm4, %v22522_v35  ;;  %21190 = vmatmul.mubr.msk.bf16.gmra.mrb[48].mxu0 %vm1887_vm4, %v29335_v4  ;;  %v27640_v35 = vsel %vm23613_vm8, %v14988_v40, %v14989_v33  ;;  %v7558_v4 = vor.u32 %v7557_v19, %v7553_v20  ;;  %v7605_v12 = vshll.u32 %v22888_v56, 16  ;;  %v7609_v63 = vshrl.u32 %v22888_v56, 16  ;;  %v22524_v26 = vld [vmem:[%s23101_s5 + $0x234] sm:$0xff]  }
 0x4b2   : > { %20607 = vmatprep.mubr.msk.bf16.mxu1 %vm1887_vm4, %v22523_v21  ;;  %21193 = vmatprep.mubr.msk.bf16.mxu0 %vm1887_vm4, %v29338_v30  ;;  %29339 = vst [vmem:[#allocation2_spill] sm:$0xff] %v27640_v35  ;;  %v7554_v21 = vsel %vm23119_vm5, %v7549_v39, %v7553_v20  ;;  %v27652_v33 = vsel %vm23613_vm8, %v14991_v2, %v14992_v0  ;;  %v14994_v19 = vrot.slane %v14992_v0, 4  ;;  %v14995_v54 = vrot.slane %v22889_v59, 5  ;;  %v22525_v2 = vld [vmem:[%s23101_s5 + $0x240] sm:$0xff]  }
 0x4b3   : > { %29341 = vst [vmem:[#allocation14_spill] sm:$0xff] %v27652_v33  ;;  %v7568_v40 = vor.u32 %v7567_v22, %v27624_v10  ;;  %v27659_v20 = vrot.slane %v7571_v43, 5  ;;  %v7577_v39 = vrot.slane %v7575_v58, 4  ;;  %v27661_v60 = vrot.slane %v7581_v8, 5  ;;  %v22890_v43 = vld [vmem:[%s23101_s5 + $0x1ac] sm:$0x1] }
 0x4b4   : > { %v27648_v30 = vpop.f32.mrb[8].mxu1  ;;  %v7587_v56 = vrot.slane %v7585_v29, 4  ;;  %v7559_v0 = vrot.slane %v7558_v4, 4  ;;  %v7598_v3 = vrot.slane %v7596_v18, 4  ;;  %v7601_v49 = vrot.slane %v7599_v32, 5  ;;  %v29346_v18 = vld [vmem:[#allocation17_spill] sm:$0xff] }
 0x4b5   : > { %29340 = vst [vmem:[#allocation12_spill] sm:$0xff] %v27648_v30  ;;  %v27656_v13 = vpop.f32.mrb[9].mxu1  ;;  %v7591_v9 = vshll.u32 %v22890_v43, 16  ;;  %v27673_v58 = vrot.slane %v7605_v12, 5  ;;  %v7611_v8 = vrot.slane %v7609_v63, 4  ;;  %v14997_v5 = vrot.slane %v14995_v54, 4 }
 0x4b6   : > { %29342 = vst [vmem:[#allocation15_spill] sm:$0xff] %v27656_v13  ;;  %v27663_v30 = vpop.f32.mrb[10].mxu1  ;;  %v27670_v13 = vcombine.low %v7544_v6, %v7554_v21  ;;  %v22891_v22 = vld [vmem:[%s23101_s5 + $0x1c8] sm:$0xf]  ;;  %v29347_v32 = vld [vmem:[#allocation18_spill] sm:$0xff]  ;;  %v27685_v21 = vsel %vm23613_vm8, %v14994_v19, %v14995_v54  ;;  %v7578_v12 = vor.u32 %v7577_v39, %v27659_v20  ;;  %v7588_v63 = vor.u32 %v7587_v56, %v27661_v60 }
 0x4b7   : > { %29343 = vst [vmem:[#allocation16_spill] sm:$0xff] %v27663_v30  ;;  %v27668_v59 = vpop.f32.mrb[11].mxu1  ;;  %v7569_v30 = vrot.slane %v7568_v40, 4  ;;  %v14998_v4 = vrot.slane %v22891_v22, 5  ;;  %v29348_v6 = vcombine.low %v29346_v18, %v29347_v32  ;;  %v29349_v40 = vcombine.low %v27211_v24, %v27221_v11  ;;  %v22892_v22 = vld [vmem:[%s23101_s5 + $0x1cc] sm:$0xf] }
 0x4b8   : > { %29344 = vst [vmem:[#allocation25_spill] sm:$0xff] %v27668_v59  ;;  %29345 = vst [vmem:[#allocation26_spill] sm:$0xff] %v27670_v13  ;;  %v15001_v43 = vrot.slane %v22892_v22, 5  ;;  %v7602_v54 = vor.u32 %v7601_v49, %v7598_v3  ;;  %v22893_v19 = vld [vmem:[%s23101_s5 + $0x1b8] sm:$0xf]  ;;  %v7593_v18 = vrot.slane %v7591_v9, 5  ;;  %v7612_v56 = vor.u32 %v7611_v8, %v27673_v58 }
 0x4b9   : > { %20608 = vmatmul.mubr.msk.bf16.gmra.mrb[116].mxu1 %vm1887_vm4, %v22524_v26  ;;  %21194 = vmatmul.mubr.msk.bf16.gmra.mrb[52].mxu0 %vm1887_vm4, %v29348_v6  ;;  %v7564_v26 = vsel %vm23119_vm5, %v7559_v0, %v27624_v10  ;;  %v7615_v39 = vshll.u32 %v22893_v19, 16  ;;  %v22894_v32 = vld [vmem:[%s23101_s5 + $0x1d8] sm:$0xf]  ;;  %v7619_v11 = vshrl.u32 %v22893_v19, 16  ;;  %v7574_v10 = vsel %vm23119_vm5, %v7569_v30, %v27659_v20  ;;  %v22895_v3 = vld [vmem:[%s23101_s5 + $0x1bc] sm:$0xf] }
 0x4ba   : > { %20611 = vmatprep.mubr.msk.bf16.mxu1 %vm1887_vm4, %v22525_v2  ;;  %21197 = vmatprep.mubr.msk.bf16.mxu0 %vm1887_vm4, %v29349_v40  ;;  %v19104_v2 = vld [vmem:[%s23101_s5 + $0x1d4] sm:$0xe]  ;;  %v15008_v24 = vrot.slane %v22894_v32, 5  ;;  %v27709_v49 = vsel %vm23613_vm8, %v14997_v5, %v14998_v4  ;;  %v7625_v9 = vshll.u32 %v22895_v3, 16  ;;  %v7629_v0 = vshrl.u32 %v22895_v3, 16  ;;  %v22526_v40 = vld [vmem:[%s23101_s5 + $0x248] sm:$0xff]  }
 0x4bb   : > { %29351 = vst [vmem:[#allocation18_spill] sm:$0xff] %v27709_v49  ;;  %v7579_v22 = vrot.slane %v7578_v12, 4  ;;  %v7589_v32 = vrot.slane %v7588_v63, 4  ;;  %v15000_v19 = vrot.slane %v14998_v4, 4  ;;  %v22896_v29 = vld [vmem:[%s23101_s5 + $0x1d0] sm:$0x1]  ;;  %v27722_v12 = vcombine.low %v7564_v26, %v7574_v10 }
 0x4bc   : > { %v27702_v6 = vpop.f32.mrb[12].mxu1  ;;  %v22527_v30 = vld [vmem:[%s23101_s5 + $0x250] sm:$0xff]   ;;  %v15003_v20 = vrot.slane %v15001_v43, 4  ;;  %v7603_v1 = vrot.slane %v7602_v54, 4  ;;  %v7617_v5 = vrot.slane %v7615_v39, 5  ;;  %v19120_v45 = vrot.slane %v19104_v2, 9 }
 0x4bd   : > { %29350 = vst [vmem:[#allocation17_spill] sm:$0xff] %v27702_v6  ;;  %v27712_v8 = vpop.f32.mrb[13].mxu1  ;;  %v15004_v6 = vrot.slane %v22896_v29, 5  ;;  %v7613_v3 = vrot.slane %v7612_v56, 4  ;;  %v15010_v33 = vrot.slane %v15008_v24, 4  ;;  %v7621_v13 = vrot.slane %v7619_v11, 4 }
 0x4be   : > { %29352 = vst [vmem:[#allocation27_spill] sm:$0xff] %v27712_v8  ;;  %v27716_v59 = vpop.f32.mrb[14].mxu1  ;;  %v22897_v8 = vld [vmem:[%s23101_s5 + $0x1dc] sm:$0xf]  ;;  %v27724_v4 = vrot.slane %v7625_v9, 5  ;;  %v7631_v29 = vrot.slane %v7629_v0, 4  ;;  %v7584_v56 = vsel %vm23119_vm5, %v7579_v22, %v27661_v60  ;;  %v7594_v26 = vsel %vm23119_vm5, %v7589_v32, %v7593_v18 }
 0x4bf   : > { %29353 = vst [vmem:[#allocation28_spill] sm:$0xff] %v27716_v59  ;;  %v27719_v50 = vpop.f32.mrb[15].mxu1  ;;  %v15011_v35 = vrot.slane %v22897_v8, 5  ;;  %v22898_v63 = vld [vmem:[%s23101_s5 + $0x1c0] sm:$0xf]  ;;  %v29355_v54 = vld [vmem:[#allocation19_spill] sm:$0xff]  ;;  %v27739_v11 = vsel %vm23613_vm8, %v15000_v19, %v15001_v43  ;;  %v27748_v8 = vsel %vm23613_vm8, %v15003_v20, %v15004_v6  ;;  %v7608_v60 = vsel %vm23119_vm5, %v7603_v1, %v27673_v58 }
 0x4c0   : > { %29354 = vst [vmem:[#allocation29_spill] sm:$0xff] %v27719_v50  ;;  %v7639_v59 = vshrl.u32 %v22898_v63, 16  ;;  %v29356_v39 = vld [vmem:[#allocation3_spill] sm:$0xff]  ;;  %29358 = vst [vmem:[#allocation19_spill] sm:$0xff] %v27739_v11  ;;  %v29359_v10 = vld [vmem:[#allocation20_spill] sm:$0xff]  ;;  %v27755_v43 = vsel %vm23613_vm8, %v19120_v45, %v15008_v24  ;;  %v7635_v18 = vshll.u32 %v22898_v63, 16  ;;  %v7622_v6 = vor.u32 %v7621_v13, %v7617_v5 }
 0x4c1   : > { %20612 = vmatmul.mubr.msk.bf16.gmra.mrb[120].mxu1 %vm1887_vm4, %v22526_v40  ;;  %v29357_v2 = vcombine.low %v29355_v54, %v29356_v39  ;;  %v29360_v9 = vld [vmem:[#allocation21_spill] sm:$0xff]  ;;  %29362 = vst [vmem:[#allocation3_spill] sm:$0xff] %v27748_v8  ;;  %29363 = vst [vmem:[#allocation20_spill] sm:$0xff] %v27755_v43  ;;  %v7618_v40 = vsel %vm23119_vm5, %v7613_v3, %v7617_v5  ;;  %v27761_v22 = vsel %vm23613_vm8, %v15010_v33, %v15011_v35  ;;  %v22899_v32 = vld [vmem:[%s23101_s5 + $0x1e0] sm:$0xf] }
 0x4c2   : > { %20615 = vmatprep.mubr.msk.bf16.mxu1 %vm1887_vm4, %v22527_v30  ;;  %v29361_v0 = vcombine.low %v29359_v10, %v29360_v9  ;;  %29364 = vst [vmem:[#allocation21_spill] sm:$0xff] %v27761_v22  ;;  %v15014_v19 = vrot.slane %v22899_v32, 5  ;;  %v7632_v1 = vor.u32 %v7631_v29, %v27724_v4  ;;  %v7641_v58 = vrot.slane %v7639_v59, 4  ;;  %v22900_v20 = vld [vmem:[%s23101_s5 + $0x1c4] sm:$0xf]  ;;  %v22528_v54 = vld [vmem:[%s23101_s5 + $0x258] sm:$0xff]  }
 0x4c3   : > { %21198 = vmatmul.mubr.msk.bf16.gmra.mrb[56].mxu0 %vm1887_vm4, %v29357_v2  ;;  %v7645_v45 = vshll.u32 %v22900_v20, 16  ;;  %v7649_v24 = vshrl.u32 %v22900_v20, 16  ;;  %v27773_v33 = vcombine.low %v7584_v56, %v7594_v26  ;;  %v22901_v13 = vld [vmem:[%s23101_s5 + $0x1c8] sm:$0xf]  ;;  %v27782_v10 = vrot.slane %v7635_v18, 5 }
 0x4c4   : > { %21201 = vmatprep.mubr.msk.bf16.mxu0 %vm1887_vm4, %v29361_v0  ;;  %v27764_v30 = vpop.f32.mrb[16].mxu1  ;;  %v7655_v5 = vshll.u32 %v22901_v13, 16  ;;  %v7659_v39 = vshrl.u32 %v22901_v13, 16  ;;  %v15013_v9 = vrot.slane %v15011_v35, 4  ;;  %v27786_v32 = vcombine.low %v7608_v60, %v7618_v40  ;;  %v22902_v20 = vld [vmem:[%s23101_s5 + $0x1e4] sm:$0xf] }
 0x4c5   : > { %29365 = vst [vmem:[#allocation30_spill] sm:$0xff] %v27764_v30  ;;  %v27768_v63 = vpop.f32.mrb[17].mxu1  ;;  %29367 = vst [vmem:[#allocation32_spill] sm:$0xff] %v27773_v33  ;;  %v27788_v56 = vrot.slane %v7622_v6, 4  ;;  %v15016_v26 = vrot.slane %v15014_v19, 4  ;;  %v15017_v13 = vrot.slane %v22902_v20, 5  ;;  %v7642_v59 = vor.u32 %v7641_v58, %v27782_v10 }
 0x4c6   : > { %29366 = vst [vmem:[#allocation31_spill] sm:$0xff] %v27768_v63  ;;  %v27776_v2 = vpop.f32.mrb[18].mxu1  ;;  %29370 = vst [vmem:[#allocation35_spill] sm:$0xff] %v27786_v32  ;;  %v18235_v3 = vld [vmem:[%s23101_s5 + $0x1d4] sm:$0xf]  ;;  %v27795_v29 = vrot.slane %v7645_v45, 5 }
 0x4c7   : > { %29368 = vst [vmem:[#allocation33_spill] sm:$0xff] %v27776_v2  ;;  %v27784_v0 = vpop.f32.mrb[19].mxu1  ;;  %v27792_v2 = vrot.slane %v7632_v1, 4  ;;  %v7651_v18 = vrot.slane %v7649_v24, 4  ;;  %v29371_v35 = vld [vmem:[#allocation22_spill] sm:$0xff]  ;;  %v27802_v40 = vrot.slane %v7655_v5, 5 }
 0x4c8   : > { %29369 = vst [vmem:[#allocation34_spill] sm:$0xff] %v27784_v0  ;;  %v29372_v0 = vld [vmem:[#allocation23_spill] sm:$0xff]  ;;  %v7661_v6 = vrot.slane %v7659_v39, 4  ;;  %v29374_v58 = vld [vmem:[#allocation4_spill] sm:$0xff]  ;;  %v29375_v45 = vld [vmem:[#allocation6_spill] sm:$0xff] }
 0x4c9   : > { %20616 = vmatmul.mubr.msk.bf16.gmra.mrb[124].mxu1 %vm1887_vm4, %v22528_v54  ;;  %v29373_v60 = vcombine.low %v29371_v35, %v29372_v0  ;;  %v22903_v20 = vld [vmem:[%s23101_s5 + $0x1cc] sm:$0xf]  ;;  %v29376_v24 = vcombine.low %v29374_v58, %v29375_v45  ;;  %v7680_v54 = vshrl.u32 %v18235_v3, 16  ;;  %v7683_v0 = vshll.u32 %v18235_v3, 16  ;;  %v22904_v35 = vld [vmem:[%s23101_s5 + $0x1d8] sm:$0xf] }
 0x4ca   : > { %v7665_v63 = vshll.u32 %v22903_v20, 16  ;;  %v7669_v1 = vshrl.u32 %v22903_v20, 16  ;;  %20685 = vmatprep.mubr.msk.bf16.mxu1 %vm1887_vm4, %v27421_v44  ;;  %v7693_v5 = vshrl.u32 %v22904_v35, 16  ;;  %v27818_v20 = vsel %vm23613_vm8, %v15013_v9, %v15014_v19  ;;  %v22906_v30 = vld [vmem:[%s23101_s5 + $0x1ec] sm:$0xf] }
 0x4cb   : > { %21202 = vmatmul.mubr.msk.bf16.gmra.mrb[60].mxu0 %vm1887_vm4, %v29373_v60  ;;  %v7689_v60 = vshll.u32 %v22904_v35, 16  ;;  %v27822_v44 = vsel %vm23613_vm8, %v15016_v26, %v15017_v13  ;;  %v15019_v58 = vrot.slane %v15017_v13, 4  ;;  %v22905_v35 = vld [vmem:[%s23101_s5 + $0x1e8] sm:$0xf]  ;;  %v15023_v19 = vrot.slane %v22906_v30, 5 }
 0x4cc   : > { %21205 = vmatprep.mubr.msk.bf16.mxu0 %vm1887_vm4, %v29376_v24  ;;  %v27824_v45 = vpop.f32.mrb[20].mxu1  ;;  %v7652_v24 = vor.u32 %v7651_v18, %v27795_v29  ;;  %v15020_v39 = vrot.slane %v22905_v35, 5  ;;  %v27835_v26 = vrot.slane %v7642_v59, 4  ;;  %v7662_v13 = vor.u32 %v7661_v6, %v27802_v40  ;;  %v22907_v30 = vld [vmem:[%s23101_s5 + $0x1dc] sm:$0xf] }
 0x4cd   : > { %29377 = vst [vmem:[#allocation22_spill] sm:$0xff] %v27824_v45  ;;  %v27833_v9 = vpop.f32.mrb[21].mxu1  ;;  %v27838_v45 = vrot.slane %v7665_v63, 5  ;;  %v7671_v50 = vrot.slane %v7669_v1, 4  ;;  %v7682_v3 = vrot.slane %v7680_v54, 4  ;;  %v7685_v18 = vrot.slane %v7683_v0, 5 }
 0x4ce   : > { %29378 = vst [vmem:[#allocation23_spill] sm:$0xff] %v27833_v9  ;;  %v27840_v22 = vpop.f32.mrb[22].mxu1  ;;  %v27842_v43 = vrot.slane %v7689_v60, 5  ;;  %v7695_v35 = vrot.slane %v7693_v5, 4  ;;  %v7699_v9 = vshll.u32 %v22907_v30, 16  ;;  %v7703_v59 = vshrl.u32 %v22907_v30, 16 }
 0x4cf   : > { %29379 = vst [vmem:[#allocation4_spill] sm:$0xff] %v27840_v22  ;;  %v27844_v32 = vpop.f32.mrb[23].mxu1  ;;  %v22908_v8 = vld [vmem:[%s23101_s5 + $0x1e0] sm:$0xf]  ;;  %v27848_v63 = vrot.slane %v7652_v24, 4  ;;  %v27852_v1 = vsel %vm23613_vm8, %v15019_v58, %v15020_v39  ;;  %v15022_v54 = vrot.slane %v15020_v39, 4  ;;  %v29381_v5 = vcombine.low %v27329_v34, %v27340_v46 }
 0x4d0   : > { %29380 = vst [vmem:[#allocation6_spill] sm:$0xff] %v27844_v32  ;;  %v7709_v11 = vshll.u32 %v22908_v8, 16  ;;  %v7713_v6 = vshrl.u32 %v22908_v8, 16  ;;  %v22909_v0 = vld [vmem:[%s23101_s5 + $0x1d0] sm:$0x1]  ;;  %v7672_v58 = vor.u32 %v7671_v50, %v27838_v45  ;;  %v15025_v24 = vrot.slane %v15023_v19, 4 }
 0x4d1   : > { %v7675_v60 = vshll.u32 %v22909_v0, 16  ;;  %20686 = vmatmul.mubr.msk.bf16.vlgmr.msra.gmra.mrb[64].mxu1 %vm1887_vm4, %v27431_v25  ;;  %v22910_v39 = vld [vmem:[%s23101_s5 + $0x1f0] sm:$0xf]  ;;  %v29382_v25 = vcombine.low %v27363_v51, %v27382_v55  ;;  %v27873_v34 = vrot.slane %v7662_v13, 4  ;;  %v7686_v46 = vor.u32 %v7685_v18, %v7682_v3  ;;  %v22911_v8 = vld [vmem:[%s23101_s5 + $0x1fc] sm:$0xf] }
 0x4d2   : > { %v15026_v30 = vrot.slane %v22910_v39, 5  ;;  %20689 = vmatprep.mubr.msk.bf16.mxu1 %vm1887_vm4, %v27433_v16  ;;  %v7696_v0 = vor.u32 %v7695_v35, %v27842_v43  ;;  %v15033_v50 = vrot.slane %v22911_v8, 5  ;;  %v27878_v32 = vrot.slane %v7699_v9, 5  ;;  %v22912_v13 = vld [vmem:[%s23101_s5 + $0x1f4] sm:$0x1] }
 0x4d3   : > { %21206 = vmatmul.mubr.msk.bf16.gmra.mrb[64].mxu0 %vm1887_vm4, %v29381_v5  ;;  %v19105_v5 = vld [vmem:[%s23101_s5 + $0x1f8] sm:$0xe]  ;;  %v7705_v39 = vrot.slane %v7703_v59, 4  ;;  %v27880_v22 = vrot.slane %v7709_v11, 5  ;;  %v7715_v16 = vrot.slane %v7713_v6, 4  ;;  %v7658_v51 = vsel %vm23119_vm5, %v27848_v63, %v27802_v40 }
 0x4d4   : > { %21209 = vmatprep.mubr.msk.bf16.mxu0 %vm1887_vm4, %v29382_v25  ;;  %v27882_v33 = vpop.f32.mrb[24].mxu1  ;;  %v27890_v55 = vsel %vm23613_vm8, %v15022_v54, %v15023_v19  ;;  %v7677_v3 = vrot.slane %v7675_v60, 5  ;;  %v15029_v9 = vrot.slane %v22912_v13, 5  ;;  %v7673_v11 = vrot.slane %v7672_v58, 4  ;;  %v22913_v6 = vld [vmem:[%s23101_s5 + $0x200] sm:$0xf] }
 0x4d5   : > { %29383 = vst [vmem:[#allocation36_spill] sm:$0xff] %v27882_v33  ;;  %v27893_v18 = vpop.f32.mrb[25].mxu1  ;;  %v15028_v35 = vrot.slane %v15026_v30, 4  ;;  %v19121_v59 = vrot.slane %v19105_v5, 9  ;;  %v15036_v8 = vrot.slane %v22913_v6, 5  ;;  %v7687_v33 = vrot.slane %v7686_v46, 4 }
 0x4d6   : > { %29384 = vst [vmem:[#allocation37_spill] sm:$0xff] %v27893_v18  ;;  %v27896_v25 = vpop.f32.mrb[26].mxu1  ;;  %v7697_v40 = vrot.slane %v7696_v0, 4  ;;  %v15035_v63 = vrot.slane %v15033_v50, 4  ;;  %v22914_v49 = vld [vmem:[%s23101_s5 + $0x1e4] sm:$0xf]  ;;  %v7668_v60 = vsel %vm23119_vm5, %v27873_v34, %v27838_v45  ;;  %v27907_v58 = vsel %vm23613_vm8, %v15025_v24, %v15026_v30 }
 0x4d7   : > { %29385 = vst [vmem:[#allocation38_spill] sm:$0xff] %v27896_v25  ;;  %v7719_v19 = vshll.u32 %v22914_v49, 16  ;;  %v27899_v54 = vpop.f32.mrb[27].mxu1  ;;  %v7706_v5 = vor.u32 %v7705_v39, %v27878_v32  ;;  %v7716_v13 = vor.u32 %v7715_v16, %v27880_v22  ;;  %v22915_v46 = vld [vmem:[%s23101_s5 + $0x204] sm:$0xf]  ;;  %v7723_v6 = vshrl.u32 %v22914_v49, 16 }
 0x4d8   : > { %29386 = vst [vmem:[#allocation39_spill] sm:$0xff] %v27899_v54  ;;  %v15039_v0 = vrot.slane %v22915_v46, 5  ;;  %v22916_v25 = vld [vmem:[%s23101_s5 + $0x1e8] sm:$0xf]  ;;  %v29387_v45 = vcombine.low %v27390_v31, %v27407_v57  ;;  %v7678_v24 = vsel %vm23119_vm5, %v7673_v11, %v7677_v3  ;;  %v27923_v30 = vsel %vm23613_vm8, %v15028_v35, %v15029_v9 }
 0x4d9   : > { %v7729_v18 = vshll.u32 %v22916_v25, 16  ;;  %v7733_v54 = vshrl.u32 %v22916_v25, 16  ;;  %20690 = vmatmul.mubr.msk.bf16.gmra.mrb[68].mxu1 %vm1887_vm4, %v27438_v38  ;;  %v27927_v49 = vsel %vm23613_vm8, %v19121_v59, %v15033_v50  ;;  %v29388_v38 = vcombine.low %v27444_v37, %v27448_v61  ;;  %v22917_v3 = vld [vmem:[%s23101_s5 + $0x208] sm:$0xf] }
 0x4da   : > { %20693 = vmatprep.mubr.msk.bf16.mxu1 %vm1887_vm4, %v27477_v41  ;;  %v7692_v31 = vsel %vm23119_vm5, %v7687_v33, %v27842_v43  ;;  %v7702_v57 = vsel %vm23119_vm5, %v7697_v40, %v27878_v32  ;;  %v27943_v34 = vsel %vm23613_vm8, %v15035_v63, %v15036_v8  ;;  %v7721_v50 = vrot.slane %v7719_v19, 5 }
 0x4db   : > { %21210 = vmatmul.mubr.msk.bf16.gmra.mrb[68].mxu0 %vm1887_vm4, %v29387_v45  ;;  %v7707_v39 = vrot.slane %v7706_v5, 4  ;;  %v7717_v41 = vrot.slane %v7716_v13, 4  ;;  %v15038_v16 = vrot.slane %v15036_v8, 4  ;;  %v15042_v37 = vrot.slane %v22917_v3, 5  ;;  %v18244_v13 = vld [vmem:[%s23101_s5 + $0x1f8] sm:$0xf] }
 0x4dc   : > { %21213 = vmatprep.mubr.msk.bf16.mxu0 %vm1887_vm4, %v29388_v38  ;;  %v27946_v61 = vpop.f32.mrb[28].mxu1  ;;  %v15041_v9 = vrot.slane %v15039_v0, 4  ;;  %v7725_v11 = vrot.slane %v7723_v6, 4  ;;  %v27948_v35 = vrot.slane %v7729_v18, 5  ;;  %v7735_v43 = vrot.slane %v7733_v54, 4 }
 0x4dd   : > { %v27950_v33 = vpop.f32.mrb[29].mxu1  ;;  %v29390_v32 = vsel %vm23119_vm5, %v27792_v2, %v27782_v10  ;;  %v29391_v59 = vsel %vm23119_vm5, %v27788_v56, %v27724_v4  ;;  %v29392_v25 = vsel %vm23119_vm5, %v27835_v26, %v27795_v29  ;;  %v27977_v63 = vcombine.low %v7668_v60, %v7678_v24  ;;  %v22918_v60 = vld [vmem:[%s23101_s5 + $0x1ec] sm:$0xf] }
 0x4de   : > { %29389 = vst [vmem:[#allocation40_spill] sm:$0xff] %v27950_v33  ;;  %v27962_v8 = vcombine.low %v29391_v59, %v29390_v32  ;;  %v27971_v40 = vcombine.low %v29392_v25, %v7658_v51  ;;  %v27975_v10 = vpop.f32.mrb[30].mxu1  ;;  %v27981_v56 = vcombine.low %v7692_v31, %v7702_v57  ;;  %v7712_v29 = vsel %vm23119_vm5, %v7707_v39, %v27880_v22  ;;  %v22919_v38 = vld [vmem:[%s23101_s5 + $0x20c] sm:$0xf]  ;;  %v22920_v57 = vld [vmem:[%s23101_s5 + $0x1f0] sm:$0xf] }
 0x4df   : > { %29393 = vst [vmem:[#allocation41_spill] sm:$0xff] %v27975_v10  ;;  %v27985_v54 = vpop.f32.mrb[31].mxu1  ;;  %v7722_v26 = vsel %vm23119_vm5, %v7717_v41, %v7721_v50  ;;  %v27994_v51 = vsel %vm23613_vm8, %v15038_v16, %v15039_v0  ;;  %v7739_v5 = vshll.u32 %v22918_v60, 16  ;;  %v28000_v46 = vsel %vm23613_vm8, %v15041_v9, %v15042_v37  ;;  %v22921_v16 = vld [vmem:[%s23101_s5 + $0x1fc] sm:$0xf] }
 0x4e0   : > { %29394 = vst [vmem:[#allocation42_spill] sm:$0xff] %v27985_v54  ;;  %v7726_v6 = vor.u32 %v7725_v11, %v7721_v50  ;;  %v7736_v45 = vor.u32 %v7735_v43, %v27948_v35  ;;  %v7743_v24 = vshrl.u32 %v22918_v60, 16  ;;  %v29395_v22 = vcombine.low %v27481_v17, %v27502_v47  ;;  %v22922_v11 = vld [vmem:[%s23101_s5 + $0x210] sm:$0xf]  ;;  %v22923_v25 = vld [vmem:[%s23101_s5 + $0x1f4] sm:$0x1] }
 0x4e1   : > { %20694 = vmatmul.mubr.msk.bf16.gmra.mrb[72].mxu1 %vm1887_vm4, %v27514_v15  ;;  %v15044_v0 = vrot.slane %v15042_v37, 4  ;;  %v15045_v31 = vrot.slane %v22919_v38, 5  ;;  %v7749_v39 = vshll.u32 %v22920_v57, 16  ;;  %v7753_v41 = vshrl.u32 %v22920_v57, 16  ;;  %v22925_v37 = vld [vmem:[%s23101_s5 + $0x204] sm:$0xf] }
 0x4e2   : > { %20697 = vmatprep.mubr.msk.bf16.mxu1 %vm1887_vm4, %v27599_v53  ;;  %v29396_v50 = vcombine.low %v27546_v27, %v27559_v42  ;;  %v28017_v15 = vcombine.low %v7712_v29, %v7722_v26  ;;  %v7764_v17 = vshrl.u32 %v18244_v13, 16  ;;  %v7767_v47 = vshll.u32 %v18244_v13, 16 }
 0x4e3   : > { %21214 = vmatmul.mubr.msk.bf16.gmra.mrb[72].mxu0 %vm1887_vm4, %v29395_v22  ;;  %v7773_v3 = vshll.u32 %v22921_v16, 16  ;;  %v7741_v9 = vrot.slane %v7739_v5, 5  ;;  %v15048_v43 = vrot.slane %v22922_v11, 5  ;;  %v7777_v32 = vshrl.u32 %v22921_v16, 16 }
 0x4e4   : > { %21217 = vmatprep.mubr.msk.bf16.mxu0 %vm1887_vm4, %v29396_v50  ;;  %v28023_v53 = vpop.f32.mrb[32].mxu1  ;;  %v7727_v27 = vrot.slane %v7726_v6, 4  ;;  %v7737_v42 = vrot.slane %v7736_v45, 4  ;;  %v7745_v59 = vrot.slane %v7743_v24, 4  ;;  %v7759_v29 = vshll.u32 %v22923_v25, 16 }
 0x4e5   : > { %29397 = vst [vmem:[#allocation43_spill] sm:$0xff] %v28023_v53  ;;  %v28026_v26 = vpop.f32.mrb[33].mxu1  ;;  %v28030_v60 = vsel %vm23613_vm8, %v15044_v0, %v15045_v31  ;;  %v15047_v13 = vrot.slane %v15045_v31, 4  ;;  %v28032_v5 = vrot.slane %v7749_v39, 5  ;;  %v7755_v22 = vrot.slane %v7753_v41, 4 }
 0x4e6   : > { %29398 = vst [vmem:[#allocation44_spill] sm:$0xff] %v28026_v26  ;;  %v28034_v38 = vpop.f32.mrb[34].mxu1  ;;  %v7766_v57 = vrot.slane %v7764_v17, 4  ;;  %v7769_v50 = vrot.slane %v7767_v47, 5  ;;  %v28036_v6 = vrot.slane %v7773_v3, 5  ;;  %v7779_v11 = vrot.slane %v7777_v32, 4 }
 0x4e7   : > { %29399 = vst [vmem:[#allocation45_spill] sm:$0xff] %v28034_v38  ;;  %v22924_v45 = vld [vmem:[%s23101_s5 + $0x200] sm:$0xf]  ;;  %v28039_v16 = vpop.f32.mrb[35].mxu1  ;;  %v7793_v0 = vshll.u32 %v22925_v37, 16  ;;  %v7797_v19 = vshrl.u32 %v22925_v37, 16  ;;  %v7732_v31 = vsel %vm23119_vm5, %v7727_v27, %v27948_v35  ;;  %v7742_v39 = vsel %vm23119_vm5, %v7737_v42, %v7741_v9 }
 0x4e8   : > { %v7783_v24 = vshll.u32 %v22924_v45, 16  ;;  %29400 = vst [vmem:[#allocation46_spill] sm:$0xff] %v28039_v16  ;;  %v7787_v25 = vshrl.u32 %v22924_v45, 16  ;;  %v7746_v41 = vor.u32 %v7745_v59, %v7741_v9  ;;  %v28047_v17 = vrot.slane %v7759_v29, 5  ;;  %v22926_v32 = vld [vmem:[%s23101_s5 + $0x214] sm:$0xf] }
 0x4e9   : > { %20698 = vmatmul.mubr.msk.bf16.gmra.mrb[76].mxu1 %vm1887_vm4, %v27603_v62  ;;  %v29401_v47 = vcombine.low %v27563_v23, %v27577_v52  ;;  %v28057_v3 = vsel %vm23613_vm8, %v15047_v13, %v15048_v43  ;;  %v7756_v35 = vor.u32 %v7755_v22, %v28032_v5  ;;  %v15050_v37 = vrot.slane %v15048_v43, 4  ;;  %v19106_v27 = vld [vmem:[%s23101_s5 + $0x21c] sm:$0xe]  ;;  %v22927_v42 = vld [vmem:[%s23101_s5 + $0x220] sm:$0xf] }
 0x4ea   : > { %v15051_v9 = vrot.slane %v22926_v32, 5  ;;  %20701 = vmatprep.mubr.msk.bf16.mxu1 %vm1887_vm4, %v27616_v14  ;;  %v29402_v62 = vcombine.low %v27612_v7, %v27620_v28  ;;  %v7770_v23 = vor.u32 %v7769_v50, %v7766_v57  ;;  %v28067_v52 = vrot.slane %v7783_v24, 5  ;;  %v22928_v29 = vld [vmem:[%s23101_s5 + $0x224] sm:$0xf]  ;;  %v22929_v50 = vld [vmem:[%s23101_s5 + $0x218] sm:$0x1] }
 0x4eb   : > { %21218 = vmatmul.mubr.msk.bf16.gmra.mrb[76].mxu0 %vm1887_vm4, %v29401_v47  ;;  %v15058_v59 = vrot.slane %v22927_v42, 5  ;;  %v15061_v43 = vrot.slane %v22928_v29, 5  ;;  %v7780_v13 = vor.u32 %v7779_v11, %v28036_v6  ;;  %v7789_v22 = vrot.slane %v7787_v25, 4  ;;  %v22930_v47 = vld [vmem:[%s23101_s5 + $0x228] sm:$0xf]  ;;  %v29409_v38 = vld [vmem:[#allocation14_spill] sm:$0xff] }
 0x4ec   : > { %21221 = vmatprep.mubr.msk.bf16.mxu0 %vm1887_vm4, %v29402_v62  ;;  %v28073_v45 = vrot.slane %v7793_v0, 5  ;;  %v7799_v14 = vrot.slane %v7797_v19, 4  ;;  %v28075_v7 = vpop.f32.mrb[36].mxu1  ;;  %v28077_v28 = vcombine.low %v7732_v31, %v7742_v39  ;;  %v7747_v57 = vrot.slane %v7746_v41, 4  ;;  %v22931_v41 = vld [vmem:[%s23101_s5 + $0x208] sm:$0xf] }
 0x4ed   : > { %29403 = vst [vmem:[#allocation47_spill] sm:$0xff] %v28075_v7  ;;  %v15054_v24 = vrot.slane %v22929_v50, 5  ;;  %v15064_v32 = vrot.slane %v22930_v47, 5  ;;  %v28081_v62 = vpop.f32.mrb[37].mxu1  ;;  %v7757_v42 = vrot.slane %v7756_v35, 4  ;;  %v28085_v11 = vsel %vm23613_vm8, %v15050_v37, %v15051_v9 }
 0x4ee   : > { %29404 = vst [vmem:[#allocation48_spill] sm:$0xff] %v28081_v62  ;;  %v15053_v25 = vrot.slane %v15051_v9, 4  ;;  %v19122_v19 = vrot.slane %v19106_v27, 9  ;;  %v28087_v0 = vpop.f32.mrb[38].mxu1  ;;  %v7771_v31 = vrot.slane %v7770_v23, 4  ;;  %v15060_v39 = vrot.slane %v15058_v59, 4 }
 0x4ef   : > { %29405 = vst [vmem:[#allocation49_spill] sm:$0xff] %v28087_v0  ;;  %v7803_v29 = vshll.u32 %v22931_v41, 16  ;;  %v7807_v50 = vshrl.u32 %v22931_v41, 16  ;;  %v28090_v4 = vpop.f32.mrb[39].mxu1  ;;  %v7781_v47 = vrot.slane %v7780_v13, 4  ;;  %v7790_v35 = vor.u32 %v7789_v22, %v28067_v52  ;;  %v29407_v0 = vld [vmem:[#allocation26_spill] sm:$0xff] }
 0x4f0   : > { %29406 = vst [vmem:[#allocation50_spill] sm:$0xff] %v28090_v4  ;;  %v7800_v2 = vor.u32 %v7799_v14, %v28073_v45  ;;  %v15063_v18 = vrot.slane %v15061_v43, 4  ;;  %v15066_v37 = vrot.slane %v15064_v32, 4  ;;  %v22932_v62 = vld [vmem:[%s23101_s5 + $0x22c] sm:$0xf]  ;;  %v29408_v23 = vld [vmem:[#allocation2_spill] sm:$0xff]  ;;  %v7752_v13 = vsel %vm23119_vm5, %v7747_v57, %v28032_v5 }
 0x4f1   : > { %v15067_v9 = vrot.slane %v22932_v62, 5  ;;  %v22933_v7 = vld [vmem:[%s23101_s5 + $0x20c] sm:$0xf]  ;;  %20702 = vmatmul.mubr.msk.bf16.gmra.mrb[80].mxu1 %vm1887_vm4, %v29407_v0  ;;  %v29410_v41 = vcombine.low %v29408_v23, %v29409_v38  ;;  %v7762_v22 = vsel %vm23119_vm5, %v7757_v42, %v28047_v17  ;;  %v28110_v14 = vsel %vm23613_vm8, %v15053_v25, %v15054_v24 }
 0x4f2   : > { %v7813_v27 = vshll.u32 %v22933_v7, 16  ;;  %v7817_v16 = vshrl.u32 %v22933_v7, 16  ;;  %20705 = vmatprep.mubr.msk.bf16.mxu1 %vm1887_vm4, %v27722_v12  ;;  %v29411_v7 = vld [vmem:[#allocation18_spill] sm:$0xff]  ;;  %v7776_v5 = vsel %vm23119_vm5, %v7771_v31, %v28036_v6  ;;  %v28123_v57 = vsel %vm23613_vm8, %v19122_v19, %v15058_v59  ;;  %v29421_v31 = vld [vmem:[#allocation35_spill] sm:$0xff] }
 0x4f3   : > { %21222 = vmatmul.mubr.msk.bf16.gmra.mrb[80].mxu0 %vm1887_vm4, %v29410_v41  ;;  %v29412_v38 = vcombine.low %v27685_v21, %v29411_v7  ;;  %v28127_v17 = vsel %vm23613_vm8, %v15060_v39, %v15061_v43  ;;  %v7809_v24 = vrot.slane %v7807_v50, 4  ;;  %v7786_v12 = vsel %vm23119_vm5, %v7781_v47, %v28067_v52  ;;  %v22935_v7 = vld [vmem:[%s23101_s5 + $0x230] sm:$0xf] }
 0x4f4   : > { %v28132_v21 = vrot.slane %v7790_v35, 4  ;;  %v7801_v62 = vrot.slane %v7800_v2, 4  ;;  %v7805_v42 = vrot.slane %v7803_v29, 5  ;;  %v28134_v25 = vpop.f32.mrb[40].mxu1  ;;  %v28138_v6 = vsel %vm23613_vm8, %v15063_v18, %v15064_v32  ;;  %v22934_v29 = vld [vmem:[%s23101_s5 + $0x210] sm:$0xf] }
 0x4f5   : > { %21225 = vmatprep.mubr.msk.bf16.mxu0 %vm1887_vm4, %v29412_v38  ;;  %29413 = vst [vmem:[#allocation26_spill] sm:$0xff] %v28134_v25  ;;  %v28142_v59 = vsel %vm23613_vm8, %v15066_v37, %v15067_v9  ;;  %v28144_v43 = vrot.slane %v7813_v27, 5  ;;  %v7819_v19 = vrot.slane %v7817_v16, 4  ;;  %v28146_v52 = vpop.f32.mrb[41].mxu1  ;;  %v28150_v0 = vcombine.low %v7752_v13, %v7762_v22  ;;  %v18253_v35 = vld [vmem:[%s23101_s5 + $0x21c] sm:$0xf] }
 0x4f6   : > { %29414 = vst [vmem:[#allocation2_spill] sm:$0xff] %v28146_v52  ;;  %v28156_v32 = vpop.f32.mrb[42].mxu1  ;;  %v28158_v39 = vcombine.low %v7776_v5, %v7786_v12  ;;  %v7810_v16 = vor.u32 %v7809_v24, %v7805_v42  ;;  %v7823_v50 = vshll.u32 %v22934_v29, 16  ;;  %v7827_v47 = vshrl.u32 %v22934_v29, 16  ;;  %v22936_v5 = vld [vmem:[%s23101_s5 + $0x214] sm:$0xf] }
 0x4f7   : > { %29415 = vst [vmem:[#allocation14_spill] sm:$0xff] %v28156_v32  ;;  %v28162_v37 = vpop.f32.mrb[43].mxu1  ;;  %v7796_v27 = vsel %vm23119_vm5, %v28132_v21, %v28073_v45  ;;  %v7806_v23 = vsel %vm23119_vm5, %v7801_v62, %v7805_v42  ;;  %v15069_v13 = vrot.slane %v15067_v9, 4  ;;  %v7820_v22 = vor.u32 %v7819_v19, %v28144_v43  ;;  %v29417_v29 = vld [vmem:[#allocation32_spill] sm:$0xff]  ;;  %v29418_v45 = vld [vmem:[#allocation19_spill] sm:$0xff]  ;;  %v29423_v2 = vld [vmem:[#allocation21_spill] sm:$0xff] }
 0x4f8   : > { %29416 = vst [vmem:[#allocation18_spill] sm:$0xff] %v28162_v37  ;;  %v15070_v38 = vrot.slane %v22935_v7, 5  ;;  %v7833_v24 = vshll.u32 %v22936_v5, 16  ;;  %v7837_v12 = vshrl.u32 %v22936_v5, 16  ;;  %v29419_v21 = vld [vmem:[#allocation3_spill] sm:$0xff]  ;;  %v7848_v62 = vshrl.u32 %v18253_v35, 16 }
 0x4f9   : > { %20706 = vmatmul.mubr.msk.bf16.gmra.mrb[84].mxu1 %vm1887_vm4, %v29417_v29  ;;  %v29420_v18 = vcombine.low %v29418_v45, %v29419_v21  ;;  %v7851_v9 = vshll.u32 %v18253_v35, 16  ;;  %v22937_v42 = vld [vmem:[%s23101_s5 + $0x220] sm:$0xf]  ;;  %v29422_v7 = vld [vmem:[#allocation20_spill] sm:$0xff]  ;;  %v28188_v29 = vrot.slane %v7810_v16, 4  ;;  %v28190_v37 = vrot.slane %v7823_v50, 5 }
 0x4fa   : > { %v7857_v19 = vshll.u32 %v22937_v42, 16  ;;  %v7861_v41 = vshrl.u32 %v22937_v42, 16  ;;  %20709 = vmatprep.mubr.msk.bf16.mxu1 %vm1887_vm4, %v29421_v31  ;;  %v29424_v5 = vcombine.low %v29422_v7, %v29423_v2  ;;  %v22938_v45 = vld [vmem:[%s23101_s5 + $0x234] sm:$0xf]  ;;  %v7829_v21 = vrot.slane %v7827_v47, 4 }
 0x4fb   : > { %21226 = vmatmul.mubr.msk.bf16.gmra.mrb[84].mxu0 %vm1887_vm4, %v29420_v18  ;;  %v15073_v18 = vrot.slane %v22938_v45, 5  ;;  %v22939_v32 = vld [vmem:[%s23101_s5 + $0x224] sm:$0xf]  ;;  %v22940_v25 = vld [vmem:[%s23101_s5 + $0x228] sm:$0xf]  ;;  %v28197_v26 = vrot.slane %v7820_v22, 4  ;;  %v28207_v54 = vcombine.low %v7796_v27, %v7806_v23 }
 0x4fc   : > { %21229 = vmatprep.mubr.msk.bf16.mxu0 %vm1887_vm4, %v29424_v5  ;;  %v7867_v35 = vshll.u32 %v22939_v32, 16  ;;  %v7871_v52 = vshrl.u32 %v22939_v32, 16  ;;  %v7877_v42 = vshll.u32 %v22940_v25, 16  ;;  %v7881_v4 = vshrl.u32 %v22940_v25, 16  ;;  %v28195_v31 = vpop.f32.mrb[44].mxu1 }
 0x4fd   : > { %29425 = vst [vmem:[#allocation32_spill] sm:$0xff] %v28195_v31  ;;  %v15072_v2 = vrot.slane %v15070_v38, 4  ;;  %v28199_v7 = vrot.slane %v7833_v24, 5  ;;  %v7839_v16 = vrot.slane %v7837_v12, 4  ;;  %v28201_v50 = vpop.f32.mrb[45].mxu1  ;;  %v7850_v5 = vrot.slane %v7848_v62, 4 }
 0x4fe   : > { %29426 = vst [vmem:[#allocation19_spill] sm:$0xff] %v28201_v50  ;;  %v7853_v45 = vrot.slane %v7851_v9, 5  ;;  %v28203_v47 = vrot.slane %v7857_v19, 5  ;;  %v7863_v32 = vrot.slane %v7861_v41, 4  ;;  %v28205_v53 = vpop.f32.mrb[46].mxu1  ;;  %v28211_v25 = vsel %vm23613_vm8, %v15069_v13, %v15070_v38 }
 0x4ff   : > { %29427 = vst [vmem:[#allocation3_spill] sm:$0xff] %v28205_v53  ;;  %v7830_v22 = vor.u32 %v7829_v21, %v28190_v37  ;;  %v22941_v24 = vld [vmem:[%s23101_s5 + $0x218] sm:$0x1]  ;;  %v28215_v31 = vpop.f32.mrb[47].mxu1  ;;  %v28217_v62 = vrot.slane %v7867_v35, 5  ;;  %v7873_v9 = vrot.slane %v7871_v52, 4  ;;  %v28227_v23 = vsel %vm23613_vm8, %v15072_v2, %v15073_v18 }
 0x500   : > { %v7843_v12 = vshll.u32 %v22941_v24, 16  ;;  %29428 = vst [vmem:[#allocation35_spill] sm:$0xff] %v28215_v31  ;;  %v28219_v19 = vrot.slane %v7877_v42, 5  ;;  %v7883_v41 = vrot.slane %v7881_v4, 4  ;;  %v7840_v13 = vor.u32 %v7839_v16, %v28199_v7  ;;  %v22942_v38 = vld [vmem:[%s23101_s5 + $0x238] sm:$0xf] }
 0x501   : > { %v15076_v21 = vrot.slane %v22942_v38, 5  ;;  %20710 = vmatmul.mubr.msk.bf16.gmra.mrb[88].mxu1 %vm1887_vm4, %v27962_v8  ;;  %v29429_v4 = vcombine.low %v27818_v20, %v27822_v44  ;;  %v15075_v35 = vrot.slane %v15073_v18, 4  ;;  %v7854_v42 = vor.u32 %v7853_v45, %v7850_v5  ;;  %v19107_v16 = vld [vmem:[%s23101_s5 + $0x240] sm:$0xe]  ;;  %v22943_v24 = vld [vmem:[%s23101_s5 + $0x244] sm:$0xf] }
 0x502   : > { %v7864_v2 = vor.u32 %v7863_v32, %v28203_v47  ;;  %20713 = vmatprep.mubr.msk.bf16.mxu1 %vm1887_vm4, %v27971_v40  ;;  %v29430_v8 = vcombine.low %v27852_v1, %v27890_v55  ;;  %v28248_v20 = vrot.slane %v7830_v22, 4  ;;  %v28250_v44 = vrot.slane %v7843_v12, 5  ;;  %v22944_v18 = vld [vmem:[%s23101_s5 + $0x22c] sm:$0xf]  ;;  %v22945_v45 = vld [vmem:[%s23101_s5 + $0x23c] sm:$0x1] }
 0x503   : > { %21230 = vmatmul.mubr.msk.bf16.gmra.mrb[88].mxu0 %vm1887_vm4, %v29429_v4  ;;  %v15083_v38 = vrot.slane %v22943_v24, 5  ;;  %v7887_v5 = vshll.u32 %v22944_v18, 16  ;;  %v15079_v32 = vrot.slane %v22945_v45, 5  ;;  %v7874_v4 = vor.u32 %v7873_v9, %v28217_v62  ;;  %v22946_v27 = vld [vmem:[%s23101_s5 + $0x230] sm:$0xf] }
 0x504   : > { %21233 = vmatprep.mubr.msk.bf16.mxu0 %vm1887_vm4, %v29430_v8  ;;  %v7884_v40 = vor.u32 %v7883_v41, %v28219_v19  ;;  %v7891_v1 = vshrl.u32 %v22944_v18, 16  ;;  %v28258_v55 = vpop.f32.mrb[48].mxu1  ;;  %v7841_v8 = vrot.slane %v7840_v13, 4  ;;  %v15078_v22 = vrot.slane %v15076_v21, 4 }
 0x505   : > { %29431 = vst [vmem:[#allocation20_spill] sm:$0xff] %v28258_v55  ;;  %v7897_v12 = vshll.u32 %v22946_v27, 16  ;;  %v7901_v52 = vshrl.u32 %v22946_v27, 16  ;;  %v28261_v31 = vpop.f32.mrb[49].mxu1  ;;  %v28265_v24 = vsel %vm23613_vm8, %v15075_v35, %v15076_v21  ;;  %v7855_v45 = vrot.slane %v7854_v42, 4 }
 0x506   : > { %29432 = vst [vmem:[#allocation21_spill] sm:$0xff] %v28261_v31  ;;  %v7865_v9 = vrot.slane %v7864_v2, 4  ;;  %v19123_v53 = vrot.slane %v19107_v16, 9  ;;  %v28267_v41 = vpop.f32.mrb[50].mxu1  ;;  %v7836_v13 = vsel %vm23119_vm5, %v28248_v20, %v28199_v7  ;;  %v15085_v18 = vrot.slane %v15083_v38, 4 }
 0x507   : > { %v22947_v55 = vld [vmem:[%s23101_s5 + $0x248] sm:$0xf]  ;;  %v7889_v27 = vrot.slane %v7887_v5, 5  ;;  %v28274_v10 = vpop.f32.mrb[51].mxu1  ;;  %v7875_v31 = vrot.slane %v7874_v4, 4  ;;  %v7885_v33 = vrot.slane %v7884_v40, 4  ;;  %v7846_v2 = vsel %vm23119_vm5, %v7841_v8, %v28250_v44 }
 0x508   : > { %v15086_v50 = vrot.slane %v22947_v55, 5  ;;  %v22948_v21 = vld [vmem:[%s23101_s5 + $0x24c] sm:$0xf]  ;;  %v7893_v42 = vrot.slane %v7891_v1, 4  ;;  %v28282_v7 = vsel %vm23613_vm8, %v15078_v22, %v15079_v32  ;;  %v28284_v20 = vrot.slane %v7897_v12, 5 }
 0x509   : > { %v15089_v35 = vrot.slane %v22948_v21, 5  ;;  %v7903_v16 = vrot.slane %v7901_v52, 4  ;;  %20714 = vmatmul.mubr.msk.bf16.gmra.mrb[92].mxu1 %vm1887_vm4, %v27977_v63  ;;  %v29433_v5 = vcombine.low %v27907_v58, %v27923_v30  ;;  %v7860_v4 = vsel %vm23119_vm5, %v7855_v45, %v28203_v47  ;;  %v22949_v47 = vld [vmem:[%s23101_s5 + $0x250] sm:$0xf]  ;;  %v22950_v52 = vld [vmem:[%s23101_s5 + $0x234] sm:$0xf] }
 0x50a   : > { %v7870_v44 = vsel %vm23119_vm5, %v7865_v9, %v28217_v62  ;;  %v28300_v32 = vsel %vm23613_vm8, %v19123_v53, %v15083_v38  ;;  %20717 = vmatprep.mubr.msk.bf16.mxu1 %vm1887_vm4, %v27981_v56  ;;  %v29434_v58 = vcombine.low %v27927_v49, %v27943_v34  ;;  %v28310_v30 = vsel %vm23613_vm8, %v15085_v18, %v15086_v50  ;;  %v22951_v55 = vld [vmem:[%s23101_s5 + $0x238] sm:$0xf] }
 0x50b   : > { %21234 = vmatmul.mubr.msk.bf16.gmra.mrb[92].mxu0 %vm1887_vm4, %v29433_v5  ;;  %v15088_v63 = vrot.slane %v15086_v50, 4  ;;  %v15092_v62 = vrot.slane %v22949_v47, 5  ;;  %v7907_v40 = vshll.u32 %v22950_v52, 16  ;;  %v7880_v53 = vsel %vm23119_vm5, %v7875_v31, %v28219_v19 }
 0x50c   : > { %21237 = vmatprep.mubr.msk.bf16.mxu0 %vm1887_vm4, %v29434_v58  ;;  %v7890_v56 = vsel %vm23119_vm5, %v7885_v33, %v7889_v27  ;;  %v15091_v38 = vrot.slane %v15089_v35, 4  ;;  %v7894_v49 = vor.u32 %v7893_v42, %v7889_v27  ;;  %v28319_v34 = vpop.f32.mrb[52].mxu1  ;;  %v7904_v1 = vor.u32 %v7903_v16, %v28284_v20  ;;  %v18262_v42 = vld [vmem:[%s23101_s5 + $0x240] sm:$0xf] }
 0x50d   : > { %v7911_v50 = vshrl.u32 %v22950_v52, 16  ;;  %v7917_v8 = vshll.u32 %v22951_v55, 16  ;;  %v7921_v22 = vshrl.u32 %v22951_v55, 16  ;;  %v28323_v12 = vpop.f32.mrb[53].mxu1  ;;  %v29435_v31 = vsel %vm23119_vm5, %v28197_v26, %v28190_v37  ;;  %v22952_v37 = vld [vmem:[%s23101_s5 + $0x254] sm:$0xf] }
 0x50e   : > { %v29436_v33 = vsel %vm23119_vm5, %v28188_v29, %v28144_v43  ;;  %v28339_v9 = vcombine.low %v7836_v13, %v7846_v2  ;;  %v28343_v27 = vpop.f32.mrb[54].mxu1  ;;  %v28345_v21 = vcombine.low %v7860_v4, %v7870_v44  ;;  %v28351_v43 = vsel %vm23613_vm8, %v15088_v63, %v15089_v35 }
 0x50f   : > { %v28335_v19 = vcombine.low %v29436_v33, %v29435_v31  ;;  %v15095_v29 = vrot.slane %v22952_v37, 5  ;;  %v28355_v13 = vpop.f32.mrb[55].mxu1  ;;  %v28357_v2 = vcombine.low %v7880_v53, %v7890_v56  ;;  %v28361_v16 = vsel %vm23613_vm8, %v15091_v38, %v15092_v62  ;;  %v22957_v33 = vld [vmem:[%s23101_s5 + $0x24c] sm:$0xf] }
 0x510   : > { %v7895_v5 = vrot.slane %v7894_v49, 4  ;;  %v7909_v4 = vrot.slane %v7907_v40, 5  ;;  %v7905_v44 = vrot.slane %v7904_v1, 4  ;;  %v7913_v58 = vrot.slane %v7911_v50, 4  ;;  %v22953_v40 = vld [vmem:[%s23101_s5 + $0x244] sm:$0xf] }
 0x511   : > { %v28363_v35 = vrot.slane %v7917_v8, 5  ;;  %v7923_v63 = vrot.slane %v7921_v22, 4  ;;  %20718 = vmatmul.mubr.msk.bf16.gmra.mrb[96].mxu1 %vm1887_vm4, %v28017_v15  ;;  %v29437_v47 = vcombine.low %v27994_v51, %v28000_v46  ;;  %v7932_v52 = vshrl.u32 %v18262_v42, 16  ;;  %v22954_v50 = vld [vmem:[%s23101_s5 + $0x258] sm:$0xf] }
 0x512   : > { %v7935_v53 = vshll.u32 %v18262_v42, 16  ;;  %v7941_v56 = vshll.u32 %v22953_v40, 16  ;;  %v7945_v38 = vshrl.u32 %v22953_v40, 16  ;;  %20721 = vmatprep.mubr.msk.bf16.mxu1 %vm1887_vm4, %v28077_v28  ;;  %v29438_v49 = vcombine.low %v28030_v60, %v28057_v3  ;;  %v22955_v46 = vld [vmem:[%s23101_s5 + $0x23c] sm:$0x1] }
 0x513   : > { %21238 = vmatmul.mubr.msk.bf16.gmra.mrb[96].mxu0 %vm1887_vm4, %v29437_v47  ;;  %v15094_v15 = vrot.slane %v15092_v62, 4  ;;  %v15097_v1 = vrot.slane %v15095_v29, 4  ;;  %v15098_v51 = vrot.slane %v22954_v50, 5  ;;  %v7927_v55 = vshll.u32 %v22955_v46, 16  ;;  %v22956_v8 = vld [vmem:[%s23101_s5 + $0x248] sm:$0xf] }
 0x514   : > { %21241 = vmatprep.mubr.msk.bf16.mxu0 %vm1887_vm4, %v29438_v49  ;;  %v7951_v22 = vshll.u32 %v22956_v8, 16  ;;  %v7955_v31 = vshrl.u32 %v22956_v8, 16  ;;  %v7961_v37 = vshll.u32 %v22957_v33, 16  ;;  %v7965_v42 = vshrl.u32 %v22957_v33, 16  ;;  %v28382_v47 = vpop.f32.mrb[56].mxu1 }
 0x515   : > { %v7900_v60 = vsel %vm23119_vm5, %v7895_v5, %v28284_v20  ;;  %v7910_v3 = vsel %vm23119_vm5, %v7905_v44, %v7909_v4  ;;  %v7914_v28 = vor.u32 %v7913_v58, %v7909_v4  ;;  %v7924_v62 = vor.u32 %v7923_v63, %v28363_v35  ;;  %v28390_v40 = vpop.f32.mrb[57].mxu1 }
 0x516   : > { %v7934_v49 = vrot.slane %v7932_v52, 4  ;;  %v7937_v50 = vrot.slane %v7935_v53, 5  ;;  %v28392_v46 = vrot.slane %v7941_v56, 5  ;;  %v7947_v8 = vrot.slane %v7945_v38, 4  ;;  %v28394_v33 = vpop.f32.mrb[58].mxu1 }
 0x517   : > { %v28401_v5 = vsel %vm23613_vm8, %v15094_v15, %v15095_v29  ;;  %v28405_v4 = vsel %vm23613_vm8, %v15097_v1, %v15098_v51  ;;  %v7929_v44 = vrot.slane %v7927_v55, 5  ;;  %v28407_v58 = vpop.f32.mrb[59].mxu1  ;;  %v28409_v63 = vrot.slane %v7951_v22, 5  ;;  %v22958_v15 = vld [vmem:[%s23101_s5 + $0x25c] sm:$0xf] }
 0x518   : > { %29439 = vst [vmem:[#allocation51_spill] sm:$0xff] %v28407_v58  ;;  %v7957_v52 = vrot.slane %v7955_v31, 4  ;;  %v28411_v53 = vrot.slane %v7961_v37, 5  ;;  %v7967_v56 = vrot.slane %v7965_v42, 4  ;;  %v28413_v38 = vcombine.low %v7900_v60, %v7910_v3  ;;  %v22960_v60 = vld [vmem:[%s23101_s5 + $0x26c] sm:$0xf] }
 0x519   : > { %v7915_v20 = vrot.slane %v7914_v28, 4  ;;  %v15100_v29 = vrot.slane %v15098_v51, 4  ;;  %v15101_v1 = vrot.slane %v22958_v15, 5  ;;  %20722 = vmatmul.mubr.msk.bf16.gmra.mrb[100].mxu1 %vm1887_vm4, %v28150_v0  ;;  %v29440_v55 = vcombine.low %v28085_v11, %v28110_v14  ;;  %v19108_v14 = vld [vmem:[%s23101_s5 + $0x264] sm:$0xe] }
 0x51a   : > { %v7925_v22 = vrot.slane %v7924_v62, 4  ;;  %v7938_v31 = vor.u32 %v7937_v50, %v7934_v49  ;;  %v7948_v37 = vor.u32 %v7947_v8, %v28392_v46  ;;  %20725 = vmatprep.mubr.msk.bf16.mxu1 %vm1887_vm4, %v28158_v39  ;;  %v29442_v11 = vcombine.low %v28123_v57, %v28127_v17  ;;  %v22959_v0 = vld [vmem:[%s23101_s5 + $0x268] sm:$0xf]  ;;  %v22961_v28 = vld [vmem:[%s23101_s5 + $0x250] sm:$0xf] }
 0x51b   : > { %21242 = vmatmul.mubr.msk.bf16.gmra.mrb[100].mxu0 %vm1887_vm4, %v29440_v55  ;;  %v15108_v42 = vrot.slane %v22959_v0, 5  ;;  %v15111_v3 = vrot.slane %v22960_v60, 5  ;;  %v7971_v62 = vshll.u32 %v22961_v28, 16  ;;  %v7975_v49 = vshrl.u32 %v22961_v28, 16  ;;  %v22962_v50 = vld [vmem:[%s23101_s5 + $0x260] sm:$0x1] }
 0x51c   : > { %21245 = vmatprep.mubr.msk.bf16.mxu0 %vm1887_vm4, %v29442_v11  ;;  %v15104_v15 = vrot.slane %v22962_v50, 5  ;;  %v7958_v8 = vor.u32 %v7957_v52, %v28409_v63  ;;  %v7968_v39 = vor.u32 %v7967_v56, %v28411_v53  ;;  %v22963_v57 = vld [vmem:[%s23101_s5 + $0x270] sm:$0xf]  ;;  %v28445_v55 = vpop.f32.mrb[60].mxu1  ;;  %v7920_v11 = vsel %vm23119_vm5, %v7915_v20, %v28363_v35  ;;  %v22964_v60 = vld [vmem:[%s23101_s5 + $0x254] sm:$0xf] }
 0x51d   : > { %v15114_v17 = vrot.slane %v22963_v57, 5  ;;  %29443 = vst [vmem:[#allocation52_spill] sm:$0xff] %v28445_v55  ;;  %v15103_v0 = vrot.slane %v15101_v1, 4  ;;  %v7981_v51 = vshll.u32 %v22964_v60, 16  ;;  %v7985_v28 = vshrl.u32 %v22964_v60, 16  ;;  %v28451_v50 = vpop.f32.mrb[61].mxu1 }
 0x51e   : > { %29444 = vst [vmem:[#allocation53_spill] sm:$0xff] %v28451_v50  ;;  %v7930_v52 = vsel %vm23119_vm5, %v7925_v22, %v7929_v44  ;;  %v7939_v26 = vrot.slane %v7938_v31, 4  ;;  %v7949_v56 = vrot.slane %v7948_v37, 4  ;;  %v19124_v18 = vrot.slane %v19108_v14, 9  ;;  %v28455_v57 = vpop.f32.mrb[62].mxu1 }
 0x51f   : > { %29445 = vst [vmem:[#allocation54_spill] sm:$0xff] %v28455_v57  ;;  %v15110_v35 = vrot.slane %v15108_v42, 4  ;;  %v7973_v20 = vrot.slane %v7971_v62, 5  ;;  %v15113_v45 = vrot.slane %v15111_v3, 4  ;;  %v7977_v55 = vrot.slane %v7975_v49, 4  ;;  %v28463_v60 = vpop.f32.mrb[63].mxu1 }
 0x520   : > { %v7959_v50 = vrot.slane %v7958_v8, 4  ;;  %v7969_v58 = vrot.slane %v7968_v39, 4  ;;  %v15116_v44 = vrot.slane %v15114_v17, 4  ;;  %v22965_v22 = vld [vmem:[%s23101_s5 + $0x274] sm:$0xf]  ;;  %v28466_v37 = vcombine.low %v7920_v11, %v7930_v52 }
 0x521   : > { %v15117_v31 = vrot.slane %v22965_v22, 5  ;;  %v28470_v14 = vsel %vm23613_vm8, %v15100_v29, %v15101_v1  ;;  %v28472_v57 = vrot.slane %v7981_v51, 5  ;;  %v7987_v62 = vrot.slane %v7985_v28, 4  ;;  %20726 = vmatmul.mubr.msk.bf16.gmra.mrb[104].mxu1 %vm1887_vm4, %v28207_v54  ;;  %v28491_v51 = vld [vmem:[%s23101_s5 + $0x258] sm:$0xf] }
 0x522   : > { %v29446_v49 = vcombine.low %v28138_v6, %v28142_v59  ;;  %v28482_v8 = vsel %vm23613_vm8, %v15103_v0, %v15104_v15  ;;  %v7944_v29 = vsel %vm23119_vm5, %v7939_v26, %v28392_v46  ;;  %v7954_v1 = vsel %vm23119_vm5, %v7949_v56, %v28409_v63  ;;  %20729 = vmatprep.mubr.msk.bf16.mxu1 %vm1887_vm4, %v28335_v19  ;;  %v22967_v0 = vld [vmem:[%s23101_s5 + $0x278] sm:$0xf] }
 0x523   : > { %v7991_v54 = vshll.u32 %v28491_v51, 16  ;;  %v29447_v6 = vcombine.low %v28211_v25, %v28227_v23  ;;  %v28504_v59 = vsel %vm23613_vm8, %v19124_v18, %v15108_v42  ;;  %v28508_v26 = vsel %vm23613_vm8, %v15110_v35, %v15111_v3  ;;  %v28526_v42 = vld [vmem:[%s29138_s2] ss:$0 sm:$0xff] }
 0x524   : > { %21246 = vmatmul.mubr.msk.bf16.gmra.mrb[104].mxu0 %vm1887_vm4, %v29446_v49  ;;  %v7978_v46 = vor.u32 %v7977_v55, %v7973_v20  ;;  %v7964_v19 = vsel %vm23119_vm5, %v7959_v50, %v28411_v53  ;;  %v7974_v25 = vsel %vm23119_vm5, %v7969_v58, %v7973_v20  ;;  %v28517_v23 = vsel %vm23613_vm8, %v15113_v45, %v15114_v17  ;;  %v21143_v63 = vpop.f32.mrb[0].mxu0  ;;  %v29448_v45 = vld [vmem:[#allocation8_spill] sm:$0xff] }
 0x525   : > { %21249 = vmatprep.mubr.msk.bf16.mxu0 %vm1887_vm4, %v29447_v6  ;;  %v28521_v18 = vsel %vm23613_vm8, %v15116_v44, %v15117_v31  ;;  %v19185_v53 = vcombine.low %v28470_v14, %v28482_v8  ;;  %v28530_v3 = vcombine.low %v7944_v29, %v7954_v1  ;;  %v7988_v58 = vor.u32 %v7987_v62, %v28472_v57  ;;  %v15554_v17 = vpop.f32.mrb[1].mxu0  ;;  %v29449_v50 = vld [vmem:[#allocation24_spill] sm:$0xff]  ;;  %v28551_v29 = vld [vmem:[%s23101_s5 + $0x27c] sm:$0xf] }
 0x526   : > { %v15119_v15 = vrot.slane %v15117_v31, 4  ;;  %v21271_v39 = vadd.f32 %v21143_v63, %v29448_v45  ;;  %v19186_v55 = vcombine.low %v28504_v59, %v28508_v26  ;;  %v28538_v11 = vrot.slane %v7991_v54, 5  ;;  %v21144_v56 = vpop.f32.mrb[2].mxu0  ;;  %v29450_v31 = vld [vmem:[#allocation5_spill] sm:$0xff] }
 0x527   : > { %v15120_v28 = vrot.slane %v22967_v0, 5  ;;  %v21272_v52 = vadd.f32 %v15554_v17, %v29449_v50  ;;  %v28542_v35 = vcombine.low %v7964_v19, %v7974_v25  ;;  %v19187_v20 = vcombine.low %v28517_v23, %v28521_v18  ;;  %v15557_v49 = vpop.f32.mrb[3].mxu0  ;;  %v29451_v19 = vld [vmem:[#allocation7_spill] sm:$0xff]  ;;  %v28579_v50 = vld [vmem:[%s23101_s5 + $0x25c] sm:$0xf] }
 0x528   : > { %v28546_v44 = vrot.slane %v7978_v46, 4  ;;  %v16202_v22 = vadd.f32 %v21271_v39, %v28526_v42  ;;  %v21273_v62 = vadd.f32 %v21144_v56, %v29450_v31  ;;  %v15123_v1 = vrot.slane %v28551_v29, 5 }
 0x529   : > { %v7995_v54 = vshrl.u32 %v28491_v51, 16  ;;  %v16200_v6 = vadd.f32 %v21272_v52, %v28526_v42  ;;  %v21274_v25 = vadd.f32 %v15557_v49, %v29451_v19  ;;  %v28558_v63 = vrot.slane %v7988_v58, 4  ;;  %20730 = vmatmul.mubr.msk.bf16.gmra.mrb[108].mxu1 %vm1887_vm4, %v28339_v9 }
 0x52a   : > { %v28562_v46 = vsel %vm23613_vm8, %v15119_v15, %v15120_v28  ;;  %vm16330_vm10 = vcmp.gt.f32.partialorder %v16202_v22, 0.0  ;;  %v16458_v45 = vmul.f32 0.1, %v16202_v22  ;;  %v16203_v39 = vadd.f32 %v21273_v62, %v28526_v42  ;;  %20733 = vmatprep.mubr.msk.bf16.mxu1 %vm1887_vm4, %v28345_v21  ;;  %v29454_v62 = vld [vmem:[#allocation9_spill] sm:$0xff] }
 0x52b   : > { %v29452_v51 = vcombine.low %v28265_v24, %v28282_v7  ;;  %v15122_v17 = vrot.slane %v15120_v28, 4  ;;  %vm16328_vm11 = vcmp.gt.f32.partialorder %v16200_v6, 0.0  ;;  %v16456_v58 = vmul.f32 0.1, %v16200_v6 }
 0x52c   : > { %v16201_v0 = vadd.f32 %v21274_v25, %v28526_v42  ;;  %v29453_v15 = vcombine.low %v28300_v32, %v28310_v30  ;;  %v8001_v9 = vshll.u32 %v28579_v50, 16  ;;  %v16586_v24 = vsel %vm16330_vm10, %v16202_v22, %v16458_v45  ;;  %v21147_v52 = vpop.f32.mrb[4].mxu0 }
 0x52d   : > { %21250 = vmatmul.mubr.msk.bf16.gmra.mrb[108].mxu0 %vm1887_vm4, %v29452_v51  ;;  %vm16331_vm12 = vcmp.gt.f32.partialorder %v16203_v39, 0.0  ;;  %v16459_v7 = vmul.f32 0.1, %v16203_v39  ;;  %v7984_v32 = vsel %vm23119_vm5, %v28546_v44, %v28472_v57  ;;  %v19388_v30 = vpack.c.bf16 %v16586_v24, %v16586_v24  ;;  %v15570_v22 = vpop.f32.mrb[5].mxu0  ;;  %v29455_v57 = vld [vmem:[#allocation13_spill] sm:$0xff] }
 0x52e   : > { %21253 = vmatprep.mubr.msk.bf16.mxu0 %vm1887_vm4, %v29453_v15  ;;  %v16584_v21 = vsel %vm16328_vm11, %v16200_v6, %v16456_v58  ;;  %vm16329_vm13 = vcmp.gt.f32.partialorder %v16201_v0, 0.0  ;;  %v16457_v28 = vmul.f32 0.1, %v16201_v0  ;;  %v21275_v49 = vadd.f32 %v21147_v52, %v29454_v62  ;;  %v21148_v6 = vpop.f32.mrb[6].mxu0  ;;  %v29456_v15 = vld [vmem:[#allocation10_spill] sm:$0xff] }
 0x52f   : > { %v19386_v56 = vpack.c.bf16 %v16584_v21, %v16584_v21  ;;  %v16587_v31 = vsel %vm16331_vm12, %v16203_v39, %v16459_v7  ;;  %v28592_v19 = vrot.slane %v7995_v54, 4  ;;  %17227 = vst.msk [vmem:[%s28585_s4 + $0x8] sm:$0xf] %vm17224_vm9, %v19388_v30  ;;  %v21276_v44 = vadd.f32 %v15570_v22, %v29455_v57  ;;  %v15573_v7 = vpop.f32.mrb[7].mxu0  ;;  %v22970_v54 = vld [vmem:[%s23101_s5 + $0x260] sm:$0x1] }
 0x530   : > { %v19389_v25 = vpack.c.bf16 %v16587_v31, %v16587_v31  ;;  %v16585_v45 = vsel %vm16329_vm13, %v16201_v0, %v16457_v28  ;;  %v8005_v51 = vshrl.u32 %v28579_v50, 16  ;;  %v16206_v39 = vadd.f32 %v21275_v49, %v28526_v42  ;;  %v29457_v30 = vld [vmem:[#allocation11_spill] sm:$0xff] }
 0x531   : > { %17225 = vst.msk [vmem:[%s28585_s4] sm:$0xf] %vm17224_vm9, %v19386_v56  ;;  %v19387_v58 = vpack.c.bf16 %v16585_v45, %v16585_v45  ;;  %v21277_v24 = vadd.f32 %v21148_v6, %v29456_v15  ;;  %v8011_v21 = vshll.u32 %v22970_v54, 16  ;;  %v16204_v0 = vadd.f32 %v21276_v44, %v28526_v42  ;;  %20734 = vmatmul.mubr.msk.bf16.gmra.mrb[112].mxu1 %vm1887_vm4, %v28357_v2 }
 0x532   : > { %17228 = vst.msk [vmem:[%s28585_s4 + $0xc] sm:$0xf] %vm17224_vm9, %v19389_v25  ;;  %v21278_v28 = vadd.f32 %v15573_v7, %v29457_v30  ;;  %v7994_v50 = vsel %vm23119_vm5, %v28558_v63, %v28538_v11  ;;  %v28615_v52 = vsel %vm23613_vm8, %v15122_v17, %v15123_v1  ;;  %vm16334_vm14 = vcmp.gt.f32.partialorder %v16206_v39, 0.0  ;;  %20737 = vmatprep.mubr.msk.bf16.mxu1 %vm1887_vm4, %v28413_v38  ;;  %v29462_v30 = vld [vmem:[#allocation16_spill] sm:$0xff] }
 0x533   : > { %17226 = vst.msk [vmem:[%s28585_s4 + $0x4] sm:$0xf] %vm17224_vm9, %v19387_v58  ;;  %v16462_v56 = vmul.f32 0.1, %v16206_v39  ;;  %v16207_v31 = vadd.f32 %v21277_v24, %v28526_v42  ;;  %v29458_v62 = vcombine.low %v28351_v43, %v28361_v16  ;;  %v28626_v63 = vrot.slane %v8001_v9, 5 }
 0x534   : > { %vm16332_vm15 = vcmp.gt.f32.partialorder %v16204_v0, 0.0  ;;  %v16460_v49 = vmul.f32 0.1, %v16204_v0  ;;  %v16205_v17 = vadd.f32 %v21278_v28, %v28526_v42  ;;  %v29459_v22 = vcombine.low %v28401_v5, %v28405_v4  ;;  %v21151_v57 = vpop.f32.mrb[8].mxu0  ;;  %v29460_v4 = vld [vmem:[#allocation12_spill] sm:$0xff] }
 0x535   : > { %21254 = vmatmul.mubr.msk.bf16.gmra.mrb[112].mxu0 %vm1887_vm4, %v29458_v62  ;;  %v28637_v43 = vrot.slane %v15123_v1, 4  ;;  %v16590_v2 = vsel %vm16334_vm14, %v16206_v39, %v16462_v56  ;;  %vm16335_vm0 = vcmp.gt.f32.partialorder %v16207_v31, 0.0  ;;  %v16463_v16 = vmul.f32 0.1, %v16207_v31  ;;  %v15586_v29 = vpop.f32.mrb[9].mxu0  ;;  %v29461_v39 = vld [vmem:[#allocation15_spill] sm:$0xff] }
 0x536   : > { %21257 = vmatprep.mubr.msk.bf16.mxu0 %vm1887_vm4, %v29459_v22  ;;  %v28639_v9 = vcombine.low %v7984_v32, %v7994_v50  ;;  %v19392_v25 = vpack.c.bf16 %v16590_v2, %v16590_v2  ;;  %v16588_v45 = vsel %vm16332_vm15, %v16204_v0, %v16460_v49  ;;  %vm16333_vm1 = vcmp.gt.f32.partialorder %v16205_v17, 0.0  ;;  %v21152_v24 = vpop.f32.mrb[10].mxu0  ;;  %v22971_v56 = vld [vmem:[%s23101_s5 + $0x280] sm:$0xf]  ;;  %v29463_v49 = vld [vmem:[#allocation25_spill] sm:$0xff] }
 0x537   : > { %v16461_v38 = vmul.f32 0.1, %v16205_v17  ;;  %v19390_v44 = vpack.c.bf16 %v16588_v45, %v16588_v45  ;;  %v16591_v5 = vsel %vm16335_vm0, %v16207_v31, %v16463_v16  ;;  %v21279_v6 = vadd.f32 %v21151_v57, %v29460_v4  ;;  %v15589_v50 = vpop.f32.mrb[11].mxu0  ;;  %v29464_v4 = vld [vmem:[#allocation17_spill] sm:$0xff] }
 0x538   : > { %v19188_v1 = vcombine.low %v28562_v46, %v28615_v52  ;;  %17231 = vst.msk [vmem:[%s28585_s4 + $0x18] sm:$0xf] %vm17224_vm9, %v19392_v25  ;;  %v19393_v32 = vpack.c.bf16 %v16591_v5, %v16591_v5  ;;  %v21280_v15 = vadd.f32 %v15586_v29, %v29461_v39  ;;  %v8007_v7 = vrot.slane %v8005_v51, 4  ;;  %v22972_v25 = vld [vmem:[%s23101_s5 + $0x284] sm:$0x1] }
 0x539   : > { %v16589_v58 = vsel %vm16333_vm1, %v16205_v17, %v16461_v38  ;;  %17229 = vst.msk [vmem:[%s28585_s4 + $0x10] sm:$0xf] %vm17224_vm9, %v19390_v44  ;;  %v16210_v0 = vadd.f32 %v21279_v6, %v28526_v42  ;;  %v21281_v28 = vadd.f32 %v21152_v24, %v29462_v30  ;;  %v15126_v31 = vrot.slane %v22971_v56, 5  ;;  %20738 = vmatmul.mubr.msk.bf16.gmra.mrb[116].mxu1 %vm1887_vm4, %v28466_v37  ;;  %v29468_v52 = vld [vmem:[#allocation30_spill] sm:$0xff] }
 0x53a   : > { %v19391_v54 = vpack.c.bf16 %v16589_v58, %v16589_v58  ;;  %17232 = vst.msk [vmem:[%s28585_s4 + $0x1c] sm:$0xf] %vm17224_vm9, %v19393_v32  ;;  %v16208_v62 = vadd.f32 %v21280_v15, %v28526_v42  ;;  %v21282_v17 = vadd.f32 %v15589_v50, %v29463_v49  ;;  %v7998_v51 = vor.u32 %v28592_v19, %v28538_v11  ;;  %v29465_v32 = vld [vmem:[#allocation27_spill] sm:$0xff]  ;;  %v29467_v50 = vld [vmem:[#allocation29_spill] sm:$0xff] }
 0x53b   : > { %v28658_v22 = vrot.slane %v8011_v21, 5  ;;  %vm16338_vm2 = vcmp.gt.f32.partialorder %v16210_v0, 0.0  ;;  %v16466_v2 = vmul.f32 0.1, %v16210_v0  ;;  %v16211_v16 = vadd.f32 %v21281_v28, %v28526_v42  ;;  %20741 = vmatprep.mubr.msk.bf16.mxu1 %vm1887_vm4, %v28530_v3 }
 0x53c   : > { %17230 = vst.msk [vmem:[%s28585_s4 + $0x14] sm:$0xf] %vm17224_vm9, %v19391_v54  ;;  %v15129_v45 = vrot.slane %v22972_v25, 5  ;;  %vm16336_vm3 = vcmp.gt.f32.partialorder %v16208_v62, 0.0  ;;  %v16464_v11 = vmul.f32 0.1, %v16208_v62  ;;  %v16209_v19 = vadd.f32 %v21282_v17, %v28526_v42 }
 0x53d   : > { %21258 = vmatmul.mubr.msk.bf16.gmra.mrb[116].mxu0 %vm1887_vm4, %v19185_v53  ;;  %v8008_v37 = vor.u32 %v8007_v7, %v28626_v63  ;;  %v16594_v14 = vsel %vm16338_vm2, %v16210_v0, %v16466_v2  ;;  %vm16339_vm6 = vcmp.gt.f32.partialorder %v16211_v16, 0.0  ;;  %v16467_v8 = vmul.f32 0.1, %v16211_v16  ;;  %v21155_v44 = vpop.f32.mrb[12].mxu0  ;;  %v29466_v54 = vld [vmem:[#allocation28_spill] sm:$0xff] }
 0x53e   : > { %21261 = vmatprep.mubr.msk.bf16.mxu0 %vm1887_vm4, %v19186_v55  ;;  %v15128_v53 = vrot.slane %v15126_v31, 4  ;;  %v19396_v21 = vpack.c.bf16 %v16594_v14, %v16594_v14  ;;  %v16592_v38 = vsel %vm16336_vm3, %v16208_v62, %v16464_v11  ;;  %vm16337_vm7 = vcmp.gt.f32.partialorder %v16209_v19, 0.0  ;;  %v15602_v26 = vpop.f32.mrb[13].mxu0 }
 0x53f   : > { %v16465_v57 = vmul.f32 0.1, %v16209_v19  ;;  %v19394_v5 = vpack.c.bf16 %v16592_v38, %v16592_v38  ;;  %v16595_v3 = vsel %vm16339_vm6, %v16211_v16, %v16467_v8  ;;  %v21283_v59 = vadd.f32 %v21155_v44, %v29464_v4  ;;  %v21156_v39 = vpop.f32.mrb[14].mxu0 }
 0x540   : > { %v7999_v55 = vrot.slane %v7998_v51, 4  ;;  %17235 = vst.msk [vmem:[%s28585_s4 + $0x28] sm:$0xf] %vm17224_vm9, %v19396_v21  ;;  %v19397_v6 = vpack.c.bf16 %v16595_v3, %v16595_v3  ;;  %v21284_v58 = vadd.f32 %v15602_v26, %v29465_v32  ;;  %v8009_v15 = vrot.slane %v8008_v37, 4  ;;  %v15605_v30 = vpop.f32.mrb[15].mxu0  ;;  %v29470_v21 = vld [vmem:[#allocation33_spill] sm:$0xff] }
 0x541   : > { %v16593_v29 = vsel %vm16337_vm7, %v16209_v19, %v16465_v57  ;;  %17233 = vst.msk [vmem:[%s28585_s4 + $0x20] sm:$0xf] %vm17224_vm9, %v19394_v5  ;;  %v16214_v7 = vadd.f32 %v21283_v59, %v28526_v42  ;;  %v21285_v0 = vadd.f32 %v21156_v39, %v29466_v54  ;;  %v21286_v56 = vadd.f32 %v15605_v30, %v29467_v50  ;;  %v29469_v19 = vld [vmem:[#allocation31_spill] sm:$0xff]  ;;  %v29471_v5 = vld [vmem:[#allocation34_spill] sm:$0xff] }
 0x542   : > { %v19395_v24 = vpack.c.bf16 %v16593_v29, %v16593_v29  ;;  %17236 = vst.msk [vmem:[%s28585_s4 + $0x2c] sm:$0xf] %vm17224_vm9, %v19397_v6  ;;  %v16212_v28 = vadd.f32 %v21284_v58, %v28526_v42  ;;  %v15127_v62 = vsel %vm23613_vm8, %v28637_v43, %v15126_v31  ;;  %v15130_v49 = vsel %vm23613_vm8, %v15128_v53, %v15129_v45  ;;  %v29472_v54 = vld [vmem:[#allocation22_spill] sm:$0xff] }
 0x543   : > { %vm16342_vm10 = vcmp.gt.f32.partialorder %v16214_v7, 0.0  ;;  %v16470_v17 = vmul.f32 0.1, %v16214_v7  ;;  %v16215_v51 = vadd.f32 %v21285_v0, %v28526_v42  ;;  %20742 = vmatmul.mubr.msk.bf16.gmra.mrb[120].mxu1 %vm1887_vm4, %v28542_v35  ;;  %v8004_v43 = vsel %vm23119_vm5, %v7999_v55, %v28626_v63 }
 0x544   : > { %17234 = vst.msk [vmem:[%s28585_s4 + $0x24] sm:$0xf] %vm17224_vm9, %v19395_v24  ;;  %vm16340_vm11 = vcmp.gt.f32.partialorder %v16212_v28, 0.0  ;;  %v16468_v48 = vmul.f32 0.1, %v16212_v28  ;;  %v16213_v31 = vadd.f32 %v21286_v56, %v28526_v42  ;;  %20745 = vmatprep.mubr.msk.bf16.mxu1 %vm1887_vm4, %v28639_v9  ;;  %v8014_v23 = vsel %vm23119_vm5, %v8009_v15, %v28658_v22  ;;  %v21159_v9 = vpop.f32.mrb[16].mxu0 }
 0x545   : > { %21262 = vmatmul.mubr.msk.bf16.gmra.mrb[120].mxu0 %vm1887_vm4, %v19187_v20  ;;  %v16598_v18 = vsel %vm16342_vm10, %v16214_v7, %v16470_v17  ;;  %vm16343_vm8 = vcmp.gt.f32.partialorder %v16215_v51, 0.0  ;;  %v16471_v35 = vmul.f32 0.1, %v16215_v51  ;;  %v19189_v20 = vcombine.low %v15127_v62, %v15130_v49  ;;  %v15618_v45 = vpop.f32.mrb[17].mxu0  ;;  %v29473_v56 = vld [vmem:[#allocation23_spill] sm:$0xff] }
 0x546   : > { %21265 = vmatprep.mubr.msk.bf16.mxu0 %vm1887_vm4, %v19188_v1  ;;  %v19400_v63 = vpack.c.bf16 %v16598_v18, %v16598_v18  ;;  %v16596_v2 = vsel %vm16340_vm11, %v16212_v28, %v16468_v48  ;;  %vm16341_vm12 = vcmp.gt.f32.partialorder %v16213_v31, 0.0  ;;  %v16469_v16 = vmul.f32 0.1, %v16213_v31  ;;  %v21160_v14 = vpop.f32.mrb[18].mxu0  ;;  %v29475_v18 = vld [vmem:[#allocation6_spill] sm:$0xff] }
 0x547   : > { %v19398_v25 = vpack.c.bf16 %v16596_v2, %v16596_v2  ;;  %v16599_v46 = vsel %vm16343_vm8, %v16215_v51, %v16471_v35  ;;  %v21287_v1 = vadd.f32 %v21159_v9, %v29468_v52  ;;  %v18335_v36 = vcombine.low %v8004_v43, %v8014_v23  ;;  %v15621_v57 = vpop.f32.mrb[19].mxu0  ;;  %v29474_v43 = vld [vmem:[#allocation4_spill] sm:$0xff] }
 0x548   : > { %17239 = vst.msk [vmem:[%s28585_s4 + $0x38] sm:$0xf] %vm17224_vm9, %v19400_v63  ;;  %v19401_v22 = vpack.c.bf16 %v16599_v46, %v16599_v46  ;;  %v16597_v11 = vsel %vm16341_vm12, %v16213_v31, %v16469_v16  ;;  %v21288_v37 = vadd.f32 %v15618_v45, %v29469_v19  ;;  %v21289_v38 = vadd.f32 %v21160_v14, %v29470_v21 }
 0x549   : > { %17237 = vst.msk [vmem:[%s28585_s4 + $0x30] sm:$0xf] %vm17224_vm9, %v19398_v25  ;;  %v19399_v8 = vpack.c.bf16 %v16597_v11, %v16597_v11  ;;  %v16218_v53 = vadd.f32 %v21287_v1, %v28526_v42  ;;  %v21290_v3 = vadd.f32 %v15621_v57, %v29471_v5  ;;  %v29476_v11 = vld [vmem:[#allocation36_spill] sm:$0xff]  ;;  %v29478_v5 = vld [vmem:[#allocation38_spill] sm:$0xff] }
 0x54a   : > { %17240 = vst.msk [vmem:[%s28585_s4 + $0x3c] sm:$0xf] %vm17224_vm9, %v19401_v22  ;;  %v16216_v44 = vadd.f32 %v21288_v37, %v28526_v42  ;;  %v16219_v59 = vadd.f32 %v21289_v38, %v28526_v42 }
 0x54b   : > { %17238 = vst.msk [vmem:[%s28585_s4 + $0x34] sm:$0xf] %vm17224_vm9, %v19399_v8  ;;  %vm16346_vm5 = vcmp.gt.f32.partialorder %v16218_v53, 0.0  ;;  %v16474_v4 = vmul.f32 0.1, %v16218_v53  ;;  %20746 = vmatmul.mubr.msk.bf16.gmra.mrb[124].mxu1 %vm1887_vm4, %v18335_v36  ;;  %v16217_v55 = vadd.f32 %v21290_v3, %v28526_v42 }
 0x54c   : > { %vm16344_vm13 = vcmp.gt.f32.partialorder %v16216_v44, 0.0  ;;  %v16472_v26 = vmul.f32 0.1, %v16216_v44  ;;  %vm16347_vm14 = vcmp.gt.f32.partialorder %v16219_v59, 0.0  ;;  %v16475_v29 = vmul.f32 0.1, %v16219_v59 }
 0x54d   : > { %21266 = vmatmul.mubr.msk.bf16.gmra.mrb[124].mxu0 %vm1887_vm4, %v19189_v20  ;;  %v16602_v6 = vsel %vm16346_vm5, %v16218_v53, %v16474_v4  ;;  %vm16345_vm15 = vcmp.gt.f32.partialorder %v16217_v55, 0.0  ;;  %v16473_v39 = vmul.f32 0.1, %v16217_v55  ;;  %v21163_v15 = vpop.f32.mrb[20].mxu0  ;;  %v29477_v53 = vld [vmem:[#allocation37_spill] sm:$0xff] }
 0x54e   : > { %v19404_v32 = vpack.c.bf16 %v16602_v6, %v16602_v6  ;;  %v16600_v58 = vsel %vm16344_vm13, %v16216_v44, %v16472_v26  ;;  %v16603_v7 = vsel %vm16347_vm14, %v16219_v59, %v16475_v29  ;;  %v21291_v0 = vadd.f32 %v21163_v15, %v29472_v54  ;;  %v15634_v30 = vpop.f32.mrb[21].mxu0  ;;  %v29479_v26 = vld [vmem:[#allocation39_spill] sm:$0xff] }
 0x54f   : > { %v19402_v24 = vpack.c.bf16 %v16600_v58, %v16600_v58  ;;  %v19405_v28 = vpack.c.bf16 %v16603_v7, %v16603_v7  ;;  %v16601_v50 = vsel %vm16345_vm15, %v16217_v55, %v16473_v39  ;;  %v21292_v62 = vadd.f32 %v15634_v30, %v29473_v56  ;;  %v21164_v49 = vpop.f32.mrb[22].mxu0 }
 0x550   : > { %17243 = vst.msk [vmem:[%s28585_s4 + $0x48] sm:$0xf] %vm17224_vm9, %v19404_v32  ;;  %v19403_v17 = vpack.c.bf16 %v16601_v50, %v16601_v50  ;;  %v16222_v51 = vadd.f32 %v21291_v0, %v28526_v42  ;;  %v21293_v48 = vadd.f32 %v21164_v49, %v29474_v43  ;;  %v15637_v31 = vpop.f32.mrb[23].mxu0 }
 0x551   : > { %17241 = vst.msk [vmem:[%s28585_s4 + $0x40] sm:$0xf] %vm17224_vm9, %v19402_v24  ;;  %17244 = vst.msk [vmem:[%s28585_s4 + $0x4c] sm:$0xf] %vm17224_vm9, %v19405_v28  ;;  %v16220_v23 = vadd.f32 %v21292_v62, %v28526_v42  ;;  %v21294_v35 = vadd.f32 %v15637_v31, %v29475_v18 }
 0x552   : > { %17242 = vst.msk [vmem:[%s28585_s4 + $0x44] sm:$0xf] %vm17224_vm9, %v19403_v17  ;;  %vm16350_vm4 = vcmp.gt.f32.partialorder %v16222_v51, 0.0  ;;  %v16478_v20 = vmul.f32 0.1, %v16222_v51  ;;  %v16223_v63 = vadd.f32 %v21293_v48, %v28526_v42  ;;  %v29480_v17 = vld [vmem:[#allocation40_spill] sm:$0xff] }
 0x553   : > { %vm16348_vm0 = vcmp.gt.f32.partialorder %v16220_v23, 0.0  ;;  %v16476_v2 = vmul.f32 0.1, %v16220_v23  ;;  %v16221_v16 = vadd.f32 %v21294_v35, %v28526_v42 }
 0x554   : > { %v16606_v9 = vsel %vm16350_vm4, %v16222_v51, %v16478_v20  ;;  %vm16351_vm1 = vcmp.gt.f32.partialorder %v16223_v63, 0.0  ;;  %v16479_v25 = vmul.f32 0.1, %v16223_v63  ;;  %v21167_v45 = vpop.f32.mrb[24].mxu0  ;;  %v29482_v20 = vld [vmem:[#allocation42_spill] sm:$0xff] }
 0x555   : > { %v19408_v46 = vpack.c.bf16 %v16606_v9, %v16606_v9  ;;  %v16604_v52 = vsel %vm16348_vm0, %v16220_v23, %v16476_v2  ;;  %vm16349_vm2 = vcmp.gt.f32.partialorder %v16221_v16, 0.0  ;;  %v16477_v1 = vmul.f32 0.1, %v16221_v16  ;;  %v15650_v37 = vpop.f32.mrb[25].mxu0  ;;  %v29481_v23 = vld [vmem:[#allocation41_spill] sm:$0xff] }
 0x556   : > { %v19406_v36 = vpack.c.bf16 %v16604_v52, %v16604_v52  ;;  %v16607_v22 = vsel %vm16351_vm1, %v16223_v63, %v16479_v25  ;;  %v21295_v19 = vadd.f32 %v21167_v45, %v29476_v11  ;;  %v21296_v21 = vadd.f32 %v15650_v37, %v29477_v53  ;;  %v21168_v38 = vpop.f32.mrb[26].mxu0  ;;  %v29483_v37 = vld [vmem:[#allocation43_spill] sm:$0xff] }
 0x557   : > { %17247 = vst.msk [vmem:[%s28585_s4 + $0x58] sm:$0xf] %vm17224_vm9, %v19408_v46  ;;  %v19409_v14 = vpack.c.bf16 %v16607_v22, %v16607_v22  ;;  %v16605_v8 = vsel %vm16349_vm2, %v16221_v16, %v16477_v1  ;;  %v21297_v3 = vadd.f32 %v21168_v38, %v29478_v5  ;;  %v15653_v4 = vpop.f32.mrb[27].mxu0  ;;  %v29484_v38 = vld [vmem:[#allocation44_spill] sm:$0xff] }
 0x558   : > { %17245 = vst.msk [vmem:[%s28585_s4 + $0x50] sm:$0xf] %vm17224_vm9, %v19406_v36  ;;  %v19407_v57 = vpack.c.bf16 %v16605_v8, %v16605_v8  ;;  %v16226_v44 = vadd.f32 %v21295_v19, %v28526_v42  ;;  %v16224_v59 = vadd.f32 %v21296_v21, %v28526_v42  ;;  %v21298_v55 = vadd.f32 %v15653_v4, %v29479_v26  ;;  %v29485_v4 = vld [vmem:[#allocation45_spill] sm:$0xff] }
 0x559   : > { %17248 = vst.msk [vmem:[%s28585_s4 + $0x5c] sm:$0xf] %vm17224_vm9, %v19409_v14  ;;  %v16227_v29 = vadd.f32 %v21297_v3, %v28526_v42 }
 0x55a   : > { %17246 = vst.msk [vmem:[%s28585_s4 + $0x54] sm:$0xf] %vm17224_vm9, %v19407_v57  ;;  %vm16354_vm3 = vcmp.gt.f32.partialorder %v16226_v44, 0.0  ;;  %v16482_v6 = vmul.f32 0.1, %v16226_v44  ;;  %vm16352_vm6 = vcmp.gt.f32.partialorder %v16224_v59, 0.0  ;;  %v16225_v58 = vadd.f32 %v21298_v55, %v28526_v42 }
 0x55b   : > { %v16480_v32 = vmul.f32 0.1, %v16224_v59  ;;  %vm16355_vm7 = vcmp.gt.f32.partialorder %v16227_v29, 0.0  ;;  %v16483_v15 = vmul.f32 0.1, %v16227_v29 }
 0x55c   : > { %v16610_v39 = vsel %vm16354_vm3, %v16226_v44, %v16482_v6  ;;  %vm16353_vm10 = vcmp.gt.f32.partialorder %v16225_v58, 0.0  ;;  %v16481_v54 = vmul.f32 0.1, %v16225_v58  ;;  %v21171_v0 = vpop.f32.mrb[28].mxu0  ;;  %v29486_v6 = vld [vmem:[#allocation46_spill] sm:$0xff] }
 0x55d   : > { %v19412_v24 = vpack.c.bf16 %v16610_v39, %v16610_v39  ;;  %v16608_v7 = vsel %vm16352_vm6, %v16224_v59, %v16480_v32  ;;  %v16611_v28 = vsel %vm16355_vm7, %v16227_v29, %v16483_v15  ;;  %v21299_v50 = vadd.f32 %v21171_v0, %v27946_v61  ;;  %v15666_v56 = vpop.f32.mrb[29].mxu0 }
 0x55e   : > { %v19410_v30 = vpack.c.bf16 %v16608_v7, %v16608_v7  ;;  %v19413_v62 = vpack.c.bf16 %v16611_v28, %v16611_v28  ;;  %v16609_v49 = vsel %vm16353_vm10, %v16225_v58, %v16481_v54  ;;  %v21300_v51 = vadd.f32 %v15666_v56, %v29480_v17  ;;  %v21172_v43 = vpop.f32.mrb[30].mxu0 }
 0x55f   : > { %17251 = vst.msk [vmem:[%s28585_s4 + $0x68] sm:$0xf] %vm17224_vm9, %v19412_v24  ;;  %v19411_v48 = vpack.c.bf16 %v16609_v49, %v16609_v49  ;;  %v16230_v31 = vadd.f32 %v21299_v50, %v28526_v42  ;;  %v21301_v18 = vadd.f32 %v21172_v43, %v29481_v23  ;;  %v15669_v35 = vpop.f32.mrb[31].mxu0 }
 0x560   : > { %17249 = vst.msk [vmem:[%s28585_s4 + $0x60] sm:$0xf] %vm17224_vm9, %v19410_v30  ;;  %17252 = vst.msk [vmem:[%s28585_s4 + $0x6c] sm:$0xf] %vm17224_vm9, %v19413_v62  ;;  %v16228_v61 = vadd.f32 %v21300_v51, %v28526_v42  ;;  %v21302_v63 = vadd.f32 %v15669_v35, %v29482_v20  ;;  %v29487_v62 = vld [vmem:[#allocation47_spill] sm:$0xff] }
 0x561   : > { %17250 = vst.msk [vmem:[%s28585_s4 + $0x64] sm:$0xf] %vm17224_vm9, %v19411_v48  ;;  %vm16358_vm11 = vcmp.gt.f32.partialorder %v16230_v31, 0.0  ;;  %v16486_v2 = vmul.f32 0.1, %v16230_v31  ;;  %v16231_v16 = vadd.f32 %v21301_v18, %v28526_v42  ;;  %v29488_v48 = vld [vmem:[#allocation48_spill] sm:$0xff] }
 0x562   : > { %vm16356_vm8 = vcmp.gt.f32.partialorder %v16228_v61, 0.0  ;;  %v16484_v9 = vmul.f32 0.1, %v16228_v61  ;;  %v16229_v25 = vadd.f32 %v21302_v63, %v28526_v42 }
 0x563   : > { %v16614_v46 = vsel %vm16358_vm11, %v16230_v31, %v16486_v2  ;;  %vm16359_vm12 = vcmp.gt.f32.partialorder %v16231_v16, 0.0  ;;  %v16487_v52 = vmul.f32 0.1, %v16231_v16 }
 0x564   : > { %v19416_v1 = vpack.c.bf16 %v16614_v46, %v16614_v46  ;;  %v16612_v45 = vsel %vm16356_vm8, %v16228_v61, %v16484_v9  ;;  %vm16357_vm5 = vcmp.gt.f32.partialorder %v16229_v25, 0.0  ;;  %v16485_v36 = vmul.f32 0.1, %v16229_v25  ;;  %v21175_v22 = vpop.f32.mrb[32].mxu0  ;;  %v29489_v61 = vld [vmem:[#allocation49_spill] sm:$0xff] }
 0x565   : > { %v19414_v11 = vpack.c.bf16 %v16612_v45, %v16612_v45  ;;  %v16615_v19 = vsel %vm16359_vm12, %v16231_v16, %v16487_v52  ;;  %v21303_v14 = vadd.f32 %v21175_v22, %v29483_v37  ;;  %v15682_v8 = vpop.f32.mrb[33].mxu0  ;;  %v29490_v16 = vld [vmem:[#allocation50_spill] sm:$0xff] }
 0x566   : > { %17255 = vst.msk [vmem:[%s28585_s4 + $0x78] sm:$0xf] %vm17224_vm9, %v19416_v1  ;;  %v19417_v53 = vpack.c.bf16 %v16615_v19, %v16615_v19  ;;  %v16613_v21 = vsel %vm16357_vm5, %v16229_v25, %v16485_v36  ;;  %v21304_v57 = vadd.f32 %v15682_v8, %v29484_v38  ;;  %v21176_v44 = vpop.f32.mrb[34].mxu0 }
 0x567   : > { %17253 = vst.msk [vmem:[%s28585_s4 + $0x70] sm:$0xf] %vm17224_vm9, %v19414_v11  ;;  %v19415_v5 = vpack.c.bf16 %v16613_v21, %v16613_v21  ;;  %v16234_v3 = vadd.f32 %v21303_v14, %v28526_v42  ;;  %v21305_v59 = vadd.f32 %v21176_v44, %v29485_v4  ;;  %v15685_v26 = vpop.f32.mrb[35].mxu0 }
 0x568   : > { %17256 = vst.msk [vmem:[%s28585_s4 + $0x7c] sm:$0xf] %vm17224_vm9, %v19417_v53  ;;  %v16232_v55 = vadd.f32 %v21304_v57, %v28526_v42  ;;  %v21306_v29 = vadd.f32 %v15685_v26, %v29486_v6  ;;  %v29491_v53 = vld [vmem:[#allocation26_spill] sm:$0xff] }
 0x569   : > { %17254 = vst.msk [vmem:[%s28585_s4 + $0x74] sm:$0xf] %vm17224_vm9, %v19415_v5  ;;  %vm16362_vm13 = vcmp.gt.f32.partialorder %v16234_v3, 0.0  ;;  %v16490_v32 = vmul.f32 0.1, %v16234_v3  ;;  %v16235_v58 = vadd.f32 %v21305_v59, %v28526_v42  ;;  %v29492_v5 = vld [vmem:[#allocation2_spill] sm:$0xff] }
 0x56a   : > { %vm16360_vm14 = vcmp.gt.f32.partialorder %v16232_v55, 0.0  ;;  %v16488_v39 = vmul.f32 0.1, %v16232_v55  ;;  %v16233_v15 = vadd.f32 %v21306_v29, %v28526_v42 }
 0x56b   : > { %v16618_v24 = vsel %vm16362_vm13, %v16234_v3, %v16490_v32  ;;  %vm16363_vm15 = vcmp.gt.f32.partialorder %v16235_v58, 0.0  ;;  %v16491_v7 = vmul.f32 0.1, %v16235_v58 }
 0x56c   : > { %v19420_v54 = vpack.c.bf16 %v16618_v24, %v16618_v24  ;;  %v16616_v0 = vsel %vm16360_vm14, %v16232_v55, %v16488_v39  ;;  %vm16361_vm4 = vcmp.gt.f32.partialorder %v16233_v15, 0.0  ;;  %v16489_v30 = vmul.f32 0.1, %v16233_v15  ;;  %v21179_v28 = vpop.f32.mrb[36].mxu0  ;;  %v29493_v55 = vld [vmem:[#allocation14_spill] sm:$0xff] }
 0x56d   : > { %v19418_v50 = vpack.c.bf16 %v16616_v0, %v16616_v0  ;;  %v16619_v56 = vsel %vm16363_vm15, %v16235_v58, %v16491_v7  ;;  %v21307_v49 = vadd.f32 %v21179_v28, %v29487_v62  ;;  %v15698_v17 = vpop.f32.mrb[37].mxu0  ;;  %v29494_v58 = vld [vmem:[#allocation18_spill] sm:$0xff] }
 0x56e   : > { %17259 = vst.msk [vmem:[%s28585_s4 + $0x88] sm:$0xf] %vm17224_vm9, %v19420_v54  ;;  %v19421_v51 = vpack.c.bf16 %v16619_v56, %v16619_v56  ;;  %v16617_v43 = vsel %vm16361_vm4, %v16233_v15, %v16489_v30  ;;  %v21308_v31 = vadd.f32 %v15698_v17, %v29488_v48  ;;  %v21180_v23 = vpop.f32.mrb[38].mxu0 }
 0x56f   : > { %17257 = vst.msk [vmem:[%s28585_s4 + $0x80] sm:$0xf] %vm17224_vm9, %v19418_v50  ;;  %v19419_v18 = vpack.c.bf16 %v16617_v43, %v16617_v43  ;;  %v16238_v35 = vadd.f32 %v21307_v49, %v28526_v42  ;;  %v21309_v20 = vadd.f32 %v21180_v23, %v29489_v61  ;;  %v15701_v63 = vpop.f32.mrb[39].mxu0 }
 0x570   : > { %17260 = vst.msk [vmem:[%s28585_s4 + $0x8c] sm:$0xf] %vm17224_vm9, %v19421_v51  ;;  %v16236_v2 = vadd.f32 %v21308_v31, %v28526_v42  ;;  %v21310_v9 = vadd.f32 %v15701_v63, %v29490_v16  ;;  %v29495_v51 = vld [vmem:[#allocation32_spill] sm:$0xff] }
 0x571   : > { %17258 = vst.msk [vmem:[%s28585_s4 + $0x84] sm:$0xf] %vm17224_vm9, %v19419_v18  ;;  %vm16366_vm0 = vcmp.gt.f32.partialorder %v16238_v35, 0.0  ;;  %v16494_v25 = vmul.f32 0.1, %v16238_v35  ;;  %v16239_v46 = vadd.f32 %v21309_v20, %v28526_v42  ;;  %v29496_v18 = vld [vmem:[#allocation19_spill] sm:$0xff] }
 0x572   : > { %vm16364_vm1 = vcmp.gt.f32.partialorder %v16236_v2, 0.0  ;;  %v16492_v52 = vmul.f32 0.1, %v16236_v2  ;;  %v16237_v1 = vadd.f32 %v21310_v9, %v28526_v42 }
 0x573   : > { %v16622_v45 = vsel %vm16366_vm0, %v16238_v35, %v16494_v25  ;;  %vm16367_vm2 = vcmp.gt.f32.partialorder %v16239_v46, 0.0  ;;  %v16495_v36 = vmul.f32 0.1, %v16239_v46 }
 0x574   : > { %v19424_v22 = vpack.c.bf16 %v16622_v45, %v16622_v45  ;;  %v16620_v11 = vsel %vm16364_vm1, %v16236_v2, %v16492_v52  ;;  %vm16365_vm3 = vcmp.gt.f32.partialorder %v16237_v1, 0.0  ;;  %v16493_v19 = vmul.f32 0.1, %v16237_v1  ;;  %v21183_v37 = vpop.f32.mrb[40].mxu0  ;;  %v29497_v2 = vld [vmem:[#allocation3_spill] sm:$0xff] }
 0x575   : > { %v19422_v14 = vpack.c.bf16 %v16620_v11, %v16620_v11  ;;  %v16623_v8 = vsel %vm16367_vm2, %v16239_v46, %v16495_v36  ;;  %v21311_v21 = vadd.f32 %v21183_v37, %v29491_v53  ;;  %v15714_v38 = vpop.f32.mrb[41].mxu0  ;;  %v29498_v46 = vld [vmem:[#allocation35_spill] sm:$0xff] }
 0x576   : > { %17263 = vst.msk [vmem:[%s28585_s4 + $0x98] sm:$0xf] %vm17224_vm9, %v19424_v22  ;;  %v19425_v57 = vpack.c.bf16 %v16623_v8, %v16623_v8  ;;  %v16621_v44 = vsel %vm16365_vm3, %v16237_v1, %v16493_v19  ;;  %v21312_v3 = vadd.f32 %v15714_v38, %v29492_v5  ;;  %v21184_v4 = vpop.f32.mrb[42].mxu0 }
 0x577   : > { %17261 = vst.msk [vmem:[%s28585_s4 + $0x90] sm:$0xf] %vm17224_vm9, %v19422_v14  ;;  %v19423_v59 = vpack.c.bf16 %v16621_v44, %v16621_v44  ;;  %v16242_v26 = vadd.f32 %v21311_v21, %v28526_v42  ;;  %v21313_v6 = vadd.f32 %v21184_v4, %v29493_v55  ;;  %v15717_v29 = vpop.f32.mrb[43].mxu0 }
 0x578   : > { %17264 = vst.msk [vmem:[%s28585_s4 + $0x9c] sm:$0xf] %vm17224_vm9, %v19425_v57  ;;  %v16240_v32 = vadd.f32 %v21312_v3, %v28526_v42  ;;  %v21314_v39 = vadd.f32 %v15717_v29, %v29494_v58  ;;  %v29499_v57 = vld [vmem:[#allocation20_spill] sm:$0xff] }
 0x579   : > { %17262 = vst.msk [vmem:[%s28585_s4 + $0x94] sm:$0xf] %vm17224_vm9, %v19423_v59  ;;  %vm16370_vm6 = vcmp.gt.f32.partialorder %v16242_v26, 0.0  ;;  %v16498_v15 = vmul.f32 0.1, %v16242_v26  ;;  %v16243_v24 = vadd.f32 %v21313_v6, %v28526_v42  ;;  %v29500_v59 = vld [vmem:[#allocation21_spill] sm:$0xff] }
 0x57a   : > { %vm16368_vm7 = vcmp.gt.f32.partialorder %v16240_v32, 0.0  ;;  %v16496_v7 = vmul.f32 0.1, %v16240_v32  ;;  %v16241_v54 = vadd.f32 %v21314_v39, %v28526_v42 }
 0x57b   : > { %v16626_v0 = vsel %vm16370_vm6, %v16242_v26, %v16498_v15  ;;  %vm16371_vm10 = vcmp.gt.f32.partialorder %v16243_v24, 0.0  ;;  %v16499_v30 = vmul.f32 0.1, %v16243_v24 }
 0x57c   : > { %v19428_v28 = vpack.c.bf16 %v16626_v0, %v16626_v0  ;;  %v16624_v50 = vsel %vm16368_vm7, %v16240_v32, %v16496_v7  ;;  %vm16369_vm11 = vcmp.gt.f32.partialorder %v16241_v54, 0.0  ;;  %v16497_v56 = vmul.f32 0.1, %v16241_v54  ;;  %v21187_v62 = vpop.f32.mrb[44].mxu0 }
 0x57d   : > { %v19426_v49 = vpack.c.bf16 %v16624_v50, %v16624_v50  ;;  %v16627_v17 = vsel %vm16371_vm10, %v16243_v24, %v16499_v30  ;;  %v21315_v43 = vadd.f32 %v21187_v62, %v29495_v51  ;;  %v15730_v48 = vpop.f32.mrb[45].mxu0 }
 0x57e   : > { %17267 = vst.msk [vmem:[%s28585_s4 + $0xa8] sm:$0xf] %vm17224_vm9, %v19428_v28  ;;  %v19429_v31 = vpack.c.bf16 %v16627_v17, %v16627_v17  ;;  %v16625_v23 = vsel %vm16369_vm11, %v16241_v54, %v16497_v56  ;;  %v21316_v35 = vadd.f32 %v15730_v48, %v29496_v18  ;;  %v21188_v61 = vpop.f32.mrb[46].mxu0 }
 0x57f   : > { %17265 = vst.msk [vmem:[%s28585_s4 + $0xa0] sm:$0xf] %vm17224_vm9, %v19426_v49  ;;  %v19427_v20 = vpack.c.bf16 %v16625_v23, %v16625_v23  ;;  %v16246_v63 = vadd.f32 %v21315_v43, %v28526_v42  ;;  %v21317_v16 = vadd.f32 %v21188_v61, %v29497_v2  ;;  %v15733_v9 = vpop.f32.mrb[47].mxu0 }
 0x580   : > { %17268 = vst.msk [vmem:[%s28585_s4 + $0xac] sm:$0xf] %vm17224_vm9, %v19429_v31  ;;  %v16244_v25 = vadd.f32 %v21316_v35, %v28526_v42  ;;  %v21318_v52 = vadd.f32 %v15733_v9, %v29498_v46 }
 0x581   : > { %17266 = vst.msk [vmem:[%s28585_s4 + $0xa4] sm:$0xf] %vm17224_vm9, %v19427_v20  ;;  %vm16374_vm8 = vcmp.gt.f32.partialorder %v16246_v63, 0.0  ;;  %v16502_v1 = vmul.f32 0.1, %v16246_v63  ;;  %v16247_v45 = vadd.f32 %v21317_v16, %v28526_v42 }
 0x582   : > { %vm16372_vm12 = vcmp.gt.f32.partialorder %v16244_v25, 0.0  ;;  %v16500_v36 = vmul.f32 0.1, %v16244_v25  ;;  %v16245_v22 = vadd.f32 %v21318_v52, %v28526_v42 }
 0x583   : > { %v16630_v11 = vsel %vm16374_vm8, %v16246_v63, %v16502_v1  ;;  %vm16375_vm5 = vcmp.gt.f32.partialorder %v16247_v45, 0.0  ;;  %v16503_v19 = vmul.f32 0.1, %v16247_v45 }
 0x584   : > { %v19432_v37 = vpack.c.bf16 %v16630_v11, %v16630_v11  ;;  %v16628_v14 = vsel %vm16372_vm12, %v16244_v25, %v16500_v36  ;;  %vm16373_vm13 = vcmp.gt.f32.partialorder %v16245_v22, 0.0  ;;  %v16501_v8 = vmul.f32 0.1, %v16245_v22  ;;  %v21191_v53 = vpop.f32.mrb[48].mxu0 }
 0x585   : > { %v19430_v21 = vpack.c.bf16 %v16628_v14, %v16628_v14  ;;  %v16631_v38 = vsel %vm16375_vm5, %v16247_v45, %v16503_v19  ;;  %v21319_v44 = vadd.f32 %v21191_v53, %v29499_v57  ;;  %v15746_v5 = vpop.f32.mrb[49].mxu0  ;;  %v28888_v53 = vld [vmem:[%s29138_s2] ss:$0 sm:$0xff] }
 0x586   : > { %17271 = vst.msk [vmem:[%s28585_s4 + $0xb8] sm:$0xf] %vm17224_vm9, %v19432_v37  ;;  %v19433_v3 = vpack.c.bf16 %v16631_v38, %v16631_v38  ;;  %v16629_v4 = vsel %vm16373_vm13, %v16245_v22, %v16501_v8  ;;  %v21320_v26 = vadd.f32 %v15746_v5, %v29500_v59  ;;  %v21192_v55 = vpop.f32.mrb[50].mxu0 }
 0x587   : > { %17269 = vst.msk [vmem:[%s28585_s4 + $0xb0] sm:$0xf] %vm17224_vm9, %v19430_v21  ;;  %v19431_v6 = vpack.c.bf16 %v16629_v4, %v16629_v4  ;;  %v16250_v29 = vadd.f32 %v21319_v44, %v28526_v42  ;;  %v21321_v32 = vadd.f32 %v21192_v55, %v28267_v41  ;;  %v15749_v58 = vpop.f32.mrb[51].mxu0  ;;  %v29501_v44 = vld [vmem:[#allocation51_spill] sm:$0xff] }
 0x588   : > { %17272 = vst.msk [vmem:[%s28585_s4 + $0xbc] sm:$0xf] %vm17224_vm9, %v19433_v3  ;;  %v16248_v39 = vadd.f32 %v21320_v26, %v28526_v42  ;;  %v21322_v15 = vadd.f32 %v15749_v58, %v28274_v10 }
 0x589   : > { %17270 = vst.msk [vmem:[%s28585_s4 + $0xb4] sm:$0xf] %vm17224_vm9, %v19431_v6  ;;  %vm16378_vm14 = vcmp.gt.f32.partialorder %v16250_v29, 0.0  ;;  %v16506_v24 = vmul.f32 0.1, %v16250_v29  ;;  %v16251_v7 = vadd.f32 %v21321_v32, %v28526_v42 }
 0x58a   : > { %vm16376_vm15 = vcmp.gt.f32.partialorder %v16248_v39, 0.0  ;;  %v16504_v54 = vmul.f32 0.1, %v16248_v39  ;;  %v16249_v0 = vadd.f32 %v21322_v15, %v28526_v42  ;;  %v29502_v15 = vld [vmem:[#allocation52_spill] sm:$0xff] }
 0x58b   : > { %v16634_v30 = vsel %vm16378_vm14, %v16250_v29, %v16506_v24  ;;  %vm16379_vm4 = vcmp.gt.f32.partialorder %v16251_v7, 0.0  ;;  %v16507_v41 = vmul.f32 0.1, %v16251_v7 }
 0x58c   : > { %v19436_v28 = vpack.c.bf16 %v16634_v30, %v16634_v30  ;;  %v16632_v50 = vsel %vm16376_vm15, %v16248_v39, %v16504_v54  ;;  %vm16377_vm0 = vcmp.gt.f32.partialorder %v16249_v0, 0.0  ;;  %v16505_v56 = vmul.f32 0.1, %v16249_v0  ;;  %v21195_v10 = vpop.f32.mrb[52].mxu0  ;;  %v29503_v30 = vld [vmem:[#allocation53_spill] sm:$0xff] }
 0x58d   : > { %v19434_v62 = vpack.c.bf16 %v16632_v50, %v16632_v50  ;;  %v16635_v49 = vsel %vm16379_vm4, %v16251_v7, %v16507_v41  ;;  %v21323_v17 = vadd.f32 %v21195_v10, %v28319_v34  ;;  %v15762_v51 = vpop.f32.mrb[53].mxu0  ;;  %v29504_v10 = vld [vmem:[#allocation54_spill] sm:$0xff] }
 0x58e   : > { %17275 = vst.msk [vmem:[%s28585_s4 + $0xc8] sm:$0xf] %vm17224_vm9, %v19436_v28  ;;  %v19437_v43 = vpack.c.bf16 %v16635_v49, %v16635_v49  ;;  %v16633_v48 = vsel %vm16377_vm0, %v16249_v0, %v16505_v56  ;;  %v21324_v31 = vadd.f32 %v15762_v51, %v28323_v12  ;;  %v21196_v23 = vpop.f32.mrb[54].mxu0 }
 0x58f   : > { %17273 = vst.msk [vmem:[%s28585_s4 + $0xc0] sm:$0xf] %vm17224_vm9, %v19434_v62  ;;  %v19435_v18 = vpack.c.bf16 %v16633_v48, %v16633_v48  ;;  %v16254_v35 = vadd.f32 %v21323_v17, %v28526_v42  ;;  %v21325_v61 = vadd.f32 %v21196_v23, %v28343_v27  ;;  %v15765_v20 = vpop.f32.mrb[55].mxu0 }
 0x590   : > { %17276 = vst.msk [vmem:[%s28585_s4 + $0xcc] sm:$0xf] %vm17224_vm9, %v19437_v43  ;;  %v16252_v34 = vadd.f32 %v21324_v31, %v28526_v42  ;;  %v21326_v63 = vadd.f32 %v15765_v20, %v28355_v13 }
 0x591   : > { %17274 = vst.msk [vmem:[%s28585_s4 + $0xc4] sm:$0xf] %vm17224_vm9, %v19435_v18  ;;  %vm16382_vm1 = vcmp.gt.f32.partialorder %v16254_v35, 0.0  ;;  %v16510_v2 = vmul.f32 0.1, %v16254_v35  ;;  %v16255_v12 = vadd.f32 %v21325_v61, %v28526_v42 }
 0x592   : > { %vm16380_vm2 = vcmp.gt.f32.partialorder %v16252_v34, 0.0  ;;  %v16508_v16 = vmul.f32 0.1, %v16252_v34  ;;  %v16253_v9 = vadd.f32 %v21326_v63, %v28526_v42 }
 0x593   : > { %v16638_v25 = vsel %vm16382_vm1, %v16254_v35, %v16510_v2  ;;  %vm16383_vm3 = vcmp.gt.f32.partialorder %v16255_v12, 0.0  ;;  %v16511_v27 = vmul.f32 0.1, %v16255_v12 }
 0x594   : > { %v19440_v46 = vpack.c.bf16 %v16638_v25, %v16638_v25  ;;  %v16636_v52 = vsel %vm16380_vm2, %v16252_v34, %v16508_v16  ;;  %vm16381_vm6 = vcmp.gt.f32.partialorder %v16253_v9, 0.0  ;;  %v16509_v1 = vmul.f32 0.1, %v16253_v9 }
 0x595   : > { %v19438_v45 = vpack.c.bf16 %v16636_v52, %v16636_v52  ;;  %v16639_v36 = vsel %vm16383_vm3, %v16255_v12, %v16511_v27 }
 0x596   : > { %v21199_v13 = vpop.f32.mrb[56].mxu0  ;;  %17279 = vst.msk [vmem:[%s28585_s4 + $0xd8] sm:$0xf] %vm17224_vm9, %v19440_v46  ;;  %v19441_v19 = vpack.c.bf16 %v16639_v36, %v16639_v36  ;;  %v16637_v42 = vsel %vm16381_vm6, %v16253_v9, %v16509_v1 }
 0x597   : > { %v21327_v22 = vadd.f32 %v21199_v13, %v28382_v47  ;;  %v15778_v11 = vpop.f32.mrb[57].mxu0  ;;  %17277 = vst.msk [vmem:[%s28585_s4 + $0xd0] sm:$0xf] %vm17224_vm9, %v19438_v45  ;;  %v19439_v8 = vpack.c.bf16 %v16637_v42, %v16637_v42 }
 0x598   : > { %v21328_v37 = vadd.f32 %v15778_v11, %v28390_v40  ;;  %v21200_v14 = vpop.f32.mrb[58].mxu0  ;;  %17280 = vst.msk [vmem:[%s28585_s4 + $0xdc] sm:$0xf] %vm17224_vm9, %v19441_v19 }
 0x599   : > { %v16258_v21 = vadd.f32 %v28888_v53, %v21327_v22  ;;  %v21329_v47 = vadd.f32 %v21200_v14, %v28394_v33  ;;  %v15781_v38 = vpop.f32.mrb[59].mxu0  ;;  %17278 = vst.msk [vmem:[%s28585_s4 + $0xd4] sm:$0xf] %vm17224_vm9, %v19439_v8 }
 0x59a   : > { %v16256_v57 = vadd.f32 %v28888_v53, %v21328_v37  ;;  %v21330_v40 = vadd.f32 %v15781_v38, %v29501_v44 }
 0x59b   : > { %vm16386_vm7 = vcmp.gt.f32.partialorder %v16258_v21, 0.0  ;;  %v16514_v5 = vmul.f32 0.1, %v16258_v21  ;;  %v16259_v3 = vadd.f32 %v28888_v53, %v21329_v47 }
 0x59c   : > { %vm16384_vm10 = vcmp.gt.f32.partialorder %v16256_v57, 0.0  ;;  %v16512_v4 = vmul.f32 0.1, %v16256_v57  ;;  %v16257_v59 = vadd.f32 %v28888_v53, %v21330_v40 }
 0x59d   : > { %v16642_v26 = vsel %vm16386_vm7, %v16258_v21, %v16514_v5  ;;  %vm16387_vm11 = vcmp.gt.f32.partialorder %v16259_v3, 0.0  ;;  %v16515_v33 = vmul.f32 0.1, %v16259_v3 }
 0x59e   : > { %v19444_v55 = vpack.c.bf16 %v16642_v26, %v16642_v26  ;;  %v16640_v6 = vsel %vm16384_vm10, %v16256_v57, %v16512_v4  ;;  %vm16385_vm8 = vcmp.gt.f32.partialorder %v16257_v59, 0.0  ;;  %v16513_v29 = vmul.f32 0.1, %v16257_v59  ;;  %v21203_v32 = vpop.f32.mrb[60].mxu0 }
 0x59f   : > { %v19442_v58 = vpack.c.bf16 %v16640_v6, %v16640_v6  ;;  %v16643_v39 = vsel %vm16387_vm11, %v16259_v3, %v16515_v33  ;;  %v21331_v24 = vadd.f32 %v21203_v32, %v29502_v15  ;;  %v15794_v7 = vpop.f32.mrb[61].mxu0 }
 0x5a0   : > { %17283 = vst.msk [vmem:[%s28585_s4 + $0xe8] sm:$0xf] %vm17224_vm9, %v19444_v55  ;;  %v19445_v54 = vpack.c.bf16 %v16643_v39, %v16643_v39  ;;  %v16641_v0 = vsel %vm16385_vm8, %v16257_v59, %v16513_v29  ;;  %v21332_v41 = vadd.f32 %v15794_v7, %v29503_v30  ;;  %v21204_v28 = vpop.f32.mrb[62].mxu0 }
 0x5a1   : > { %17281 = vst.msk [vmem:[%s28585_s4 + $0xe0] sm:$0xf] %vm17224_vm9, %v19442_v58  ;;  %v19443_v50 = vpack.c.bf16 %v16641_v0, %v16641_v0  ;;  %v16262_v56 = vadd.f32 %v28888_v53, %v21331_v24  ;;  %v21333_v62 = vadd.f32 %v21204_v28, %v29504_v10  ;;  %v15797_v49 = vpop.f32.mrb[63].mxu0 }
 0x5a2   : > { %17284 = vst.msk [vmem:[%s28585_s4 + $0xec] sm:$0xf] %vm17224_vm9, %v19445_v54  ;;  %v16260_v17 = vadd.f32 %v28888_v53, %v21332_v41  ;;  %v21334_v51 = vadd.f32 %v15797_v49, %v28463_v60 }
 0x5a3   : > { %17282 = vst.msk [vmem:[%s28585_s4 + $0xe4] sm:$0xf] %vm17224_vm9, %v19443_v50  ;;  %vm16390_vm12 = vcmp.gt.f32.partialorder %v16262_v56, 0.0  ;;  %v16518_v43 = vmul.f32 0.1, %v16262_v56  ;;  %v16263_v48 = vadd.f32 %v28888_v53, %v21333_v62 }
 0x5a4   : > { %vm16388_vm5 = vcmp.gt.f32.partialorder %v16260_v17, 0.0  ;;  %v16516_v31 = vmul.f32 0.1, %v16260_v17  ;;  %v16261_v23 = vadd.f32 %v28888_v53, %v21334_v51  ;;  %v20687_v60 = vpop.f32.mrb[64].mxu1 }
 0x5a5   : > { %v16646_v18 = vsel %vm16390_vm12, %v16262_v56, %v16518_v43  ;;  %vm16391_vm13 = vcmp.gt.f32.partialorder %v16263_v48, 0.0  ;;  %v16519_v35 = vmul.f32 0.1, %v16263_v48  ;;  %v8694_v9 = vpop.f32.mrb[65].mxu1 }
 0x5a6   : > { %v19448_v61 = vpack.c.bf16 %v16646_v18, %v16646_v18  ;;  %v16644_v20 = vsel %vm16388_vm5, %v16260_v17, %v16516_v31  ;;  %vm16389_vm14 = vcmp.gt.f32.partialorder %v16261_v23, 0.0  ;;  %v16517_v34 = vmul.f32 0.1, %v16261_v23  ;;  %v21207_v63 = vpop.f32.mrb[64].mxu0  ;;  %v20688_v1 = vpop.f32.mrb[66].mxu1 }
 0x5a7   : > { %v19446_v2 = vpack.c.bf16 %v16644_v20, %v16644_v20  ;;  %v16647_v12 = vsel %vm16391_vm13, %v16263_v48, %v16519_v35  ;;  %v21335_v16 = vadd.f32 %v21207_v63, %v20687_v60  ;;  %v15810_v25 = vpop.f32.mrb[65].mxu0  ;;  %v8697_v11 = vpop.f32.mrb[67].mxu1 }
 0x5a8   : > { %17287 = vst.msk [vmem:[%s28585_s4 + $0xf8] sm:$0xf] %vm17224_vm9, %v19448_v61  ;;  %v19449_v27 = vpack.c.bf16 %v16647_v12, %v16647_v12  ;;  %v16645_v46 = vsel %vm16389_vm14, %v16261_v23, %v16517_v34  ;;  %v21336_v52 = vadd.f32 %v15810_v25, %v8694_v9  ;;  %v21208_v13 = vpop.f32.mrb[66].mxu0 }
 0x5a9   : > { %17285 = vst.msk [vmem:[%s28585_s4 + $0xf0] sm:$0xf] %vm17224_vm9, %v19446_v2  ;;  %v19447_v45 = vpack.c.bf16 %v16645_v46, %v16645_v46  ;;  %v16266_v36 = vadd.f32 %v28888_v53, %v21335_v16  ;;  %v21337_v22 = vadd.f32 %v21208_v13, %v20688_v1  ;;  %v15813_v19 = vpop.f32.mrb[67].mxu0 }
 0x5aa   : > { %17288 = vst.msk [vmem:[%s28585_s4 + $0xfc] sm:$0xf] %vm17224_vm9, %v19449_v27  ;;  %v16264_v42 = vadd.f32 %v28888_v53, %v21336_v52  ;;  %v21338_v37 = vadd.f32 %v15813_v19, %v8697_v11 }
 0x5ab   : > { %17286 = vst.msk [vmem:[%s28585_s4 + $0xf4] sm:$0xf] %vm17224_vm9, %v19447_v45  ;;  %vm16394_vm15 = vcmp.gt.f32.partialorder %v16266_v36, 0.0  ;;  %v16522_v14 = vmul.f32 0.1, %v16266_v36  ;;  %v16267_v8 = vadd.f32 %v28888_v53, %v21337_v22 }
 0x5ac   : > { %vm16392_vm4 = vcmp.gt.f32.partialorder %v16264_v42, 0.0  ;;  %v16520_v21 = vmul.f32 0.1, %v16264_v42  ;;  %v16265_v47 = vadd.f32 %v28888_v53, %v21338_v37  ;;  %v20691_v3 = vpop.f32.mrb[68].mxu1 }
 0x5ad   : > { %v16650_v38 = vsel %vm16394_vm15, %v16266_v36, %v16522_v14  ;;  %vm16395_vm0 = vcmp.gt.f32.partialorder %v16267_v8, 0.0  ;;  %v16523_v57 = vmul.f32 0.1, %v16267_v8  ;;  %v8710_v55 = vpop.f32.mrb[69].mxu1 }
 0x5ae   : > { %v19452_v44 = vpack.c.bf16 %v16650_v38, %v16650_v38  ;;  %v16648_v40 = vsel %vm16392_vm4, %v16264_v42, %v16520_v21  ;;  %vm16393_vm1 = vcmp.gt.f32.partialorder %v16265_v47, 0.0  ;;  %v16521_v5 = vmul.f32 0.1, %v16265_v47  ;;  %v21211_v4 = vpop.f32.mrb[68].mxu0  ;;  %v20692_v39 = vpop.f32.mrb[70].mxu1 }
 0x5af   : > { %v19450_v59 = vpack.c.bf16 %v16648_v40, %v16648_v40  ;;  %v16651_v26 = vsel %vm16395_vm0, %v16267_v8, %v16523_v57  ;;  %v21339_v33 = vadd.f32 %v21211_v4, %v20691_v3  ;;  %v15826_v6 = vpop.f32.mrb[69].mxu0  ;;  %v8713_v0 = vpop.f32.mrb[71].mxu1 }
 0x5b0   : > { %17291 = vst.msk [vmem:[%s28585_s4 + $0x108] sm:$0xf] %vm17224_vm9, %v19452_v44  ;;  %v19453_v29 = vpack.c.bf16 %v16651_v26, %v16651_v26  ;;  %v16649_v32 = vsel %vm16393_vm1, %v16265_v47, %v16521_v5  ;;  %v21340_v58 = vadd.f32 %v15826_v6, %v8710_v55  ;;  %v21212_v15 = vpop.f32.mrb[70].mxu0 }
 0x5b1   : > { %17289 = vst.msk [vmem:[%s28585_s4 + $0x100] sm:$0xf] %vm17224_vm9, %v19450_v59  ;;  %v19451_v24 = vpack.c.bf16 %v16649_v32, %v16649_v32  ;;  %v16270_v7 = vadd.f32 %v28888_v53, %v21339_v33  ;;  %v21341_v54 = vadd.f32 %v21212_v15, %v20692_v39  ;;  %v15829_v30 = vpop.f32.mrb[71].mxu0 }
 0x5b2   : > { %17292 = vst.msk [vmem:[%s28585_s4 + $0x10c] sm:$0xf] %vm17224_vm9, %v19453_v29  ;;  %v16268_v41 = vadd.f32 %v28888_v53, %v21340_v58  ;;  %v21342_v28 = vadd.f32 %v15829_v30, %v8713_v0 }
 0x5b3   : > { %17290 = vst.msk [vmem:[%s28585_s4 + $0x104] sm:$0xf] %vm17224_vm9, %v19451_v24  ;;  %vm16398_vm2 = vcmp.gt.f32.partialorder %v16270_v7, 0.0  ;;  %v16526_v50 = vmul.f32 0.1, %v16270_v7  ;;  %v16271_v56 = vadd.f32 %v28888_v53, %v21341_v54 }
 0x5b4   : > { %vm16396_vm3 = vcmp.gt.f32.partialorder %v16268_v41, 0.0  ;;  %v16524_v10 = vmul.f32 0.1, %v16268_v41  ;;  %v16269_v62 = vadd.f32 %v28888_v53, %v21342_v28  ;;  %v20695_v31 = vpop.f32.mrb[72].mxu1 }
 0x5b5   : > { %v16654_v49 = vsel %vm16398_vm2, %v16270_v7, %v16526_v50  ;;  %vm16399_vm6 = vcmp.gt.f32.partialorder %v16271_v56, 0.0  ;;  %v16527_v17 = vmul.f32 0.1, %v16271_v56  ;;  %v8726_v20 = vpop.f32.mrb[73].mxu1 }
 0x5b6   : > { %v19456_v51 = vpack.c.bf16 %v16654_v49, %v16654_v49  ;;  %v16652_v43 = vsel %vm16396_vm3, %v16268_v41, %v16524_v10  ;;  %vm16397_vm7 = vcmp.gt.f32.partialorder %v16269_v62, 0.0  ;;  %v16525_v48 = vmul.f32 0.1, %v16269_v62  ;;  %v21215_v23 = vpop.f32.mrb[72].mxu0  ;;  %v20696_v12 = vpop.f32.mrb[74].mxu1 }
 0x5b7   : > { %v19454_v18 = vpack.c.bf16 %v16652_v43, %v16652_v43  ;;  %v16655_v35 = vsel %vm16399_vm6, %v16271_v56, %v16527_v17  ;;  %v21343_v61 = vadd.f32 %v21215_v23, %v20695_v31  ;;  %v15842_v34 = vpop.f32.mrb[73].mxu0  ;;  %v8729_v46 = vpop.f32.mrb[75].mxu1 }
 0x5b8   : > { %17295 = vst.msk [vmem:[%s28585_s4 + $0x118] sm:$0xf] %vm17224_vm9, %v19456_v51  ;;  %v19457_v60 = vpack.c.bf16 %v16655_v35, %v16655_v35  ;;  %v16653_v63 = vsel %vm16397_vm7, %v16269_v62, %v16525_v48  ;;  %v21344_v2 = vadd.f32 %v15842_v34, %v8726_v20  ;;  %v21216_v16 = vpop.f32.mrb[74].mxu0 }
 0x5b9   : > { %17293 = vst.msk [vmem:[%s28585_s4 + $0x110] sm:$0xf] %vm17224_vm9, %v19454_v18  ;;  %v19455_v9 = vpack.c.bf16 %v16653_v63, %v16653_v63  ;;  %v16274_v25 = vadd.f32 %v28888_v53, %v21343_v61  ;;  %v21345_v27 = vadd.f32 %v21216_v16, %v20696_v12  ;;  %v15845_v52 = vpop.f32.mrb[75].mxu0 }
 0x5ba   : > { %17296 = vst.msk [vmem:[%s28585_s4 + $0x11c] sm:$0xf] %vm17224_vm9, %v19457_v60  ;;  %v16272_v1 = vadd.f32 %v28888_v53, %v21344_v2  ;;  %v21346_v13 = vadd.f32 %v15845_v52, %v8729_v46 }
 0x5bb   : > { %17294 = vst.msk [vmem:[%s28585_s4 + $0x114] sm:$0xf] %vm17224_vm9, %v19455_v9  ;;  %vm16402_vm10 = vcmp.gt.f32.partialorder %v16274_v25, 0.0  ;;  %v16530_v45 = vmul.f32 0.1, %v16274_v25  ;;  %v16275_v36 = vadd.f32 %v28888_v53, %v21345_v27 }
 0x5bc   : > { %vm16400_vm11 = vcmp.gt.f32.partialorder %v16272_v1, 0.0  ;;  %v16528_v22 = vmul.f32 0.1, %v16272_v1  ;;  %v16273_v11 = vadd.f32 %v28888_v53, %v21346_v13  ;;  %v20699_v21 = vpop.f32.mrb[76].mxu1 }
 0x5bd   : > { %v16658_v19 = vsel %vm16402_vm10, %v16274_v25, %v16530_v45  ;;  %vm16403_vm8 = vcmp.gt.f32.partialorder %v16275_v36, 0.0  ;;  %v16531_v42 = vmul.f32 0.1, %v16275_v36  ;;  %v8742_v40 = vpop.f32.mrb[77].mxu1 }
 0x5be   : > { %v19460_v37 = vpack.c.bf16 %v16658_v19, %v16658_v19  ;;  %v16656_v14 = vsel %vm16400_vm11, %v16272_v1, %v16528_v22  ;;  %vm16401_vm12 = vcmp.gt.f32.partialorder %v16273_v11, 0.0  ;;  %v16529_v8 = vmul.f32 0.1, %v16273_v11  ;;  %v21219_v47 = vpop.f32.mrb[76].mxu0  ;;  %v20700_v26 = vpop.f32.mrb[78].mxu1 }
 0x5bf   : > { %v19458_v38 = vpack.c.bf16 %v16656_v14, %v16656_v14  ;;  %v16659_v57 = vsel %vm16403_vm8, %v16275_v36, %v16531_v42  ;;  %v21347_v44 = vadd.f32 %v21219_v47, %v20699_v21  ;;  %v15858_v5 = vpop.f32.mrb[77].mxu0  ;;  %v8745_v32 = vpop.f32.mrb[79].mxu1 }
 0x5c0   : > { %17299 = vst.msk [vmem:[%s28585_s4 + $0x128] sm:$0xf] %vm17224_vm9, %v19460_v37  ;;  %v19461_v3 = vpack.c.bf16 %v16659_v57, %v16659_v57  ;;  %v16657_v4 = vsel %vm16401_vm12, %v16273_v11, %v16529_v8  ;;  %v21348_v59 = vadd.f32 %v15858_v5, %v8742_v40  ;;  %v21220_v33 = vpop.f32.mrb[78].mxu0 }
 0x5c1   : > { %17297 = vst.msk [vmem:[%s28585_s4 + $0x120] sm:$0xf] %vm17224_vm9, %v19458_v38  ;;  %v19459_v55 = vpack.c.bf16 %v16657_v4, %v16657_v4  ;;  %v16278_v6 = vadd.f32 %v28888_v53, %v21347_v44  ;;  %v21349_v29 = vadd.f32 %v21220_v33, %v20700_v26  ;;  %v15861_v58 = vpop.f32.mrb[79].mxu0 }
 0x5c2   : > { %17300 = vst.msk [vmem:[%s28585_s4 + $0x12c] sm:$0xf] %vm17224_vm9, %v19461_v3  ;;  %v16276_v39 = vadd.f32 %v28888_v53, %v21348_v59  ;;  %v21350_v15 = vadd.f32 %v15861_v58, %v8745_v32 }
 0x5c3   : > { %17298 = vst.msk [vmem:[%s28585_s4 + $0x124] sm:$0xf] %vm17224_vm9, %v19459_v55  ;;  %vm16406_vm5 = vcmp.gt.f32.partialorder %v16278_v6, 0.0  ;;  %v16534_v24 = vmul.f32 0.1, %v16278_v6  ;;  %v16279_v7 = vadd.f32 %v28888_v53, %v21349_v29 }
 0x5c4   : > { %vm16404_vm13 = vcmp.gt.f32.partialorder %v16276_v39, 0.0  ;;  %v16532_v54 = vmul.f32 0.1, %v16276_v39  ;;  %v16277_v0 = vadd.f32 %v28888_v53, %v21350_v15  ;;  %v20703_v10 = vpop.f32.mrb[80].mxu1 }
 0x5c5   : > { %v16662_v30 = vsel %vm16406_vm5, %v16278_v6, %v16534_v24  ;;  %vm16407_vm14 = vcmp.gt.f32.partialorder %v16279_v7, 0.0  ;;  %v16535_v41 = vmul.f32 0.1, %v16279_v7  ;;  %v8758_v43 = vpop.f32.mrb[81].mxu1 }
 0x5c6   : > { %v19464_v28 = vpack.c.bf16 %v16662_v30, %v16662_v30  ;;  %v16660_v50 = vsel %vm16404_vm13, %v16276_v39, %v16532_v54  ;;  %vm16405_vm15 = vcmp.gt.f32.partialorder %v16277_v0, 0.0  ;;  %v16533_v56 = vmul.f32 0.1, %v16277_v0  ;;  %v21223_v62 = vpop.f32.mrb[80].mxu0  ;;  %v20704_v35 = vpop.f32.mrb[82].mxu1 }
 0x5c7   : > { %v19462_v49 = vpack.c.bf16 %v16660_v50, %v16660_v50  ;;  %v16663_v17 = vsel %vm16407_vm14, %v16279_v7, %v16535_v41  ;;  %v21351_v51 = vadd.f32 %v21223_v62, %v20703_v10  ;;  %v15874_v48 = vpop.f32.mrb[81].mxu0  ;;  %v8761_v63 = vpop.f32.mrb[83].mxu1 }
 0x5c8   : > { %17303 = vst.msk [vmem:[%s28585_s4 + $0x138] sm:$0xf] %vm17224_vm9, %v19464_v28  ;;  %v19465_v31 = vpack.c.bf16 %v16663_v17, %v16663_v17  ;;  %v16661_v23 = vsel %vm16405_vm15, %v16277_v0, %v16533_v56  ;;  %v21352_v18 = vadd.f32 %v15874_v48, %v8758_v43  ;;  %v21224_v61 = vpop.f32.mrb[82].mxu0 }
 0x5c9   : > { %17301 = vst.msk [vmem:[%s28585_s4 + $0x130] sm:$0xf] %vm17224_vm9, %v19462_v49  ;;  %v19463_v20 = vpack.c.bf16 %v16661_v23, %v16661_v23  ;;  %v16282_v34 = vadd.f32 %v28888_v53, %v21351_v51  ;;  %v21353_v60 = vadd.f32 %v21224_v61, %v20704_v35  ;;  %v15877_v2 = vpop.f32.mrb[83].mxu0 }
 0x5ca   : > { %17304 = vst.msk [vmem:[%s28585_s4 + $0x13c] sm:$0xf] %vm17224_vm9, %v19465_v31  ;;  %v16280_v12 = vadd.f32 %v28888_v53, %v21352_v18  ;;  %v21354_v16 = vadd.f32 %v15877_v2, %v8761_v63 }
 0x5cb   : > { %17302 = vst.msk [vmem:[%s28585_s4 + $0x134] sm:$0xf] %vm17224_vm9, %v19463_v20  ;;  %vm16410_vm4 = vcmp.gt.f32.partialorder %v16282_v34, 0.0  ;;  %v16538_v9 = vmul.f32 0.1, %v16282_v34  ;;  %v16283_v25 = vadd.f32 %v28888_v53, %v21353_v60 }
 0x5cc   : > { %vm16408_vm0 = vcmp.gt.f32.partialorder %v16280_v12, 0.0  ;;  %v16536_v27 = vmul.f32 0.1, %v16280_v12  ;;  %v16281_v46 = vadd.f32 %v28888_v53, %v21354_v16  ;;  %v20707_v22 = vpop.f32.mrb[84].mxu1 }
 0x5cd   : > { %v16666_v52 = vsel %vm16410_vm4, %v16282_v34, %v16538_v9  ;;  %vm16411_vm1 = vcmp.gt.f32.partialorder %v16283_v25, 0.0  ;;  %v16539_v1 = vmul.f32 0.1, %v16283_v25  ;;  %v8774_v14 = vpop.f32.mrb[85].mxu1 }
 0x5ce   : > { %v19468_v13 = vpack.c.bf16 %v16666_v52, %v16666_v52  ;;  %v16664_v45 = vsel %vm16408_vm0, %v16280_v12, %v16536_v27  ;;  %vm16409_vm2 = vcmp.gt.f32.partialorder %v16281_v46, 0.0  ;;  %v16537_v36 = vmul.f32 0.1, %v16281_v46  ;;  %v21227_v11 = vpop.f32.mrb[84].mxu0  ;;  %v20708_v57 = vpop.f32.mrb[86].mxu1 }
 0x5cf   : > { %v19466_v19 = vpack.c.bf16 %v16664_v45, %v16664_v45  ;;  %v16667_v42 = vsel %vm16411_vm1, %v16283_v25, %v16539_v1  ;;  %v21355_v37 = vadd.f32 %v21227_v11, %v20707_v22  ;;  %v15890_v8 = vpop.f32.mrb[85].mxu0  ;;  %v8777_v4 = vpop.f32.mrb[87].mxu1 }
 0x5d0   : > { %17307 = vst.msk [vmem:[%s28585_s4 + $0x148] sm:$0xf] %vm17224_vm9, %v19468_v13  ;;  %v19469_v21 = vpack.c.bf16 %v16667_v42, %v16667_v42  ;;  %v16665_v47 = vsel %vm16409_vm2, %v16281_v46, %v16537_v36  ;;  %v21356_v38 = vadd.f32 %v15890_v8, %v8774_v14  ;;  %v21228_v44 = vpop.f32.mrb[86].mxu0 }
 0x5d1   : > { %17305 = vst.msk [vmem:[%s28585_s4 + $0x140] sm:$0xf] %vm17224_vm9, %v19466_v19  ;;  %v19467_v40 = vpack.c.bf16 %v16665_v47, %v16665_v47  ;;  %v16286_v5 = vadd.f32 %v28888_v53, %v21355_v37  ;;  %v21357_v3 = vadd.f32 %v21228_v44, %v20708_v57  ;;  %v15893_v59 = vpop.f32.mrb[87].mxu0 }
 0x5d2   : > { %17308 = vst.msk [vmem:[%s28585_s4 + $0x14c] sm:$0xf] %vm17224_vm9, %v19469_v21  ;;  %v16284_v26 = vadd.f32 %v28888_v53, %v21356_v38  ;;  %v21358_v33 = vadd.f32 %v15893_v59, %v8777_v4 }
 0x5d3   : > { %17306 = vst.msk [vmem:[%s28585_s4 + $0x144] sm:$0xf] %vm17224_vm9, %v19467_v40  ;;  %vm16414_vm3 = vcmp.gt.f32.partialorder %v16286_v5, 0.0  ;;  %v16542_v55 = vmul.f32 0.1, %v16286_v5  ;;  %v16287_v6 = vadd.f32 %v28888_v53, %v21357_v3 }
 0x5d4   : > { %vm16412_vm6 = vcmp.gt.f32.partialorder %v16284_v26, 0.0  ;;  %v16540_v29 = vmul.f32 0.1, %v16284_v26  ;;  %v16285_v32 = vadd.f32 %v28888_v53, %v21358_v33  ;;  %v20711_v54 = vpop.f32.mrb[88].mxu1 }
 0x5d5   : > { %v16670_v58 = vsel %vm16414_vm3, %v16286_v5, %v16542_v55  ;;  %vm16415_vm7 = vcmp.gt.f32.partialorder %v16287_v6, 0.0  ;;  %v16543_v39 = vmul.f32 0.1, %v16287_v6  ;;  %v8790_v50 = vpop.f32.mrb[89].mxu1 }
 0x5d6   : > { %v19472_v15 = vpack.c.bf16 %v16670_v58, %v16670_v58  ;;  %v16668_v24 = vsel %vm16412_vm6, %v16284_v26, %v16540_v29  ;;  %vm16413_vm10 = vcmp.gt.f32.partialorder %v16285_v32, 0.0  ;;  %v16541_v7 = vmul.f32 0.1, %v16285_v32  ;;  %v21231_v0 = vpop.f32.mrb[88].mxu0  ;;  %v20712_v17 = vpop.f32.mrb[90].mxu1 }
 0x5d7   : > { %v19470_v30 = vpack.c.bf16 %v16668_v24, %v16668_v24  ;;  %v16671_v41 = vsel %vm16415_vm7, %v16287_v6, %v16543_v39  ;;  %v21359_v28 = vadd.f32 %v21231_v0, %v20711_v54  ;;  %v15906_v56 = vpop.f32.mrb[89].mxu0  ;;  %v8793_v23 = vpop.f32.mrb[91].mxu1 }
 0x5d8   : > { %17311 = vst.msk [vmem:[%s28585_s4 + $0x158] sm:$0xf] %vm17224_vm9, %v19472_v15  ;;  %v19473_v10 = vpack.c.bf16 %v16671_v41, %v16671_v41  ;;  %v16669_v62 = vsel %vm16413_vm10, %v16285_v32, %v16541_v7  ;;  %v21360_v49 = vadd.f32 %v15906_v56, %v8790_v50  ;;  %v21232_v51 = vpop.f32.mrb[90].mxu0 }
 0x5d9   : > { %17309 = vst.msk [vmem:[%s28585_s4 + $0x150] sm:$0xf] %vm17224_vm9, %v19470_v30  ;;  %v19471_v43 = vpack.c.bf16 %v16669_v62, %v16669_v62  ;;  %v16290_v48 = vadd.f32 %v28888_v53, %v21359_v28  ;;  %v21361_v31 = vadd.f32 %v21232_v51, %v20712_v17  ;;  %v15909_v18 = vpop.f32.mrb[91].mxu0 }
 0x5da   : > { %17312 = vst.msk [vmem:[%s28585_s4 + $0x15c] sm:$0xf] %vm17224_vm9, %v19473_v10  ;;  %v16288_v35 = vadd.f32 %v28888_v53, %v21360_v49  ;;  %v21362_v61 = vadd.f32 %v15909_v18, %v8793_v23 }
 0x5db   : > { %17310 = vst.msk [vmem:[%s28585_s4 + $0x154] sm:$0xf] %vm17224_vm9, %v19471_v43  ;;  %vm16418_vm11 = vcmp.gt.f32.partialorder %v16290_v48, 0.0  ;;  %v16546_v20 = vmul.f32 0.1, %v16290_v48  ;;  %v16291_v34 = vadd.f32 %v28888_v53, %v21361_v31 }
 0x5dc   : > { %vm16416_vm8 = vcmp.gt.f32.partialorder %v16288_v35, 0.0  ;;  %v16544_v60 = vmul.f32 0.1, %v16288_v35  ;;  %v16289_v63 = vadd.f32 %v28888_v53, %v21362_v61  ;;  %v20715_v27 = vpop.f32.mrb[92].mxu1 }
 0x5dd   : > { %v16674_v2 = vsel %vm16418_vm11, %v16290_v48, %v16546_v20  ;;  %vm16419_vm12 = vcmp.gt.f32.partialorder %v16291_v34, 0.0  ;;  %v16547_v12 = vmul.f32 0.1, %v16291_v34  ;;  %v8806_v45 = vpop.f32.mrb[93].mxu1 }
 0x5de   : > { %v19476_v16 = vpack.c.bf16 %v16674_v2, %v16674_v2  ;;  %v16672_v9 = vsel %vm16416_vm8, %v16288_v35, %v16544_v60  ;;  %vm16417_vm5 = vcmp.gt.f32.partialorder %v16289_v63, 0.0  ;;  %v16545_v25 = vmul.f32 0.1, %v16289_v63  ;;  %v21235_v46 = vpop.f32.mrb[92].mxu0  ;;  %v20716_v42 = vpop.f32.mrb[94].mxu1 }
 0x5df   : > { %v19474_v52 = vpack.c.bf16 %v16672_v9, %v16672_v9  ;;  %v16675_v1 = vsel %vm16419_vm12, %v16291_v34, %v16547_v12  ;;  %v21363_v13 = vadd.f32 %v21235_v46, %v20715_v27  ;;  %v15922_v36 = vpop.f32.mrb[93].mxu0  ;;  %v8809_v47 = vpop.f32.mrb[95].mxu1 }
 0x5e0   : > { %17315 = vst.msk [vmem:[%s28585_s4 + $0x168] sm:$0xf] %vm17224_vm9, %v19476_v16  ;;  %v19477_v22 = vpack.c.bf16 %v16675_v1, %v16675_v1  ;;  %v16673_v11 = vsel %vm16417_vm5, %v16289_v63, %v16545_v25  ;;  %v21364_v19 = vadd.f32 %v15922_v36, %v8806_v45  ;;  %v21236_v37 = vpop.f32.mrb[94].mxu0 }
 0x5e1   : > { %17313 = vst.msk [vmem:[%s28585_s4 + $0x160] sm:$0xf] %vm17224_vm9, %v19474_v52  ;;  %v19475_v14 = vpack.c.bf16 %v16673_v11, %v16673_v11  ;;  %v16294_v8 = vadd.f32 %v28888_v53, %v21363_v13  ;;  %v21365_v21 = vadd.f32 %v21236_v37, %v20716_v42  ;;  %v15925_v38 = vpop.f32.mrb[95].mxu0 }
 0x5e2   : > { %17316 = vst.msk [vmem:[%s28585_s4 + $0x16c] sm:$0xf] %vm17224_vm9, %v19477_v22  ;;  %v16292_v57 = vadd.f32 %v28888_v53, %v21364_v19  ;;  %v21366_v44 = vadd.f32 %v15925_v38, %v8809_v47 }
 0x5e3   : > { %17314 = vst.msk [vmem:[%s28585_s4 + $0x164] sm:$0xf] %vm17224_vm9, %v19475_v14  ;;  %vm16422_vm13 = vcmp.gt.f32.partialorder %v16294_v8, 0.0  ;;  %v16550_v40 = vmul.f32 0.1, %v16294_v8  ;;  %v16295_v5 = vadd.f32 %v28888_v53, %v21365_v21 }
 0x5e4   : > { %vm16420_vm14 = vcmp.gt.f32.partialorder %v16292_v57, 0.0  ;;  %v16548_v3 = vmul.f32 0.1, %v16292_v57  ;;  %v16293_v4 = vadd.f32 %v28888_v53, %v21366_v44  ;;  %v20719_v29 = vpop.f32.mrb[96].mxu1 }
 0x5e5   : > { %v16678_v59 = vsel %vm16422_vm13, %v16294_v8, %v16550_v40  ;;  %vm16423_vm15 = vcmp.gt.f32.partialorder %v16295_v5, 0.0  ;;  %v16551_v26 = vmul.f32 0.1, %v16295_v5  ;;  %v8822_v24 = vpop.f32.mrb[97].mxu1 }
 0x5e6   : > { %v19480_v33 = vpack.c.bf16 %v16678_v59, %v16678_v59  ;;  %v16676_v55 = vsel %vm16420_vm14, %v16292_v57, %v16548_v3  ;;  %vm16421_vm4 = vcmp.gt.f32.partialorder %v16293_v4, 0.0  ;;  %v16549_v6 = vmul.f32 0.1, %v16293_v4  ;;  %v21239_v32 = vpop.f32.mrb[96].mxu0  ;;  %v20720_v41 = vpop.f32.mrb[98].mxu1 }
 0x5e7   : > { %v19478_v58 = vpack.c.bf16 %v16676_v55, %v16676_v55  ;;  %v16679_v39 = vsel %vm16423_vm15, %v16295_v5, %v16551_v26  ;;  %v21367_v15 = vadd.f32 %v21239_v32, %v20719_v29  ;;  %v15938_v7 = vpop.f32.mrb[97].mxu0  ;;  %v8825_v62 = vpop.f32.mrb[99].mxu1 }
 0x5e8   : > { %17319 = vst.msk [vmem:[%s28585_s4 + $0x178] sm:$0xf] %vm17224_vm9, %v19480_v33  ;;  %v19481_v54 = vpack.c.bf16 %v16679_v39, %v16679_v39  ;;  %v16677_v0 = vsel %vm16421_vm4, %v16293_v4, %v16549_v6  ;;  %v21368_v30 = vadd.f32 %v15938_v7, %v8822_v24  ;;  %v21240_v28 = vpop.f32.mrb[98].mxu0 }
 0x5e9   : > { %17317 = vst.msk [vmem:[%s28585_s4 + $0x170] sm:$0xf] %vm17224_vm9, %v19478_v58  ;;  %v19479_v50 = vpack.c.bf16 %v16677_v0, %v16677_v0  ;;  %v16298_v56 = vadd.f32 %v28888_v53, %v21367_v15  ;;  %v21369_v10 = vadd.f32 %v21240_v28, %v20720_v41  ;;  %v15941_v49 = vpop.f32.mrb[99].mxu0 }
 0x5ea   : > { %17320 = vst.msk [vmem:[%s28585_s4 + $0x17c] sm:$0xf] %vm17224_vm9, %v19481_v54  ;;  %v16296_v17 = vadd.f32 %v28888_v53, %v21368_v30  ;;  %v21370_v51 = vadd.f32 %v15941_v49, %v8825_v62 }
 0x5eb   : > { %17318 = vst.msk [vmem:[%s28585_s4 + $0x174] sm:$0xf] %vm17224_vm9, %v19479_v50  ;;  %vm16426_vm0 = vcmp.gt.f32.partialorder %v16298_v56, 0.0  ;;  %v16554_v43 = vmul.f32 0.1, %v16298_v56  ;;  %v16299_v48 = vadd.f32 %v28888_v53, %v21369_v10 }
 0x5ec   : > { %vm16424_vm1 = vcmp.gt.f32.partialorder %v16296_v17, 0.0  ;;  %v16552_v31 = vmul.f32 0.1, %v16296_v17  ;;  %v16297_v23 = vadd.f32 %v28888_v53, %v21370_v51  ;;  %v20723_v60 = vpop.f32.mrb[100].mxu1 }
 0x5ed   : > { %v16682_v18 = vsel %vm16426_vm0, %v16298_v56, %v16554_v43  ;;  %vm16427_vm2 = vcmp.gt.f32.partialorder %v16299_v48, 0.0  ;;  %v16555_v35 = vmul.f32 0.1, %v16299_v48  ;;  %v8838_v9 = vpop.f32.mrb[101].mxu1 }
 0x5ee   : > { %v19484_v61 = vpack.c.bf16 %v16682_v18, %v16682_v18  ;;  %v16680_v20 = vsel %vm16424_vm1, %v16296_v17, %v16552_v31  ;;  %vm16425_vm3 = vcmp.gt.f32.partialorder %v16297_v23, 0.0  ;;  %v16553_v34 = vmul.f32 0.1, %v16297_v23  ;;  %v21243_v63 = vpop.f32.mrb[100].mxu0  ;;  %v20724_v1 = vpop.f32.mrb[102].mxu1 }
 0x5ef   : > { %v19482_v2 = vpack.c.bf16 %v16680_v20, %v16680_v20  ;;  %v16683_v12 = vsel %vm16427_vm2, %v16299_v48, %v16555_v35  ;;  %v21371_v16 = vadd.f32 %v21243_v63, %v20723_v60  ;;  %v15954_v25 = vpop.f32.mrb[101].mxu0  ;;  %v8841_v11 = vpop.f32.mrb[103].mxu1 }
 0x5f0   : > { %17323 = vst.msk [vmem:[%s28585_s4 + $0x188] sm:$0xf] %vm17224_vm9, %v19484_v61  ;;  %v19485_v27 = vpack.c.bf16 %v16683_v12, %v16683_v12  ;;  %v16681_v46 = vsel %vm16425_vm3, %v16297_v23, %v16553_v34  ;;  %v21372_v52 = vadd.f32 %v15954_v25, %v8838_v9  ;;  %v21244_v13 = vpop.f32.mrb[102].mxu0 }
 0x5f1   : > { %17321 = vst.msk [vmem:[%s28585_s4 + $0x180] sm:$0xf] %vm17224_vm9, %v19482_v2  ;;  %v19483_v45 = vpack.c.bf16 %v16681_v46, %v16681_v46  ;;  %v16302_v36 = vadd.f32 %v28888_v53, %v21371_v16  ;;  %v21373_v22 = vadd.f32 %v21244_v13, %v20724_v1  ;;  %v15957_v19 = vpop.f32.mrb[103].mxu0 }
 0x5f2   : > { %17324 = vst.msk [vmem:[%s28585_s4 + $0x18c] sm:$0xf] %vm17224_vm9, %v19485_v27  ;;  %v16300_v42 = vadd.f32 %v28888_v53, %v21372_v52  ;;  %v21374_v37 = vadd.f32 %v15957_v19, %v8841_v11 }
 0x5f3   : > { %17322 = vst.msk [vmem:[%s28585_s4 + $0x184] sm:$0xf] %vm17224_vm9, %v19483_v45  ;;  %vm16430_vm6 = vcmp.gt.f32.partialorder %v16302_v36, 0.0  ;;  %v16558_v14 = vmul.f32 0.1, %v16302_v36  ;;  %v16303_v8 = vadd.f32 %v28888_v53, %v21373_v22 }
 0x5f4   : > { %vm16428_vm7 = vcmp.gt.f32.partialorder %v16300_v42, 0.0  ;;  %v16556_v21 = vmul.f32 0.1, %v16300_v42  ;;  %v16301_v47 = vadd.f32 %v28888_v53, %v21374_v37  ;;  %v20727_v3 = vpop.f32.mrb[104].mxu1 }
 0x5f5   : > { %v16686_v38 = vsel %vm16430_vm6, %v16302_v36, %v16558_v14  ;;  %vm16431_vm10 = vcmp.gt.f32.partialorder %v16303_v8, 0.0  ;;  %v16559_v57 = vmul.f32 0.1, %v16303_v8  ;;  %v8854_v55 = vpop.f32.mrb[105].mxu1 }
 0x5f6   : > { %v19488_v44 = vpack.c.bf16 %v16686_v38, %v16686_v38  ;;  %v16684_v40 = vsel %vm16428_vm7, %v16300_v42, %v16556_v21  ;;  %vm16429_vm11 = vcmp.gt.f32.partialorder %v16301_v47, 0.0  ;;  %v16557_v5 = vmul.f32 0.1, %v16301_v47  ;;  %v20728_v39 = vpop.f32.mrb[106].mxu1 }
 0x5f7   : > { %v21247_v4 = vpop.f32.mrb[104].mxu0  ;;  %v19486_v59 = vpack.c.bf16 %v16684_v40, %v16684_v40  ;;  %v16687_v26 = vsel %vm16431_vm10, %v16303_v8, %v16559_v57  ;;  %v8857_v0 = vpop.f32.mrb[107].mxu1 }
 0x5f8   : > { %v21375_v33 = vadd.f32 %v21247_v4, %v20727_v3  ;;  %v15970_v6 = vpop.f32.mrb[105].mxu0  ;;  %17327 = vst.msk [vmem:[%s28585_s4 + $0x198] sm:$0xf] %vm17224_vm9, %v19488_v44  ;;  %v19489_v29 = vpack.c.bf16 %v16687_v26, %v16687_v26  ;;  %v16685_v32 = vsel %vm16429_vm11, %v16301_v47, %v16557_v5 }
 0x5f9   : > { %v21376_v58 = vadd.f32 %v15970_v6, %v8854_v55  ;;  %v21248_v15 = vpop.f32.mrb[106].mxu0  ;;  %17325 = vst.msk [vmem:[%s28585_s4 + $0x190] sm:$0xf] %vm17224_vm9, %v19486_v59  ;;  %v19487_v24 = vpack.c.bf16 %v16685_v32, %v16685_v32 }
 0x5fa   : > { %v16306_v7 = vadd.f32 %v28888_v53, %v21375_v33  ;;  %v21377_v54 = vadd.f32 %v21248_v15, %v20728_v39  ;;  %v15973_v30 = vpop.f32.mrb[107].mxu0  ;;  %17328 = vst.msk [vmem:[%s28585_s4 + $0x19c] sm:$0xf] %vm17224_vm9, %v19489_v29 }
 0x5fb   : > { %v16304_v41 = vadd.f32 %v28888_v53, %v21376_v58  ;;  %v21378_v28 = vadd.f32 %v15973_v30, %v8857_v0  ;;  %17326 = vst.msk [vmem:[%s28585_s4 + $0x194] sm:$0xf] %vm17224_vm9, %v19487_v24  ;;  %v29074_v0 = vld [vmem:[%s29138_s2] ss:$0 sm:$0xff] }
 0x5fc   : > { %vm16434_vm8 = vcmp.gt.f32.partialorder %v16306_v7, 0.0  ;;  %v16562_v50 = vmul.f32 0.1, %v16306_v7  ;;  %v16307_v56 = vadd.f32 %v28888_v53, %v21377_v54  ;;  %v20731_v31 = vpop.f32.mrb[108].mxu1 }
 0x5fd   : > { %vm16432_vm12 = vcmp.gt.f32.partialorder %v16304_v41, 0.0  ;;  %v16560_v10 = vmul.f32 0.1, %v16304_v41  ;;  %v16305_v62 = vadd.f32 %v28888_v53, %v21378_v28  ;;  %v8870_v20 = vpop.f32.mrb[109].mxu1 }
 0x5fe   : > { %v16690_v49 = vsel %vm16434_vm8, %v16306_v7, %v16562_v50  ;;  %vm16435_vm5 = vcmp.gt.f32.partialorder %v16307_v56, 0.0  ;;  %v16563_v17 = vmul.f32 0.1, %v16307_v56  ;;  %v20732_v12 = vpop.f32.mrb[110].mxu1 }
 0x5ff   : > { %v19492_v51 = vpack.c.bf16 %v16690_v49, %v16690_v49  ;;  %v16688_v43 = vsel %vm16432_vm12, %v16304_v41, %v16560_v10  ;;  %vm16433_vm13 = vcmp.gt.f32.partialorder %v16305_v62, 0.0  ;;  %v16561_v48 = vmul.f32 0.1, %v16305_v62  ;;  %v8873_v46 = vpop.f32.mrb[111].mxu1 }
 0x600   : > { %v21251_v23 = vpop.f32.mrb[108].mxu0  ;;  %v19490_v18 = vpack.c.bf16 %v16688_v43, %v16688_v43  ;;  %v16691_v35 = vsel %vm16435_vm5, %v16307_v56, %v16563_v17 }
 0x601   : > { %v21379_v61 = vadd.f32 %v21251_v23, %v20731_v31  ;;  %v15986_v34 = vpop.f32.mrb[109].mxu0  ;;  %17331 = vst.msk [vmem:[%s28585_s4 + $0x1a8] sm:$0xf] %vm17224_vm9, %v19492_v51  ;;  %v19493_v60 = vpack.c.bf16 %v16691_v35, %v16691_v35  ;;  %v16689_v63 = vsel %vm16433_vm13, %v16305_v62, %v16561_v48 }
 0x602   : > { %v21380_v2 = vadd.f32 %v15986_v34, %v8870_v20  ;;  %v21252_v16 = vpop.f32.mrb[110].mxu0  ;;  %17329 = vst.msk [vmem:[%s28585_s4 + $0x1a0] sm:$0xf] %vm17224_vm9, %v19490_v18  ;;  %v19491_v9 = vpack.c.bf16 %v16689_v63, %v16689_v63 }
 0x603   : > { %v16310_v25 = vadd.f32 %v28888_v53, %v21379_v61  ;;  %v21381_v27 = vadd.f32 %v21252_v16, %v20732_v12  ;;  %v15989_v52 = vpop.f32.mrb[111].mxu0  ;;  %17332 = vst.msk [vmem:[%s28585_s4 + $0x1ac] sm:$0xf] %vm17224_vm9, %v19493_v60 }
 0x604   : > { %v16308_v1 = vadd.f32 %v28888_v53, %v21380_v2  ;;  %v21382_v13 = vadd.f32 %v15989_v52, %v8873_v46  ;;  %17330 = vst.msk [vmem:[%s28585_s4 + $0x1a4] sm:$0xf] %vm17224_vm9, %v19491_v9  ;;  %v20735_v21 = vpop.f32.mrb[112].mxu1 }
 0x605   : > { %vm16438_vm14 = vcmp.gt.f32.partialorder %v16310_v25, 0.0  ;;  %v16566_v45 = vmul.f32 0.1, %v16310_v25  ;;  %v16311_v36 = vadd.f32 %v28888_v53, %v21381_v27  ;;  %v8886_v40 = vpop.f32.mrb[113].mxu1 }
 0x606   : > { %vm16436_vm15 = vcmp.gt.f32.partialorder %v16308_v1, 0.0  ;;  %v16564_v22 = vmul.f32 0.1, %v16308_v1  ;;  %v16309_v11 = vadd.f32 %v28888_v53, %v21382_v13  ;;  %v20736_v26 = vpop.f32.mrb[114].mxu1 }
 0x607   : > { %v16694_v19 = vsel %vm16438_vm14, %v16310_v25, %v16566_v45  ;;  %vm16439_vm4 = vcmp.gt.f32.partialorder %v16311_v36, 0.0  ;;  %v16567_v42 = vmul.f32 0.1, %v16311_v36  ;;  %v8889_v32 = vpop.f32.mrb[115].mxu1 }
 0x608   : > { %v19496_v37 = vpack.c.bf16 %v16694_v19, %v16694_v19  ;;  %v16692_v14 = vsel %vm16436_vm15, %v16308_v1, %v16564_v22  ;;  %vm16437_vm0 = vcmp.gt.f32.partialorder %v16309_v11, 0.0  ;;  %v16565_v8 = vmul.f32 0.1, %v16309_v11  ;;  %v21255_v47 = vpop.f32.mrb[112].mxu0 }
 0x609   : > { %v19494_v38 = vpack.c.bf16 %v16692_v14, %v16692_v14  ;;  %v16695_v57 = vsel %vm16439_vm4, %v16311_v36, %v16567_v42  ;;  %v21383_v44 = vadd.f32 %v21255_v47, %v20735_v21  ;;  %v16002_v5 = vpop.f32.mrb[113].mxu0 }
 0x60a   : > { %17335 = vst.msk [vmem:[%s28585_s4 + $0x1b8] sm:$0xf] %vm17224_vm9, %v19496_v37  ;;  %v19497_v3 = vpack.c.bf16 %v16695_v57, %v16695_v57  ;;  %v16693_v4 = vsel %vm16437_vm0, %v16309_v11, %v16565_v8  ;;  %v21384_v59 = vadd.f32 %v16002_v5, %v8886_v40  ;;  %v21256_v33 = vpop.f32.mrb[114].mxu0 }
 0x60b   : > { %17333 = vst.msk [vmem:[%s28585_s4 + $0x1b0] sm:$0xf] %vm17224_vm9, %v19494_v38  ;;  %v19495_v55 = vpack.c.bf16 %v16693_v4, %v16693_v4  ;;  %v16314_v6 = vadd.f32 %v28888_v53, %v21383_v44  ;;  %v21385_v29 = vadd.f32 %v21256_v33, %v20736_v26  ;;  %v16005_v58 = vpop.f32.mrb[115].mxu0 }
 0x60c   : > { %17336 = vst.msk [vmem:[%s28585_s4 + $0x1bc] sm:$0xf] %vm17224_vm9, %v19497_v3  ;;  %v16312_v39 = vadd.f32 %v28888_v53, %v21384_v59  ;;  %v21386_v15 = vadd.f32 %v16005_v58, %v8889_v32  ;;  %v20739_v62 = vpop.f32.mrb[116].mxu1 }
 0x60d   : > { %17334 = vst.msk [vmem:[%s28585_s4 + $0x1b4] sm:$0xf] %vm17224_vm9, %v19495_v55  ;;  %vm16442_vm1 = vcmp.gt.f32.partialorder %v16314_v6, 0.0  ;;  %v16570_v24 = vmul.f32 0.1, %v16314_v6  ;;  %v16315_v7 = vadd.f32 %v28888_v53, %v21385_v29  ;;  %v8902_v43 = vpop.f32.mrb[117].mxu1 }
 0x60e   : > { %vm16440_vm2 = vcmp.gt.f32.partialorder %v16312_v39, 0.0  ;;  %v16568_v54 = vmul.f32 0.1, %v16312_v39  ;;  %v16313_v30 = vadd.f32 %v29074_v0, %v21386_v15  ;;  %v20740_v35 = vpop.f32.mrb[118].mxu1 }
 0x60f   : > { %v16698_v41 = vsel %vm16442_vm1, %v16314_v6, %v16570_v24  ;;  %vm16443_vm3 = vcmp.gt.f32.partialorder %v16315_v7, 0.0  ;;  %v16571_v28 = vmul.f32 0.1, %v16315_v7  ;;  %v8905_v63 = vpop.f32.mrb[119].mxu1 }
 0x610   : > { %v19500_v50 = vpack.c.bf16 %v16698_v41, %v16698_v41  ;;  %v16696_v56 = vsel %vm16440_vm2, %v16312_v39, %v16568_v54  ;;  %vm16441_vm6 = vcmp.gt.f32.partialorder %v16313_v30, 0.0  ;;  %v16569_v10 = vmul.f32 0.1, %v16313_v30  ;;  %v21259_v53 = vpop.f32.mrb[116].mxu0 }
 0x611   : > { %v19498_v49 = vpack.c.bf16 %v16696_v56, %v16696_v56  ;;  %v16699_v17 = vsel %vm16443_vm3, %v16315_v7, %v16571_v28  ;;  %v21387_v51 = vadd.f32 %v21259_v53, %v20739_v62  ;;  %v16018_v48 = vpop.f32.mrb[117].mxu0 }
 0x612   : > { %17339 = vst.msk [vmem:[%s28585_s4 + $0x1c8] sm:$0xf] %vm17224_vm9, %v19500_v50  ;;  %v19501_v31 = vpack.c.bf16 %v16699_v17, %v16699_v17  ;;  %v16697_v23 = vsel %vm16441_vm6, %v16313_v30, %v16569_v10  ;;  %v21388_v18 = vadd.f32 %v16018_v48, %v8902_v43  ;;  %v21260_v61 = vpop.f32.mrb[118].mxu0 }
 0x613   : > { %17337 = vst.msk [vmem:[%s28585_s4 + $0x1c0] sm:$0xf] %vm17224_vm9, %v19498_v49  ;;  %v19499_v20 = vpack.c.bf16 %v16697_v23, %v16697_v23  ;;  %v16318_v34 = vadd.f32 %v29074_v0, %v21387_v51  ;;  %v21389_v60 = vadd.f32 %v21260_v61, %v20740_v35  ;;  %v16021_v2 = vpop.f32.mrb[119].mxu0 }
 0x614   : > { %17340 = vst.msk [vmem:[%s28585_s4 + $0x1cc] sm:$0xf] %vm17224_vm9, %v19501_v31  ;;  %v16316_v12 = vadd.f32 %v29074_v0, %v21388_v18  ;;  %v21390_v16 = vadd.f32 %v16021_v2, %v8905_v63 }
 0x615   : > { %17338 = vst.msk [vmem:[%s28585_s4 + $0x1c4] sm:$0xf] %vm17224_vm9, %v19499_v20  ;;  %vm16446_vm7 = vcmp.gt.f32.partialorder %v16318_v34, 0.0  ;;  %v16574_v9 = vmul.f32 0.1, %v16318_v34  ;;  %v16319_v25 = vadd.f32 %v29074_v0, %v21389_v60 }
 0x616   : > { %vm16444_vm10 = vcmp.gt.f32.partialorder %v16316_v12, 0.0  ;;  %v16572_v27 = vmul.f32 0.1, %v16316_v12  ;;  %v16317_v46 = vadd.f32 %v29074_v0, %v21390_v16  ;;  %v20743_v22 = vpop.f32.mrb[120].mxu1 }
 0x617   : > { %v16702_v52 = vsel %vm16446_vm7, %v16318_v34, %v16574_v9  ;;  %vm16447_vm11 = vcmp.gt.f32.partialorder %v16319_v25, 0.0  ;;  %v16575_v1 = vmul.f32 0.1, %v16319_v25  ;;  %v8918_v14 = vpop.f32.mrb[121].mxu1 }
 0x618   : > { %v19504_v13 = vpack.c.bf16 %v16702_v52, %v16702_v52  ;;  %v16700_v45 = vsel %vm16444_vm10, %v16316_v12, %v16572_v27  ;;  %vm16445_vm8 = vcmp.gt.f32.partialorder %v16317_v46, 0.0  ;;  %v16573_v36 = vmul.f32 0.1, %v16317_v46  ;;  %v21263_v11 = vpop.f32.mrb[120].mxu0  ;;  %v20744_v57 = vpop.f32.mrb[122].mxu1 }
 0x619   : > { %v19502_v19 = vpack.c.bf16 %v16700_v45, %v16700_v45  ;;  %v16703_v42 = vsel %vm16447_vm11, %v16319_v25, %v16575_v1  ;;  %v21391_v37 = vadd.f32 %v21263_v11, %v20743_v22  ;;  %v16034_v8 = vpop.f32.mrb[121].mxu0  ;;  %v8921_v4 = vpop.f32.mrb[123].mxu1 }
 0x61a   : > { %17343 = vst.msk [vmem:[%s28585_s4 + $0x1d8] sm:$0xf] %vm17224_vm9, %v19504_v13  ;;  %v19505_v21 = vpack.c.bf16 %v16703_v42, %v16703_v42  ;;  %v16701_v47 = vsel %vm16445_vm8, %v16317_v46, %v16573_v36  ;;  %v21392_v38 = vadd.f32 %v16034_v8, %v8918_v14  ;;  %v21264_v44 = vpop.f32.mrb[122].mxu0 }
 0x61b   : > { %17341 = vst.msk [vmem:[%s28585_s4 + $0x1d0] sm:$0xf] %vm17224_vm9, %v19502_v19  ;;  %v19503_v40 = vpack.c.bf16 %v16701_v47, %v16701_v47  ;;  %v16322_v5 = vadd.f32 %v29074_v0, %v21391_v37  ;;  %v21393_v3 = vadd.f32 %v21264_v44, %v20744_v57  ;;  %v16037_v59 = vpop.f32.mrb[123].mxu0 }
 0x61c   : > { %17344 = vst.msk [vmem:[%s28585_s4 + $0x1dc] sm:$0xf] %vm17224_vm9, %v19505_v21  ;;  %v16320_v26 = vadd.f32 %v29074_v0, %v21392_v38  ;;  %v21394_v33 = vadd.f32 %v16037_v59, %v8921_v4 }
 0x61d   : > { %17342 = vst.msk [vmem:[%s28585_s4 + $0x1d4] sm:$0xf] %vm17224_vm9, %v19503_v40  ;;  %vm16450_vm12 = vcmp.gt.f32.partialorder %v16322_v5, 0.0  ;;  %v16578_v55 = vmul.f32 0.1, %v16322_v5  ;;  %v16323_v6 = vadd.f32 %v29074_v0, %v21393_v3 }
 0x61e   : > { %vm16448_vm5 = vcmp.gt.f32.partialorder %v16320_v26, 0.0  ;;  %v16576_v29 = vmul.f32 0.1, %v16320_v26  ;;  %v16321_v32 = vadd.f32 %v29074_v0, %v21394_v33  ;;  %v20747_v54 = vpop.f32.mrb[124].mxu1 }
 0x61f   : > { %v16706_v58 = vsel %vm16450_vm12, %v16322_v5, %v16578_v55  ;;  %vm16451_vm13 = vcmp.gt.f32.partialorder %v16323_v6, 0.0  ;;  %v16579_v39 = vmul.f32 0.1, %v16323_v6  ;;  %v8934_v56 = vpop.f32.mrb[125].mxu1 }
 0x620   : > { %v19508_v15 = vpack.c.bf16 %v16706_v58, %v16706_v58  ;;  %v16704_v24 = vsel %vm16448_vm5, %v16320_v26, %v16576_v29  ;;  %vm16449_vm14 = vcmp.gt.f32.partialorder %v16321_v32, 0.0  ;;  %v16577_v7 = vmul.f32 0.1, %v16321_v32  ;;  %v21267_v30 = vpop.f32.mrb[124].mxu0  ;;  %v20748_v17 = vpop.f32.mrb[126].mxu1 }
 0x621   : > { %v19506_v41 = vpack.c.bf16 %v16704_v24, %v16704_v24  ;;  %v16707_v28 = vsel %vm16451_vm13, %v16323_v6, %v16579_v39  ;;  %v21395_v50 = vadd.f32 %v21267_v30, %v20747_v54  ;;  %v16050_v10 = vpop.f32.mrb[125].mxu0  ;;  %v8937_v23 = vpop.f32.mrb[127].mxu1 }
 0x622   : > { %17347 = vst.msk [vmem:[%s28585_s4 + $0x1e8] sm:$0xf] %vm17224_vm9, %v19508_v15  ;;  %v19509_v62 = vpack.c.bf16 %v16707_v28, %v16707_v28  ;;  %v16705_v53 = vsel %vm16449_vm14, %v16321_v32, %v16577_v7  ;;  %v21396_v49 = vadd.f32 %v16050_v10, %v8934_v56  ;;  %v21268_v51 = vpop.f32.mrb[126].mxu0 }
 0x623   : > { %17345 = vst.msk [vmem:[%s28585_s4 + $0x1e0] sm:$0xf] %vm17224_vm9, %v19506_v41  ;;  %v19507_v43 = vpack.c.bf16 %v16705_v53, %v16705_v53  ;;  %v16326_v48 = vadd.f32 %v29074_v0, %v21395_v50  ;;  %v21397_v31 = vadd.f32 %v21268_v51, %v20748_v17  ;;  %v16053_v18 = vpop.f32.mrb[127].mxu0 }
 0x624   : > { %17348 = vst.msk [vmem:[%s28585_s4 + $0x1ec] sm:$0xf] %vm17224_vm9, %v19509_v62  ;;  %v16324_v35 = vadd.f32 %v29074_v0, %v21396_v49  ;;  %v21398_v61 = vadd.f32 %v16053_v18, %v8937_v23 }
 0x625   : > { %17346 = vst.msk [vmem:[%s28585_s4 + $0x1e4] sm:$0xf] %vm17224_vm9, %v19507_v43  ;;  %vm16454_vm15 = vcmp.gt.f32.partialorder %v16326_v48, 0.0  ;;  %v16582_v20 = vmul.f32 0.1, %v16326_v48  ;;  %v16327_v34 = vadd.f32 %v29074_v0, %v21397_v31 }
 0x626   : > { %vm16452_vm4 = vcmp.gt.f32.partialorder %v16324_v35, 0.0  ;;  %v16580_v60 = vmul.f32 0.1, %v16324_v35  ;;  %v16325_v63 = vadd.f32 %v29074_v0, %v21398_v61 }
 0x627   : > { %v16710_v2 = vsel %vm16454_vm15, %v16326_v48, %v16582_v20  ;;  %vm16455_vm0 = vcmp.gt.f32.partialorder %v16327_v34, 0.0  ;;  %v16583_v12 = vmul.f32 0.1, %v16327_v34 }
 0x628   : > { %v19512_v16 = vpack.c.bf16 %v16710_v2, %v16710_v2  ;;  %v16708_v9 = vsel %vm16452_vm4, %v16324_v35, %v16580_v60  ;;  %vm16453_vm1 = vcmp.gt.f32.partialorder %v16325_v63, 0.0  ;;  %v16581_v25 = vmul.f32 0.1, %v16325_v63 }
 0x629   : > { %v19510_v27 = vpack.c.bf16 %v16708_v9, %v16708_v9  ;;  %v16711_v46 = vsel %vm16455_vm0, %v16327_v34, %v16583_v12 }
 0x62a   : > { %17351 = vst.msk [vmem:[%s28585_s4 + $0x1f8] sm:$0xf] %vm17224_vm9, %v19512_v16  ;;  %v19513_v52 = vpack.c.bf16 %v16711_v46, %v16711_v46  ;;  %v16709_v1 = vsel %vm16453_vm1, %v16325_v63, %v16581_v25 }
 0x62b   : > { %17349 = vst.msk [vmem:[%s28585_s4 + $0x1f0] sm:$0xf] %vm17224_vm9, %v19510_v27  ;;  %v19511_v13 = vpack.c.bf16 %v16709_v1, %v16709_v1 }
 0x62c   : > { %17352 = vst.msk [vmem:[%s28585_s4 + $0x1fc] sm:$0xf] %vm17224_vm9, %v19513_v52 }
 0x62d   : > { %17350 = vst.msk [vmem:[%s28585_s4 + $0x1f4] sm:$0xf] %vm17224_vm9, %v19511_v13 }
 0x62e PF: > { %s13_s16 = sadd.s32 1, %s23013_s16   ;;  %s29505_s12 = smov %s23005_s14 }
 0x62f   : > { %p10_p7 = scmp.ge.s32.totalorder %s13_s16, 14   ;;  %s29506_s13 = smov %s23009_s15 }
 0x630   : > { %s29507_s14 = smov %s29510_s17  ;;  %s29508_s15 = smov %s29514_s18 }
 0x631   :  { %12 = sbr.rel (!%p10_p7) target bundleno = 3 (0x3), region = 73 }

</bundles_post_ra>
